<compile_context>
chip_gen: v6e
topology: v6e:2x2x1
jax: 0.10.0
libtpu: 0.0.40
codegen_flags: <defaults>
</compile_context>

<pallas_src>
import functools

import jax
import jax.numpy as jnp
from jax.experimental import pallas as pl
from jax.experimental.pallas import tpu as pltpu


_BN_EPS = 1e-5
_VMEM_BUDGET = 10 * 1024 * 1024     # target per-step working set (bytes)
_VMEM_LIMIT = 32 * 1024 * 1024      # scoped-VMEM limit passed to Mosaic
_TM_CAP = 2048                      # keep M tiles modest (v5e guidance)
_TK_SINGLE_MAX = 2304               # below this, take K in one step


def _round_up(x, m):
    return ((x + m - 1) // m) * m


def _choose_tiles(m, k, cw, out_bytes):
    """Byte-budgeted, (8,128)/MXU-aligned tile sizes and padded dims."""
    # Cw (output columns): lane-dense, multiples of 128.
    cwp = _round_up(cw, 128)
    if cwp <= 512:
        tn = cwp
    else:
        tn = 512
        while cwp % tn:                     # multiple of 128 dividing cwp
            tn -= 128
    # K (reduction): single step when small, else 512-wide steps.
    if k <= _TK_SINGLE_MAX:
        kp = _round_up(k, 16)
        tk = kp
    else:
        tk = 512
        kp = _round_up(k, tk)

    def step_bytes(tm):
        return (2 * tm * tk * 2             # patch tile (bf16, double-buffered)
                + 2 * tk * tn * 2           # weight tile (bf16, double-buffered)
                + tm * tn * 4               # f32 accumulator scratch
                + 2 * tm * tn * out_bytes   # output tile (double-buffered)
                + 4 * 2 * tn * 4)           # stats tiles

    tm = _TM_CAP
    while tm > 128 and step_bytes(tm) > _VMEM_BUDGET:
        tm -= 128
    mp16 = _round_up(m, 16)
    if mp16 <= tm:
        tm = mp16
        mp = mp16
    else:
        mp = _round_up(m, tm)
    return tm, tn, tk, mp, kp, cwp


# ----------------------------------------------------------------------------
# Pallas kernel: tiled GEMM + optional activation + optional fused BN stats
# ----------------------------------------------------------------------------
def _gemm_kernel(p_ref, w_ref, *rest, activation, with_stats):
    if with_stats:
        y_ref, sum_ref, sq_ref, acc_ref = rest
    else:
        y_ref, acc_ref = rest

    k_step = pl.program_id(2)

    @pl.when(k_step == 0)
    def _():
        acc_ref[...] = jnp.zeros_like(acc_ref)

    if with_stats:
        # First visit of this stats block: (first M tile, first K step).
        @pl.when((pl.program_id(1) == 0) & (k_step == 0))
        def _():
            sum_ref[...] = jnp.zeros_like(sum_ref)
            sq_ref[...] = jnp.zeros_like(sq_ref)

    acc_ref[...] += jnp.dot(p_ref[...], w_ref[...],
                            preferred_element_type=jnp.float32)

    @pl.when(k_step == pl.num_programs(2) - 1)
    def _():
        acc = acc_ref[...]
        if activation == "tanh":
            acc = jnp.tanh(acc)
        y_out = acc.astype(y_ref.dtype)
        y_ref[...] = y_out
        if with_stats:
            # Stats from the same rounded values BN will be applied to.
            yf = y_out.astype(jnp.float32)
            sum_ref[...] += jnp.sum(yf, axis=0, keepdims=True)
            sq_ref[...] += jnp.sum(yf * yf, axis=0, keepdims=True)


def fused_gemm(patches, w_mat, *, activation="none", with_stats=True,
               out_dtype=jnp.bfloat16):
    """y = act(patches @ w_mat) with optional fused per-column sum / sumsq.

    patches: (M, K) bf16, w_mat: (K, Cw) bf16. Returns y of shape (Mp, Cwp)
    (M, K, Cw zero-padded up to tile multiples; padded rows/cols contribute 0
    to the fused statistics) plus, if with_stats, (1, Cwp) sum and sumsq.
    """
    m, k = patches.shape
    k2, cw = w_mat.shape
    assert k2 == k
    out_bytes = jnp.dtype(out_dtype).itemsize
    tm, tn, tk, mp, kp, cwp = _choose_tiles(m, k, cw, out_bytes)
    if (mp, kp) != (m, k):
        patches = jnp.pad(patches, ((0, mp - m), (0, kp - k)))
    if (kp, cwp) != (k, cw):
        w_mat = jnp.pad(w_mat, ((0, kp - k), (0, cwp - cw)))

    grid = (cwp // tn, mp // tm, kp // tk)   # (Cw [parallel], M, K)
    kern = functools.partial(_gemm_kernel, activation=activation,
                             with_stats=with_stats)

    y_shape = jax.ShapeDtypeStruct((mp, cwp), out_dtype)
    y_spec = pl.BlockSpec((tm, tn), lambda j, i, kk: (i, j))
    if with_stats:
        s_shape = jax.ShapeDtypeStruct((1, cwp), jnp.float32)
        s_spec = pl.BlockSpec((1, tn), lambda j, i, kk: (0, j))
        out_shape = (y_shape, s_shape, s_shape)
        out_specs = (y_spec, s_spec, s_spec)
    else:
        out_shape = y_shape
        out_specs = y_spec

    return pl.pallas_call(
        kern,
        out_shape=out_shape,
        grid_spec=pltpu.PrefetchScalarGridSpec(
            num_scalar_prefetch=0,
            grid=grid,
            in_specs=[
                pl.BlockSpec((tm, tk), lambda j, i, kk: (i, kk)),
                pl.BlockSpec((tk, tn), lambda j, i, kk: (kk, j)),
            ],
            out_specs=out_specs,
            scratch_shapes=[pltpu.VMEM((tm, tn), jnp.float32)],
        ),
        compiler_params=pltpu.CompilerParams(
            dimension_semantics=("parallel", "arbitrary", "arbitrary"),
            vmem_limit_bytes=_VMEM_LIMIT),
    )(patches, w_mat)


# ----------------------------------------------------------------------------
# XLA glue: BN scalar math, fused affine+ReLU+pixel-shuffle, subpixel patches
# ----------------------------------------------------------------------------
def _bn_scale_shift(col_sum, col_sq, gamma, beta, *, count, groups, cw):
    """Training-mode BatchNorm (biased batch stats) -> per-channel scale/shift."""
    c = gamma.shape[0]
    s = col_sum[0, :cw].reshape(groups, c).sum(axis=0)
    sq = col_sq[0, :cw].reshape(groups, c).sum(axis=0)
    mean = s / count
    var = jnp.maximum(sq / count - mean * mean, 0.0)   # guard cancellation
    scale = gamma * jax.lax.rsqrt(var + _BN_EPS)
    shift = beta - mean * scale
    return scale, shift


def _affine_relu_layer0(y_wide, scale, shift, n, cout):
    """Layer-0 slab (N, 16*C), cols (ky,kx,co) -> BN+ReLU -> (N,4,4,C) bf16."""
    y = y_wide[:n, :16 * cout].astype(jnp.float32)
    y = jnp.maximum(y * jnp.tile(scale, 16)[None, :]
                    + jnp.tile(shift, 16)[None, :], 0.0)
    return y.reshape(n, 4, 4, cout).astype(jnp.bfloat16)


def _affine_relu_shuffle(y_wide, scale, shift, n, h, w, cout):
    """Wide slab (N*H*W, 4*C), cols (ry,rx,co) -> BN+ReLU + depth-to-space.

    Replaces the separate bn_relu Pallas pass and the standalone transpose
    pass of v2; XLA fuses the affine, ReLU and relayout into one pass over
    the slab.
    """
    m = n * h * w
    y = y_wide[:m, :4 * cout].astype(jnp.float32)
    y = jnp.maximum(y * jnp.tile(scale, 4)[None, :]
                    + jnp.tile(shift, 4)[None, :], 0.0)
    y = y.reshape(n, h, w, 2, 2, cout)
    y = jnp.transpose(y, (0, 1, 3, 2, 4, 5)).reshape(n, 2 * h, 2 * w, cout)
    return y.astype(jnp.bfloat16)


def _subpixel_patches(x_nhwc):
    """9 shifted views of the 1-padded input, concatenated on channels.

    Returns (N*H*W, 9*C) bf16, column order (sy, sx, ci).
    TODO(synk): replace with in-kernel halo-DMA patch construction
    (feedback #1) to avoid the 9x HBM materialization on the late layers.
    """
    n, h, w, c = x_nhwc.shape
    xpad = jnp.pad(x_nhwc, ((0, 0), (1, 1), (1, 1), (0, 0)))
    views = [xpad[:, sy:sy + h, sx:sx + w, :]
             for sy in range(3) for sx in range(3)]
    return jnp.concatenate(views, axis=-1).reshape(n * h * w, 9 * c)


# ----------------------------------------------------------------------------
# Weight packing (done once at init — feedback #9) and parameter init
# ----------------------------------------------------------------------------
def _pack_dense_1x1(w):
    """(Cin, Cout, 4, 4) -> (Cin, 16*Cout) bf16, columns (ky, kx, co).
    ConvTranspose2d(k=4, s=1, p=0) on a 1x1 input is exactly this GEMM."""
    cin, cout = w.shape[0], w.shape[1]
    return jnp.transpose(w, (0, 2, 3, 1)).reshape(cin, 16 * cout).astype(
        jnp.bfloat16)


def _pack_subpixel(w):
    """(Cin, Cout, 4, 4) -> (9*Cin, 4*Cout) bf16 for ConvTranspose2d(4,2,1):
      out[2a+ry, 2b+rx] = sum_{dy,dx} xpad[a+ry+dy, b+rx+dx]
                                      * w[:, :, 3-ry-2dy, 3-rx-2dx]
    Rows ordered (sy, sx, ci), columns (ry, rx, co)."""
    cin, cout = w.shape[0], w.shape[1]
    w9 = jnp.zeros((3, 3, cin, 2, 2, cout), w.dtype)
    for ry in range(2):
        for rx in range(2):
            for dy in range(2):
                for dx in range(2):
                    w9 = w9.at[ry + dy, rx + dx, :, ry, rx, :].set(
                        w[:, :, 3 - ry - 2 * dy, 3 - rx - 2 * dx])
    return w9.reshape(9 * cin, 4 * cout).astype(jnp.bfloat16)


def init_params(key, config):
    nc, nz, ngf = config["nc"], config["nz"], config["ngf"]
    chans = [nz, 16 * ngf, 8 * ngf, 4 * ngf, 2 * ngf, ngf, nc]
    keys = jax.random.split(key, len(chans) - 1)
    params = {}
    for i in range(len(chans) - 1):
        cin, cout = chans[i], chans[i + 1]
        # DCGAN-style N(0, 0.02) init, deterministic via PRNGKey.
        w = 0.02 * jax.random.normal(keys[i], (cin, cout, 4, 4), jnp.float32)
        params[f"w{i}"] = _pack_dense_1x1(w) if i == 0 else _pack_subpixel(w)
        if i < len(chans) - 2:     # BatchNorm after every layer except last
            params[f"gamma{i}"] = jnp.ones((cout,), jnp.float32)
            params[f"beta{i}"] = jnp.zeros((cout,), jnp.float32)
    return params


# ----------------------------------------------------------------------------
# Generator forward
# ----------------------------------------------------------------------------
def generator_forward(z_nchw, params):
    """z: (N, nz, 1, 1) NCHW -> (N, nc, 128, 128) NCHW (matches PyTorch)."""
    n, nz = z_nchw.shape[0], z_nchw.shape[1]
    z2d = z_nchw.reshape(n, nz).astype(jnp.bfloat16)

    # Layer 0: ConvTranspose2d(nz, 16*ngf, 4, 1, 0) + BN + ReLU.
    w0 = params["w0"]
    c0 = w0.shape[1] // 16
    y, s, sq = fused_gemm(z2d, w0, with_stats=True)
    scale, shift = _bn_scale_shift(s, sq, params["gamma0"], params["beta0"],
                                   count=n * 16, groups=16, cw=16 * c0)
    x = _affine_relu_layer0(y, scale, shift, n, c0)          # (n, 4, 4, c0)
    h = w = 4

    # Layers 1..4: ConvTranspose2d(cin, cout, 4, 2, 1) + BN + ReLU.
    for li in range(1, 5):
        wmat = params[f"w{li}"]
        cout = wmat.shape[1] // 4
        patches = _subpixel_patches(x)                       # (n*h*w, 9*cin)
        y, s, sq = fused_gemm(patches, wmat, with_stats=True)
        scale, shift = _bn_scale_shift(
            s, sq, params[f"gamma{li}"], params[f"beta{li}"],
            count=n * h * w * 4, groups=4, cw=4 * cout)
        x = _affine_relu_shuffle(y, scale, shift, n, h, w, cout)
        h, w = 2 * h, 2 * w

    # Layer 5: ConvTranspose2d(ngf, nc, 4, 2, 1) + Tanh (stats-free kernel).
    w5 = params["w5"]
    nc_out = w5.shape[1] // 4
    patches = _subpixel_patches(x)
    y = fused_gemm(patches, w5, activation="tanh", with_stats=False,
                   out_dtype=jnp.bfloat16)
    m = n * h * w
    y = y[:m, :4 * nc_out].reshape(n, h, w, 2, 2, nc_out)
    y = jnp.transpose(y, (0, 1, 3, 2, 4, 5)).reshape(n, 2 * h, 2 * w, nc_out)
    return jnp.transpose(y, (0, 3, 1, 2)).astype(jnp.float32)   # NHWC -> NCHW


if __name__ == "__main__":
    config = {"nc": 3, "nz": 8, "ngf": 4}
    key = jax.random.PRNGKey(0)
    params = init_params(key, config)

    z = jax.random.normal(jax.random.fold_in(key, 999),
                          (2, config["nz"], 1, 1), dtype=jnp.float32)

    fwd = jax.jit(generator_forward)
    out = jax.block_until_ready(fwd(z, params))

    assert out.shape == (2, config["nc"], 128, 128), out.shape
    assert bool(jnp.all(jnp.isfinite(out)))
    assert bool(jnp.all(jnp.abs(out) <= 1.0 + 1e-6))   # tanh range
    print("KERNEL_OK")
</pallas_src>

<mosaic_0001>
module attributes {stable_mosaic.version = 11 : i64} {
  func.func @_gemm_kernel(%arg0: i32, %arg1: i32, %arg2: i32, %arg3: memref<16x16xbf16, #tpu.memory_space<vmem>>, %arg4: memref<16x512xbf16, #tpu.memory_space<vmem>>, %arg5: memref<16x512xbf16, #tpu.memory_space<vmem>>, %arg6: memref<1x512xf32, #tpu.memory_space<vmem>>, %arg7: memref<1x512xf32, #tpu.memory_space<vmem>>, %arg8: memref<16x512xf32, #tpu.memory_space<vmem>>) attributes {dimension_semantics = [#tpu.dimension_semantics<parallel>, #tpu.dimension_semantics<arbitrary>, #tpu.dimension_semantics<arbitrary>], iteration_bounds = array<i64: 2, 1, 1>, scalar_prefetch = 0 : i64, scratch_operands = 1 : i64, tpu.core_type = #tpu.core_type<tc>, window_params = [{transform_indices = @transform_0, window_bounds = array<i64: 16, 16>}, {transform_indices = @transform_1, window_bounds = array<i64: 16, 512>}, {transform_indices = @transform_2, window_bounds = array<i64: 16, 512>}, {transform_indices = @transform_3, window_bounds = array<i64: 1, 512>}, {transform_indices = @transform_4, window_bounds = array<i64: 1, 512>}]} {
    %c0_i32 = arith.constant 0 : i32
    %0 = arith.cmpi eq, %arg2, %c0_i32 : i32
    %1 = arith.extui %0 : i1 to i32
    %c0_i32_0 = arith.constant 0 : i32
    %2 = arith.cmpi ne, %1, %c0_i32_0 : i32
    scf.if %2 {
      %cst_13 = arith.constant 0.000000e+00 : f32
      %17 = vector.broadcast %cst_13 : f32 to vector<16x512xf32>
      %c0_14 = arith.constant 0 : index
      %c0_15 = arith.constant 0 : index
      %18 = vector.load %arg8[%c0_14, %c0_15] : memref<16x512xf32, #tpu.memory_space<vmem>>, vector<16x512xf32>
      tpu.vector_store %arg8[%c0_14, %c0_15], %17 {strides = array<i32>} : memref<16x512xf32, #tpu.memory_space<vmem>>, vector<16x512xf32>,
    } else {
    }
    %c0_i32_1 = arith.constant 0 : i32
    %3 = arith.cmpi eq, %arg1, %c0_i32_1 : i32
    %c0_i32_2 = arith.constant 0 : i32
    %4 = arith.cmpi eq, %arg2, %c0_i32_2 : i32
    %5 = arith.andi %3, %4 : i1
    %6 = arith.extui %5 : i1 to i32
    %c0_i32_3 = arith.constant 0 : i32
    %7 = arith.cmpi ne, %6, %c0_i32_3 : i32
    scf.if %7 {
      %cst_13 = arith.constant 0.000000e+00 : f32
      %17 = vector.broadcast %cst_13 : f32 to vector<1x512xf32>
      %c0_14 = arith.constant 0 : index
      %c0_15 = arith.constant 0 : index
      %18 = vector.load %arg6[%c0_14, %c0_15] : memref<1x512xf32, #tpu.memory_space<vmem>>, vector<1x512xf32>
      tpu.vector_store %arg6[%c0_14, %c0_15], %17 {strides = array<i32>} : memref<1x512xf32, #tpu.memory_space<vmem>>, vector<1x512xf32>,
      %cst_16 = arith.constant 0.000000e+00 : f32
      %19 = vector.broadcast %cst_16 : f32 to vector<1x512xf32>
      %c0_17 = arith.constant 0 : index
      %c0_18 = arith.constant 0 : index
      %20 = vector.load %arg7[%c0_17, %c0_18] : memref<1x512xf32, #tpu.memory_space<vmem>>, vector<1x512xf32>
      tpu.vector_store %arg7[%c0_17, %c0_18], %19 {strides = array<i32>} : memref<1x512xf32, #tpu.memory_space<vmem>>, vector<1x512xf32>,
    } else {
    }
    %c0 = arith.constant 0 : index
    %c0_4 = arith.constant 0 : index
    %8 = vector.load %arg8[%c0, %c0_4] : memref<16x512xf32, #tpu.memory_space<vmem>>, vector<16x512xf32>
    %c0_5 = arith.constant 0 : index
    %c0_6 = arith.constant 0 : index
    %9 = vector.load %arg3[%c0_5, %c0_6] : memref<16x16xbf16, #tpu.memory_space<vmem>>, vector<16x16xbf16>
    %c0_7 = arith.constant 0 : index
    %c0_8 = arith.constant 0 : index
    %10 = vector.load %arg4[%c0_7, %c0_8] : memref<16x512xbf16, #tpu.memory_space<vmem>>, vector<16x512xbf16>
    %cst = arith.constant dense<0.000000e+00> : vector<16x512xf32>
    %11 = tpu.matmul %9, %10, %cst {dimension_numbers = #tpu.dot_dimension_numbers<[1], [0], [0], [1], [0, 0, 1, 1], [], []>} : vector<16x16xbf16>, vector<16x512xbf16>, vector<16x512xf32> -> vector<16x512xf32>
    %12 = arith.addf %8, %11 : vector<16x512xf32>
    %c0_9 = arith.constant 0 : index
    %c0_10 = arith.constant 0 : index
    %13 = vector.load %arg8[%c0_9, %c0_10] : memref<16x512xf32, #tpu.memory_space<vmem>>, vector<16x512xf32>
    tpu.vector_store %arg8[%c0_9, %c0_10], %12 {strides = array<i32>} : memref<16x512xf32, #tpu.memory_space<vmem>>, vector<16x512xf32>,
    %c0_i32_11 = arith.constant 0 : i32
    %14 = arith.cmpi eq, %arg2, %c0_i32_11 : i32
    %15 = arith.extui %14 : i1 to i32
    %c0_i32_12 = arith.constant 0 : i32
    %16 = arith.cmpi ne, %15, %c0_i32_12 : i32
    scf.if %16 {
      %c0_13 = arith.constant 0 : index
      %c0_14 = arith.constant 0 : index
      %17 = vector.load %arg8[%c0_13, %c0_14] : memref<16x512xf32, #tpu.memory_space<vmem>>, vector<16x512xf32>
      %18 = arith.truncf %17 : vector<16x512xf32> to vector<16x512xbf16>
      %c0_15 = arith.constant 0 : index
      %c0_16 = arith.constant 0 : index
      %19 = vector.load %arg5[%c0_15, %c0_16] : memref<16x512xbf16, #tpu.memory_space<vmem>>, vector<16x512xbf16>
      tpu.vector_store %arg5[%c0_15, %c0_16], %18 {strides = array<i32>} : memref<16x512xbf16, #tpu.memory_space<vmem>>, vector<16x512xbf16>,
      %20 = arith.extf %18 : vector<16x512xbf16> to vector<16x512xf32>
      %c0_17 = arith.constant 0 : index
      %c0_18 = arith.constant 0 : index
      %21 = vector.load %arg6[%c0_17, %c0_18] : memref<1x512xf32, #tpu.memory_space<vmem>>, vector<1x512xf32>
      %cst_19 = arith.constant dense<0.000000e+00> : vector<512xf32>
      %22 = vector.multi_reduction <add>, %20, %cst_19 [0] : vector<16x512xf32> to vector<512xf32>
      %23 = vector.shape_cast %22 : vector<512xf32> to vector<1x512xf32>
      %24 = arith.addf %21, %23 : vector<1x512xf32>
      %c0_20 = arith.constant 0 : index
      %c0_21 = arith.constant 0 : index
      %25 = vector.load %arg6[%c0_20, %c0_21] : memref<1x512xf32, #tpu.memory_space<vmem>>, vector<1x512xf32>
      tpu.vector_store %arg6[%c0_20, %c0_21], %24 {strides = array<i32>} : memref<1x512xf32, #tpu.memory_space<vmem>>, vector<1x512xf32>,
      %c0_22 = arith.constant 0 : index
      %c0_23 = arith.constant 0 : index
      %26 = vector.load %arg7[%c0_22, %c0_23] : memref<1x512xf32, #tpu.memory_space<vmem>>, vector<1x512xf32>
      %27 = arith.mulf %20, %20 : vector<16x512xf32>
      %cst_24 = arith.constant dense<0.000000e+00> : vector<512xf32>
      %28 = vector.multi_reduction <add>, %27, %cst_24 [0] : vector<16x512xf32> to vector<512xf32>
      %29 = vector.shape_cast %28 : vector<512xf32> to vector<1x512xf32>
      %30 = arith.addf %26, %29 : vector<1x512xf32>
      %c0_25 = arith.constant 0 : index
      %c0_26 = arith.constant 0 : index
      %31 = vector.load %arg7[%c0_25, %c0_26] : memref<1x512xf32, #tpu.memory_space<vmem>>, vector<1x512xf32>
      tpu.vector_store %arg7[%c0_25, %c0_26], %30 {strides = array<i32>} : memref<1x512xf32, #tpu.memory_space<vmem>>, vector<1x512xf32>,
    } else {
    }
    return
  }
  func.func @transform_0(%arg0: i32, %arg1: i32, %arg2: i32) -> (i32, i32) {
    %c0_i32 = arith.constant 0 : i32
    return %arg1, %arg2 : i32, i32
  }
  func.func @transform_1(%arg0: i32, %arg1: i32, %arg2: i32) -> (i32, i32) {
    %c0_i32 = arith.constant 0 : i32
    return %arg2, %arg0 : i32, i32
  }
  func.func @transform_2(%arg0: i32, %arg1: i32, %arg2: i32) -> (i32, i32) {
    %c0_i32 = arith.constant 0 : i32
    return %arg1, %arg0 : i32, i32
  }
  func.func @transform_3(%arg0: i32, %arg1: i32, %arg2: i32) -> (i32, i32) {
    %c0_i32 = arith.constant 0 : i32
    %c0_i32_0 = arith.constant 0 : i32
    return %c0_i32, %arg0 : i32, i32
  }
  func.func @transform_4(%arg0: i32, %arg1: i32, %arg2: i32) -> (i32, i32) {
    %c0_i32 = arith.constant 0 : i32
    %c0_i32_0 = arith.constant 0 : i32
    return %c0_i32, %arg0 : i32, i32
  }
}

module attributes {stable_mosaic.version = 11 : i64} {
  func.func @_gemm_kernel(%arg0: i32, %arg1: i32, %arg2: i32, %arg3: memref<32x576xbf16, #tpu.memory_space<vmem>>, %arg4: memref<576x128xbf16, #tpu.memory_space<vmem>>, %arg5: memref<32x128xbf16, #tpu.memory_space<vmem>>, %arg6: memref<1x128xf32, #tpu.memory_space<vmem>>, %arg7: memref<1x128xf32, #tpu.memory_space<vmem>>, %arg8: memref<32x128xf32, #tpu.memory_space<vmem>>) attributes {dimension_semantics = [#tpu.dimension_semantics<parallel>, #tpu.dimension_semantics<arbitrary>, #tpu.dimension_semantics<arbitrary>], iteration_bounds = array<i64: 1, 1, 1>, scalar_prefetch = 0 : i64, scratch_operands = 1 : i64, tpu.core_type = #tpu.core_type<tc>, window_params = [{transform_indices = @transform_0, window_bounds = array<i64: 32, 576>}, {transform_indices = @transform_1, window_bounds = array<i64: 576, 128>}, {transform_indices = @transform_2, window_bounds = array<i64: 32, 128>}, {transform_indices = @transform_3, window_bounds = array<i64: 1, 128>}, {transform_indices = @transform_4, window_bounds = array<i64: 1, 128>}]} {
    %c0_i32 = arith.constant 0 : i32
    %0 = arith.cmpi eq, %arg2, %c0_i32 : i32
    %1 = arith.extui %0 : i1 to i32
    %c0_i32_0 = arith.constant 0 : i32
    %2 = arith.cmpi ne, %1, %c0_i32_0 : i32
    scf.if %2 {
      %cst_13 = arith.constant 0.000000e+00 : f32
      %17 = vector.broadcast %cst_13 : f32 to vector<32x128xf32>
      %c0_14 = arith.constant 0 : index
      %c0_15 = arith.constant 0 : index
      %18 = vector.load %arg8[%c0_14, %c0_15] : memref<32x128xf32, #tpu.memory_space<vmem>>, vector<32x128xf32>
      tpu.vector_store %arg8[%c0_14, %c0_15], %17 {strides = array<i32>} : memref<32x128xf32, #tpu.memory_space<vmem>>, vector<32x128xf32>,
    } else {
    }
    %c0_i32_1 = arith.constant 0 : i32
    %3 = arith.cmpi eq, %arg1, %c0_i32_1 : i32
    %c0_i32_2 = arith.constant 0 : i32
    %4 = arith.cmpi eq, %arg2, %c0_i32_2 : i32
    %5 = arith.andi %3, %4 : i1
    %6 = arith.extui %5 : i1 to i32
    %c0_i32_3 = arith.constant 0 : i32
    %7 = arith.cmpi ne, %6, %c0_i32_3 : i32
    scf.if %7 {
      %cst_13 = arith.constant 0.000000e+00 : f32
      %17 = vector.broadcast %cst_13 : f32 to vector<1x128xf32>
      %c0_14 = arith.constant 0 : index
      %c0_15 = arith.constant 0 : index
      %18 = vector.load %arg6[%c0_14, %c0_15] : memref<1x128xf32, #tpu.memory_space<vmem>>, vector<1x128xf32>
      tpu.vector_store %arg6[%c0_14, %c0_15], %17 {strides = array<i32>} : memref<1x128xf32, #tpu.memory_space<vmem>>, vector<1x128xf32>,
      %cst_16 = arith.constant 0.000000e+00 : f32
      %19 = vector.broadcast %cst_16 : f32 to vector<1x128xf32>
      %c0_17 = arith.constant 0 : index
      %c0_18 = arith.constant 0 : index
      %20 = vector.load %arg7[%c0_17, %c0_18] : memref<1x128xf32, #tpu.memory_space<vmem>>, vector<1x128xf32>
      tpu.vector_store %arg7[%c0_17, %c0_18], %19 {strides = array<i32>} : memref<1x128xf32, #tpu.memory_space<vmem>>, vector<1x128xf32>,
    } else {
    }
    %c0 = arith.constant 0 : index
    %c0_4 = arith.constant 0 : index
    %8 = vector.load %arg8[%c0, %c0_4] : memref<32x128xf32, #tpu.memory_space<vmem>>, vector<32x128xf32>
    %c0_5 = arith.constant 0 : index
    %c0_6 = arith.constant 0 : index
    %9 = vector.load %arg3[%c0_5, %c0_6] : memref<32x576xbf16, #tpu.memory_space<vmem>>, vector<32x576xbf16>
    %c0_7 = arith.constant 0 : index
    %c0_8 = arith.constant 0 : index
    %10 = vector.load %arg4[%c0_7, %c0_8] : memref<576x128xbf16, #tpu.memory_space<vmem>>, vector<576x128xbf16>
    %cst = arith.constant dense<0.000000e+00> : vector<32x128xf32>
    %11 = tpu.matmul %9, %10, %cst {dimension_numbers = #tpu.dot_dimension_numbers<[1], [0], [0], [1], [0, 0, 1, 1], [], []>} : vector<32x576xbf16>, vector<576x128xbf16>, vector<32x128xf32> -> vector<32x128xf32>
    %12 = arith.addf %8, %11 : vector<32x128xf32>
    %c0_9 = arith.constant 0 : index
    %c0_10 = arith.constant 0 : index
    %13 = vector.load %arg8[%c0_9, %c0_10] : memref<32x128xf32, #tpu.memory_space<vmem>>, vector<32x128xf32>
    tpu.vector_store %arg8[%c0_9, %c0_10], %12 {strides = array<i32>} : memref<32x128xf32, #tpu.memory_space<vmem>>, vector<32x128xf32>,
    %c0_i32_11 = arith.constant 0 : i32
    %14 = arith.cmpi eq, %arg2, %c0_i32_11 : i32
    %15 = arith.extui %14 : i1 to i32
    %c0_i32_12 = arith.constant 0 : i32
    %16 = arith.cmpi ne, %15, %c0_i32_12 : i32
    scf.if %16 {
      %c0_13 = arith.constant 0 : index
      %c0_14 = arith.constant 0 : index
      %17 = vector.load %arg8[%c0_13, %c0_14] : memref<32x128xf32, #tpu.memory_space<vmem>>, vector<32x128xf32>
      %18 = arith.truncf %17 : vector<32x128xf32> to vector<32x128xbf16>
      %c0_15 = arith.constant 0 : index
      %c0_16 = arith.constant 0 : index
      %19 = vector.load %arg5[%c0_15, %c0_16] : memref<32x128xbf16, #tpu.memory_space<vmem>>, vector<32x128xbf16>
      tpu.vector_store %arg5[%c0_15, %c0_16], %18 {strides = array<i32>} : memref<32x128xbf16, #tpu.memory_space<vmem>>, vector<32x128xbf16>,
      %20 = arith.extf %18 : vector<32x128xbf16> to vector<32x128xf32>
      %c0_17 = arith.constant 0 : index
      %c0_18 = arith.constant 0 : index
      %21 = vector.load %arg6[%c0_17, %c0_18] : memref<1x128xf32, #tpu.memory_space<vmem>>, vector<1x128xf32>
      %cst_19 = arith.constant dense<0.000000e+00> : vector<128xf32>
      %22 = vector.multi_reduction <add>, %20, %cst_19 [0] : vector<32x128xf32> to vector<128xf32>
      %23 = vector.shape_cast %22 : vector<128xf32> to vector<1x128xf32>
      %24 = arith.addf %21, %23 : vector<1x128xf32>
      %c0_20 = arith.constant 0 : index
      %c0_21 = arith.constant 0 : index
      %25 = vector.load %arg6[%c0_20, %c0_21] : memref<1x128xf32, #tpu.memory_space<vmem>>, vector<1x128xf32>
      tpu.vector_store %arg6[%c0_20, %c0_21], %24 {strides = array<i32>} : memref<1x128xf32, #tpu.memory_space<vmem>>, vector<1x128xf32>,
      %c0_22 = arith.constant 0 : index
      %c0_23 = arith.constant 0 : index
      %26 = vector.load %arg7[%c0_22, %c0_23] : memref<1x128xf32, #tpu.memory_space<vmem>>, vector<1x128xf32>
      %27 = arith.mulf %20, %20 : vector<32x128xf32>
      %cst_24 = arith.constant dense<0.000000e+00> : vector<128xf32>
      %28 = vector.multi_reduction <add>, %27, %cst_24 [0] : vector<32x128xf32> to vector<128xf32>
      %29 = vector.shape_cast %28 : vector<128xf32> to vector<1x128xf32>
      %30 = arith.addf %26, %29 : vector<1x128xf32>
      %c0_25 = arith.constant 0 : index
      %c0_26 = arith.constant 0 : index
      %31 = vector.load %arg7[%c0_25, %c0_26] : memref<1x128xf32, #tpu.memory_space<vmem>>, vector<1x128xf32>
      tpu.vector_store %arg7[%c0_25, %c0_26], %30 {strides = array<i32>} : memref<1x128xf32, #tpu.memory_space<vmem>>, vector<1x128xf32>,
    } else {
    }
    return
  }
  func.func @transform_0(%arg0: i32, %arg1: i32, %arg2: i32) -> (i32, i32) {
    %c0_i32 = arith.constant 0 : i32
    return %arg1, %arg2 : i32, i32
  }
  func.func @transform_1(%arg0: i32, %arg1: i32, %arg2: i32) -> (i32, i32) {
    %c0_i32 = arith.constant 0 : i32
    return %arg2, %arg0 : i32, i32
  }
  func.func @transform_2(%arg0: i32, %arg1: i32, %arg2: i32) -> (i32, i32) {
    %c0_i32 = arith.constant 0 : i32
    return %arg1, %arg0 : i32, i32
  }
  func.func @transform_3(%arg0: i32, %arg1: i32, %arg2: i32) -> (i32, i32) {
    %c0_i32 = arith.constant 0 : i32
    %c0_i32_0 = arith.constant 0 : i32
    return %c0_i32, %arg0 : i32, i32
  }
  func.func @transform_4(%arg0: i32, %arg1: i32, %arg2: i32) -> (i32, i32) {
    %c0_i32 = arith.constant 0 : i32
    %c0_i32_0 = arith.constant 0 : i32
    return %c0_i32, %arg0 : i32, i32
  }
}

module attributes {stable_mosaic.version = 11 : i64} {
  func.func @_gemm_kernel(%arg0: i32, %arg1: i32, %arg2: i32, %arg3: memref<128x288xbf16, #tpu.memory_space<vmem>>, %arg4: memref<288x128xbf16, #tpu.memory_space<vmem>>, %arg5: memref<128x128xbf16, #tpu.memory_space<vmem>>, %arg6: memref<1x128xf32, #tpu.memory_space<vmem>>, %arg7: memref<1x128xf32, #tpu.memory_space<vmem>>, %arg8: memref<128x128xf32, #tpu.memory_space<vmem>>) attributes {dimension_semantics = [#tpu.dimension_semantics<parallel>, #tpu.dimension_semantics<arbitrary>, #tpu.dimension_semantics<arbitrary>], iteration_bounds = array<i64: 1, 1, 1>, scalar_prefetch = 0 : i64, scratch_operands = 1 : i64, tpu.core_type = #tpu.core_type<tc>, window_params = [{transform_indices = @transform_0, window_bounds = array<i64: 128, 288>}, {transform_indices = @transform_1, window_bounds = array<i64: 288, 128>}, {transform_indices = @transform_2, window_bounds = array<i64: 128, 128>}, {transform_indices = @transform_3, window_bounds = array<i64: 1, 128>}, {transform_indices = @transform_4, window_bounds = array<i64: 1, 128>}]} {
    %c0_i32 = arith.constant 0 : i32
    %0 = arith.cmpi eq, %arg2, %c0_i32 : i32
    %1 = arith.extui %0 : i1 to i32
    %c0_i32_0 = arith.constant 0 : i32
    %2 = arith.cmpi ne, %1, %c0_i32_0 : i32
    scf.if %2 {
      %cst_13 = arith.constant 0.000000e+00 : f32
      %17 = vector.broadcast %cst_13 : f32 to vector<128x128xf32>
      %c0_14 = arith.constant 0 : index
      %c0_15 = arith.constant 0 : index
      %18 = vector.load %arg8[%c0_14, %c0_15] : memref<128x128xf32, #tpu.memory_space<vmem>>, vector<128x128xf32>
      tpu.vector_store %arg8[%c0_14, %c0_15], %17 {strides = array<i32>} : memref<128x128xf32, #tpu.memory_space<vmem>>, vector<128x128xf32>,
    } else {
    }
    %c0_i32_1 = arith.constant 0 : i32
    %3 = arith.cmpi eq, %arg1, %c0_i32_1 : i32
    %c0_i32_2 = arith.constant 0 : i32
    %4 = arith.cmpi eq, %arg2, %c0_i32_2 : i32
    %5 = arith.andi %3, %4 : i1
    %6 = arith.extui %5 : i1 to i32
    %c0_i32_3 = arith.constant 0 : i32
    %7 = arith.cmpi ne, %6, %c0_i32_3 : i32
    scf.if %7 {
      %cst_13 = arith.constant 0.000000e+00 : f32
      %17 = vector.broadcast %cst_13 : f32 to vector<1x128xf32>
      %c0_14 = arith.constant 0 : index
      %c0_15 = arith.constant 0 : index
      %18 = vector.load %arg6[%c0_14, %c0_15] : memref<1x128xf32, #tpu.memory_space<vmem>>, vector<1x128xf32>
      tpu.vector_store %arg6[%c0_14, %c0_15], %17 {strides = array<i32>} : memref<1x128xf32, #tpu.memory_space<vmem>>, vector<1x128xf32>,
      %cst_16 = arith.constant 0.000000e+00 : f32
      %19 = vector.broadcast %cst_16 : f32 to vector<1x128xf32>
      %c0_17 = arith.constant 0 : index
      %c0_18 = arith.constant 0 : index
      %20 = vector.load %arg7[%c0_17, %c0_18] : memref<1x128xf32, #tpu.memory_space<vmem>>, vector<1x128xf32>
      tpu.vector_store %arg7[%c0_17, %c0_18], %19 {strides = array<i32>} : memref<1x128xf32, #tpu.memory_space<vmem>>, vector<1x128xf32>,
    } else {
    }
    %c0 = arith.constant 0 : index
    %c0_4 = arith.constant 0 : index
    %8 = vector.load %arg8[%c0, %c0_4] : memref<128x128xf32, #tpu.memory_space<vmem>>, vector<128x128xf32>
    %c0_5 = arith.constant 0 : index
    %c0_6 = arith.constant 0 : index
    %9 = vector.load %arg3[%c0_5, %c0_6] : memref<128x288xbf16, #tpu.memory_space<vmem>>, vector<128x288xbf16>
    %c0_7 = arith.constant 0 : index
    %c0_8 = arith.constant 0 : index
    %10 = vector.load %arg4[%c0_7, %c0_8] : memref<288x128xbf16, #tpu.memory_space<vmem>>, vector<288x128xbf16>
    %cst = arith.constant dense<0.000000e+00> : vector<128x128xf32>
    %11 = tpu.matmul %9, %10, %cst {dimension_numbers = #tpu.dot_dimension_numbers<[1], [0], [0], [1], [0, 0, 1, 1], [], []>} : vector<128x288xbf16>, vector<288x128xbf16>, vector<128x128xf32> -> vector<128x128xf32>
    %12 = arith.addf %8, %11 : vector<128x128xf32>
    %c0_9 = arith.constant 0 : index
    %c0_10 = arith.constant 0 : index
    %13 = vector.load %arg8[%c0_9, %c0_10] : memref<128x128xf32, #tpu.memory_space<vmem>>, vector<128x128xf32>
    tpu.vector_store %arg8[%c0_9, %c0_10], %12 {strides = array<i32>} : memref<128x128xf32, #tpu.memory_space<vmem>>, vector<128x128xf32>,
    %c0_i32_11 = arith.constant 0 : i32
    %14 = arith.cmpi eq, %arg2, %c0_i32_11 : i32
    %15 = arith.extui %14 : i1 to i32
    %c0_i32_12 = arith.constant 0 : i32
    %16 = arith.cmpi ne, %15, %c0_i32_12 : i32
    scf.if %16 {
      %c0_13 = arith.constant 0 : index
      %c0_14 = arith.constant 0 : index
      %17 = vector.load %arg8[%c0_13, %c0_14] : memref<128x128xf32, #tpu.memory_space<vmem>>, vector<128x128xf32>
      %18 = arith.truncf %17 : vector<128x128xf32> to vector<128x128xbf16>
      %c0_15 = arith.constant 0 : index
      %c0_16 = arith.constant 0 : index
      %19 = vector.load %arg5[%c0_15, %c0_16] : memref<128x128xbf16, #tpu.memory_space<vmem>>, vector<128x128xbf16>
      tpu.vector_store %arg5[%c0_15, %c0_16], %18 {strides = array<i32>} : memref<128x128xbf16, #tpu.memory_space<vmem>>, vector<128x128xbf16>,
      %20 = arith.extf %18 : vector<128x128xbf16> to vector<128x128xf32>
      %c0_17 = arith.constant 0 : index
      %c0_18 = arith.constant 0 : index
      %21 = vector.load %arg6[%c0_17, %c0_18] : memref<1x128xf32, #tpu.memory_space<vmem>>, vector<1x128xf32>
      %cst_19 = arith.constant dense<0.000000e+00> : vector<128xf32>
      %22 = vector.multi_reduction <add>, %20, %cst_19 [0] : vector<128x128xf32> to vector<128xf32>
      %23 = vector.shape_cast %22 : vector<128xf32> to vector<1x128xf32>
      %24 = arith.addf %21, %23 : vector<1x128xf32>
      %c0_20 = arith.constant 0 : index
      %c0_21 = arith.constant 0 : index
      %25 = vector.load %arg6[%c0_20, %c0_21] : memref<1x128xf32, #tpu.memory_space<vmem>>, vector<1x128xf32>
      tpu.vector_store %arg6[%c0_20, %c0_21], %24 {strides = array<i32>} : memref<1x128xf32, #tpu.memory_space<vmem>>, vector<1x128xf32>,
      %c0_22 = arith.constant 0 : index
      %c0_23 = arith.constant 0 : index
      %26 = vector.load %arg7[%c0_22, %c0_23] : memref<1x128xf32, #tpu.memory_space<vmem>>, vector<1x128xf32>
      %27 = arith.mulf %20, %20 : vector<128x128xf32>
      %cst_24 = arith.constant dense<0.000000e+00> : vector<128xf32>
      %28 = vector.multi_reduction <add>, %27, %cst_24 [0] : vector<128x128xf32> to vector<128xf32>
      %29 = vector.shape_cast %28 : vector<128xf32> to vector<1x128xf32>
      %30 = arith.addf %26, %29 : vector<1x128xf32>
      %c0_25 = arith.constant 0 : index
      %c0_26 = arith.constant 0 : index
      %31 = vector.load %arg7[%c0_25, %c0_26] : memref<1x128xf32, #tpu.memory_space<vmem>>, vector<1x128xf32>
      tpu.vector_store %arg7[%c0_25, %c0_26], %30 {strides = array<i32>} : memref<1x128xf32, #tpu.memory_space<vmem>>, vector<1x128xf32>,
    } else {
    }
    return
  }
  func.func @transform_0(%arg0: i32, %arg1: i32, %arg2: i32) -> (i32, i32) {
    %c0_i32 = arith.constant 0 : i32
    return %arg1, %arg2 : i32, i32
  }
  func.func @transform_1(%arg0: i32, %arg1: i32, %arg2: i32) -> (i32, i32) {
    %c0_i32 = arith.constant 0 : i32
    return %arg2, %arg0 : i32, i32
  }
  func.func @transform_2(%arg0: i32, %arg1: i32, %arg2: i32) -> (i32, i32) {
    %c0_i32 = arith.constant 0 : i32
    return %arg1, %arg0 : i32, i32
  }
  func.func @transform_3(%arg0: i32, %arg1: i32, %arg2: i32) -> (i32, i32) {
    %c0_i32 = arith.constant 0 : i32
    %c0_i32_0 = arith.constant 0 : i32
    return %c0_i32, %arg0 : i32, i32
  }
  func.func @transform_4(%arg0: i32, %arg1: i32, %arg2: i32) -> (i32, i32) {
    %c0_i32 = arith.constant 0 : i32
    %c0_i32_0 = arith.constant 0 : i32
    return %c0_i32, %arg0 : i32, i32
  }
}

module attributes {stable_mosaic.version = 11 : i64} {
  func.func @_gemm_kernel(%arg0: i32, %arg1: i32, %arg2: i32, %arg3: memref<512x144xbf16, #tpu.memory_space<vmem>>, %arg4: memref<144x128xbf16, #tpu.memory_space<vmem>>, %arg5: memref<512x128xbf16, #tpu.memory_space<vmem>>, %arg6: memref<1x128xf32, #tpu.memory_space<vmem>>, %arg7: memref<1x128xf32, #tpu.memory_space<vmem>>, %arg8: memref<512x128xf32, #tpu.memory_space<vmem>>) attributes {dimension_semantics = [#tpu.dimension_semantics<parallel>, #tpu.dimension_semantics<arbitrary>, #tpu.dimension_semantics<arbitrary>], iteration_bounds = array<i64: 1, 1, 1>, scalar_prefetch = 0 : i64, scratch_operands = 1 : i64, tpu.core_type = #tpu.core_type<tc>, window_params = [{transform_indices = @transform_0, window_bounds = array<i64: 512, 144>}, {transform_indices = @transform_1, window_bounds = array<i64: 144, 128>}, {transform_indices = @transform_2, window_bounds = array<i64: 512, 128>}, {transform_indices = @transform_3, window_bounds = array<i64: 1, 128>}, {transform_indices = @transform_4, window_bounds = array<i64: 1, 128>}]} {
    %c0_i32 = arith.constant 0 : i32
    %0 = arith.cmpi eq, %arg2, %c0_i32 : i32
    %1 = arith.extui %0 : i1 to i32
    %c0_i32_0 = arith.constant 0 : i32
    %2 = arith.cmpi ne, %1, %c0_i32_0 : i32
    scf.if %2 {
      %cst_13 = arith.constant 0.000000e+00 : f32
      %17 = vector.broadcast %cst_13 : f32 to vector<512x128xf32>
      %c0_14 = arith.constant 0 : index
      %c0_15 = arith.constant 0 : index
      %18 = vector.load %arg8[%c0_14, %c0_15] : memref<512x128xf32, #tpu.memory_space<vmem>>, vector<512x128xf32>
      tpu.vector_store %arg8[%c0_14, %c0_15], %17 {strides = array<i32>} : memref<512x128xf32, #tpu.memory_space<vmem>>, vector<512x128xf32>,
    } else {
    }
    %c0_i32_1 = arith.constant 0 : i32
    %3 = arith.cmpi eq, %arg1, %c0_i32_1 : i32
    %c0_i32_2 = arith.constant 0 : i32
    %4 = arith.cmpi eq, %arg2, %c0_i32_2 : i32
    %5 = arith.andi %3, %4 : i1
    %6 = arith.extui %5 : i1 to i32
    %c0_i32_3 = arith.constant 0 : i32
    %7 = arith.cmpi ne, %6, %c0_i32_3 : i32
    scf.if %7 {
      %cst_13 = arith.constant 0.000000e+00 : f32
      %17 = vector.broadcast %cst_13 : f32 to vector<1x128xf32>
      %c0_14 = arith.constant 0 : index
      %c0_15 = arith.constant 0 : index
      %18 = vector.load %arg6[%c0_14, %c0_15] : memref<1x128xf32, #tpu.memory_space<vmem>>, vector<1x128xf32>
      tpu.vector_store %arg6[%c0_14, %c0_15], %17 {strides = array<i32>} : memref<1x128xf32, #tpu.memory_space<vmem>>, vector<1x128xf32>,
      %cst_16 = arith.constant 0.000000e+00 : f32
      %19 = vector.broadcast %cst_16 : f32 to vector<1x128xf32>
      %c0_17 = arith.constant 0 : index
      %c0_18 = arith.constant 0 : index
      %20 = vector.load %arg7[%c0_17, %c0_18] : memref<1x128xf32, #tpu.memory_space<vmem>>, vector<1x128xf32>
      tpu.vector_store %arg7[%c0_17, %c0_18], %19 {strides = array<i32>} : memref<1x128xf32, #tpu.memory_space<vmem>>, vector<1x128xf32>,
    } else {
    }
    %c0 = arith.constant 0 : index
    %c0_4 = arith.constant 0 : index
    %8 = vector.load %arg8[%c0, %c0_4] : memref<512x128xf32, #tpu.memory_space<vmem>>, vector<512x128xf32>
    %c0_5 = arith.constant 0 : index
    %c0_6 = arith.constant 0 : index
    %9 = vector.load %arg3[%c0_5, %c0_6] : memref<512x144xbf16, #tpu.memory_space<vmem>>, vector<512x144xbf16>
    %c0_7 = arith.constant 0 : index
    %c0_8 = arith.constant 0 : index
    %10 = vector.load %arg4[%c0_7, %c0_8] : memref<144x128xbf16, #tpu.memory_space<vmem>>, vector<144x128xbf16>
    %cst = arith.constant dense<0.000000e+00> : vector<512x128xf32>
    %11 = tpu.matmul %9, %10, %cst {dimension_numbers = #tpu.dot_dimension_numbers<[1], [0], [0], [1], [0, 0, 1, 1], [], []>} : vector<512x144xbf16>, vector<144x128xbf16>, vector<512x128xf32> -> vector<512x128xf32>
    %12 = arith.addf %8, %11 : vector<512x128xf32>
    %c0_9 = arith.constant 0 : index
    %c0_10 = arith.constant 0 : index
    %13 = vector.load %arg8[%c0_9, %c0_10] : memref<512x128xf32, #tpu.memory_space<vmem>>, vector<512x128xf32>
    tpu.vector_store %arg8[%c0_9, %c0_10], %12 {strides = array<i32>} : memref<512x128xf32, #tpu.memory_space<vmem>>, vector<512x128xf32>,
    %c0_i32_11 = arith.constant 0 : i32
    %14 = arith.cmpi eq, %arg2, %c0_i32_11 : i32
    %15 = arith.extui %14 : i1 to i32
    %c0_i32_12 = arith.constant 0 : i32
    %16 = arith.cmpi ne, %15, %c0_i32_12 : i32
    scf.if %16 {
      %c0_13 = arith.constant 0 : index
      %c0_14 = arith.constant 0 : index
      %17 = vector.load %arg8[%c0_13, %c0_14] : memref<512x128xf32, #tpu.memory_space<vmem>>, vector<512x128xf32>
      %18 = arith.truncf %17 : vector<512x128xf32> to vector<512x128xbf16>
      %c0_15 = arith.constant 0 : index
      %c0_16 = arith.constant 0 : index
      %19 = vector.load %arg5[%c0_15, %c0_16] : memref<512x128xbf16, #tpu.memory_space<vmem>>, vector<512x128xbf16>
      tpu.vector_store %arg5[%c0_15, %c0_16], %18 {strides = array<i32>} : memref<512x128xbf16, #tpu.memory_space<vmem>>, vector<512x128xbf16>,
      %20 = arith.extf %18 : vector<512x128xbf16> to vector<512x128xf32>
      %c0_17 = arith.constant 0 : index
      %c0_18 = arith.constant 0 : index
      %21 = vector.load %arg6[%c0_17, %c0_18] : memref<1x128xf32, #tpu.memory_space<vmem>>, vector<1x128xf32>
      %cst_19 = arith.constant dense<0.000000e+00> : vector<128xf32>
      %22 = vector.multi_reduction <add>, %20, %cst_19 [0] : vector<512x128xf32> to vector<128xf32>
      %23 = vector.shape_cast %22 : vector<128xf32> to vector<1x128xf32>
      %24 = arith.addf %21, %23 : vector<1x128xf32>
      %c0_20 = arith.constant 0 : index
      %c0_21 = arith.constant 0 : index
      %25 = vector.load %arg6[%c0_20, %c0_21] : memref<1x128xf32, #tpu.memory_space<vmem>>, vector<1x128xf32>
      tpu.vector_store %arg6[%c0_20, %c0_21], %24 {strides = array<i32>} : memref<1x128xf32, #tpu.memory_space<vmem>>, vector<1x128xf32>,
      %c0_22 = arith.constant 0 : index
      %c0_23 = arith.constant 0 : index
      %26 = vector.load %arg7[%c0_22, %c0_23] : memref<1x128xf32, #tpu.memory_space<vmem>>, vector<1x128xf32>
      %27 = arith.mulf %20, %20 : vector<512x128xf32>
      %cst_24 = arith.constant dense<0.000000e+00> : vector<128xf32>
      %28 = vector.multi_reduction <add>, %27, %cst_24 [0] : vector<512x128xf32> to vector<128xf32>
      %29 = vector.shape_cast %28 : vector<128xf32> to vector<1x128xf32>
      %30 = arith.addf %26, %29 : vector<1x128xf32>
      %c0_25 = arith.constant 0 : index
      %c0_26 = arith.constant 0 : index
      %31 = vector.load %arg7[%c0_25, %c0_26] : memref<1x128xf32, #tpu.memory_space<vmem>>, vector<1x128xf32>
      tpu.vector_store %arg7[%c0_25, %c0_26], %30 {strides = array<i32>} : memref<1x128xf32, #tpu.memory_space<vmem>>, vector<1x128xf32>,
    } else {
    }
    return
  }
  func.func @transform_0(%arg0: i32, %arg1: i32, %arg2: i32) -> (i32, i32) {
    %c0_i32 = arith.constant 0 : i32
    return %arg1, %arg2 : i32, i32
  }
  func.func @transform_1(%arg0: i32, %arg1: i32, %arg2: i32) -> (i32, i32) {
    %c0_i32 = arith.constant 0 : i32
    return %arg2, %arg0 : i32, i32
  }
  func.func @transform_2(%arg0: i32, %arg1: i32, %arg2: i32) -> (i32, i32) {
    %c0_i32 = arith.constant 0 : i32
    return %arg1, %arg0 : i32, i32
  }
  func.func @transform_3(%arg0: i32, %arg1: i32, %arg2: i32) -> (i32, i32) {
    %c0_i32 = arith.constant 0 : i32
    %c0_i32_0 = arith.constant 0 : i32
    return %c0_i32, %arg0 : i32, i32
  }
  func.func @transform_4(%arg0: i32, %arg1: i32, %arg2: i32) -> (i32, i32) {
    %c0_i32 = arith.constant 0 : i32
    %c0_i32_0 = arith.constant 0 : i32
    return %c0_i32, %arg0 : i32, i32
  }
}

module attributes {stable_mosaic.version = 11 : i64} {
  func.func @_gemm_kernel(%arg0: i32, %arg1: i32, %arg2: i32, %arg3: memref<2048x80xbf16, #tpu.memory_space<vmem>>, %arg4: memref<80x128xbf16, #tpu.memory_space<vmem>>, %arg5: memref<2048x128xbf16, #tpu.memory_space<vmem>>, %arg6: memref<1x128xf32, #tpu.memory_space<vmem>>, %arg7: memref<1x128xf32, #tpu.memory_space<vmem>>, %arg8: memref<2048x128xf32, #tpu.memory_space<vmem>>) attributes {dimension_semantics = [#tpu.dimension_semantics<parallel>, #tpu.dimension_semantics<arbitrary>, #tpu.dimension_semantics<arbitrary>], iteration_bounds = array<i64: 1, 1, 1>, scalar_prefetch = 0 : i64, scratch_operands = 1 : i64, tpu.core_type = #tpu.core_type<tc>, window_params = [{transform_indices = @transform_0, window_bounds = array<i64: 2048, 80>}, {transform_indices = @transform_1, window_bounds = array<i64: 80, 128>}, {transform_indices = @transform_2, window_bounds = array<i64: 2048, 128>}, {transform_indices = @transform_3, window_bounds = array<i64: 1, 128>}, {transform_indices = @transform_4, window_bounds = array<i64: 1, 128>}]} {
    %c0_i32 = arith.constant 0 : i32
    %0 = arith.cmpi eq, %arg2, %c0_i32 : i32
    %1 = arith.extui %0 : i1 to i32
    %c0_i32_0 = arith.constant 0 : i32
    %2 = arith.cmpi ne, %1, %c0_i32_0 : i32
    scf.if %2 {
      %cst_13 = arith.constant 0.000000e+00 : f32
      %17 = vector.broadcast %cst_13 : f32 to vector<2048x128xf32>
      %c0_14 = arith.constant 0 : index
      %c0_15 = arith.constant 0 : index
      %18 = vector.load %arg8[%c0_14, %c0_15] : memref<2048x128xf32, #tpu.memory_space<vmem>>, vector<2048x128xf32>
      tpu.vector_store %arg8[%c0_14, %c0_15], %17 {strides = array<i32>} : memref<2048x128xf32, #tpu.memory_space<vmem>>, vector<2048x128xf32>,
    } else {
    }
    %c0_i32_1 = arith.constant 0 : i32
    %3 = arith.cmpi eq, %arg1, %c0_i32_1 : i32
    %c0_i32_2 = arith.constant 0 : i32
    %4 = arith.cmpi eq, %arg2, %c0_i32_2 : i32
    %5 = arith.andi %3, %4 : i1
    %6 = arith.extui %5 : i1 to i32
    %c0_i32_3 = arith.constant 0 : i32
    %7 = arith.cmpi ne, %6, %c0_i32_3 : i32
    scf.if %7 {
      %cst_13 = arith.constant 0.000000e+00 : f32
      %17 = vector.broadcast %cst_13 : f32 to vector<1x128xf32>
      %c0_14 = arith.constant 0 : index
      %c0_15 = arith.constant 0 : index
      %18 = vector.load %arg6[%c0_14, %c0_15] : memref<1x128xf32, #tpu.memory_space<vmem>>, vector<1x128xf32>
      tpu.vector_store %arg6[%c0_14, %c0_15], %17 {strides = array<i32>} : memref<1x128xf32, #tpu.memory_space<vmem>>, vector<1x128xf32>,
      %cst_16 = arith.constant 0.000000e+00 : f32
      %19 = vector.broadcast %cst_16 : f32 to vector<1x128xf32>
      %c0_17 = arith.constant 0 : index
      %c0_18 = arith.constant 0 : index
      %20 = vector.load %arg7[%c0_17, %c0_18] : memref<1x128xf32, #tpu.memory_space<vmem>>, vector<1x128xf32>
      tpu.vector_store %arg7[%c0_17, %c0_18], %19 {strides = array<i32>} : memref<1x128xf32, #tpu.memory_space<vmem>>, vector<1x128xf32>,
    } else {
    }
    %c0 = arith.constant 0 : index
    %c0_4 = arith.constant 0 : index
    %8 = vector.load %arg8[%c0, %c0_4] : memref<2048x128xf32, #tpu.memory_space<vmem>>, vector<2048x128xf32>
    %c0_5 = arith.constant 0 : index
    %c0_6 = arith.constant 0 : index
    %9 = vector.load %arg3[%c0_5, %c0_6] : memref<2048x80xbf16, #tpu.memory_space<vmem>>, vector<2048x80xbf16>
    %c0_7 = arith.constant 0 : index
    %c0_8 = arith.constant 0 : index
    %10 = vector.load %arg4[%c0_7, %c0_8] : memref<80x128xbf16, #tpu.memory_space<vmem>>, vector<80x128xbf16>
    %cst = arith.constant dense<0.000000e+00> : vector<2048x128xf32>
    %11 = tpu.matmul %9, %10, %cst {dimension_numbers = #tpu.dot_dimension_numbers<[1], [0], [0], [1], [0, 0, 1, 1], [], []>} : vector<2048x80xbf16>, vector<80x128xbf16>, vector<2048x128xf32> -> vector<2048x128xf32>
    %12 = arith.addf %8, %11 : vector<2048x128xf32>
    %c0_9 = arith.constant 0 : index
    %c0_10 = arith.constant 0 : index
    %13 = vector.load %arg8[%c0_9, %c0_10] : memref<2048x128xf32, #tpu.memory_space<vmem>>, vector<2048x128xf32>
    tpu.vector_store %arg8[%c0_9, %c0_10], %12 {strides = array<i32>} : memref<2048x128xf32, #tpu.memory_space<vmem>>, vector<2048x128xf32>,
    %c0_i32_11 = arith.constant 0 : i32
    %14 = arith.cmpi eq, %arg2, %c0_i32_11 : i32
    %15 = arith.extui %14 : i1 to i32
    %c0_i32_12 = arith.constant 0 : i32
    %16 = arith.cmpi ne, %15, %c0_i32_12 : i32
    scf.if %16 {
      %c0_13 = arith.constant 0 : index
      %c0_14 = arith.constant 0 : index
      %17 = vector.load %arg8[%c0_13, %c0_14] : memref<2048x128xf32, #tpu.memory_space<vmem>>, vector<2048x128xf32>
      %18 = arith.truncf %17 : vector<2048x128xf32> to vector<2048x128xbf16>
      %c0_15 = arith.constant 0 : index
      %c0_16 = arith.constant 0 : index
      %19 = vector.load %arg5[%c0_15, %c0_16] : memref<2048x128xbf16, #tpu.memory_space<vmem>>, vector<2048x128xbf16>
      tpu.vector_store %arg5[%c0_15, %c0_16], %18 {strides = array<i32>} : memref<2048x128xbf16, #tpu.memory_space<vmem>>, vector<2048x128xbf16>,
      %20 = arith.extf %18 : vector<2048x128xbf16> to vector<2048x128xf32>
      %c0_17 = arith.constant 0 : index
      %c0_18 = arith.constant 0 : index
      %21 = vector.load %arg6[%c0_17, %c0_18] : memref<1x128xf32, #tpu.memory_space<vmem>>, vector<1x128xf32>
      %cst_19 = arith.constant dense<0.000000e+00> : vector<128xf32>
      %22 = vector.multi_reduction <add>, %20, %cst_19 [0] : vector<2048x128xf32> to vector<128xf32>
      %23 = vector.shape_cast %22 : vector<128xf32> to vector<1x128xf32>
      %24 = arith.addf %21, %23 : vector<1x128xf32>
      %c0_20 = arith.constant 0 : index
      %c0_21 = arith.constant 0 : index
      %25 = vector.load %arg6[%c0_20, %c0_21] : memref<1x128xf32, #tpu.memory_space<vmem>>, vector<1x128xf32>
      tpu.vector_store %arg6[%c0_20, %c0_21], %24 {strides = array<i32>} : memref<1x128xf32, #tpu.memory_space<vmem>>, vector<1x128xf32>,
      %c0_22 = arith.constant 0 : index
      %c0_23 = arith.constant 0 : index
      %26 = vector.load %arg7[%c0_22, %c0_23] : memref<1x128xf32, #tpu.memory_space<vmem>>, vector<1x128xf32>
      %27 = arith.mulf %20, %20 : vector<2048x128xf32>
      %cst_24 = arith.constant dense<0.000000e+00> : vector<128xf32>
      %28 = vector.multi_reduction <add>, %27, %cst_24 [0] : vector<2048x128xf32> to vector<128xf32>
      %29 = vector.shape_cast %28 : vector<128xf32> to vector<1x128xf32>
      %30 = arith.addf %26, %29 : vector<1x128xf32>
      %c0_25 = arith.constant 0 : index
      %c0_26 = arith.constant 0 : index
      %31 = vector.load %arg7[%c0_25, %c0_26] : memref<1x128xf32, #tpu.memory_space<vmem>>, vector<1x128xf32>
      tpu.vector_store %arg7[%c0_25, %c0_26], %30 {strides = array<i32>} : memref<1x128xf32, #tpu.memory_space<vmem>>, vector<1x128xf32>,
    } else {
    }
    return
  }
  func.func @transform_0(%arg0: i32, %arg1: i32, %arg2: i32) -> (i32, i32) {
    %c0_i32 = arith.constant 0 : i32
    return %arg1, %arg2 : i32, i32
  }
  func.func @transform_1(%arg0: i32, %arg1: i32, %arg2: i32) -> (i32, i32) {
    %c0_i32 = arith.constant 0 : i32
    return %arg2, %arg0 : i32, i32
  }
  func.func @transform_2(%arg0: i32, %arg1: i32, %arg2: i32) -> (i32, i32) {
    %c0_i32 = arith.constant 0 : i32
    return %arg1, %arg0 : i32, i32
  }
  func.func @transform_3(%arg0: i32, %arg1: i32, %arg2: i32) -> (i32, i32) {
    %c0_i32 = arith.constant 0 : i32
    %c0_i32_0 = arith.constant 0 : i32
    return %c0_i32, %arg0 : i32, i32
  }
  func.func @transform_4(%arg0: i32, %arg1: i32, %arg2: i32) -> (i32, i32) {
    %c0_i32 = arith.constant 0 : i32
    %c0_i32_0 = arith.constant 0 : i32
    return %c0_i32, %arg0 : i32, i32
  }
}

module attributes {stable_mosaic.version = 11 : i64} {
  func.func @_gemm_kernel(%arg0: i32, %arg1: i32, %arg2: i32, %arg3: memref<2048x48xbf16, #tpu.memory_space<vmem>>, %arg4: memref<48x128xbf16, #tpu.memory_space<vmem>>, %arg5: memref<2048x128xbf16, #tpu.memory_space<vmem>>, %arg6: memref<2048x128xf32, #tpu.memory_space<vmem>>) attributes {dimension_semantics = [#tpu.dimension_semantics<parallel>, #tpu.dimension_semantics<arbitrary>, #tpu.dimension_semantics<arbitrary>], iteration_bounds = array<i64: 1, 4, 1>, scalar_prefetch = 0 : i64, scratch_operands = 1 : i64, tpu.core_type = #tpu.core_type<tc>, window_params = [{transform_indices = @transform_0, window_bounds = array<i64: 2048, 48>}, {transform_indices = @transform_1, window_bounds = array<i64: 48, 128>}, {transform_indices = @transform_2, window_bounds = array<i64: 2048, 128>}]} {
    %c0_i32 = arith.constant 0 : i32
    %0 = arith.cmpi eq, %arg2, %c0_i32 : i32
    %1 = arith.extui %0 : i1 to i32
    %c0_i32_0 = arith.constant 0 : i32
    %2 = arith.cmpi ne, %1, %c0_i32_0 : i32
    scf.if %2 {
      %cst_10 = arith.constant 0.000000e+00 : f32
      %12 = vector.broadcast %cst_10 : f32 to vector<2048x128xf32>
      %c0_11 = arith.constant 0 : index
      %c0_12 = arith.constant 0 : index
      %13 = vector.load %arg6[%c0_11, %c0_12] : memref<2048x128xf32, #tpu.memory_space<vmem>>, vector<2048x128xf32>
      tpu.vector_store %arg6[%c0_11, %c0_12], %12 {strides = array<i32>} : memref<2048x128xf32, #tpu.memory_space<vmem>>, vector<2048x128xf32>,
    } else {
    }
    %c0 = arith.constant 0 : index
    %c0_1 = arith.constant 0 : index
    %3 = vector.load %arg6[%c0, %c0_1] : memref<2048x128xf32, #tpu.memory_space<vmem>>, vector<2048x128xf32>
    %c0_2 = arith.constant 0 : index
    %c0_3 = arith.constant 0 : index
    %4 = vector.load %arg3[%c0_2, %c0_3] : memref<2048x48xbf16, #tpu.memory_space<vmem>>, vector<2048x48xbf16>
    %c0_4 = arith.constant 0 : index
    %c0_5 = arith.constant 0 : index
    %5 = vector.load %arg4[%c0_4, %c0_5] : memref<48x128xbf16, #tpu.memory_space<vmem>>, vector<48x128xbf16>
    %cst = arith.constant dense<0.000000e+00> : vector<2048x128xf32>
    %6 = tpu.matmul %4, %5, %cst {dimension_numbers = #tpu.dot_dimension_numbers<[1], [0], [0], [1], [0, 0, 1, 1], [], []>} : vector<2048x48xbf16>, vector<48x128xbf16>, vector<2048x128xf32> -> vector<2048x128xf32>
    %7 = arith.addf %3, %6 : vector<2048x128xf32>
    %c0_6 = arith.constant 0 : index
    %c0_7 = arith.constant 0 : index
    %8 = vector.load %arg6[%c0_6, %c0_7] : memref<2048x128xf32, #tpu.memory_space<vmem>>, vector<2048x128xf32>
    tpu.vector_store %arg6[%c0_6, %c0_7], %7 {strides = array<i32>} : memref<2048x128xf32, #tpu.memory_space<vmem>>, vector<2048x128xf32>,
    %c0_i32_8 = arith.constant 0 : i32
    %9 = arith.cmpi eq, %arg2, %c0_i32_8 : i32
    %10 = arith.extui %9 : i1 to i32
    %c0_i32_9 = arith.constant 0 : i32
    %11 = arith.cmpi ne, %10, %c0_i32_9 : i32
    scf.if %11 {
      %c0_10 = arith.constant 0 : index
      %c0_11 = arith.constant 0 : index
      %12 = vector.load %arg6[%c0_10, %c0_11] : memref<2048x128xf32, #tpu.memory_space<vmem>>, vector<2048x128xf32>
      %13 = math.tanh %12 : vector<2048x128xf32>
      %14 = arith.truncf %13 : vector<2048x128xf32> to vector<2048x128xbf16>
      %c0_12 = arith.constant 0 : index
      %c0_13 = arith.constant 0 : index
      %15 = vector.load %arg5[%c0_12, %c0_13] : memref<2048x128xbf16, #tpu.memory_space<vmem>>, vector<2048x128xbf16>
      tpu.vector_store %arg5[%c0_12, %c0_13], %14 {strides = array<i32>} : memref<2048x128xbf16, #tpu.memory_space<vmem>>, vector<2048x128xbf16>,
    } else {
    }
    return
  }
  func.func @transform_0(%arg0: i32, %arg1: i32, %arg2: i32) -> (i32, i32) {
    %c0_i32 = arith.constant 0 : i32
    return %arg1, %arg2 : i32, i32
  }
  func.func @transform_1(%arg0: i32, %arg1: i32, %arg2: i32) -> (i32, i32) {
    %c0_i32 = arith.constant 0 : i32
    return %arg2, %arg0 : i32, i32
  }
  func.func @transform_2(%arg0: i32, %arg1: i32, %arg2: i32) -> (i32, i32) {
    %c0_i32 = arith.constant 0 : i32
    return %arg1, %arg0 : i32, i32
  }
}

</mosaic_0001>

<bundles_post_ra>
// kernel: squeeze.11
= control target key start
LH: loop header
LB: loop body
LE: loop exit
PB: predicated region body
PF: predicated region fallthrough
CT: control target
= control target key end

     0   :  { %vm3_vm0 = vcmask 523264   ;;  %s13_s9 = smov 64   ;;  %s33_s0 = inlined_call_operand.vmem [shape: f32[1024], index: 0, kind: input, shape index: {}]   ;;  %s34_s1 = inlined_call_operand.vmem [shape: f32[16,64], index: 1, kind: output, shape index: {}]  }
   0x1   :  { %v2_v0 = vld [vmem:[%s33_s0] sm:$0xff]  }
   0x2   :  { %4 = vst.msk [vmem:[%s34_s1] ss:$2 sm:$0xff] %vm3_vm0, %v2_v0   ;;  %6 = vrot.lane.b32.xlu0 %v2_v0, %s13_s9 }
  0x74   :  { %v7_v1 = vpop.permute.xlu0 %6  }
  0x75   :  { %11 = vst.msk [vmem:[%s34_s1 + $0x1] ss:$2 sm:$0xff] %vm3_vm0, %v7_v1  }

// kernel: tile.58
= control target key start
LH: loop header
LB: loop body
LE: loop exit
PB: predicated region body
PF: predicated region fallthrough
CT: control target
= control target key end

     0   :  { %s28_s0 = inlined_call_operand.vmem [shape: f32[64], index: 0, kind: input, shape index: {}]   ;;  %s29_s1 = inlined_call_operand.vmem [shape: f32[16,64], index: 1, kind: output, shape index: {}]  }
   0x1   :  { %v4_v0 = vld [vmem:[%s28_s0] ss:$0 sm:$0xff] }
   0x2   :  { %5 = vst [vmem:[%s29_s1] sm:$0xff] %v4_v0  ;;  %8 = vst [vmem:[%s29_s1 + $0x8] sm:$0xff] %v4_v0 }

// kernel: squeeze.12
= control target key start
LH: loop header
LB: loop body
LE: loop exit
PB: predicated region body
PF: predicated region fallthrough
CT: control target
= control target key end

     0   :  { %s40_s8 = smov 32   ;;  %vm8_vm0 = vcmask 261120   ;;  %s41_s9 = smov 64   ;;  %s58_s0 = inlined_call_operand.vmem [shape: f32[128], index: 0, kind: input, shape index: {}]   ;;  %s59_s1 = inlined_call_operand.vmem [shape: f32[4,32], index: 1, kind: output, shape index: {}]  }
   0x1   :  { %v5_v0 = vld [vmem:[%s58_s0] sm:$0x1]  ;;  %s39_s0 = smov 96  }
   0x2   :  { %6 = vst [vmem:[#allocation1] sm:$0x1] %v5_v0 }
   0x9   :  { %v10_v1 = vld [vmem:[#allocation1] sm:$0x1]  }
   0xa   :  { %v22_v2 = vld [vmem:[#allocation1] sm:$0x1]   ;;  %11 = vrot.lane.b32.xlu0 %v10_v1, %s39_s0 }
   0xb   :  { %23 = vrot.lane.b32.xlu1 %v22_v2, %s40_s8  ;;  %v7_v3 = vld [vmem:[#allocation1] sm:$0x1]  }
   0xc   :  { %v16_v4 = vld [vmem:[#allocation1] sm:$0x1]   ;;  %9 = vst.msk [vmem:[#allocation0] sm:$0x1] %vm8_vm0, %v7_v3  }
   0xe   :  { %17 = vrot.lane.b32.xlu0 %v16_v4, %s41_s9 }
  0x7c   :  { %v12_v5 = vpop.permute.xlu0 %11  }
  0x7d   :  { %v24_v6 = vpop.permute.xlu1 %23   ;;  %15 = vst.msk [vmem:[#allocation0 + $0x1] sm:$0x1] %vm8_vm0, %v12_v5  }
  0x7e   :  { %27 = vst.msk [vmem:[#allocation0 + $0x3] sm:$0x1] %vm8_vm0, %v24_v6  }
  0x80   :  { %v18_v7 = vpop.permute.xlu0 %17  }
  0x81   :  { %21 = vst.msk [vmem:[#allocation0 + $0x2] sm:$0x1] %vm8_vm0, %v18_v7  }
  0x88   :  { %v32_v8 = vld [vmem:[#allocation0] sm:$0xf] }
  0x89   :  { %35 = vst [vmem:[%s59_s1] sm:$0xf] %v32_v8 }

// kernel: tile.68
= control target key start
LH: loop header
LB: loop body
LE: loop exit
PB: predicated region body
PF: predicated region fallthrough
CT: control target
= control target key end

     0   :  { %s22_s0 = inlined_call_operand.vmem [shape: f32[32], index: 0, kind: input, shape index: {}]   ;;  %s23_s1 = inlined_call_operand.vmem [shape: f32[4,32], index: 1, kind: output, shape index: {}]  }
   0x1   :  { %v4_v0 = vld [vmem:[%s22_s0] ss:$0 sm:$0xff] }
   0x2   :  { %5 = vst [vmem:[%s23_s1] sm:$0xf] %v4_v0 }

// kernel: generator_forward.6
= control target key start
LH: loop header
LB: loop body
LE: loop exit
PB: predicated region body
PF: predicated region fallthrough
CT: control target
= control target key end

     0   :  { %s989_s15 = smov 0   ;;  %s991_s16 = smov 0   ;;  %s1109_s0 = inlined_call_operand.vmem [shape: bf16[16,16], index: 0, kind: input, shape index: {}]   ;;  %s1110_s1 = inlined_call_operand.vmem [shape: bf16[16,1024], index: 1, kind: input, shape index: {}]   ;;  %s1111_s2 = inlined_call_operand.vmem [shape: bf16[16,1024], index: 2, kind: output, shape index: {0}]   ;;  %s1112_s3 = inlined_call_operand.vmem [shape: f32[1,1024], index: 3, kind: output, shape index: {1}]   ;;  %s1113_s4 = inlined_call_operand.vmem [shape: f32[1,1024], index: 4, kind: output, shape index: {2}]  }
   0x1   :  { %s993_s17 = smov 0   ;;  %s995_s18 = smov 0  }
   0x2   :  { %s997_s19 = smov 0  }
   0x3 LB: > { %s34_s20 = sadd.s32 1, %s955_s18  ;;  %s836_s21 = sadd.s32 4294967295, %s959_s19   ;;  %s959_s19 = sphi %s997_s19, %s15_s19   ;;  %s955_s18 = sphi %s995_s18, %s1120_s18   ;;  %s951_s17 = sphi %s993_s17, %s1119_s17   ;;  %s947_s16 = sphi %s991_s16, %s1118_s16   ;;  %s943_s15 = sphi %s989_s15, %s1117_s15  }
   0x4   : > { %p36_p0 = scmp.ge.s32.totalorder %s34_s20, 2  ;;  %p78_p1 = scmp.ne.s32.totalorder %s947_s16, %s943_s15 }
   0x5   : > { %p79_p2 = scmp.eq.s32.totalorder %s959_s19, 0  ;;  %p110_p4 = scmp.eq.s32.totalorder %s836_s21, 1 }
   0x6   : > { %s1122_s20 = smov (%p36_p0, %s34_s20), 0  ;;  %s71_s23 = sadd.s32 1, %s947_s16 }
   0x7   : > { %p80_p3 = por %p79_p2, %p78_p1  ;;  %s67_s22 = ssub.s32 %s955_s18, %s1122_s20 }
   0x8   : > { %p69_p5 = scmp.eq.s32.totalorder %s67_s22, 0  ;;  %p1024_p6 = por %p110_p4, %p78_p1 }
   0x9   : > { %p840_p7 = scmp.ge.s32.totalorder %s959_s19, 2 }
   0xa   : > { %s1029_s25 = scalar_select %p69_p5, %s947_s16, %s71_s23  }
   0xb   : > { %196 = sbr.rel (%p840_p7) target bundleno = 22 (0x16), region = 20 }
  0x10   : > { %199 = sbr.rel (!%p80_p3) target bundleno = 22 (0x16), region = 24  ;;  %s201_s26 = sand.u32 (%p80_p3), 1, %s947_s16  }
  0x11   : > { %s865_s27 = sshll.u32 (%p80_p3), %s955_s18, 4  ;;  %s841_s28 = sshll.u32 (%p80_p3), %s201_s26, 5 }
  0x12   : > { %s209_s5 = scalar_lea.vmem (%p80_p3), %s1110_s1, %s865_s27  ;;  %s203_s6 = scalar_lea.vmem (%p80_p3), [#allocation3], %s841_s28 }
  0x13   : > { %v222_v0 = vld [vmem:[%s209_s5] sm:$0xff] (%p80_p3)  ;;  %v224_v1 = vld [vmem:[%s209_s5 + $0x8] sm:$0xff] (%p80_p3) }
  0x14   : > { %v226_v2 = vld [vmem:[%s209_s5 + $0x20] sm:$0xff] (%p80_p3)  ;;  %223 = vst [vmem:[%s203_s6] sm:$0xff] (%p80_p3), %v222_v0  ;;  %225 = vst [vmem:[%s203_s6 + $0x8] sm:$0xff] (%p80_p3), %v224_v1  ;;  %v228_v3 = vld [vmem:[%s209_s5 + $0x28] sm:$0xff] (%p80_p3) }
  0x15   : > { %227 = vst [vmem:[%s203_s6 + $0x10] sm:$0xff] %v226_v2  ;;  %229 = vst [vmem:[%s203_s6 + $0x18] sm:$0xff] %v228_v3 }
  0x16 PF: > { %p844_p8 = scmp.ge.s32.totalorder %s959_s19, 1  ;;  %p234_p9 = scmp.lt.s32.totalorder %s959_s19, 3 }
  0x18   : > { %p235_p10 = pnand %p844_p8, %p234_p9 }
  0x19   : > { %s241_s7 = sand.u32 (!%p235_p10), 1, %s943_s15   ;;  %s847_s12 = sshll.u32 (!%p235_p10), %s951_s17, 2 }
  0x1a   : > { %238 = sbr.rel (%p235_p10) target bundleno = 272 (0x110), region = 47  ;;  %s1040_s8 = sshll.u32 (!%p235_p10), %s241_s7, 5 }
  0x1b   : > { %s243_s9 = scalar_lea.vmem (!%p235_p10), [#allocation3], %s1040_s8  ;;  %p295_p11 = scmp.lt.s32.totalorder (!%p235_p10), %s847_s12, 7 }
  0x1c   : > { %s1069_s26 = scalar_lea.vmem (!%p235_p10), [#allocation4], %s1040_s8 }
  0x1f   : > { %v961_v4 = vmov 0   ;;  %v914_v5 = vld [vmem:[%s243_s9 + $0x4] ss:$16 sps:$4 sm:$0xff]   ;;  %v916_v6 = vld [vmem:[%s243_s9 + $0xc] ss:$16 sps:$4 sm:$0xff]   ;;  %vm367_vm0 = vcmask 130048   ;;  %v322_v10 = vlaneseq }
  0x20   : > { %403 = vmatprep.mubr.bf16.mxu0 %v961_v4  ;;  %446 = vmatprep.mubr.bf16.mxu1 %v961_v4  ;;  %v918_v7 = vld [vmem:[%s243_s9] ss:$16 sps:$4 sm:$0xff]   ;;  %v919_v8 = vld [vmem:[%s243_s9 + $0x8] ss:$16 sps:$4 sm:$0xff]   ;;  %s1124_s12 = smov (!%p295_p11, %s847_s12), 7  ;;  %v962_v12 = vmov 0.0  }
  0x21   : > { %385 = vmatprep.subr.bf16.mxu0 %v914_v5  ;;  %428 = vmatprep.subr.bf16.mxu1 %v916_v6  ;;  %v920_v9 = vld [vmem:[%s1109_s0] sm:$0xff]   ;;  %s1050_s15 = scalar_lea.vmem %s1112_s3, %s1124_s12  ;;  %vm1053_vm1 = vcmp.lt.s32.totalorder %v322_v10, 512  ;;  %s1063_s23 = scalar_lea.vmem %s1113_s4, %s1124_s12  ;;  %v963_v3 = vmov 1966171168  }
  0x22   : > { %386 = vmatpush1.bf16.msra.mxu0 %v918_v7  ;;  %429 = vmatpush1.bf16.msra.mxu1 %v919_v8  ;;  %326 = vst.msk [vmem:[%s1050_s15] sm:$0xf] %vm1053_vm1, %v962_v12  ;;  %327 = vst.msk [vmem:[%s1063_s23] sm:$0xf] %vm1053_vm1, %v962_v12  ;;  %v556_v4 = vunpack.c.l.s4 %v963_v3  ;;  %s870_s27 = sshll.u32 (%p1024_p6), %s951_s17, 4 }
  0x23   : > { %s672_s30 = scalar_lea.vmem (%p1024_p6), %s1111_s2, %s870_s27 }
  0x25   : > { %854 = vmatmul.mubr.msk.bf16.vlgmr.msra.gmra.mxu0 %vm367_vm0, %v920_v9  ;;  %855 = vmatmul.mubr.msk.bf16.vlgmr.msra.gmra.mxu1 %vm367_vm0, %v920_v9 }
  0xe5   : > { %v405_v13 = vpop.f32.mrf.mxu0  ;;  %v448_v14 = vpop.f32.mrf.mxu1 }
  0xe7   : > { %v407_v15 = vpop.f32.mrf.mxu0  ;;  %v450_v16 = vpop.f32.mrf.mxu1 }
  0xe8   : > { %v866_v17 = vpack.c.bf16 %v407_v15, %v405_v13  ;;  %v867_v18 = vpack.c.bf16 %v450_v16, %v448_v14 }
  0xe9   : > { %v409_v19 = vpop.f32.mrf.mxu0  ;;  %v452_v20 = vpop.f32.mrf.mxu1 }
  0xea   : > { %508 = vst [vmem:[%s1069_s26] sm:$0xff] %v866_v17  ;;  %509 = vst [vmem:[%s1069_s26 + $0x8] sm:$0xff] %v867_v18  ;;  %v484_v21 = vpack.c.bf16 %v409_v19, %v405_v13  ;;  %v486_v22 = vpack.c.bf16 %v452_v20, %v448_v14 }
  0xeb   : > { %v411_v23 = vpop.f32.mrf.mxu0  ;;  %v454_v24 = vpop.f32.mrf.mxu1 }
  0xec   : > { %v512_v25 = vunpack.c.l.bf16 %v484_v21  ;;  %v516_v26 = vunpack.c.h.bf16 %v484_v21  ;;  %v514_v27 = vunpack.c.l.bf16 %v486_v22  ;;  %v518_v28 = vunpack.c.h.bf16 %v486_v22 }
  0xed   : > { %v485_v29 = vpack.c.bf16 %v411_v23, %v407_v15  ;;  %v868_v30 = vpack.c.bf16 %v411_v23, %v409_v19  ;;  %v487_v31 = vpack.c.bf16 %v454_v24, %v450_v16  ;;  %v869_v32 = vpack.c.bf16 %v454_v24, %v452_v20 }
  0xee   : > { %v521_v33 = vadd.f32 %v516_v26, %v512_v25  ;;  %v585_v34 = vmul.f32 %v512_v25, %v512_v25  ;;  %v589_v35 = vmul.f32 %v516_v26, %v516_v26  ;;  %v535_v36 = vadd.f32 %v518_v28, %v514_v27 }
  0xef   : > { %v587_v37 = vmul.f32 %v514_v27, %v514_v27  ;;  %v591_v38 = vmul.f32 %v518_v28, %v518_v28  ;;  %510 = vst [vmem:[%s1069_s26 + $0x10] sm:$0xff] %v868_v30  ;;  %v513_v39 = vunpack.c.l.bf16 %v485_v29  ;;  %v517_v40 = vunpack.c.h.bf16 %v485_v29  ;;  %511 = vst [vmem:[%s1069_s26 + $0x18] sm:$0xff] %v869_v32 }
  0xf0   : > { %v522_v41 = vrot.slane %v521_v33, 4  ;;  %v593_v42 = vadd.f32 %v589_v35, %v585_v34  ;;  %v536_v43 = vrot.slane %v535_v36, 4  ;;  %v515_v44 = vunpack.c.l.bf16 %v487_v31 }
  0xf1   : > { %v607_v45 = vadd.f32 %v591_v38, %v587_v37  ;;  %v528_v46 = vadd.f32 %v517_v40, %v513_v39  ;;  %v586_v47 = vmul.f32 %v513_v39, %v513_v39  ;;  %v590_v48 = vmul.f32 %v517_v40, %v517_v40 }
  0xf2   : > { %v523_v49 = vadd.f32 %v522_v41, %v521_v33  ;;  %v594_v50 = vrot.slane %v593_v42, 4  ;;  %v537_v51 = vadd.f32 %v536_v43, %v535_v36  ;;  %v519_v52 = vunpack.c.h.bf16 %v487_v31 }
  0xf3   : > { %v608_v53 = vrot.slane %v607_v45, 4  ;;  %v529_v54 = vrot.slane %v528_v46, 4  ;;  %v600_v55 = vadd.f32 %v590_v48, %v586_v47  ;;  %v588_v56 = vmul.f32 %v515_v44, %v515_v44 }
  0xf4   : > { %v524_v57 = vrot.slane %v523_v49, 2  ;;  %v595_v58 = vadd.f32 %v594_v50, %v593_v42  ;;  %v538_v59 = vrot.slane %v537_v51, 2  ;;  %v542_v60 = vadd.f32 %v519_v52, %v515_v44 }
  0xf5   : > { %v609_v61 = vadd.f32 %v608_v53, %v607_v45  ;;  %v530_v62 = vadd.f32 %v529_v54, %v528_v46  ;;  %v601_v63 = vrot.slane %v600_v55, 4  ;;  %v592_v0 = vmul.f32 %v519_v52, %v519_v52 }
  0xf6   : > { %v525_v1 = vadd.f32 %v524_v57, %v523_v49  ;;  %v596_v2 = vrot.slane %v595_v58, 2  ;;  %v543_v5 = vrot.slane %v542_v60, 4  ;;  %v539_v13 = vadd.f32 %v538_v59, %v537_v51  ;;  %v520_v51 = vld [vmem:[%s1050_s15] sm:$0xf] }
  0xf7   : > { %v610_v6 = vrot.slane %v609_v61, 2  ;;  %v531_v7 = vrot.slane %v530_v62, 2  ;;  %v602_v8 = vadd.f32 %v601_v63, %v600_v55  ;;  %v614_v9 = vadd.f32 %v592_v0, %v588_v56  ;;  %v584_v56 = vld [vmem:[%s1063_s23] sm:$0xf] }
  0xf8   : > { %v597_v12 = vadd.f32 %v596_v2, %v595_v58  ;;  %v544_v14 = vadd.f32 %v543_v5, %v542_v60  ;;  %v526_v15 = vrot.slane %v525_v1, 1  ;;  %v557_v20 = vunpack.c.0.s8 %v556_v4  ;;  %v685_v59 = vld [vmem:[%s1069_s26] sm:$0xff] (%p1024_p6)  ;;  %v687_v60 = vld [vmem:[%s1069_s26 + $0x8] sm:$0xff] (%p1024_p6) }
  0xf9   : > { %v532_v16 = vadd.f32 %v531_v7, %v530_v62  ;;  %v603_v17 = vrot.slane %v602_v8, 2  ;;  %v615_v18 = vrot.slane %v614_v9, 4  ;;  %v611_v19 = vadd.f32 %v610_v6, %v609_v61  ;;  %v689_v61 = vld [vmem:[%s1069_s26 + $0x10] sm:$0xff] (%p1024_p6)  ;;  %v691_v62 = vld [vmem:[%s1069_s26 + $0x18] sm:$0xff] (%p1024_p6)  ;;  %686 = vst [vmem:[%s672_s30] sm:$0xff] (%p1024_p6), %v685_v59  ;;  %688 = vst [vmem:[%s672_s30 + $0x8] sm:$0xff] (%p1024_p6), %v687_v60 }
  0xfa   : > { %v559_v21 = vshrl.u32 %v322_v10, 7  ;;  %v545_v22 = vrot.slane %v544_v14, 2  ;;  %v598_v23 = vrot.slane %v597_v12, 1  ;;  %v540_v27 = vrot.slane %v539_v13, 1  ;;  %690 = vst [vmem:[%s672_s30 + $0x20] sm:$0xff] (%p1024_p6), %v689_v61  ;;  %692 = vst [vmem:[%s672_s30 + $0x28] sm:$0xff] (%p1024_p6), %v691_v62 }
  0xfb   : > { %v533_v24 = vrot.slane %v532_v16, 1  ;;  %v604_v25 = vadd.f32 %v603_v17, %v602_v8  ;;  %v616_v26 = vadd.f32 %v615_v18, %v614_v9  ;;  %v527_v29 = vadd.f32 %v526_v15, %v525_v1 }
  0xfc   : > { %v546_v28 = vadd.f32 %v545_v22, %v544_v14  ;;  %v612_v33 = vrot.slane %v611_v19, 1  ;;  %v560_v34 = vsub.s32 %v557_v20, %v559_v21  ;;  %v599_v36 = vadd.f32 %v598_v23, %v597_v12 }
  0xfd   : > { %v534_v30 = vadd.f32 %v533_v24, %v532_v16  ;;  %v605_v31 = vrot.slane %v604_v25, 1  ;;  %v617_v32 = vrot.slane %v616_v26, 2  ;;  %v541_v10 = vadd.f32 %v540_v27, %v539_v13 }
  0xfe   : > { %v547_v35 = vrot.slane %v546_v28, 1  ;;  %v613_v45 = vadd.f32 %v612_v33, %v611_v19 }
  0xff   : > { %v553_v37 = vcombine.low %v527_v29, %v534_v30  ;;  %v606_v38 = vadd.f32 %v605_v31, %v604_v25  ;;  %v618_v39 = vadd.f32 %v617_v32, %v616_v26 }
 0x100   : > { %v548_v40 = vadd.f32 %v547_v35, %v546_v28 }
 0x101   : > { %v625_v41 = vcombine.low %v599_v36, %v606_v38  ;;  %v619_v42 = vrot.slane %v618_v39, 1  ;;  %v561_v43 = vrot.slane %v553_v37, %v560_v34 }
 0x102   : > { %v554_v44 = vcombine.low %v541_v10, %v548_v40 }
 0x103   : > { %v620_v46 = vadd.f32 %v619_v42, %v618_v39  ;;  %v633_v48 = vrot.slane %v625_v41, %v560_v34 }
 0x104   : > { %v568_v47 = vrot.slane %v554_v44, %v560_v34 }
 0x105   : > { %v626_v49 = vcombine.low %v613_v45, %v620_v46 }
 0x106   : > { %v569_v50 = vcombine.low %v561_v43, %v568_v47 }
 0x107   : > { %v640_v52 = vrot.slane %v626_v49, %v560_v34 }
 0x108   : > { %v576_v53 = vrot.slane %v569_v50, %v560_v34 }
 0x109   : > { %v641_v54 = vcombine.low %v633_v48, %v640_v52 }
 0x10a   : > { %v578_v55 = vadd.f32 %v576_v53, %v520_v51 }
 0x10b   : > { %v648_v57 = vrot.slane %v641_v54, %v560_v34  ;;  %666 = sbr.rel (!%p1024_p6) target bundleno = 272 (0x110), region = 67 }
 0x10c   : > { %583 = vst.msk [vmem:[%s1050_s15] sm:$0xf] %vm1053_vm1, %v578_v55 }
 0x10d   : > { %v650_v58 = vadd.f32 %v648_v57, %v584_v56 }
 0x10f   : > { %651 = vst.msk [vmem:[%s1063_s23] sm:$0xf] %vm1053_vm1, %v650_v58 }
 0x110 PF: > { %s15_s19 = sadd.s32 1, %s959_s19   ;;  %s1117_s15 = smov %s947_s16 }
 0x111   : > { %p12_p12 = scmp.ge.s32.totalorder %s15_s19, 4   ;;  %s1118_s16 = smov %s1029_s25 }
 0x112   : > { %s1119_s17 = smov %s955_s18  ;;  %s1120_s18 = smov %s1122_s20 }
 0x113   :  { %14 = sbr.rel (!%p12_p12) target bundleno = 3 (0x3), region = 148 }

// kernel: generator_forward.7
= control target key start
LH: loop header
LB: loop body
LE: loop exit
PB: predicated region body
PF: predicated region fallthrough
CT: control target
= control target key end

     0   :  { %10 = vsyncpa [#allocation4], 0  ;;  %s849_s15 = smov [#allocation3]   ;;  %s935_s0 = inlined_call_operand.vmem [shape: bf16[32,576], index: 0, kind: input, shape index: {}]   ;;  %s936_s1 = inlined_call_operand.hbm [shape: bf16[576,128], index: 1, kind: input, shape index: {}]   ;;  %s937_s2 = inlined_call_operand.vmem [shape: bf16[32,128], index: 2, kind: output, shape index: {0}]   ;;  %s938_s3 = inlined_call_operand.vmem [shape: f32[1,128], index: 3, kind: output, shape index: {1}]   ;;  %s939_s4 = inlined_call_operand.vmem [shape: f32[1,128], index: 4, kind: output, shape index: {2}]  }
   0x1   :  { %s18_s16 = sshll.u32 %s849_s15, 4  ;;  %s19_s16 = int_to_ptr.vmem [resolvable:$true] %s18_s16 }
   0x2   :  { %s835_s17 = scalar_lea.vmem %s19_s16, 4608  ;;  %p840_p1 = scmp.lt.s32.totalorder %s19_s16, %s19_s16 }
   0x3   :  { %p836_p0 = scmp.ne.s32.totalorder %s19_s16, %s835_s17  ;;  %p841_p2 = scmp.lt.s32.totalorder %s835_s17, %s835_s17 }
   0x5   :  { %p842_p3 = por %p841_p2, %p840_p1 }
   0x7   :  { %p843_p4 = pnand %p842_p3, %p836_p0 }
   0x9   :  { %846 = shalt.err (!%p843_p4)
}
   0xa   :  { %s850_s18 = smov 64   ;;  %s851_s19 = smov 4  }
   0xb   :  { %24 = dma.hbm_to_vmem [thread:$0]  %s936_s1, 4608, %s19_s16, [#allocation4], %s850_s18, %s850_s18, %s851_s19  }
   0xc   :  { %847 = dma.done.wait [#allocation4], 4608  }
   0xd   :  { %848 = vsyncadd [#allocation4], 4294962688  ;;  %v777_v0 = vld [vmem:[#allocation3 + $0x78] sm:$0xff]   ;;  %v781_v4 = vld [vmem:[#allocation3 + $0x70] sm:$0xff]   ;;  %vm398_vm0 = vcmask 523264   ;;  %v852_v46 = vmov 0.0  }
   0xe   :  { %v778_v1 = vld [vmem:[#allocation3 + $0xf8] sm:$0xff]   ;;  %699 = vmatprep.subr.bf16.mxu0 %v777_v0  ;;  %v782_v5 = vld [vmem:[#allocation3 + $0xf0] sm:$0xff]   ;;  %v785_v8 = vld [vmem:[#allocation3 + $0x68] sm:$0xff]   ;;  %42 = vst [vmem:[%s938_s3] sm:$0x1] %v852_v46 }
   0xf   :  { %v779_v2 = vld [vmem:[#allocation3 + $0x38] sm:$0xff]   ;;  %727 = vmatprep.subr.bf16.mxu1 %v778_v1  ;;  %v783_v6 = vld [vmem:[#allocation3 + $0x30] sm:$0xff]   ;;  %v786_v9 = vld [vmem:[#allocation3 + $0xe8] sm:$0xff]   ;;  %43 = vst [vmem:[%s939_s4] sm:$0x1] %v852_v46 }
  0x10   :  { %v780_v3 = vld [vmem:[#allocation3 + $0xb8] sm:$0xff]   ;;  %700 = vmatpush3.bf16.msra.mxu0 %v779_v2  ;;  %v784_v7 = vld [vmem:[#allocation3 + $0xb0] sm:$0xff]   ;;  %v787_v10 = vld [vmem:[#allocation3 + $0x28] sm:$0xff]  }
  0x11   :  { %728 = vmatpush3.bf16.msra.mxu1 %v780_v3  ;;  %701 = vmatprep.subr.bf16.mxu0 %v781_v4  ;;  %v788_v11 = vld [vmem:[#allocation3 + $0xa8] sm:$0xff]   ;;  %v789_v12 = vld [vmem:[#allocation3 + $0x60] sm:$0xff]   ;;  %v793_v16 = vld [vmem:[#allocation3 + $0x58] sm:$0xff]  }
  0x12   :  { %729 = vmatprep.subr.bf16.mxu1 %v782_v5  ;;  %v790_v13 = vld [vmem:[#allocation3 + $0xe0] sm:$0xff]   ;;  %v794_v17 = vld [vmem:[#allocation3 + $0xd8] sm:$0xff]   ;;  %v797_v20 = vld [vmem:[#allocation3 + $0x50] sm:$0xff]  }
  0x13   :  { %v791_v14 = vld [vmem:[#allocation3 + $0x20] sm:$0xff]   ;;  %v795_v18 = vld [vmem:[#allocation3 + $0x18] sm:$0xff]   ;;  %v798_v21 = vld [vmem:[#allocation3 + $0xd0] sm:$0xff]  }
  0x14   :  { %702 = vmatpush3.bf16.msra.mxu0 %v783_v6  ;;  %v792_v15 = vld [vmem:[#allocation3 + $0xa0] sm:$0xff]   ;;  %v796_v19 = vld [vmem:[#allocation3 + $0x98] sm:$0xff]   ;;  %v799_v22 = vld [vmem:[#allocation3 + $0x10] sm:$0xff]  }
  0x15   :  { %730 = vmatpush3.bf16.msra.mxu1 %v784_v7  ;;  %703 = vmatprep.subr.bf16.mxu0 %v785_v8  ;;  %v800_v23 = vld [vmem:[#allocation3 + $0x90] sm:$0xff]   ;;  %v801_v24 = vld [vmem:[#allocation3 + $0x48] sm:$0xff]   ;;  %v805_v28 = vld [vmem:[#allocation3 + $0x40] sm:$0xff]  }
  0x16   :  { %731 = vmatprep.subr.bf16.mxu1 %v786_v9  ;;  %v802_v25 = vld [vmem:[#allocation3 + $0xc8] sm:$0xff]   ;;  %v806_v29 = vld [vmem:[#allocation3 + $0xc0] sm:$0xff]   ;;  %v815_v36 = vld [vmem:[#allocation3 + $0x118] sm:$0xff]  }
  0x17   :  { %v803_v26 = vld [vmem:[#allocation3 + $0x8] sm:$0xff]   ;;  %v807_v30 = vld [vmem:[#allocation3] sm:$0xff]   ;;  %v816_v37 = vld [vmem:[#allocation3 + $0x110] sm:$0xff]  }
  0x18   :  { %704 = vmatpush3.bf16.msra.mxu0 %v787_v10  ;;  %v804_v27 = vld [vmem:[#allocation3 + $0x88] sm:$0xff]   ;;  %v808_v31 = vld [vmem:[#allocation3 + $0x80] sm:$0xff]  }
  0x19   :  { %732 = vmatpush3.bf16.msra.mxu1 %v788_v11  ;;  %705 = vmatprep.subr.bf16.mxu0 %v789_v12  ;;  %v809_v32 = vld [vmem:[%s935_s0] ss:$20 sps:$4 sm:$0xff]   ;;  %v811_v33 = vld [vmem:[%s935_s0 + $0x4] ss:$20 sps:$4 sm:$0xff]   ;;  %v812_v34 = vld [vmem:[%s935_s0 + $0x8] ss:$20 sps:$4 sm:$0xff]  }
  0x1a   :  { %733 = vmatprep.subr.bf16.mxu1 %v790_v13  ;;  %v814_v35 = vld [vmem:[%s935_s0 + $0xc] ss:$20 sps:$4 sm:$0xff]   ;;  %437 = vmatprep.mubr.bf16.mxu0 %v811_v33  ;;  %v819_v39 = vld [vmem:[%s935_s0 + $0x34] ss:$20 sps:$4 sm:$0xff]   ;;  %v822_v42 = vld [vmem:[%s935_s0 + $0x30] ss:$20 sps:$4 sm:$0xff]  }
  0x1b   :  { %486 = vmatprep.mubr.bf16.mxu1 %v814_v35  ;;  %v817_v38 = vld [vmem:[%s935_s0 + $0x2c] ss:$20 sps:$4 sm:$0xff]   ;;  %v821_v40 = vld [vmem:[%s935_s0 + $0x28] ss:$20 sps:$4 sm:$0xff]   ;;  %v825_v43 = vld [vmem:[%s935_s0 + $0x10] ss:$20 sps:$4 sm:$0xff]  }
  0x1c   :  { %706 = vmatpush3.bf16.msra.mxu0 %v791_v14  ;;  %v823_v41 = vld [vmem:[#allocation3 + $0x108] sm:$0xff]   ;;  %v824_v44 = vld [vmem:[#allocation3 + $0x100] sm:$0xff]  }
  0x1d   :  { %734 = vmatpush3.bf16.msra.mxu1 %v792_v15  ;;  %707 = vmatprep.subr.bf16.mxu0 %v793_v16  ;;  %v826_v45 = vld [vmem:[%s935_s0 + $0x38] ss:$20 sps:$4 sm:$0xff]  }
  0x1e   :  { %735 = vmatprep.subr.bf16.mxu1 %v794_v17 }
  0x20   :  { %708 = vmatpush3.bf16.msra.mxu0 %v795_v18 }
  0x21   :  { %736 = vmatpush3.bf16.msra.mxu1 %v796_v19  ;;  %709 = vmatprep.subr.bf16.mxu0 %v797_v20 }
  0x22   :  { %737 = vmatprep.subr.bf16.mxu1 %v798_v21 }
  0x24   :  { %710 = vmatpush3.bf16.msra.mxu0 %v799_v22 }
  0x25   :  { %738 = vmatpush3.bf16.msra.mxu1 %v800_v23  ;;  %711 = vmatprep.subr.bf16.mxu0 %v801_v24 }
  0x26   :  { %739 = vmatprep.subr.bf16.mxu1 %v802_v25 }
  0x28   :  { %712 = vmatpush3.bf16.msra.mxu0 %v803_v26 }
  0x29   :  { %740 = vmatpush3.bf16.msra.mxu1 %v804_v27  ;;  %713 = vmatprep.subr.bf16.mxu0 %v805_v28 }
  0x2a   :  { %741 = vmatprep.subr.bf16.mxu1 %v806_v29 }
  0x2c   :  { %714 = vmatpush3.bf16.msra.mxu0 %v807_v30 }
  0x2d   :  { %742 = vmatpush3.bf16.msra.mxu1 %v808_v31  ;;  %761 = vmatprep.subr.bf16.mxu0 %v815_v36 }
  0x2f   :  { %438 = vmatmul.mubr.bf16.vlgmr.msra.gmra.mxu0 %v809_v32 }
  0x30   :  { %487 = vmatmul.mubr.bf16.vlgmr.msra.gmra.mxu1 %v812_v34  ;;  %762 = vmatpush3.bf16.msra.mxu0 %v815_v36 }
  0x31   :  { %763 = vmatprep.subr.bf16.mxu0 %v816_v37  ;;  %445 = vmatprep.mubr.bf16.mxu0 %v817_v38 }
  0x32   :  { %494 = vmatprep.mubr.bf16.mxu1 %v819_v39 }
  0x34   :  { %764 = vmatpush3.bf16.msra.mxu0 %v816_v37 }
  0x35   :  { %765 = vmatprep.subr.bf16.mxu0 %v823_v41 }
  0x37   :  { %446 = vmatmul.mubr.bf16.gmra.mxu0 %v821_v40 }
  0x38   :  { %495 = vmatmul.mubr.bf16.gmra.mxu1 %v822_v42  ;;  %769 = vmatprep.mubr.msk.bf16.mxu0 %vm398_vm0, %v825_v43 }
  0x39   :  { %766 = vmatpush3.bf16.msra.mxu0 %v823_v41 }
  0x3a   :  { %767 = vmatprep.subr.bf16.mxu0 %v824_v44 }
  0x3d   :  { %768 = vmatpush3.bf16.msra.mxu0 %v824_v44  ;;  %v591_v44 = vld [vmem:[%s938_s3] sm:$0x1] }
  0x40   :  { %770 = vmatmul.mubr.msk.bf16.vlgmr.msra.gmra.mxu0 %vm398_vm0, %v826_v45 }
  0xef   :  { %v715_v47 = vpop.f32.mrf.mxu0 }
  0xf0   :  { %v743_v48 = vpop.f32.mrf.mxu1 }
  0xf1   :  { %v716_v49 = vpop.f32.mrf.mxu0 }
  0xf2   :  { %v744_v50 = vpop.f32.mrf.mxu1  ;;  %v717_v4 = vadd.f32 %v716_v49, %v715_v47  ;;  %v603_v47 = vld [vmem:[%s939_s4] sm:$0x1] }
  0xf3   :  { %v718_v51 = vpop.f32.mrf.mxu0  ;;  %v745_v5 = vadd.f32 %v744_v50, %v743_v48 }
  0xf4   :  { %v746_v52 = vpop.f32.mrf.mxu1 }
  0xf5   :  { %v719_v53 = vpop.f32.mrf.mxu0  ;;  %v489_v13 = vadd.f32 %v745_v5, %v717_v4 }
  0xf6   :  { %v747_v54 = vpop.f32.mrf.mxu1  ;;  %v720_v6 = vadd.f32 %v719_v53, %v718_v51 }
  0xf7   :  { %v721_v55 = vpop.f32.mrf.mxu0  ;;  %v748_v7 = vadd.f32 %v747_v54, %v746_v52 }
  0xf8   :  { %v749_v56 = vpop.f32.mrf.mxu1 }
  0xf9   :  { %v722_v57 = vpop.f32.mrf.mxu0  ;;  %v492_v15 = vadd.f32 %v748_v7, %v720_v6 }
  0xfa   :  { %v750_v58 = vpop.f32.mrf.mxu1  ;;  %v723_v63 = vadd.f32 %v722_v57, %v721_v55 }
  0xfb   :  { %v724_v59 = vpop.f32.mrf.mxu0  ;;  %v751_v0 = vadd.f32 %v750_v58, %v749_v56 }
  0xfc   :  { %v752_v60 = vpop.f32.mrf.mxu1 }
  0xfd   :  { %v725_v61 = vpop.f32.mrf.mxu0  ;;  %v497_v9 = vadd.f32 %v751_v0, %v723_v63 }
  0xfe   :  { %v753_v62 = vpop.f32.mrf.mxu1  ;;  %v726_v1 = vadd.f32 %v725_v61, %v724_v59 }
  0xff   :  { %v754_v2 = vadd.f32 %v753_v62, %v752_v60 }
 0x100   :  { %v771_v3 = vpop.f32.mrf.mxu0 }
 0x101   :  { %v500_v10 = vadd.f32 %v754_v2, %v726_v1  ;;  %v546_v12 = vadd.f32 %v771_v3, %v497_v9 }
 0x102   :  { %v537_v8 = vpop.f32.mrf.mxu0 }
 0x103   :  { %v538_v17 = vadd.f32 %v537_v8, %v489_v13 }
 0x104   :  { %v772_v11 = vpop.f32.mrf.mxu0 }
 0x105   :  { %v549_v14 = vadd.f32 %v772_v11, %v500_v10 }
 0x106   :  { %v540_v16 = vpop.f32.mrf.mxu0 }
 0x107   :  { %v568_v18 = vpack.c.bf16 %v549_v14, %v546_v12  ;;  %v541_v19 = vadd.f32 %v540_v16, %v492_v15 }
 0x109   :  { %698 = vst [vmem:[%s937_s2 + $0x8] sm:$0xff] %v568_v18   ;;  %v567_v20 = vpack.c.bf16 %v541_v19, %v538_v17  ;;  %v589_v21 = vunpack.c.l.bf16 %v568_v18  ;;  %v590_v24 = vunpack.c.h.bf16 %v568_v18 }
 0x10b   :  { %692 = vst [vmem:[%s937_s2] sm:$0xff] %v567_v20   ;;  %v587_v22 = vunpack.c.l.bf16 %v567_v20  ;;  %v588_v23 = vunpack.c.h.bf16 %v567_v20  ;;  %v606_v28 = vmul.f32 %v589_v21, %v589_v21  ;;  %v607_v31 = vmul.f32 %v590_v24, %v590_v24 }
 0x10d   :  { %v592_v25 = vadd.f32 %v588_v23, %v587_v22  ;;  %v604_v26 = vmul.f32 %v587_v22, %v587_v22  ;;  %v605_v27 = vmul.f32 %v588_v23, %v588_v23 }
 0x10f   :  { %v593_v29 = vadd.f32 %v592_v25, %v589_v21  ;;  %v608_v30 = vadd.f32 %v605_v27, %v604_v26 }
 0x111   :  { %v594_v32 = vadd.f32 %v593_v29, %v590_v24  ;;  %v609_v33 = vadd.f32 %v608_v30, %v606_v28 }
 0x113   :  { %v595_v34 = vrot.slane %v594_v32, 4  ;;  %v610_v35 = vadd.f32 %v609_v33, %v607_v31 }
 0x115   :  { %v596_v36 = vadd.f32 %v595_v34, %v594_v32  ;;  %v611_v37 = vrot.slane %v610_v35, 4 }
 0x117   :  { %v597_v38 = vrot.slane %v596_v36, 2  ;;  %v612_v39 = vadd.f32 %v611_v37, %v610_v35 }
 0x119   :  { %v598_v40 = vadd.f32 %v597_v38, %v596_v36  ;;  %v613_v41 = vrot.slane %v612_v39, 2 }
 0x11b   :  { %v599_v42 = vrot.slane %v598_v40, 1  ;;  %v614_v43 = vadd.f32 %v613_v41, %v612_v39 }
 0x11d   :  { %v600_v45 = vadd.f32 %v599_v42, %v598_v40  ;;  %v615_v46 = vrot.slane %v614_v43, 1 }
 0x11f   :  { %v601_v48 = vadd.f32 %v600_v45, %v591_v44  ;;  %v616_v49 = vadd.f32 %v615_v46, %v614_v43 }
 0x121   :  { %602 = vst [vmem:[%s938_s3] sm:$0x1] %v601_v48  ;;  %v617_v50 = vadd.f32 %v616_v49, %v603_v47 }
 0x123   :  { %618 = vst [vmem:[%s939_s4] sm:$0x1] %v617_v50 }
 0x124   :  { %631 = vsyncpa [#allocation4], 1 }

// kernel: squeeze.14
= control target key start
LH: loop header
LB: loop body
LE: loop exit
PB: predicated region body
PF: predicated region fallthrough
CT: control target
= control target key end

     0   :  { %s40_s8 = smov 80   ;;  %vm8_vm0 = vcmask 130048   ;;  %s41_s9 = smov 96   ;;  %s58_s0 = inlined_call_operand.vmem [shape: f32[64], index: 0, kind: input, shape index: {}]   ;;  %s59_s1 = inlined_call_operand.vmem [shape: f32[4,16], index: 1, kind: output, shape index: {}]  }
   0x1   :  { %v5_v0 = vld [vmem:[%s58_s0] sm:$0x1]  ;;  %s39_s0 = smov 112  }
   0x2   :  { %6 = vst [vmem:[#allocation1] sm:$0x1] %v5_v0 }
   0x9   :  { %v10_v1 = vld [vmem:[#allocation1] sm:$0x1]  }
   0xa   :  { %v22_v2 = vld [vmem:[#allocation1] sm:$0x1]   ;;  %11 = vrot.lane.b32.xlu0 %v10_v1, %s39_s0 }
   0xb   :  { %23 = vrot.lane.b32.xlu1 %v22_v2, %s40_s8  ;;  %v7_v3 = vld [vmem:[#allocation1] sm:$0x1]  }
   0xc   :  { %v16_v4 = vld [vmem:[#allocation1] sm:$0x1]   ;;  %9 = vst.msk [vmem:[#allocation0] sm:$0x1] %vm8_vm0, %v7_v3  }
   0xe   :  { %17 = vrot.lane.b32.xlu0 %v16_v4, %s41_s9 }
  0x7c   :  { %v12_v5 = vpop.permute.xlu0 %11  }
  0x7d   :  { %v24_v6 = vpop.permute.xlu1 %23   ;;  %15 = vst.msk [vmem:[#allocation0 + $0x1] sm:$0x1] %vm8_vm0, %v12_v5  }
  0x7e   :  { %27 = vst.msk [vmem:[#allocation0 + $0x3] sm:$0x1] %vm8_vm0, %v24_v6  }
  0x80   :  { %v18_v7 = vpop.permute.xlu0 %17  }
  0x81   :  { %21 = vst.msk [vmem:[#allocation0 + $0x2] sm:$0x1] %vm8_vm0, %v18_v7  }
  0x88   :  { %v32_v8 = vld [vmem:[#allocation0] sm:$0xf] }
  0x89   :  { %35 = vst [vmem:[%s59_s1] sm:$0xf] %v32_v8 }

// kernel: tile.78
= control target key start
LH: loop header
LB: loop body
LE: loop exit
PB: predicated region body
PF: predicated region fallthrough
CT: control target
= control target key end

     0   :  { %s22_s0 = inlined_call_operand.vmem [shape: f32[16], index: 0, kind: input, shape index: {}]   ;;  %s23_s1 = inlined_call_operand.vmem [shape: f32[4,16], index: 1, kind: output, shape index: {}]  }
   0x1   :  { %v4_v0 = vld [vmem:[%s22_s0] ss:$0 sm:$0xff] }
   0x2   :  { %5 = vst [vmem:[%s23_s1] sm:$0xf] %v4_v0 }

// kernel: generator_forward.8
= control target key start
LH: loop header
LB: loop body
LE: loop exit
PB: predicated region body
PF: predicated region fallthrough
CT: control target
= control target key end

     0   :  { %vm354_vm0 = vcmask 261120   ;;  %v1086_v42 = vmov 0.0   ;;  %s1312_s1 = inlined_call_operand.vmem [shape: bf16[288,128], index: 1, kind: input, shape index: {}]   ;;  %s1313_s0 = inlined_call_operand.vmem [shape: bf16[128,288], index: 0, kind: input, shape index: {}]   ;;  %s1314_s3 = inlined_call_operand.vmem [shape: f32[1,128], index: 3, kind: output, shape index: {1}]   ;;  %s1315_s4 = inlined_call_operand.vmem [shape: f32[1,128], index: 4, kind: output, shape index: {2}]   ;;  %s1316_s2 = inlined_call_operand.vmem [shape: bf16[128,128], index: 2, kind: output, shape index: {0}]  }
   0x1   :  { %v1036_v0 = vld [vmem:[%s1312_s1 + $0x78] sm:$0xff]   ;;  %v1038_v2 = vld [vmem:[%s1312_s1 + $0x70] sm:$0xff]   ;;  %v1040_v4 = vld [vmem:[%s1312_s1 + $0x68] sm:$0xff]   ;;  %40 = vst [vmem:[%s1314_s3] sm:$0x1] %v1086_v42 }
   0x2   :  { %v1037_v1 = vld [vmem:[%s1312_s1 + $0x38] sm:$0xff]   ;;  %925 = vmatprep.subr.bf16.mxu0 %v1036_v0  ;;  %1019 = vmatprep.subr.bf16.mxu1 %v1036_v0  ;;  %v1039_v3 = vld [vmem:[%s1312_s1 + $0x30] sm:$0xff]   ;;  %v1041_v5 = vld [vmem:[%s1312_s1 + $0x28] sm:$0xff]   ;;  %41 = vst [vmem:[%s1315_s4] sm:$0x1] %v1086_v42 }
   0x3   :  { %926 = vmatpush3.bf16.msra.mxu0 %v1037_v1  ;;  %1027 = vmatpush3.bf16.msra.mxu1 %v1037_v1  ;;  %v1042_v6 = vld [vmem:[%s1312_s1 + $0x60] sm:$0xff]   ;;  %v1044_v8 = vld [vmem:[%s1312_s1 + $0x58] sm:$0xff]   ;;  %v1046_v10 = vld [vmem:[%s1312_s1 + $0x50] sm:$0xff]  }
   0x4   :  { %927 = vmatprep.subr.bf16.mxu0 %v1038_v2  ;;  %1020 = vmatprep.subr.bf16.mxu1 %v1038_v2  ;;  %v1043_v7 = vld [vmem:[%s1312_s1 + $0x20] sm:$0xff]   ;;  %v1045_v9 = vld [vmem:[%s1312_s1 + $0x18] sm:$0xff]   ;;  %v1047_v13 = vld [vmem:[%s1312_s1 + $0x10] sm:$0xff]  }
   0x5   :  { %v1054_v11 = vld [vmem:[%s1313_s0 + $0x4] ss:$12 sps:$4 sm:$0xff]   ;;  %v1057_v12 = vld [vmem:[%s1313_s0 + $0x94] ss:$12 sps:$4 sm:$0xff]   ;;  %v1048_v14 = vld [vmem:[%s1312_s1 + $0x48] sm:$0xff]  }
   0x6   :  { %411 = vmatprep.mubr.bf16.mxu0 %v1054_v11  ;;  %459 = vmatprep.mubr.bf16.mxu1 %v1057_v12  ;;  %v1049_v15 = vld [vmem:[%s1312_s1 + $0x8] sm:$0xff]   ;;  %v1050_v16 = vld [vmem:[%s1312_s1 + $0x40] sm:$0xff]   ;;  %v1055_v20 = vld [vmem:[%s1313_s0 + $0x90] ss:$12 sps:$4 sm:$0xff]  }
   0x7   :  { %928 = vmatpush3.bf16.msra.mxu0 %v1039_v3  ;;  %1028 = vmatpush3.bf16.msra.mxu1 %v1039_v3  ;;  %v1051_v17 = vld [vmem:[%s1312_s1] sm:$0xff]   ;;  %v1058_v19 = vld [vmem:[%s1312_s1 + $0x88] sm:$0xff]   ;;  %v1069_v28 = vld [vmem:[%s1313_s0 + $0x30] ss:$12 sps:$4 sm:$0xff]  }
   0x8   :  { %929 = vmatprep.subr.bf16.mxu0 %v1040_v4  ;;  %1021 = vmatprep.subr.bf16.mxu1 %v1040_v4  ;;  %v1052_v18 = vld [vmem:[%s1313_s0] ss:$12 sps:$4 sm:$0xff]   ;;  %v1059_v21 = vld [vmem:[%s1313_s0 + $0x1c] ss:$12 sps:$4 sm:$0xff]   ;;  %v1063_v24 = vld [vmem:[%s1313_s0 + $0x18] ss:$12 sps:$4 sm:$0xff]  }
   0x9   :  { %v1061_v22 = vld [vmem:[%s1313_s0 + $0xac] ss:$12 sps:$4 sm:$0xff]   ;;  %v1065_v23 = vld [vmem:[%s1312_s1 + $0x80] sm:$0xff]   ;;  %v1064_v25 = vld [vmem:[%s1313_s0 + $0xa8] ss:$12 sps:$4 sm:$0xff]  }
   0xa   :  { %v1066_v26 = vld [vmem:[%s1313_s0 + $0x34] ss:$12 sps:$4 sm:$0xff]   ;;  %v1071_v30 = vld [vmem:[%s1313_s0 + $0x4c] ss:$12 sps:$4 sm:$0xff]   ;;  %v1075_v33 = vld [vmem:[%s1313_s0 + $0x50] ss:$12 sps:$4 sm:$0xff]  }
   0xb   :  { %930 = vmatpush3.bf16.msra.mxu0 %v1041_v5  ;;  %1029 = vmatpush3.bf16.msra.mxu1 %v1041_v5  ;;  %v1068_v27 = vld [vmem:[%s1313_s0 + $0x8] ss:$12 sps:$4 sm:$0xff]   ;;  %v1070_v29 = vld [vmem:[%s1313_s0 + $0x20] ss:$12 sps:$4 sm:$0xff]   ;;  %v1073_v31 = vld [vmem:[%s1313_s0 + $0x38] ss:$12 sps:$4 sm:$0xff]  }
   0xc   :  { %931 = vmatprep.subr.bf16.mxu0 %v1042_v6  ;;  %1022 = vmatprep.subr.bf16.mxu1 %v1042_v6  ;;  %v1074_v32 = vld [vmem:[%s1313_s0 + $0x48] ss:$12 sps:$4 sm:$0xff]   ;;  %v1076_v34 = vld [vmem:[%s1313_s0 + $0x64] ss:$12 sps:$4 sm:$0xff]   ;;  %v1079_v36 = vld [vmem:[%s1313_s0 + $0x60] ss:$12 sps:$4 sm:$0xff]  }
   0xd   :  { %v1078_v35 = vld [vmem:[%s1313_s0 + $0x68] ss:$12 sps:$4 sm:$0xff]   ;;  %v1080_v37 = vld [vmem:[%s1313_s0 + $0x80] ss:$12 sps:$4 sm:$0xff]   ;;  %v1083_v39 = vld [vmem:[%s1313_s0 + $0x98] ss:$12 sps:$4 sm:$0xff]  }
   0xe   :  { %v1081_v38 = vld [vmem:[%s1313_s0 + $0x7c] ss:$12 sps:$4 sm:$0xff]   ;;  %v1084_v40 = vld [vmem:[%s1313_s0 + $0x78] ss:$12 sps:$4 sm:$0xff]  }
   0xf   :  { %932 = vmatpush3.bf16.msra.mxu0 %v1043_v7  ;;  %1030 = vmatpush3.bf16.msra.mxu1 %v1043_v7  ;;  %v1085_v41 = vld [vmem:[%s1313_s0 + $0xb0] ss:$12 sps:$4 sm:$0xff]  }
  0x10   :  { %933 = vmatprep.subr.bf16.mxu0 %v1044_v8  ;;  %1023 = vmatprep.subr.bf16.mxu1 %v1044_v8 }
  0x13   :  { %934 = vmatpush3.bf16.msra.mxu0 %v1045_v9  ;;  %1031 = vmatpush3.bf16.msra.mxu1 %v1045_v9 }
  0x14   :  { %935 = vmatprep.subr.bf16.mxu0 %v1046_v10  ;;  %1024 = vmatprep.subr.bf16.mxu1 %v1046_v10 }
  0x17   :  { %936 = vmatpush3.bf16.msra.mxu0 %v1047_v13  ;;  %1032 = vmatpush3.bf16.msra.mxu1 %v1047_v13 }
  0x18   :  { %937 = vmatprep.subr.bf16.mxu0 %v1048_v14  ;;  %1025 = vmatprep.subr.bf16.mxu1 %v1048_v14 }
  0x1b   :  { %938 = vmatpush3.bf16.msra.mxu0 %v1049_v15  ;;  %1033 = vmatpush3.bf16.msra.mxu1 %v1049_v15 }
  0x1c   :  { %939 = vmatprep.subr.bf16.mxu0 %v1050_v16  ;;  %1026 = vmatprep.subr.bf16.mxu1 %v1050_v16 }
  0x1f   :  { %940 = vmatpush3.bf16.msra.mxu0 %v1051_v17  ;;  %1034 = vmatpush3.bf16.msra.mxu1 %v1051_v17 }
  0x20   :  { %999 = vmatprep.subr.bf16.mxu1 %v1058_v19 }
  0x22   :  { %412 = vmatmul.mubr.bf16.vlgmr.msra.gmra.mxu0 %v1052_v18  ;;  %460 = vmatmul.mubr.bf16.vlgmr.msra.gmra.mxu1 %v1055_v20 }
  0x23   :  { %1000 = vmatpush3.bf16.msra.mxu1 %v1058_v19  ;;  %419 = vmatprep.mubr.bf16.mxu0 %v1059_v21 }
  0x24   :  { %467 = vmatprep.mubr.bf16.mxu1 %v1061_v22  ;;  %1001 = vmatprep.subr.bf16.mxu1 %v1065_v23 }
  0x27   :  { %1002 = vmatpush3.bf16.msra.mxu1 %v1065_v23 }
  0x2a   :  { %420 = vmatmul.mubr.bf16.gmra.mxu0 %v1063_v24  ;;  %468 = vmatmul.mubr.bf16.gmra.mxu1 %v1064_v25 }
  0x2b   :  { %427 = vmatprep.mubr.bf16.mxu0 %v1066_v26  ;;  %1003 = vmatprep.mubr.msk.bf16.mxu1 %vm354_vm0, %v1068_v27 }
  0x32   :  { %428 = vmatmul.mubr.bf16.gmra.mxu0 %v1069_v28  ;;  %1004 = vmatmul.mubr.msk.bf16.vlgmr.msra.gmra.mxu1 %vm354_vm0, %v1070_v29 }
  0x33   :  { %435 = vmatprep.mubr.bf16.mxu0 %v1071_v30  ;;  %1007 = vmatprep.mubr.msk.bf16.mxu1 %vm354_vm0, %v1073_v31 }
  0x3a   :  { %436 = vmatmul.mubr.bf16.gmra.mxu0 %v1074_v32  ;;  %1008 = vmatmul.mubr.msk.bf16.gmra.mxu1 %vm354_vm0, %v1075_v33 }
  0x3b   :  { %443 = vmatprep.mubr.bf16.mxu0 %v1076_v34  ;;  %1011 = vmatprep.mubr.msk.bf16.mxu1 %vm354_vm0, %v1078_v35 }
  0x42   :  { %444 = vmatmul.mubr.bf16.gmra.mxu0 %v1079_v36  ;;  %1012 = vmatmul.mubr.msk.bf16.gmra.mxu1 %vm354_vm0, %v1080_v37 }
  0x43   :  { %451 = vmatprep.mubr.bf16.mxu0 %v1081_v38  ;;  %1015 = vmatprep.mubr.msk.bf16.mxu1 %vm354_vm0, %v1083_v39 }
  0x4a   :  { %452 = vmatmul.mubr.bf16.gmra.mxu0 %v1084_v40  ;;  %1016 = vmatmul.mubr.msk.bf16.gmra.mxu1 %vm354_vm0, %v1085_v41 }
  0xe2   :  { %v941_v43 = vpop.f32.mrf.mxu0  ;;  %v1252_v44 = vpop.f32.mrf.mxu1 }
  0xe4   :  { %v942_v45 = vpop.f32.mrf.mxu0  ;;  %v1254_v46 = vpop.f32.mrf.mxu1 }
  0xe5   :  { %v943_v3 = vadd.f32 %v942_v45, %v941_v43 }
  0xe6   :  { %v944_v47 = vpop.f32.mrf.mxu0  ;;  %v1256_v48 = vpop.f32.mrf.mxu1 }
  0xe8   :  { %v945_v49 = vpop.f32.mrf.mxu0  ;;  %v1258_v50 = vpop.f32.mrf.mxu1 }
  0xe9   :  { %v946_v4 = vadd.f32 %v945_v49, %v944_v47 }
  0xea   :  { %v947_v51 = vpop.f32.mrf.mxu0  ;;  %v1260_v52 = vpop.f32.mrf.mxu1 }
  0xec   :  { %v948_v53 = vpop.f32.mrf.mxu0  ;;  %v1262_v54 = vpop.f32.mrf.mxu1 }
  0xed   :  { %v949_v63 = vadd.f32 %v948_v53, %v947_v51 }
  0xee   :  { %v950_v55 = vpop.f32.mrf.mxu0  ;;  %v1264_v56 = vpop.f32.mrf.mxu1 }
  0xf0   :  { %v951_v57 = vpop.f32.mrf.mxu0  ;;  %v1266_v58 = vpop.f32.mrf.mxu1 }
  0xf1   :  { %v952_v0 = vadd.f32 %v951_v57, %v950_v55 }
  0xf2   :  { %v953_v59 = vpop.f32.mrf.mxu0  ;;  %v1005_v60 = vpop.f32.mrf.mxu1 }
  0xf3   :  { %v519_v5 = vadd.f32 %v1005_v60, %v949_v63 }
  0xf4   :  { %v954_v61 = vpop.f32.mrf.mxu0  ;;  %v510_v62 = vpop.f32.mrf.mxu1 }
  0xf5   :  { %v511_v9 = vadd.f32 %v943_v3, %v510_v62  ;;  %v955_v20 = vadd.f32 %v954_v61, %v953_v59 }
  0xf6   :  { %v956_v1 = vpop.f32.mrf.mxu0  ;;  %v1006_v2 = vpop.f32.mrf.mxu1 }
  0xf7   :  { %v522_v6 = vadd.f32 %v1006_v2, %v952_v0 }
  0xf8   :  { %v957_v7 = vpop.f32.mrf.mxu0  ;;  %v513_v8 = vpop.f32.mrf.mxu1 }
  0xf9   :  { %v625_v10 = vpack.c.bf16 %v522_v6, %v519_v5  ;;  %v514_v11 = vadd.f32 %v946_v4, %v513_v8  ;;  %v958_v21 = vadd.f32 %v957_v7, %v956_v1 }
  0xfa   :  { %v959_v12 = vpop.f32.mrf.mxu0  ;;  %v1009_v13 = vpop.f32.mrf.mxu1 }
  0xfb   :  { %918 = vst [vmem:[%s1316_s2 + $0x8] sm:$0xff] %v625_v10   ;;  %v624_v14 = vpack.c.bf16 %v514_v11, %v511_v9  ;;  %v706_v15 = vunpack.c.l.bf16 %v625_v10  ;;  %v707_v28 = vunpack.c.h.bf16 %v625_v10 }
  0xfc   :  { %v960_v16 = vpop.f32.mrf.mxu0  ;;  %v526_v17 = vpop.f32.mrf.mxu1 }
  0xfd   :  { %882 = vst [vmem:[%s1316_s2] sm:$0xff] %v624_v14   ;;  %v704_v18 = vunpack.c.l.bf16 %v624_v14  ;;  %v705_v19 = vunpack.c.h.bf16 %v624_v14  ;;  %v961_v27 = vadd.f32 %v960_v16, %v959_v12  ;;  %v747_v29 = vmul.f32 %v706_v15, %v706_v15 }
  0xfe   :  { %v962_v22 = vpop.f32.mrf.mxu0  ;;  %v1010_v23 = vpop.f32.mrf.mxu1  ;;  %v527_v30 = vadd.f32 %v955_v20, %v526_v17  ;;  %v748_v43 = vmul.f32 %v707_v28, %v707_v28  ;;  %v985_v17 = vadd.f32 %v1262_v54, %v1260_v52 }
  0xff   :  { %v721_v24 = vadd.f32 %v705_v19, %v704_v18  ;;  %v745_v25 = vmul.f32 %v704_v18, %v704_v18  ;;  %v746_v26 = vmul.f32 %v705_v19, %v705_v19  ;;  %v535_v40 = vadd.f32 %v1009_v13, %v961_v27 }
 0x100   :  { %v963_v31 = vpop.f32.mrf.mxu0  ;;  %v529_v32 = vpop.f32.mrf.mxu1  ;;  %v988_v18 = vadd.f32 %v1266_v58, %v1264_v56 }
 0x101   :  { %v722_v33 = vadd.f32 %v721_v24, %v706_v15  ;;  %v761_v34 = vadd.f32 %v746_v26, %v745_v25  ;;  %v964_v35 = vadd.f32 %v963_v31, %v962_v22  ;;  %v530_v36 = vadd.f32 %v958_v21, %v529_v32 }
 0x102   :  { %v965_v37 = vpop.f32.mrf.mxu0  ;;  %v1013_v38 = vpop.f32.mrf.mxu1  ;;  %v979_v24 = vadd.f32 %v1254_v46, %v1252_v44  ;;  %v982_v25 = vadd.f32 %v1258_v50, %v1256_v48 }
 0x103   :  { %v762_v39 = vadd.f32 %v761_v34, %v747_v29  ;;  %v538_v41 = vadd.f32 %v1010_v23, %v964_v35  ;;  %v626_v42 = vpack.c.bf16 %v530_v36, %v527_v30  ;;  %v723_v55 = vadd.f32 %v722_v33, %v707_v28 }
 0x104   :  { %v966_v45 = vpop.f32.mrf.mxu0  ;;  %v542_v47 = vpop.f32.mrf.mxu1 }
 0x105   :  { %v627_v49 = vpack.c.bf16 %v538_v41, %v535_v40  ;;  %919 = vst [vmem:[%s1316_s2 + $0x10] sm:$0xff] %v626_v42   ;;  %v708_v51 = vunpack.c.l.bf16 %v626_v42  ;;  %v709_v53 = vunpack.c.h.bf16 %v626_v42  ;;  %v763_v62 = vadd.f32 %v762_v39, %v748_v43 }
 0x106   :  { %v968_v57 = vpop.f32.mrf.mxu0  ;;  %v1014_v59 = vpop.f32.mrf.mxu1  ;;  %v967_v0 = vadd.f32 %v966_v45, %v965_v37 }
 0x107   :  { %920 = vst [vmem:[%s1316_s2 + $0x18] sm:$0xff] %v627_v49   ;;  %v724_v60 = vadd.f32 %v723_v55, %v708_v51  ;;  %v749_v61 = vmul.f32 %v708_v51, %v708_v51  ;;  %v710_v63 = vunpack.c.l.bf16 %v627_v49  ;;  %v750_v4 = vmul.f32 %v709_v53, %v709_v53 }
 0x108   :  { %v969_v1 = vpop.f32.mrf.mxu0  ;;  %v545_v2 = vpop.f32.mrf.mxu1  ;;  %v711_v9 = vunpack.c.h.bf16 %v627_v49  ;;  %v543_v13 = vadd.f32 %v967_v0, %v542_v47 }
 0x109   :  { %v725_v3 = vadd.f32 %v724_v60, %v709_v53  ;;  %v764_v5 = vadd.f32 %v763_v62, %v749_v61  ;;  %v970_v6 = vadd.f32 %v969_v1, %v968_v57  ;;  %v751_v11 = vmul.f32 %v710_v63, %v710_v63 }
 0x10a   :  { %v971_v7 = vpop.f32.mrf.mxu0  ;;  %v1017_v8 = vpop.f32.mrf.mxu1  ;;  %v752_v28 = vmul.f32 %v711_v9, %v711_v9 }
 0x10b   :  { %v765_v10 = vadd.f32 %v764_v5, %v750_v4  ;;  %v726_v12 = vadd.f32 %v725_v3, %v710_v63  ;;  %v546_v14 = vadd.f32 %v970_v6, %v545_v2  ;;  %v567_v26 = vadd.f32 %v1017_v8, %v985_v17 }
 0x10c   :  { %v972_v15 = vpop.f32.mrf.mxu0  ;;  %v558_v16 = vpop.f32.mrf.mxu1 }
 0x10d   :  { %v766_v19 = vadd.f32 %v765_v10, %v751_v11  ;;  %v628_v20 = vpack.c.bf16 %v546_v14, %v543_v13  ;;  %v973_v21 = vadd.f32 %v972_v15, %v971_v7  ;;  %v727_v54 = vadd.f32 %v726_v12, %v711_v9 }
 0x10e   :  { %v974_v22 = vpop.f32.mrf.mxu0  ;;  %v1018_v23 = vpop.f32.mrf.mxu1  ;;  %v559_v29 = vadd.f32 %v979_v24, %v558_v16 }
 0x10f   :  { %v570_v27 = vadd.f32 %v1018_v23, %v988_v18  ;;  %921 = vst [vmem:[%s1316_s2 + $0x20] sm:$0xff] %v628_v20   ;;  %v712_v52 = vunpack.c.l.bf16 %v628_v20  ;;  %v767_v44 = vadd.f32 %v766_v19, %v752_v28  ;;  %v551_v46 = vadd.f32 %v1013_v38, %v973_v21  ;;  %v720_v18 = vld [vmem:[%s1314_s3] sm:$0x1] }
 0x110   :  { %v975_v56 = vpop.f32.mrf.mxu0  ;;  %v561_v58 = vpop.f32.mrf.mxu1  ;;  %v713_v34 = vunpack.c.h.bf16 %v628_v20  ;;  %v744_v21 = vld [vmem:[%s1315_s4] sm:$0x1] }
 0x111   :  { %v631_v30 = vpack.c.bf16 %v570_v27, %v567_v26  ;;  %v976_v31 = vadd.f32 %v975_v56, %v974_v22  ;;  %v562_v32 = vadd.f32 %v982_v25, %v561_v58  ;;  %v753_v33 = vmul.f32 %v712_v52, %v712_v52 }
 0x112   :  { %v728_v48 = vadd.f32 %v727_v54, %v712_v52  ;;  %v754_v40 = vmul.f32 %v713_v34, %v713_v34 }
 0x113   :  { %924 = vst [vmem:[%s1316_s2 + $0x38] sm:$0xff] %v631_v30   ;;  %v554_v50 = vadd.f32 %v1014_v59, %v976_v31  ;;  %v630_v35 = vpack.c.bf16 %v562_v32, %v559_v29  ;;  %v768_v36 = vadd.f32 %v767_v44, %v753_v33  ;;  %v718_v57 = vunpack.c.l.bf16 %v631_v30 }
 0x114   :  { %v729_v39 = vadd.f32 %v728_v48, %v713_v34  ;;  %v719_v62 = vunpack.c.h.bf16 %v631_v30 }
 0x115   :  { %v629_v37 = vpack.c.bf16 %v554_v50, %v551_v46  ;;  %923 = vst [vmem:[%s1316_s2 + $0x30] sm:$0xff] %v630_v35   ;;  %v769_v42 = vadd.f32 %v768_v36, %v754_v40  ;;  %v716_v47 = vunpack.c.l.bf16 %v630_v35  ;;  %v717_v53 = vunpack.c.h.bf16 %v630_v35 }
 0x116   :  { %v759_v2 = vmul.f32 %v718_v57, %v718_v57  ;;  %v760_v5 = vmul.f32 %v719_v62, %v719_v62 }
 0x117   :  { %922 = vst [vmem:[%s1316_s2 + $0x28] sm:$0xff] %v629_v37   ;;  %v714_v38 = vunpack.c.l.bf16 %v629_v37  ;;  %v715_v41 = vunpack.c.h.bf16 %v629_v37  ;;  %v757_v60 = vmul.f32 %v716_v47, %v716_v47  ;;  %v758_v0 = vmul.f32 %v717_v53, %v717_v53 }
 0x119   :  { %v730_v43 = vadd.f32 %v729_v39, %v714_v38  ;;  %v755_v45 = vmul.f32 %v714_v38, %v714_v38  ;;  %v756_v49 = vmul.f32 %v715_v41, %v715_v41 }
 0x11b   :  { %v770_v51 = vadd.f32 %v769_v42, %v755_v45  ;;  %v731_v55 = vadd.f32 %v730_v43, %v715_v41 }
 0x11d   :  { %v732_v59 = vadd.f32 %v731_v55, %v716_v47  ;;  %v771_v61 = vadd.f32 %v770_v51, %v756_v49 }
 0x11f   :  { %v733_v63 = vadd.f32 %v732_v59, %v717_v53  ;;  %v772_v1 = vadd.f32 %v771_v61, %v757_v60 }
 0x121   :  { %v734_v3 = vadd.f32 %v733_v63, %v718_v57  ;;  %v773_v4 = vadd.f32 %v772_v1, %v758_v0 }
 0x123   :  { %v735_v6 = vadd.f32 %v734_v3, %v719_v62  ;;  %v774_v7 = vadd.f32 %v773_v4, %v759_v2 }
 0x125   :  { %v736_v8 = vrot.slane %v735_v6, 4  ;;  %v775_v9 = vadd.f32 %v774_v7, %v760_v5 }
 0x127   :  { %v737_v10 = vadd.f32 %v736_v8, %v735_v6  ;;  %v776_v11 = vrot.slane %v775_v9, 4 }
 0x129   :  { %v738_v12 = vrot.slane %v737_v10, 2  ;;  %v777_v13 = vadd.f32 %v776_v11, %v775_v9 }
 0x12b   :  { %v739_v14 = vadd.f32 %v738_v12, %v737_v10  ;;  %v778_v15 = vrot.slane %v777_v13, 2 }
 0x12d   :  { %v740_v16 = vrot.slane %v739_v14, 1  ;;  %v779_v17 = vadd.f32 %v778_v15, %v777_v13 }
 0x12f   :  { %v741_v19 = vadd.f32 %v740_v16, %v739_v14  ;;  %v780_v20 = vrot.slane %v779_v17, 1 }
 0x131   :  { %v742_v22 = vadd.f32 %v741_v19, %v720_v18  ;;  %v781_v23 = vadd.f32 %v780_v20, %v779_v17 }
 0x133   :  { %743 = vst [vmem:[%s1314_s3] sm:$0x1] %v742_v22  ;;  %v782_v24 = vadd.f32 %v781_v23, %v744_v21 }
 0x135   :  { %783 = vst [vmem:[%s1315_s4] sm:$0x1] %v782_v24 }

// kernel: squeeze.16
= control target key start
LH: loop header
LB: loop body
LE: loop exit
PB: predicated region body
PF: predicated region fallthrough
CT: control target
= control target key end

     0   :  { %s40_s8 = smov 104   ;;  %vm8_vm0 = vcmask 64512   ;;  %s41_s9 = smov 112   ;;  %s58_s0 = inlined_call_operand.vmem [shape: f32[32], index: 0, kind: input, shape index: {}]   ;;  %s59_s1 = inlined_call_operand.vmem [shape: f32[4,8], index: 1, kind: output, shape index: {}]  }
   0x1   :  { %v5_v0 = vld [vmem:[%s58_s0] sm:$0x1]  ;;  %s39_s0 = smov 120  }
   0x2   :  { %6 = vst [vmem:[#allocation1] sm:$0x1] %v5_v0 }
   0x9   :  { %v10_v1 = vld [vmem:[#allocation1] sm:$0x1]  }
   0xa   :  { %v22_v2 = vld [vmem:[#allocation1] sm:$0x1]   ;;  %11 = vrot.lane.b32.xlu0 %v10_v1, %s39_s0 }
   0xb   :  { %23 = vrot.lane.b32.xlu1 %v22_v2, %s40_s8  ;;  %v7_v3 = vld [vmem:[#allocation1] sm:$0x1]  }
   0xc   :  { %v16_v4 = vld [vmem:[#allocation1] sm:$0x1]   ;;  %9 = vst.msk [vmem:[#allocation0] sm:$0x1] %vm8_vm0, %v7_v3  }
   0xe   :  { %17 = vrot.lane.b32.xlu0 %v16_v4, %s41_s9 }
  0x7c   :  { %v12_v5 = vpop.permute.xlu0 %11  }
  0x7d   :  { %v24_v6 = vpop.permute.xlu1 %23   ;;  %15 = vst.msk [vmem:[#allocation0 + $0x1] sm:$0x1] %vm8_vm0, %v12_v5  }
  0x7e   :  { %27 = vst.msk [vmem:[#allocation0 + $0x3] sm:$0x1] %vm8_vm0, %v24_v6  }
  0x80   :  { %v18_v7 = vpop.permute.xlu0 %17  }
  0x81   :  { %21 = vst.msk [vmem:[#allocation0 + $0x2] sm:$0x1] %vm8_vm0, %v18_v7  }
  0x88   :  { %v32_v8 = vld [vmem:[#allocation0] sm:$0xf] }
  0x89   :  { %35 = vst [vmem:[%s59_s1] sm:$0xf] %v32_v8 }

// kernel: tile.88
= control target key start
LH: loop header
LB: loop body
LE: loop exit
PB: predicated region body
PF: predicated region fallthrough
CT: control target
= control target key end

     0   :  { %s22_s0 = inlined_call_operand.vmem [shape: f32[8], index: 0, kind: input, shape index: {}]   ;;  %s23_s1 = inlined_call_operand.vmem [shape: f32[4,8], index: 1, kind: output, shape index: {}]  }
   0x1   :  { %v4_v0 = vld [vmem:[%s22_s0] ss:$0 sm:$0xff] }
   0x2   :  { %5 = vst [vmem:[%s23_s1] sm:$0xf] %v4_v0 }

// kernel: generator_forward.9
= control target key start
LH: loop header
LB: loop body
LE: loop exit
PB: predicated region body
PF: predicated region fallthrough
CT: control target
= control target key end

     0   :  { %v2312_v0 = vmov 0   ;;  %vm578_vm0 = vcmask 130048   ;;  %s2804_s1 = inlined_call_operand.vmem [shape: bf16[144,128], index: 1, kind: input, shape index: {}]   ;;  %s2805_s0 = inlined_call_operand.vmem [shape: bf16[512,144], index: 0, kind: input, shape index: {}]   ;;  %s2806_s2 = inlined_call_operand.vmem [shape: bf16[512,128], index: 2, kind: output, shape index: {0}]   ;;  %s2807_s3 = inlined_call_operand.vmem [shape: f32[1,128], index: 3, kind: output, shape index: {1}]   ;;  %s2808_s4 = inlined_call_operand.vmem [shape: f32[1,128], index: 4, kind: output, shape index: {2}]  }
   0x1   :  { %675 = vmatprep.subr.bf16.mxu0 %v2312_v0  ;;  %v2207_v1 = vld [vmem:[%s2804_s1 + $0x38] sm:$0xff]   ;;  %2187 = vmatprep.subr.bf16.mxu1 %v2312_v0  ;;  %v2208_v2 = vld [vmem:[%s2804_s1 + $0x30] sm:$0xff]   ;;  %v2209_v3 = vld [vmem:[%s2804_s1 + $0x28] sm:$0xff]  }
   0x2   :  { %676 = vmatpush1.bf16.msra.mxu0 %v2207_v1  ;;  %2196 = vmatpush1.bf16.msra.mxu1 %v2207_v1  ;;  %v2210_v4 = vld [vmem:[%s2804_s1 + $0x20] sm:$0xff]   ;;  %v2211_v6 = vld [vmem:[%s2804_s1 + $0x18] sm:$0xff]   ;;  %v2212_v7 = vld [vmem:[%s2804_s1 + $0x10] sm:$0xff]  }
   0x3   :  { %677 = vmatprep.subr.bf16.mxu0 %v2312_v0  ;;  %2188 = vmatprep.subr.bf16.mxu1 %v2312_v0  ;;  %v2218_v5 = vld [vmem:[%s2805_s0 + $0x4] ss:$8 sps:$4 sm:$0xff]   ;;  %v2216_v12 = vld [vmem:[%s2805_s0] ss:$8 sps:$4 sm:$0xff]   ;;  %v2219_v13 = vld [vmem:[%s2805_s0 + $0x14] ss:$8 sps:$4 sm:$0xff]  }
   0x4   :  { %1836 = vmatprep.mubr.msk.bf16.mxu0 %vm578_vm0, %v2218_v5  ;;  %v2242_v8 = vld [vmem:[%s2805_s0 + $0x104] ss:$8 sps:$4 sm:$0xff]   ;;  %v2240_v14 = vld [vmem:[%s2805_s0 + $0x100] ss:$8 sps:$4 sm:$0xff]   ;;  %v2246_v15 = vld [vmem:[%s2805_s0 + $0x114] ss:$8 sps:$4 sm:$0xff]  }
   0x5   :  { %v2213_v9 = vld [vmem:[%s2804_s1 + $0x8] sm:$0xff]   ;;  %1852 = vmatprep.mubr.msk.bf16.mxu1 %vm578_vm0, %v2242_v8  ;;  %v2214_v10 = vld [vmem:[%s2804_s1] sm:$0xff]   ;;  %v2221_v16 = vld [vmem:[%s2805_s0 + $0x10] ss:$8 sps:$4 sm:$0xff]  }
   0x6   :  { %678 = vmatpush1.bf16.msra.mxu0 %v2208_v2  ;;  %2197 = vmatpush1.bf16.msra.mxu1 %v2208_v2  ;;  %v2215_v11 = vld [vmem:[%s2804_s1 + $0x40] sm:$0xff]   ;;  %v2248_v18 = vld [vmem:[%s2805_s0 + $0x110] ss:$8 sps:$4 sm:$0xff]   ;;  %v2225_v21 = vld [vmem:[%s2805_s0 + $0x34] ss:$8 sps:$4 sm:$0xff]  }
   0x7   :  { %679 = vmatprep.subr.bf16.mxu0 %v2312_v0  ;;  %2189 = vmatprep.subr.bf16.mxu1 %v2312_v0  ;;  %v2222_v17 = vld [vmem:[%s2805_s0 + $0x24] ss:$8 sps:$4 sm:$0xff]   ;;  %v2224_v20 = vld [vmem:[%s2805_s0 + $0x20] ss:$8 sps:$4 sm:$0xff]   ;;  %v2258_v23 = vld [vmem:[%s2805_s0 + $0x134] ss:$8 sps:$4 sm:$0xff]  }
   0x8   :  { %v2252_v19 = vld [vmem:[%s2805_s0 + $0x124] ss:$8 sps:$4 sm:$0xff]   ;;  %v2254_v22 = vld [vmem:[%s2805_s0 + $0x120] ss:$8 sps:$4 sm:$0xff]   ;;  %v2227_v24 = vld [vmem:[%s2805_s0 + $0x30] ss:$8 sps:$4 sm:$0xff]  }
   0x9   :  { %v2260_v25 = vld [vmem:[%s2805_s0 + $0x130] ss:$8 sps:$4 sm:$0xff]   ;;  %v2228_v26 = vld [vmem:[%s2805_s0 + $0x44] ss:$8 sps:$4 sm:$0xff]   ;;  %v2230_v28 = vld [vmem:[%s2805_s0 + $0x40] ss:$8 sps:$4 sm:$0xff]  }
   0xa   :  { %680 = vmatpush1.bf16.msra.mxu0 %v2209_v3  ;;  %2198 = vmatpush1.bf16.msra.mxu1 %v2209_v3  ;;  %v2264_v27 = vld [vmem:[%s2805_s0 + $0x144] ss:$8 sps:$4 sm:$0xff]   ;;  %v2266_v29 = vld [vmem:[%s2805_s0 + $0x140] ss:$8 sps:$4 sm:$0xff]   ;;  %v2231_v30 = vld [vmem:[%s2805_s0 + $0x54] ss:$8 sps:$4 sm:$0xff]  }
   0xb   :  { %681 = vmatprep.subr.bf16.mxu0 %v2312_v0  ;;  %2190 = vmatprep.subr.bf16.mxu1 %v2312_v0  ;;  %v2270_v31 = vld [vmem:[%s2805_s0 + $0x154] ss:$8 sps:$4 sm:$0xff]   ;;  %v2233_v32 = vld [vmem:[%s2805_s0 + $0x50] ss:$8 sps:$4 sm:$0xff]   ;;  %v2234_v34 = vld [vmem:[%s2805_s0 + $0x64] ss:$8 sps:$4 sm:$0xff]  }
   0xc   :  { %v2272_v33 = vld [vmem:[%s2805_s0 + $0x150] ss:$8 sps:$4 sm:$0xff]   ;;  %v2276_v35 = vld [vmem:[%s2805_s0 + $0x164] ss:$8 sps:$4 sm:$0xff]   ;;  %v2236_v36 = vld [vmem:[%s2805_s0 + $0x60] ss:$8 sps:$4 sm:$0xff]  }
   0xd   :  { %v2278_v37 = vld [vmem:[%s2805_s0 + $0x160] ss:$8 sps:$4 sm:$0xff]   ;;  %v2237_v38 = vld [vmem:[%s2805_s0 + $0x74] ss:$8 sps:$4 sm:$0xff]   ;;  %v2239_v40 = vld [vmem:[%s2805_s0 + $0x70] ss:$8 sps:$4 sm:$0xff]  }
   0xe   :  { %682 = vmatpush1.bf16.msra.mxu0 %v2210_v4  ;;  %2199 = vmatpush1.bf16.msra.mxu1 %v2210_v4  ;;  %v2282_v39 = vld [vmem:[%s2805_s0 + $0x174] ss:$8 sps:$4 sm:$0xff]   ;;  %v2284_v41 = vld [vmem:[%s2805_s0 + $0x170] ss:$8 sps:$4 sm:$0xff]   ;;  %v2243_v42 = vld [vmem:[%s2805_s0 + $0x84] ss:$8 sps:$4 sm:$0xff]  }
   0xf   :  { %683 = vmatprep.subr.bf16.mxu0 %v2312_v0  ;;  %2191 = vmatprep.subr.bf16.mxu1 %v2312_v0  ;;  %v2288_v43 = vld [vmem:[%s2805_s0 + $0x184] ss:$8 sps:$4 sm:$0xff]   ;;  %v2245_v44 = vld [vmem:[%s2805_s0 + $0x80] ss:$8 sps:$4 sm:$0xff]   ;;  %v2249_v46 = vld [vmem:[%s2805_s0 + $0x94] ss:$8 sps:$4 sm:$0xff]  }
  0x10   :  { %v2290_v45 = vld [vmem:[%s2805_s0 + $0x180] ss:$8 sps:$4 sm:$0xff]   ;;  %v2291_v47 = vld [vmem:[%s2805_s0 + $0x194] ss:$8 sps:$4 sm:$0xff]   ;;  %v2251_v48 = vld [vmem:[%s2805_s0 + $0x90] ss:$8 sps:$4 sm:$0xff]  }
  0x11   :  { %v2293_v49 = vld [vmem:[%s2805_s0 + $0x190] ss:$8 sps:$4 sm:$0xff]   ;;  %v2255_v50 = vld [vmem:[%s2805_s0 + $0xa4] ss:$8 sps:$4 sm:$0xff]   ;;  %v2257_v52 = vld [vmem:[%s2805_s0 + $0xa0] ss:$8 sps:$4 sm:$0xff]  }
  0x12   :  { %684 = vmatpush1.bf16.msra.mxu0 %v2211_v6  ;;  %2200 = vmatpush1.bf16.msra.mxu1 %v2211_v6  ;;  %v2294_v51 = vld [vmem:[%s2805_s0 + $0x1a4] ss:$8 sps:$4 sm:$0xff]   ;;  %v2296_v53 = vld [vmem:[%s2805_s0 + $0x1a0] ss:$8 sps:$4 sm:$0xff]   ;;  %v2261_v54 = vld [vmem:[%s2805_s0 + $0xb4] ss:$8 sps:$4 sm:$0xff]  }
  0x13   :  { %685 = vmatprep.subr.bf16.mxu0 %v2312_v0  ;;  %2192 = vmatprep.subr.bf16.mxu1 %v2312_v0  ;;  %v2297_v55 = vld [vmem:[%s2805_s0 + $0x1b4] ss:$8 sps:$4 sm:$0xff]   ;;  %v2263_v56 = vld [vmem:[%s2805_s0 + $0xb0] ss:$8 sps:$4 sm:$0xff]   ;;  %v2267_v58 = vld [vmem:[%s2805_s0 + $0xc4] ss:$8 sps:$4 sm:$0xff]  }
  0x14   :  { %v2299_v57 = vld [vmem:[%s2805_s0 + $0x1b0] ss:$8 sps:$4 sm:$0xff]   ;;  %v2300_v59 = vld [vmem:[%s2805_s0 + $0x1c4] ss:$8 sps:$4 sm:$0xff]   ;;  %v2269_v60 = vld [vmem:[%s2805_s0 + $0xc0] ss:$8 sps:$4 sm:$0xff]  }
  0x15   :  { %v2302_v61 = vld [vmem:[%s2805_s0 + $0x1c0] ss:$8 sps:$4 sm:$0xff]   ;;  %v2273_v62 = vld [vmem:[%s2805_s0 + $0xd4] ss:$8 sps:$4 sm:$0xff]   ;;  %v2305_v1 = vld [vmem:[%s2805_s0 + $0x1d0] ss:$8 sps:$4 sm:$0xff]  }
  0x16   :  { %686 = vmatpush1.bf16.msra.mxu0 %v2212_v7  ;;  %2201 = vmatpush1.bf16.msra.mxu1 %v2212_v7  ;;  %v2303_v63 = vld [vmem:[%s2805_s0 + $0x1d4] ss:$8 sps:$4 sm:$0xff]   ;;  %v2279_v2 = vld [vmem:[%s2805_s0 + $0xe4] ss:$8 sps:$4 sm:$0xff]   ;;  %v2281_v4 = vld [vmem:[%s2805_s0 + $0xe0] ss:$8 sps:$4 sm:$0xff]  }
  0x17   :  { %687 = vmatprep.subr.bf16.mxu0 %v2312_v0  ;;  %2193 = vmatprep.subr.bf16.mxu1 %v2312_v0  ;;  %v2306_v3 = vld [vmem:[%s2805_s0 + $0x1e4] ss:$8 sps:$4 sm:$0xff]   ;;  %v2308_v5 = vld [vmem:[%s2805_s0 + $0x1e0] ss:$8 sps:$4 sm:$0xff]   ;;  %v2285_v6 = vld [vmem:[%s2805_s0 + $0xf4] ss:$8 sps:$4 sm:$0xff]  }
  0x18   :  { %v2309_v7 = vld [vmem:[%s2805_s0 + $0x1f4] ss:$8 sps:$4 sm:$0xff]   ;;  %v2287_v8 = vld [vmem:[%s2805_s0 + $0xf0] ss:$8 sps:$4 sm:$0xff]  }
  0x1a   :  { %688 = vmatpush1.bf16.msra.mxu0 %v2213_v9  ;;  %2202 = vmatpush1.bf16.msra.mxu1 %v2213_v9  ;;  %v2311_v9 = vld [vmem:[%s2805_s0 + $0x1f0] ss:$8 sps:$4 sm:$0xff]  }
  0x1b   :  { %689 = vmatprep.subr.bf16.mxu0 %v2312_v0  ;;  %2194 = vmatprep.subr.bf16.mxu1 %v2312_v0 }
  0x1e   :  { %690 = vmatpush1.bf16.msra.mxu0 %v2214_v10  ;;  %2203 = vmatpush1.bf16.msra.mxu1 %v2214_v10 }
  0x1f   :  { %705 = vmatprep.subr.bf16.mxu0 %v2312_v0  ;;  %2195 = vmatprep.subr.bf16.mxu1 %v2312_v0  ;;  %v2275_v0 = vld [vmem:[%s2805_s0 + $0xd0] ss:$8 sps:$4 sm:$0xff]  }
  0x22   :  { %706 = vmatpush2.bf16.msra.mxu0 %v2215_v11  ;;  %2204 = vmatpush2.bf16.msra.mxu1 %v2215_v11 }
  0x25   :  { %708 = vmatmul.mubr.bf16.vlgmr.msra.gmra.mxu0 %v2216_v12  ;;  %836 = vmatmul.mubr.bf16.vlgmr.msra.gmra.mxu1 %v2240_v14 }
  0x26   :  { %1837 = vmatprep.mubr.msk.bf16.mxu0 %vm578_vm0, %v2219_v13  ;;  %1853 = vmatprep.mubr.msk.bf16.mxu1 %vm578_vm0, %v2246_v15 }
  0x2d   :  { %716 = vmatmul.mubr.bf16.gmra.mxu0 %v2221_v16  ;;  %844 = vmatmul.mubr.bf16.gmra.mxu1 %v2248_v18 }
  0x2e   :  { %1838 = vmatprep.mubr.msk.bf16.mxu0 %vm578_vm0, %v2222_v17  ;;  %1854 = vmatprep.mubr.msk.bf16.mxu1 %vm578_vm0, %v2252_v19 }
  0x35   :  { %724 = vmatmul.mubr.bf16.gmra.mxu0 %v2224_v20  ;;  %852 = vmatmul.mubr.bf16.gmra.mxu1 %v2254_v22 }
  0x36   :  { %1839 = vmatprep.mubr.msk.bf16.mxu0 %vm578_vm0, %v2225_v21  ;;  %1855 = vmatprep.mubr.msk.bf16.mxu1 %vm578_vm0, %v2258_v23 }
  0x3d   :  { %732 = vmatmul.mubr.bf16.gmra.mxu0 %v2227_v24  ;;  %860 = vmatmul.mubr.bf16.gmra.mxu1 %v2260_v25 }
  0x3e   :  { %1840 = vmatprep.mubr.msk.bf16.mxu0 %vm578_vm0, %v2228_v26  ;;  %1856 = vmatprep.mubr.msk.bf16.mxu1 %vm578_vm0, %v2264_v27 }
  0x45   :  { %740 = vmatmul.mubr.bf16.gmra.mxu0 %v2230_v28  ;;  %868 = vmatmul.mubr.bf16.gmra.mxu1 %v2266_v29 }
  0x46   :  { %1841 = vmatprep.mubr.msk.bf16.mxu0 %vm578_vm0, %v2231_v30  ;;  %1857 = vmatprep.mubr.msk.bf16.mxu1 %vm578_vm0, %v2270_v31 }
  0x4d   :  { %748 = vmatmul.mubr.bf16.gmra.mxu0 %v2233_v32  ;;  %876 = vmatmul.mubr.bf16.gmra.mxu1 %v2272_v33 }
  0x4e   :  { %1842 = vmatprep.mubr.msk.bf16.mxu0 %vm578_vm0, %v2234_v34  ;;  %1858 = vmatprep.mubr.msk.bf16.mxu1 %vm578_vm0, %v2276_v35 }
  0x55   :  { %756 = vmatmul.mubr.bf16.gmra.mxu0 %v2236_v36  ;;  %884 = vmatmul.mubr.bf16.gmra.mxu1 %v2278_v37 }
  0x56   :  { %1843 = vmatprep.mubr.msk.bf16.mxu0 %vm578_vm0, %v2237_v38  ;;  %1859 = vmatprep.mubr.msk.bf16.mxu1 %vm578_vm0, %v2282_v39 }
  0x5d   :  { %764 = vmatmul.mubr.bf16.gmra.mxu0 %v2239_v40  ;;  %892 = vmatmul.mubr.bf16.gmra.mxu1 %v2284_v41 }
  0x5e   :  { %1844 = vmatprep.mubr.msk.bf16.mxu0 %vm578_vm0, %v2243_v42  ;;  %1860 = vmatprep.mubr.msk.bf16.mxu1 %vm578_vm0, %v2288_v43 }
  0x65   :  { %772 = vmatmul.mubr.bf16.gmra.mxu0 %v2245_v44  ;;  %900 = vmatmul.mubr.bf16.gmra.mxu1 %v2290_v45 }
  0x66   :  { %1845 = vmatprep.mubr.msk.bf16.mxu0 %vm578_vm0, %v2249_v46  ;;  %1861 = vmatprep.mubr.msk.bf16.mxu1 %vm578_vm0, %v2291_v47 }
  0x6d   :  { %780 = vmatmul.mubr.bf16.gmra.mxu0 %v2251_v48  ;;  %908 = vmatmul.mubr.bf16.gmra.mxu1 %v2293_v49 }
  0x6e   :  { %1846 = vmatprep.mubr.msk.bf16.mxu0 %vm578_vm0, %v2255_v50  ;;  %1862 = vmatprep.mubr.msk.bf16.mxu1 %vm578_vm0, %v2294_v51 }
  0x75   :  { %788 = vmatmul.mubr.bf16.gmra.mxu0 %v2257_v52  ;;  %916 = vmatmul.mubr.bf16.gmra.mxu1 %v2296_v53 }
  0x76   :  { %1847 = vmatprep.mubr.msk.bf16.mxu0 %vm578_vm0, %v2261_v54  ;;  %1863 = vmatprep.mubr.msk.bf16.mxu1 %vm578_vm0, %v2297_v55 }
  0x7d   :  { %796 = vmatmul.mubr.bf16.gmra.mxu0 %v2263_v56  ;;  %924 = vmatmul.mubr.bf16.gmra.mxu1 %v2299_v57 }
  0x7e   :  { %1848 = vmatprep.mubr.msk.bf16.mxu0 %vm578_vm0, %v2267_v58  ;;  %1864 = vmatprep.mubr.msk.bf16.mxu1 %vm578_vm0, %v2300_v59 }
  0x85   :  { %804 = vmatmul.mubr.bf16.gmra.mxu0 %v2269_v60  ;;  %932 = vmatmul.mubr.bf16.gmra.mxu1 %v2302_v61 }
  0x86   :  { %1849 = vmatprep.mubr.msk.bf16.mxu0 %vm578_vm0, %v2273_v62  ;;  %1865 = vmatprep.mubr.msk.bf16.mxu1 %vm578_vm0, %v2303_v63 }
  0x8d   :  { %812 = vmatmul.mubr.bf16.gmra.mxu0 %v2275_v0  ;;  %940 = vmatmul.mubr.bf16.gmra.mxu1 %v2305_v1 }
  0x8e   :  { %1850 = vmatprep.mubr.msk.bf16.mxu0 %vm578_vm0, %v2279_v2  ;;  %1866 = vmatprep.mubr.msk.bf16.mxu1 %vm578_vm0, %v2306_v3 }
  0x95   :  { %820 = vmatmul.mubr.bf16.gmra.mxu0 %v2281_v4  ;;  %948 = vmatmul.mubr.bf16.gmra.mxu1 %v2308_v5 }
  0x96   :  { %1851 = vmatprep.mubr.msk.bf16.mxu0 %vm578_vm0, %v2285_v6  ;;  %1867 = vmatprep.mubr.msk.bf16.mxu1 %vm578_vm0, %v2309_v7 }
  0x9d   :  { %828 = vmatmul.mubr.bf16.gmra.mxu0 %v2287_v8  ;;  %956 = vmatmul.mubr.bf16.gmra.mxu1 %v2311_v9 }
  0xe5   :  { %v709_v10 = vpop.f32.mrf.mxu0  ;;  %v837_v11 = vpop.f32.mrf.mxu1 }
  0xe7   :  { %v711_v12 = vpop.f32.mrf.mxu0  ;;  %v839_v13 = vpop.f32.mrf.mxu1 }
  0xe9   :  { %v712_v14 = vpop.f32.mrf.mxu0  ;;  %v840_v15 = vpop.f32.mrf.mxu1 }
  0xea   :  { %v1159_v16 = vpack.c.bf16 %v712_v14, %v709_v10  ;;  %v2590_v17 = vpack.c.bf16 %v840_v15, %v837_v11 }
  0xeb   :  { %v714_v18 = vpop.f32.mrf.mxu0  ;;  %v842_v19 = vpop.f32.mrf.mxu1 }
  0xec   :  { %2000 = vst [vmem:[%s2806_s2] sm:$0xff] %v1159_v16   ;;  %2171 = vst [vmem:[%s2806_s2 + $0x80] sm:$0xff] %v2590_v17   ;;  %v1479_v54 = vunpack.c.l.bf16 %v1159_v16  ;;  %v1480_v55 = vunpack.c.h.bf16 %v1159_v16 }
  0xed   :  { %v717_v20 = vpop.f32.mrf.mxu0  ;;  %v845_v21 = vpop.f32.mrf.mxu1 }
  0xee   :  { %v1616_v63 = vmul.f32 %v1479_v54, %v1479_v54  ;;  %v1617_v0 = vmul.f32 %v1480_v55, %v1480_v55  ;;  %v1544_v6 = vadd.f32 %v1480_v55, %v1479_v54 }
  0xef   :  { %v719_v22 = vpop.f32.mrf.mxu0  ;;  %v847_v23 = vpop.f32.mrf.mxu1 }
  0xf0   :  { %v1680_v7 = vadd.f32 %v1617_v0, %v1616_v63 }
  0xf1   :  { %v720_v24 = vpop.f32.mrf.mxu0  ;;  %v848_v25 = vpop.f32.mrf.mxu1 }
  0xf2   :  { %v1160_v26 = vpack.c.bf16 %v720_v24, %v717_v20  ;;  %v2599_v27 = vpack.c.bf16 %v848_v25, %v845_v21 }
  0xf3   :  { %v722_v28 = vpop.f32.mrf.mxu0  ;;  %v850_v29 = vpop.f32.mrf.mxu1 }
  0xf4   :  { %2156 = vst [vmem:[%s2806_s2 + $0x8] sm:$0xff] %v1160_v26   ;;  %2172 = vst [vmem:[%s2806_s2 + $0x88] sm:$0xff] %v2599_v27   ;;  %v1481_v60 = vunpack.c.l.bf16 %v1160_v26  ;;  %v1482_v8 = vunpack.c.h.bf16 %v1160_v26 }
  0xf5   :  { %v725_v30 = vpop.f32.mrf.mxu0  ;;  %v853_v31 = vpop.f32.mrf.mxu1 }
  0xf6   :  { %v1618_v3 = vmul.f32 %v1481_v60, %v1481_v60  ;;  %v1545_v12 = vadd.f32 %v1544_v6, %v1481_v60  ;;  %v1619_v19 = vmul.f32 %v1482_v8, %v1482_v8 }
  0xf7   :  { %v727_v32 = vpop.f32.mrf.mxu0  ;;  %v855_v33 = vpop.f32.mrf.mxu1 }
  0xf8   :  { %v1681_v15 = vadd.f32 %v1680_v7, %v1618_v3  ;;  %v1546_v23 = vadd.f32 %v1545_v12, %v1482_v8 }
  0xf9   :  { %v728_v34 = vpop.f32.mrf.mxu0  ;;  %v856_v35 = vpop.f32.mrf.mxu1 }
  0xfa   :  { %v1161_v36 = vpack.c.bf16 %v728_v34, %v725_v30  ;;  %v2608_v37 = vpack.c.bf16 %v856_v35, %v853_v31  ;;  %v1682_v24 = vadd.f32 %v1681_v15, %v1619_v19 }
  0xfb   :  { %v730_v38 = vpop.f32.mrf.mxu0  ;;  %v858_v39 = vpop.f32.mrf.mxu1 }
  0xfc   :  { %2157 = vst [vmem:[%s2806_s2 + $0x10] sm:$0xff] %v1161_v36   ;;  %2173 = vst [vmem:[%s2806_s2 + $0x90] sm:$0xff] %v2608_v37   ;;  %v1483_v9 = vunpack.c.l.bf16 %v1161_v36  ;;  %v1484_v25 = vunpack.c.h.bf16 %v1161_v36 }
  0xfd   :  { %v733_v40 = vpop.f32.mrf.mxu0  ;;  %v861_v41 = vpop.f32.mrf.mxu1 }
  0xfe   :  { %v1620_v20 = vmul.f32 %v1483_v9, %v1483_v9  ;;  %v1547_v30 = vadd.f32 %v1546_v23, %v1483_v9  ;;  %v1621_v38 = vmul.f32 %v1484_v25, %v1484_v25 }
  0xff   :  { %v735_v42 = vpop.f32.mrf.mxu0  ;;  %v863_v43 = vpop.f32.mrf.mxu1 }
 0x100   :  { %v1683_v31 = vadd.f32 %v1682_v24, %v1620_v20  ;;  %v1548_v42 = vadd.f32 %v1547_v30, %v1484_v25 }
 0x101   :  { %v736_v44 = vpop.f32.mrf.mxu0  ;;  %v864_v45 = vpop.f32.mrf.mxu1 }
 0x102   :  { %v2617_v46 = vpack.c.bf16 %v736_v44, %v733_v40  ;;  %v2619_v47 = vpack.c.bf16 %v864_v45, %v861_v41  ;;  %v1684_v36 = vadd.f32 %v1683_v31, %v1621_v38 }
 0x103   :  { %v738_v48 = vpop.f32.mrf.mxu0  ;;  %v866_v49 = vpop.f32.mrf.mxu1 }
 0x104   :  { %2158 = vst [vmem:[%s2806_s2 + $0x18] sm:$0xff] %v2617_v46   ;;  %2174 = vst [vmem:[%s2806_s2 + $0x98] sm:$0xff] %v2619_v47   ;;  %v1485_v26 = vunpack.c.l.bf16 %v2617_v46  ;;  %v1486_v43 = vunpack.c.h.bf16 %v2617_v46 }
 0x105   :  { %v741_v50 = vpop.f32.mrf.mxu0  ;;  %v869_v51 = vpop.f32.mrf.mxu1 }
 0x106   :  { %v1622_v39 = vmul.f32 %v1485_v26, %v1485_v26  ;;  %v1549_v49 = vadd.f32 %v1548_v42, %v1485_v26 }
 0x107   :  { %v743_v52 = vpop.f32.mrf.mxu0  ;;  %v871_v53 = vpop.f32.mrf.mxu1 }
 0x108   :  { %v1623_v53 = vmul.f32 %v1486_v43, %v1486_v43 }
 0x109   :  { %v744_v56 = vpop.f32.mrf.mxu0  ;;  %v872_v57 = vpop.f32.mrf.mxu1 }
 0x10a   :  { %v2629_v58 = vpack.c.bf16 %v744_v56, %v741_v50  ;;  %v2631_v59 = vpack.c.bf16 %v872_v57, %v869_v51  ;;  %v1685_v50 = vadd.f32 %v1684_v36, %v1622_v39  ;;  %v1550_v57 = vadd.f32 %v1549_v49, %v1486_v43 }
 0x10b   :  { %v746_v61 = vpop.f32.mrf.mxu0  ;;  %v874_v62 = vpop.f32.mrf.mxu1 }
 0x10c   :  { %2159 = vst [vmem:[%s2806_s2 + $0x20] sm:$0xff] %v2629_v58   ;;  %2175 = vst [vmem:[%s2806_s2 + $0xa0] sm:$0xff] %v2631_v59   ;;  %v1487_v44 = vunpack.c.l.bf16 %v2629_v58  ;;  %v1686_v62 = vadd.f32 %v1685_v50, %v1623_v53  ;;  %v1488_v63 = vunpack.c.h.bf16 %v2629_v58 }
 0x10d   :  { %v749_v1 = vpop.f32.mrf.mxu0  ;;  %v877_v2 = vpop.f32.mrf.mxu1 }
 0x10e   :  { %v1624_v54 = vmul.f32 %v1487_v44, %v1487_v44  ;;  %v1625_v6 = vmul.f32 %v1488_v63, %v1488_v63 }
 0x10f   :  { %v751_v4 = vpop.f32.mrf.mxu0  ;;  %v879_v5 = vpop.f32.mrf.mxu1 }
 0x110   :  { %v1687_v3 = vadd.f32 %v1686_v62, %v1624_v54 }
 0x111   :  { %v752_v10 = vpop.f32.mrf.mxu0  ;;  %v880_v11 = vpop.f32.mrf.mxu1 }
 0x112   :  { %v2641_v13 = vpack.c.bf16 %v752_v10, %v749_v1  ;;  %v2643_v14 = vpack.c.bf16 %v880_v11, %v877_v2  ;;  %v1551_v2 = vadd.f32 %v1550_v57, %v1487_v44  ;;  %v2313_v10 = vmov 0.0  }
 0x113   :  { %v754_v16 = vpop.f32.mrf.mxu0  ;;  %v882_v18 = vpop.f32.mrf.mxu1  ;;  %88 = vst [vmem:[%s2807_s3] sm:$0x1] %v2313_v10  ;;  %89 = vst [vmem:[%s2808_s4] sm:$0x1] %v2313_v10  ;;  %v1688_v11 = vadd.f32 %v1687_v3, %v1625_v6 }
 0x114   :  { %2160 = vst [vmem:[%s2806_s2 + $0x28] sm:$0xff] %v2641_v13   ;;  %2176 = vst [vmem:[%s2806_s2 + $0xa8] sm:$0xff] %v2643_v14   ;;  %v1489_v46 = vunpack.c.l.bf16 %v2641_v13  ;;  %v1552_v9 = vadd.f32 %v1551_v2, %v1488_v63  ;;  %v1490_v12 = vunpack.c.h.bf16 %v2641_v13 }
 0x115   :  { %v757_v21 = vpop.f32.mrf.mxu0  ;;  %v885_v22 = vpop.f32.mrf.mxu1 }
 0x116   :  { %v1626_v7 = vmul.f32 %v1489_v46, %v1489_v46  ;;  %v1553_v19 = vadd.f32 %v1552_v9, %v1489_v46  ;;  %v1627_v13 = vmul.f32 %v1490_v12, %v1490_v12 }
 0x117   :  { %v759_v28 = vpop.f32.mrf.mxu0  ;;  %v887_v29 = vpop.f32.mrf.mxu1 }
 0x118   :  { %v1554_v29 = vadd.f32 %v1553_v19, %v1490_v12 }
 0x119   :  { %v760_v32 = vpop.f32.mrf.mxu0  ;;  %v888_v33 = vpop.f32.mrf.mxu1 }
 0x11a   :  { %v2654_v34 = vpack.c.bf16 %v760_v32, %v757_v21  ;;  %v2656_v35 = vpack.c.bf16 %v888_v33, %v885_v22  ;;  %v1689_v22 = vadd.f32 %v1688_v11, %v1626_v7 }
 0x11b   :  { %v762_v40 = vpop.f32.mrf.mxu0  ;;  %v890_v41 = vpop.f32.mrf.mxu1 }
 0x11c   :  { %2161 = vst [vmem:[%s2806_s2 + $0x30] sm:$0xff] %v2654_v34   ;;  %2177 = vst [vmem:[%s2806_s2 + $0xb0] sm:$0xff] %v2656_v35   ;;  %v1491_v15 = vunpack.c.l.bf16 %v2654_v34  ;;  %v1690_v30 = vadd.f32 %v1689_v22, %v1627_v13  ;;  %v1492_v31 = vunpack.c.h.bf16 %v2654_v34 }
 0x11d   :  { %v765_v45 = vpop.f32.mrf.mxu0  ;;  %v893_v48 = vpop.f32.mrf.mxu1 }
 0x11e   :  { %v1628_v25 = vmul.f32 %v1491_v15, %v1491_v15  ;;  %v1555_v39 = vadd.f32 %v1554_v29, %v1491_v15  ;;  %v1629_v44 = vmul.f32 %v1492_v31, %v1492_v31 }
 0x11f   :  { %v767_v51 = vpop.f32.mrf.mxu0  ;;  %v895_v52 = vpop.f32.mrf.mxu1 }
 0x120   :  { %v1691_v40 = vadd.f32 %v1690_v30, %v1628_v25  ;;  %v1556_v50 = vadd.f32 %v1555_v39, %v1492_v31 }
 0x121   :  { %v768_v55 = vpop.f32.mrf.mxu0  ;;  %v896_v56 = vpop.f32.mrf.mxu1 }
 0x122   :  { %v1166_v60 = vpack.c.bf16 %v768_v55, %v765_v45  ;;  %v2668_v61 = vpack.c.bf16 %v896_v56, %v893_v48  ;;  %v1692_v34 = vadd.f32 %v1691_v40, %v1629_v44 }
 0x123   :  { %v770_v0 = vpop.f32.mrf.mxu0  ;;  %v898_v1 = vpop.f32.mrf.mxu1 }
 0x124   :  { %2162 = vst [vmem:[%s2806_s2 + $0x38] sm:$0xff] %v1166_v60   ;;  %2178 = vst [vmem:[%s2806_s2 + $0xb8] sm:$0xff] %v2668_v61   ;;  %v1493_v32 = vunpack.c.l.bf16 %v1166_v60  ;;  %v1494_v51 = vunpack.c.h.bf16 %v1166_v60 }
 0x125   :  { %v773_v4 = vpop.f32.mrf.mxu0  ;;  %v901_v5 = vpop.f32.mrf.mxu1 }
 0x126   :  { %v1630_v45 = vmul.f32 %v1493_v32, %v1493_v32  ;;  %v1557_v55 = vadd.f32 %v1556_v50, %v1493_v32  ;;  %v1631_v63 = vmul.f32 %v1494_v51, %v1494_v51 }
 0x127   :  { %v775_v58 = vpop.f32.mrf.mxu0  ;;  %v903_v8 = vpop.f32.mrf.mxu1 }
 0x128   :  { %v1693_v56 = vadd.f32 %v1692_v34, %v1630_v45  ;;  %v1558_v2 = vadd.f32 %v1557_v55, %v1494_v51 }
 0x129   :  { %v776_v16 = vpop.f32.mrf.mxu0  ;;  %v904_v18 = vpop.f32.mrf.mxu1 }
 0x12a   :  { %v1167_v20 = vpack.c.bf16 %v776_v16, %v773_v4  ;;  %v2687_v21 = vpack.c.bf16 %v904_v18, %v901_v5  ;;  %v1694_v5 = vadd.f32 %v1693_v56, %v1631_v63 }
 0x12b   :  { %v778_v23 = vpop.f32.mrf.mxu0  ;;  %v906_v24 = vpop.f32.mrf.mxu1 }
 0x12c   :  { %2163 = vst [vmem:[%s2806_s2 + $0x40] sm:$0xff] %v1167_v20   ;;  %2179 = vst [vmem:[%s2806_s2 + $0xc0] sm:$0xff] %v2687_v21   ;;  %v1495_v52 = vunpack.c.l.bf16 %v1167_v20  ;;  %v1496_v6 = vunpack.c.h.bf16 %v1167_v20 }
 0x12d   :  { %v781_v26 = vpop.f32.mrf.mxu0  ;;  %v909_v28 = vpop.f32.mrf.mxu1 }
 0x12e   :  { %v1632_v46 = vmul.f32 %v1495_v52, %v1495_v52  ;;  %v1559_v8 = vadd.f32 %v1558_v2, %v1495_v52  ;;  %v1633_v12 = vmul.f32 %v1496_v6, %v1496_v6 }
 0x12f   :  { %v783_v33 = vpop.f32.mrf.mxu0  ;;  %v911_v38 = vpop.f32.mrf.mxu1 }
 0x130   :  { %v1695_v9 = vadd.f32 %v1694_v5, %v1632_v46  ;;  %v1560_v19 = vadd.f32 %v1559_v8, %v1496_v6 }
 0x131   :  { %v784_v41 = vpop.f32.mrf.mxu0  ;;  %v912_v42 = vpop.f32.mrf.mxu1 }
 0x132   :  { %v1168_v36 = vpack.c.bf16 %v784_v41, %v781_v26  ;;  %v2697_v43 = vpack.c.bf16 %v912_v42, %v909_v28  ;;  %v1696_v20 = vadd.f32 %v1695_v9, %v1633_v12 }
 0x133   :  { %v786_v48 = vpop.f32.mrf.mxu0  ;;  %v914_v49 = vpop.f32.mrf.mxu1 }
 0x134   :  { %2164 = vst [vmem:[%s2806_s2 + $0x48] sm:$0xff] %v1168_v36   ;;  %2180 = vst [vmem:[%s2806_s2 + $0xc8] sm:$0xff] %v2697_v43   ;;  %v1497_v7 = vunpack.c.l.bf16 %v1168_v36  ;;  %v1498_v22 = vunpack.c.h.bf16 %v1168_v36 }
 0x135   :  { %v789_v53 = vpop.f32.mrf.mxu0  ;;  %v917_v54 = vpop.f32.mrf.mxu1 }
 0x136   :  { %v1634_v15 = vmul.f32 %v1497_v7, %v1497_v7  ;;  %v1561_v25 = vadd.f32 %v1560_v19, %v1497_v7  ;;  %v1635_v32 = vmul.f32 %v1498_v22, %v1498_v22 }
 0x137   :  { %v791_v57 = vpop.f32.mrf.mxu0  ;;  %v919_v62 = vpop.f32.mrf.mxu1 }
 0x138   :  { %v1697_v29 = vadd.f32 %v1696_v20, %v1634_v15  ;;  %v1562_v40 = vadd.f32 %v1561_v25, %v1498_v22 }
 0x139   :  { %v792_v0 = vpop.f32.mrf.mxu0  ;;  %v920_v1 = vpop.f32.mrf.mxu1 }
 0x13a   :  { %v1169_v3 = vpack.c.bf16 %v792_v0, %v789_v53  ;;  %v2706_v4 = vpack.c.bf16 %v920_v1, %v917_v54  ;;  %v1698_v41 = vadd.f32 %v1697_v29, %v1635_v32 }
 0x13b   :  { %v794_v58 = vpop.f32.mrf.mxu0  ;;  %v922_v60 = vpop.f32.mrf.mxu1 }
 0x13c   :  { %2165 = vst [vmem:[%s2806_s2 + $0x50] sm:$0xff] %v1169_v3   ;;  %2181 = vst [vmem:[%s2806_s2 + $0xd0] sm:$0xff] %v2706_v4   ;;  %v1499_v23 = vunpack.c.l.bf16 %v1169_v3  ;;  %v1500_v42 = vunpack.c.h.bf16 %v1169_v3 }
 0x13d   :  { %v797_v10 = vpop.f32.mrf.mxu0  ;;  %v925_v11 = vpop.f32.mrf.mxu1 }
 0x13e   :  { %v1636_v33 = vmul.f32 %v1499_v23, %v1499_v23  ;;  %v1563_v48 = vadd.f32 %v1562_v40, %v1499_v23  ;;  %v1637_v53 = vmul.f32 %v1500_v42, %v1500_v42 }
 0x13f   :  { %v799_v16 = vpop.f32.mrf.mxu0  ;;  %v927_v18 = vpop.f32.mrf.mxu1 }
 0x140   :  { %v1699_v49 = vadd.f32 %v1698_v41, %v1636_v33  ;;  %v1564_v57 = vadd.f32 %v1563_v48, %v1500_v42 }
 0x141   :  { %v800_v24 = vpop.f32.mrf.mxu0  ;;  %v928_v13 = vpop.f32.mrf.mxu1 }
 0x142   :  { %v1170_v26 = vpack.c.bf16 %v800_v24, %v797_v10  ;;  %v2715_v28 = vpack.c.bf16 %v928_v13, %v925_v11  ;;  %v1700_v62 = vadd.f32 %v1699_v49, %v1637_v53 }
 0x143   :  { %v802_v30 = vpop.f32.mrf.mxu0  ;;  %v930_v31 = vpop.f32.mrf.mxu1 }
 0x144   :  { %2166 = vst [vmem:[%s2806_s2 + $0x58] sm:$0xff] %v1170_v26   ;;  %2182 = vst [vmem:[%s2806_s2 + $0xd8] sm:$0xff] %v2715_v28   ;;  %v1501_v36 = vunpack.c.l.bf16 %v1170_v26  ;;  %v1502_v63 = vunpack.c.h.bf16 %v1170_v26 }
 0x145   :  { %v805_v38 = vpop.f32.mrf.mxu0  ;;  %v933_v39 = vpop.f32.mrf.mxu1 }
 0x146   :  { %v1638_v54 = vmul.f32 %v1501_v36, %v1501_v36  ;;  %v1565_v2 = vadd.f32 %v1564_v57, %v1501_v36  ;;  %v1639_v7 = vmul.f32 %v1502_v63, %v1502_v63 }
 0x147   :  { %v807_v44 = vpop.f32.mrf.mxu0  ;;  %v935_v45 = vpop.f32.mrf.mxu1 }
 0x148   :  { %v1701_v3 = vadd.f32 %v1700_v62, %v1638_v54  ;;  %v1566_v9 = vadd.f32 %v1565_v2, %v1502_v63 }
 0x149   :  { %v808_v50 = vpop.f32.mrf.mxu0  ;;  %v936_v34 = vpop.f32.mrf.mxu1 }
 0x14a   :  { %v1171_v51 = vpack.c.bf16 %v808_v50, %v805_v38  ;;  %v2724_v52 = vpack.c.bf16 %v936_v34, %v933_v39  ;;  %v1702_v12 = vadd.f32 %v1701_v3, %v1639_v7 }
 0x14b   :  { %v810_v55 = vpop.f32.mrf.mxu0  ;;  %v938_v56 = vpop.f32.mrf.mxu1 }
 0x14c   :  { %2167 = vst [vmem:[%s2806_s2 + $0x60] sm:$0xff] %v1171_v51   ;;  %2183 = vst [vmem:[%s2806_s2 + $0xe0] sm:$0xff] %v2724_v52   ;;  %v1503_v46 = vunpack.c.l.bf16 %v1171_v51  ;;  %v1504_v15 = vunpack.c.h.bf16 %v1171_v51 }
 0x14d   :  { %v813_v0 = vpop.f32.mrf.mxu0  ;;  %v941_v1 = vpop.f32.mrf.mxu1 }
 0x14e   :  { %v1640_v58 = vmul.f32 %v1503_v46, %v1503_v46  ;;  %v1567_v19 = vadd.f32 %v1566_v9, %v1503_v46  ;;  %v1641_v13 = vmul.f32 %v1504_v15, %v1504_v15 }
 0x14f   :  { %v815_v5 = vpop.f32.mrf.mxu0  ;;  %v943_v6 = vpop.f32.mrf.mxu1 }
 0x150   :  { %v1703_v22 = vadd.f32 %v1702_v12, %v1640_v58  ;;  %v1568_v29 = vadd.f32 %v1567_v19, %v1504_v15  ;;  %v1512_v12 = vunpack.c.h.bf16 %v2590_v17 }
 0x151   :  { %v816_v60 = vpop.f32.mrf.mxu0  ;;  %v944_v8 = vpop.f32.mrf.mxu1 }
 0x152   :  { %v1172_v10 = vpack.c.bf16 %v816_v60, %v813_v0  ;;  %v2733_v11 = vpack.c.bf16 %v944_v8, %v941_v1  ;;  %v1704_v31 = vadd.f32 %v1703_v22, %v1641_v13  ;;  %v1511_v60 = vunpack.c.l.bf16 %v2590_v17 }
 0x153   :  { %v818_v16 = vpop.f32.mrf.mxu0  ;;  %v946_v18 = vpop.f32.mrf.mxu1  ;;  %v1514_v13 = vunpack.c.h.bf16 %v2599_v27  ;;  %v1516_v17 = vunpack.c.h.bf16 %v2608_v37 }
 0x154   :  { %2168 = vst [vmem:[%s2806_s2 + $0x68] sm:$0xff] %v1172_v10   ;;  %v1505_v20 = vunpack.c.l.bf16 %v1172_v10  ;;  %2184 = vst [vmem:[%s2806_s2 + $0xe8] sm:$0xff] %v2733_v11   ;;  %v1506_v38 = vunpack.c.h.bf16 %v1172_v10  ;;  %v1648_v19 = vmul.f32 %v1511_v60, %v1511_v60 }
 0x155   :  { %v821_v23 = vpop.f32.mrf.mxu0  ;;  %v949_v24 = vpop.f32.mrf.mxu1 }
 0x156   :  { %v1642_v30 = vmul.f32 %v1505_v20, %v1505_v20  ;;  %v1569_v39 = vadd.f32 %v1568_v29, %v1505_v20  ;;  %v1643_v34 = vmul.f32 %v1506_v38, %v1506_v38  ;;  %v1513_v20 = vunpack.c.l.bf16 %v2599_v27 }
 0x157   :  { %v823_v25 = vpop.f32.mrf.mxu0  ;;  %v951_v26 = vpop.f32.mrf.mxu1  ;;  %v1518_v27 = vunpack.c.h.bf16 %v2619_v47 }
 0x158   :  { %v1705_v44 = vadd.f32 %v1704_v31, %v1642_v30  ;;  %v1570_v50 = vadd.f32 %v1569_v39, %v1506_v38  ;;  %v1650_v29 = vmul.f32 %v1513_v20, %v1513_v20  ;;  %v1515_v30 = vunpack.c.l.bf16 %v2608_v37 }
 0x159   :  { %v824_v32 = vpop.f32.mrf.mxu0  ;;  %v952_v33 = vpop.f32.mrf.mxu1  ;;  %v1520_v37 = vunpack.c.h.bf16 %v2631_v59 }
 0x15a   :  { %v1173_v40 = vpack.c.bf16 %v824_v32, %v821_v23  ;;  %v2742_v41 = vpack.c.bf16 %v952_v33, %v949_v24  ;;  %v1706_v55 = vadd.f32 %v1705_v44, %v1643_v34  ;;  %v1649_v24 = vmul.f32 %v1512_v12, %v1512_v12 }
 0x15b   :  { %v826_v42 = vpop.f32.mrf.mxu0  ;;  %v954_v36 = vpop.f32.mrf.mxu1  ;;  %v1651_v33 = vmul.f32 %v1514_v13, %v1514_v13  ;;  %v1519_v34 = vunpack.c.l.bf16 %v2631_v59  ;;  %v1524_v59 = vunpack.c.h.bf16 %v2656_v35 }
 0x15c   :  { %2169 = vst [vmem:[%s2806_s2 + $0x70] sm:$0xff] %v1173_v40   ;;  %v1507_v45 = vunpack.c.l.bf16 %v1173_v40  ;;  %2185 = vst [vmem:[%s2806_s2 + $0xf0] sm:$0xff] %v2742_v41   ;;  %v1508_v56 = vunpack.c.h.bf16 %v1173_v40  ;;  %v1652_v40 = vmul.f32 %v1515_v30, %v1515_v30  ;;  %v1517_v42 = vunpack.c.l.bf16 %v2619_v47 }
 0x15d   :  { %v829_v48 = vpop.f32.mrf.mxu0  ;;  %v957_v49 = vpop.f32.mrf.mxu1  ;;  %v1522_v47 = vunpack.c.h.bf16 %v2643_v14 }
 0x15e   :  { %v1644_v51 = vmul.f32 %v1507_v45, %v1507_v45  ;;  %v1571_v57 = vadd.f32 %v1570_v50, %v1507_v45  ;;  %v1645_v6 = vmul.f32 %v1508_v56, %v1508_v56  ;;  %v1653_v45 = vmul.f32 %v1516_v17, %v1516_v17 }
 0x15f   :  { %v831_v53 = vpop.f32.mrf.mxu0  ;;  %v959_v54 = vpop.f32.mrf.mxu1  ;;  %v1654_v50 = vmul.f32 %v1517_v42, %v1517_v42 }
 0x160   :  { %v1707_v46 = vadd.f32 %v1706_v55, %v1644_v51  ;;  %v1572_v5 = vadd.f32 %v1571_v57, %v1508_v56  ;;  %v1655_v54 = vmul.f32 %v1518_v27, %v1518_v27  ;;  %v1656_v57 = vmul.f32 %v1519_v34, %v1519_v34 }
 0x161   :  { %v832_v62 = vpop.f32.mrf.mxu0  ;;  %v960_v63 = vpop.f32.mrf.mxu1 }
 0x162   :  { %v1174_v0 = vpack.c.bf16 %v832_v62, %v829_v48  ;;  %v2751_v1 = vpack.c.bf16 %v960_v63, %v957_v49  ;;  %v1708_v8 = vadd.f32 %v1707_v46, %v1645_v6  ;;  %v1521_v62 = vunpack.c.l.bf16 %v2643_v14 }
 0x163   :  { %v834_v2 = vpop.f32.mrf.mxu0  ;;  %v962_v3 = vpop.f32.mrf.mxu1  ;;  %v1523_v6 = vunpack.c.l.bf16 %v2656_v35  ;;  %v1526_v14 = vunpack.c.h.bf16 %v2668_v61  ;;  %v1528_v35 = vunpack.c.h.bf16 %v2687_v21 }
 0x164   :  { %2170 = vst [vmem:[%s2806_s2 + $0x78] sm:$0xff] %v1174_v0   ;;  %v1509_v7 = vunpack.c.l.bf16 %v1174_v0  ;;  %v1510_v58 = vunpack.c.h.bf16 %v1174_v0  ;;  %2186 = vst [vmem:[%s2806_s2 + $0xf8] sm:$0xff] %v2751_v1   ;;  %v1657_v0 = vmul.f32 %v1520_v37, %v1520_v37 }
 0x166   :  { %v1573_v9 = vadd.f32 %v1572_v5, %v1509_v7  ;;  %v1646_v10 = vmul.f32 %v1509_v7, %v1509_v7  ;;  %v1647_v16 = vmul.f32 %v1510_v58, %v1510_v58  ;;  %v1658_v5 = vmul.f32 %v1521_v62, %v1521_v62 }
 0x168   :  { %v1574_v15 = vadd.f32 %v1573_v9, %v1510_v58  ;;  %v1709_v18 = vadd.f32 %v1708_v8, %v1646_v10  ;;  %v1660_v10 = vmul.f32 %v1523_v6, %v1523_v6 }
 0x16a   :  { %v1575_v22 = vadd.f32 %v1574_v15, %v1511_v60  ;;  %v1710_v23 = vadd.f32 %v1709_v18, %v1647_v16  ;;  %v1659_v60 = vmul.f32 %v1522_v47, %v1522_v47  ;;  %v1661_v18 = vmul.f32 %v1524_v59, %v1524_v59 }
 0x16c   :  { %v1576_v25 = vadd.f32 %v1575_v22, %v1512_v12  ;;  %v1711_v26 = vadd.f32 %v1710_v23, %v1648_v19  ;;  %v1525_v12 = vunpack.c.l.bf16 %v2668_v61  ;;  %v1527_v23 = vunpack.c.l.bf16 %v2687_v21 }
 0x16e   :  { %v1577_v31 = vadd.f32 %v1576_v25, %v1513_v20  ;;  %v1712_v32 = vadd.f32 %v1711_v26, %v1649_v24  ;;  %v1662_v22 = vmul.f32 %v1525_v12, %v1525_v12  ;;  %v1663_v25 = vmul.f32 %v1526_v14, %v1526_v14 }
 0x170   :  { %v1578_v38 = vadd.f32 %v1577_v31, %v1514_v13  ;;  %v1713_v39 = vadd.f32 %v1712_v32, %v1650_v29  ;;  %v1664_v31 = vmul.f32 %v1527_v23, %v1527_v23 }
 0x172   :  { %v1579_v36 = vadd.f32 %v1578_v38, %v1515_v30  ;;  %v1714_v44 = vadd.f32 %v1713_v39, %v1651_v33  ;;  %v1529_v33 = vunpack.c.l.bf16 %v2697_v43  ;;  %v1665_v38 = vmul.f32 %v1528_v35, %v1528_v35 }
 0x173   :  { %v1530_v39 = vunpack.c.h.bf16 %v2697_v43  ;;  %v1534_v43 = vunpack.c.h.bf16 %v2715_v28 }
 0x174   :  { %v1580_v48 = vadd.f32 %v1579_v36, %v1516_v17  ;;  %v1715_v49 = vadd.f32 %v1714_v44, %v1652_v40  ;;  %v1666_v36 = vmul.f32 %v1529_v33, %v1529_v33  ;;  %v1531_v44 = vunpack.c.l.bf16 %v2706_v4 }
 0x176   :  { %v1581_v51 = vadd.f32 %v1580_v48, %v1517_v42  ;;  %v1716_v53 = vadd.f32 %v1715_v49, %v1653_v45  ;;  %v1532_v48 = vunpack.c.h.bf16 %v2706_v4  ;;  %v1536_v4 = vunpack.c.h.bf16 %v2724_v52 }
 0x178   :  { %v1582_v55 = vadd.f32 %v1581_v51, %v1518_v27  ;;  %v1717_v56 = vadd.f32 %v1716_v53, %v1654_v50  ;;  %v1667_v27 = vmul.f32 %v1530_v39, %v1530_v39  ;;  %v1533_v51 = vunpack.c.l.bf16 %v2715_v28 }
 0x179   :  { %v1538_v28 = vunpack.c.h.bf16 %v2733_v11 }
 0x17a   :  { %v1718_v63 = vadd.f32 %v1717_v56, %v1655_v54  ;;  %v1583_v46 = vadd.f32 %v1582_v55, %v1519_v34  ;;  %v1668_v34 = vmul.f32 %v1531_v44, %v1531_v44  ;;  %v1669_v54 = vmul.f32 %v1532_v48, %v1532_v48 }
 0x17c   :  { %v1584_v2 = vadd.f32 %v1583_v46, %v1520_v37  ;;  %v1719_v3 = vadd.f32 %v1718_v63, %v1656_v57  ;;  %v1670_v57 = vmul.f32 %v1533_v51, %v1533_v51  ;;  %v1671_v46 = vmul.f32 %v1534_v43, %v1534_v43 }
 0x17e   :  { %v1585_v7 = vadd.f32 %v1584_v2, %v1521_v62  ;;  %v1720_v58 = vadd.f32 %v1719_v3, %v1657_v0  ;;  %v1535_v62 = vunpack.c.l.bf16 %v2724_v52  ;;  %v1540_v52 = vunpack.c.h.bf16 %v2742_v41 }
 0x180   :  { %v1586_v8 = vadd.f32 %v1585_v7, %v1522_v47  ;;  %v1721_v9 = vadd.f32 %v1720_v58, %v1658_v5  ;;  %v1672_v3 = vmul.f32 %v1535_v62, %v1535_v62  ;;  %v1537_v5 = vunpack.c.l.bf16 %v2733_v11 }
 0x181   :  { %v1673_v7 = vmul.f32 %v1536_v4, %v1536_v4  ;;  %v1542_v11 = vunpack.c.h.bf16 %v2751_v1 }
 0x182   :  { %v1587_v15 = vadd.f32 %v1586_v8, %v1523_v6  ;;  %v1722_v16 = vadd.f32 %v1721_v9, %v1659_v60  ;;  %v1674_v8 = vmul.f32 %v1537_v5, %v1537_v5  ;;  %v1539_v9 = vunpack.c.l.bf16 %v2742_v41 }
 0x184   :  { %v1588_v19 = vadd.f32 %v1587_v15, %v1524_v59  ;;  %v1723_v20 = vadd.f32 %v1722_v16, %v1660_v10 }
 0x186   :  { %v1589_v24 = vadd.f32 %v1588_v19, %v1525_v12  ;;  %v1724_v13 = vadd.f32 %v1723_v20, %v1661_v18  ;;  %v1675_v12 = vmul.f32 %v1538_v28, %v1538_v28  ;;  %v1541_v19 = vunpack.c.l.bf16 %v2751_v1  ;;  %v1543_v1 = vld [vmem:[%s2807_s3] sm:$0x1] }
 0x188   :  { %v1590_v26 = vadd.f32 %v1589_v24, %v1526_v14  ;;  %v1725_v29 = vadd.f32 %v1724_v13, %v1662_v22  ;;  %v1676_v14 = vmul.f32 %v1539_v9, %v1539_v9  ;;  %v1677_v22 = vmul.f32 %v1540_v52, %v1540_v52 }
 0x18a   :  { %v1591_v30 = vadd.f32 %v1590_v26, %v1527_v23  ;;  %v1726_v32 = vadd.f32 %v1725_v29, %v1663_v25  ;;  %v1678_v25 = vmul.f32 %v1541_v19, %v1541_v19  ;;  %v1679_v26 = vmul.f32 %v1542_v11, %v1542_v11 }
 0x18c   :  { %v1592_v17 = vadd.f32 %v1591_v30, %v1528_v35  ;;  %v1727_v61 = vadd.f32 %v1726_v32, %v1664_v31 }
 0x18e   :  { %v1728_v40 = vadd.f32 %v1727_v61, %v1665_v38  ;;  %v1593_v42 = vadd.f32 %v1592_v17, %v1529_v33 }
 0x190   :  { %v1594_v45 = vadd.f32 %v1593_v42, %v1530_v39  ;;  %v1729_v21 = vadd.f32 %v1728_v40, %v1666_v36 }
 0x192   :  { %v1730_v49 = vadd.f32 %v1729_v21, %v1667_v27  ;;  %v1595_v50 = vadd.f32 %v1594_v45, %v1531_v44  ;;  %v1615_v44 = vld [vmem:[%s2808_s4] sm:$0x1] }
 0x194   :  { %v1596_v53 = vadd.f32 %v1595_v50, %v1532_v48  ;;  %v1731_v37 = vadd.f32 %v1730_v49, %v1668_v34 }
 0x196   :  { %v1732_v55 = vadd.f32 %v1731_v37, %v1669_v54  ;;  %v1597_v56 = vadd.f32 %v1596_v53, %v1533_v51 }
 0x198   :  { %v1598_v63 = vadd.f32 %v1597_v56, %v1534_v43  ;;  %v1733_v0 = vadd.f32 %v1732_v55, %v1670_v57 }
 0x19a   :  { %v1734_v47 = vadd.f32 %v1733_v0, %v1671_v46  ;;  %v1599_v2 = vadd.f32 %v1598_v63, %v1535_v62 }
 0x19c   :  { %v1600_v6 = vadd.f32 %v1599_v2, %v1536_v4  ;;  %v1735_v58 = vadd.f32 %v1734_v47, %v1672_v3 }
 0x19e   :  { %v1736_v60 = vadd.f32 %v1735_v58, %v1673_v7  ;;  %v1601_v59 = vadd.f32 %v1600_v6, %v1537_v5 }
 0x1a0   :  { %v1602_v10 = vadd.f32 %v1601_v59, %v1538_v28  ;;  %v1737_v15 = vadd.f32 %v1736_v60, %v1674_v8 }
 0x1a2   :  { %v1738_v16 = vadd.f32 %v1737_v15, %v1675_v12  ;;  %v1603_v18 = vadd.f32 %v1602_v10, %v1539_v9 }
 0x1a4   :  { %v1604_v20 = vadd.f32 %v1603_v18, %v1540_v52  ;;  %v1739_v23 = vadd.f32 %v1738_v16, %v1676_v14 }
 0x1a6   :  { %v1740_v24 = vadd.f32 %v1739_v23, %v1677_v22  ;;  %v1605_v13 = vadd.f32 %v1604_v20, %v1541_v19 }
 0x1a8   :  { %v1606_v35 = vadd.f32 %v1605_v13, %v1542_v11  ;;  %v1741_v29 = vadd.f32 %v1740_v24, %v1678_v25 }
 0x1aa   :  { %v1607_v30 = vrot.slane %v1606_v35, 4  ;;  %v1742_v31 = vadd.f32 %v1741_v29, %v1679_v26 }
 0x1ac   :  { %v1608_v32 = vadd.f32 %v1607_v30, %v1606_v35  ;;  %v1743_v41 = vrot.slane %v1742_v31, 4 }
 0x1ae   :  { %v1609_v33 = vrot.slane %v1608_v32, 2  ;;  %v1744_v17 = vadd.f32 %v1743_v41, %v1742_v31 }
 0x1b0   :  { %v1610_v38 = vadd.f32 %v1609_v33, %v1608_v32  ;;  %v1745_v61 = vrot.slane %v1744_v17, 2 }
 0x1b2   :  { %v1611_v39 = vrot.slane %v1610_v38, 1  ;;  %v1746_v40 = vadd.f32 %v1745_v61, %v1744_v17 }
 0x1b4   :  { %v1612_v42 = vadd.f32 %v1611_v39, %v1610_v38  ;;  %v1747_v36 = vrot.slane %v1746_v40, 1 }
 0x1b6   :  { %v1613_v45 = vadd.f32 %v1612_v42, %v1543_v1  ;;  %v1748_v27 = vadd.f32 %v1747_v36, %v1746_v40 }
 0x1b8   :  { %1614 = vst [vmem:[%s2807_s3] sm:$0x1] %v1613_v45  ;;  %v1749_v21 = vadd.f32 %v1748_v27, %v1615_v44 }
 0x1ba   :  { %1750 = vst [vmem:[%s2808_s4] sm:$0x1] %v1749_v21 }

// kernel: squeeze.19
= control target key start
LH: loop header
LB: loop body
LE: loop exit
PB: predicated region body
PF: predicated region fallthrough
CT: control target
= control target key end

     0   :  { %s40_s8 = smov 116   ;;  %vm8_vm0 = vcmask 31744   ;;  %s41_s9 = smov 120   ;;  %s58_s0 = inlined_call_operand.vmem [shape: f32[16], index: 0, kind: input, shape index: {}]   ;;  %s59_s1 = inlined_call_operand.vmem [shape: f32[4,4], index: 1, kind: output, shape index: {}]  }
   0x1   :  { %v5_v0 = vld [vmem:[%s58_s0] sm:$0x1]  ;;  %s39_s0 = smov 124  }
   0x2   :  { %6 = vst [vmem:[#allocation1] sm:$0x1] %v5_v0 }
   0x9   :  { %v10_v1 = vld [vmem:[#allocation1] sm:$0x1]  }
   0xa   :  { %v22_v2 = vld [vmem:[#allocation1] sm:$0x1]   ;;  %11 = vrot.lane.b32.xlu0 %v10_v1, %s39_s0 }
   0xb   :  { %23 = vrot.lane.b32.xlu1 %v22_v2, %s40_s8  ;;  %v7_v3 = vld [vmem:[#allocation1] sm:$0x1]  }
   0xc   :  { %v16_v4 = vld [vmem:[#allocation1] sm:$0x1]   ;;  %9 = vst.msk [vmem:[#allocation0] sm:$0x1] %vm8_vm0, %v7_v3  }
   0xe   :  { %17 = vrot.lane.b32.xlu0 %v16_v4, %s41_s9 }
  0x7c   :  { %v12_v5 = vpop.permute.xlu0 %11  }
  0x7d   :  { %v24_v6 = vpop.permute.xlu1 %23   ;;  %15 = vst.msk [vmem:[#allocation0 + $0x1] sm:$0x1] %vm8_vm0, %v12_v5  }
  0x7e   :  { %27 = vst.msk [vmem:[#allocation0 + $0x3] sm:$0x1] %vm8_vm0, %v24_v6  }
  0x80   :  { %v18_v7 = vpop.permute.xlu0 %17  }
  0x81   :  { %21 = vst.msk [vmem:[#allocation0 + $0x2] sm:$0x1] %vm8_vm0, %v18_v7  }
  0x88   :  { %v32_v8 = vld [vmem:[#allocation0] sm:$0xf] }
  0x89   :  { %35 = vst [vmem:[%s59_s1] sm:$0xf] %v32_v8 }

// kernel: tile.98
= control target key start
LH: loop header
LB: loop body
LE: loop exit
PB: predicated region body
PF: predicated region fallthrough
CT: control target
= control target key end

     0   :  { %s22_s0 = inlined_call_operand.vmem [shape: f32[4], index: 0, kind: input, shape index: {}]   ;;  %s23_s1 = inlined_call_operand.vmem [shape: f32[4,4], index: 1, kind: output, shape index: {}]  }
   0x1   :  { %v4_v0 = vld [vmem:[%s22_s0] ss:$0 sm:$0xff] }
   0x2   :  { %5 = vst [vmem:[%s23_s1] sm:$0xf] %v4_v0 }

// kernel: generator_forward.10
= control target key start
LH: loop header
LB: loop body
LE: loop exit
PB: predicated region body
PF: predicated region fallthrough
CT: control target
= control target key end

     0   :  { %vm1474_vm0 = vcmask 654336   ;;  %s9370_s1 = inlined_call_operand.vmem [shape: bf16[80,128], index: 1, kind: input, shape index: {}]   ;;  %s9371_s0 = inlined_call_operand.vmem [shape: bf16[2048,80], index: 0, kind: input, shape index: {}]   ;;  %s9372_s2 = inlined_call_operand.vmem [shape: bf16[2048,128], index: 2, kind: output, shape index: {0}]   ;;  %s9373_s3 = inlined_call_operand.vmem [shape: f32[1,128], index: 3, kind: output, shape index: {1}]   ;;  %s9374_s4 = inlined_call_operand.vmem [shape: f32[1,128], index: 4, kind: output, shape index: {2}]  }
   0x1   :  { %v7969_v0 = vld [vmem:[%s9370_s1 + $0x20] sm:$0xff]   ;;  %v7970_v1 = vld [vmem:[%s9370_s1 + $0x18] sm:$0xff]   ;;  %v7971_v2 = vld [vmem:[%s9370_s1 + $0x10] sm:$0xff]  }
   0x2   :  { %7692 = vmatprep.subr.bf16.mxu0 %v7969_v0  ;;  %7958 = vmatprep.subr.bf16.mxu1 %v7969_v0  ;;  %v7974_v3 = vld [vmem:[%s9371_s0] sm:$0xff]   ;;  %v7972_v4 = vld [vmem:[%s9370_s1 + $0x8] sm:$0xff]   ;;  %v7976_v7 = vld [vmem:[%s9371_s0 + $0x10] sm:$0xff]  }
   0x3   :  { %7693 = vmatpush3.bf16.msra.mxu0 %v7969_v0  ;;  %7963 = vmatpush3.bf16.msra.mxu1 %v7969_v0  ;;  %v7973_v5 = vld [vmem:[%s9370_s1] sm:$0xff]   ;;  %v7975_v6 = vld [vmem:[%s9371_s0 + $0x8] sm:$0xff]   ;;  %v7977_v8 = vld [vmem:[%s9371_s0 + $0x18] sm:$0xff]  }
   0x4   :  { %7694 = vmatprep.subr.bf16.mxu0 %v7970_v1  ;;  %7959 = vmatprep.subr.bf16.mxu1 %v7970_v1  ;;  %v7978_v9 = vld [vmem:[%s9371_s0 + $0x20] sm:$0xff]   ;;  %v7979_v10 = vld [vmem:[%s9371_s0 + $0x28] sm:$0xff]   ;;  %v7980_v11 = vld [vmem:[%s9371_s0 + $0x30] sm:$0xff]  }
   0x5   :  { %7702 = vmatprep.mubr.msk.bf16.mxu0 %vm1474_vm0, %v7974_v3  ;;  %v7981_v12 = vld [vmem:[%s9371_s0 + $0x38] sm:$0xff]   ;;  %v7982_v13 = vld [vmem:[%s9371_s0 + $0x40] sm:$0xff]   ;;  %v7983_v14 = vld [vmem:[%s9371_s0 + $0x48] sm:$0xff]  }
   0x6   :  { %v7984_v15 = vld [vmem:[%s9371_s0 + $0x50] sm:$0xff]   ;;  %v7985_v16 = vld [vmem:[%s9371_s0 + $0x58] sm:$0xff]   ;;  %v7986_v17 = vld [vmem:[%s9371_s0 + $0x60] sm:$0xff]  }
   0x7   :  { %7695 = vmatpush3.bf16.msra.mxu0 %v7970_v1  ;;  %7964 = vmatpush3.bf16.msra.mxu1 %v7970_v1  ;;  %v7987_v18 = vld [vmem:[%s9371_s0 + $0x68] sm:$0xff]   ;;  %v7988_v19 = vld [vmem:[%s9371_s0 + $0x70] sm:$0xff]   ;;  %v7989_v20 = vld [vmem:[%s9371_s0 + $0x78] sm:$0xff]  }
   0x8   :  { %7696 = vmatprep.subr.bf16.mxu0 %v7971_v2  ;;  %7960 = vmatprep.subr.bf16.mxu1 %v7971_v2  ;;  %v7990_v21 = vld [vmem:[%s9371_s0 + $0x80] sm:$0xff]   ;;  %v7991_v22 = vld [vmem:[%s9371_s0 + $0x88] sm:$0xff]   ;;  %v7992_v23 = vld [vmem:[%s9371_s0 + $0x90] sm:$0xff]  }
   0x9   :  { %v7993_v24 = vld [vmem:[%s9371_s0 + $0x98] sm:$0xff]   ;;  %v7994_v25 = vld [vmem:[%s9371_s0 + $0xa0] sm:$0xff]   ;;  %v7995_v26 = vld [vmem:[%s9371_s0 + $0xa8] sm:$0xff]  }
   0xa   :  { %v7996_v27 = vld [vmem:[%s9371_s0 + $0xb0] sm:$0xff]   ;;  %v7997_v28 = vld [vmem:[%s9371_s0 + $0xb8] sm:$0xff]   ;;  %v7998_v29 = vld [vmem:[%s9371_s0 + $0xc0] sm:$0xff]  }
   0xb   :  { %7697 = vmatpush3.bf16.msra.mxu0 %v7971_v2  ;;  %7965 = vmatpush3.bf16.msra.mxu1 %v7971_v2  ;;  %v7999_v30 = vld [vmem:[%s9371_s0 + $0xc8] sm:$0xff]   ;;  %v8000_v31 = vld [vmem:[%s9371_s0 + $0xd0] sm:$0xff]   ;;  %v8001_v32 = vld [vmem:[%s9371_s0 + $0xd8] sm:$0xff]  }
   0xc   :  { %7698 = vmatprep.subr.bf16.mxu0 %v7972_v4  ;;  %7961 = vmatprep.subr.bf16.mxu1 %v7972_v4  ;;  %v8002_v33 = vld [vmem:[%s9371_s0 + $0xe0] sm:$0xff]   ;;  %v8003_v34 = vld [vmem:[%s9371_s0 + $0xe8] sm:$0xff]   ;;  %v8004_v35 = vld [vmem:[%s9371_s0 + $0xf0] sm:$0xff]  }
   0xd   :  { %v8005_v36 = vld [vmem:[%s9371_s0 + $0xf8] sm:$0xff]   ;;  %v8006_v37 = vld [vmem:[%s9371_s0 + $0x100] sm:$0xff]   ;;  %v8039_v39 = vld [vmem:[%s9371_s0 + $0x208] sm:$0xff]  }
   0xe   :  { %v8038_v38 = vld [vmem:[%s9371_s0 + $0x200] sm:$0xff]   ;;  %v8007_v40 = vld [vmem:[%s9371_s0 + $0x108] sm:$0xff]   ;;  %v8008_v41 = vld [vmem:[%s9371_s0 + $0x110] sm:$0xff]  }
   0xf   :  { %7699 = vmatpush3.bf16.msra.mxu0 %v7972_v4  ;;  %7966 = vmatpush3.bf16.msra.mxu1 %v7972_v4  ;;  %v8040_v42 = vld [vmem:[%s9371_s0 + $0x210] sm:$0xff]   ;;  %v8041_v43 = vld [vmem:[%s9371_s0 + $0x218] sm:$0xff]   ;;  %v8010_v45 = vld [vmem:[%s9371_s0 + $0x120] sm:$0xff]  }
  0x10   :  { %7700 = vmatprep.subr.bf16.mxu0 %v7973_v5  ;;  %7962 = vmatprep.subr.bf16.mxu1 %v7973_v5  ;;  %v8009_v44 = vld [vmem:[%s9371_s0 + $0x118] sm:$0xff]   ;;  %v8042_v46 = vld [vmem:[%s9371_s0 + $0x220] sm:$0xff]   ;;  %v8043_v47 = vld [vmem:[%s9371_s0 + $0x228] sm:$0xff]  }
  0x11   :  { %7830 = vmatprep.mubr.msk.bf16.mxu1 %vm1474_vm0, %v8038_v38  ;;  %v8011_v48 = vld [vmem:[%s9371_s0 + $0x128] sm:$0xff]   ;;  %v8012_v49 = vld [vmem:[%s9371_s0 + $0x130] sm:$0xff]   ;;  %v8045_v51 = vld [vmem:[%s9371_s0 + $0x238] sm:$0xff]  }
  0x12   :  { %v8044_v50 = vld [vmem:[%s9371_s0 + $0x230] sm:$0xff]   ;;  %v8013_v52 = vld [vmem:[%s9371_s0 + $0x138] sm:$0xff]   ;;  %v8014_v53 = vld [vmem:[%s9371_s0 + $0x140] sm:$0xff]  }
  0x13   :  { %7701 = vmatpush3.bf16.msra.mxu0 %v7973_v5  ;;  %7967 = vmatpush3.bf16.msra.mxu1 %v7973_v5  ;;  %v8046_v54 = vld [vmem:[%s9371_s0 + $0x240] sm:$0xff]   ;;  %v8047_v55 = vld [vmem:[%s9371_s0 + $0x248] sm:$0xff]   ;;  %v8016_v57 = vld [vmem:[%s9371_s0 + $0x150] sm:$0xff]  }
  0x14   :  { %v8015_v56 = vld [vmem:[%s9371_s0 + $0x148] sm:$0xff]   ;;  %v8048_v58 = vld [vmem:[%s9371_s0 + $0x250] sm:$0xff]   ;;  %v8049_v59 = vld [vmem:[%s9371_s0 + $0x258] sm:$0xff]  }
  0x15   :  { %v8017_v60 = vld [vmem:[%s9371_s0 + $0x158] sm:$0xff]   ;;  %v8018_v61 = vld [vmem:[%s9371_s0 + $0x160] sm:$0xff]   ;;  %v8051_v63 = vld [vmem:[%s9371_s0 + $0x268] sm:$0xff]  }
  0x16   :  { %7703 = vmatmul.mubr.msk.bf16.vlgmr.msra.gmra.mxu0 %vm1474_vm0, %v7975_v6  ;;  %7831 = vmatmul.mubr.msk.bf16.vlgmr.msra.gmra.mxu1 %vm1474_vm0, %v8039_v39  ;;  %v8050_v62 = vld [vmem:[%s9371_s0 + $0x260] sm:$0xff]   ;;  %v8019_v0 = vld [vmem:[%s9371_s0 + $0x168] sm:$0xff]   ;;  %v8020_v1 = vld [vmem:[%s9371_s0 + $0x170] sm:$0xff]  }
  0x17   :  { %7706 = vmatprep.mubr.msk.bf16.mxu0 %vm1474_vm0, %v7976_v7  ;;  %7834 = vmatprep.mubr.msk.bf16.mxu1 %vm1474_vm0, %v8040_v42  ;;  %v8052_v2 = vld [vmem:[%s9371_s0 + $0x270] sm:$0xff]   ;;  %v8053_v3 = vld [vmem:[%s9371_s0 + $0x278] sm:$0xff]   ;;  %v8022_v5 = vld [vmem:[%s9371_s0 + $0x180] sm:$0xff]  }
  0x18   :  { %v8021_v4 = vld [vmem:[%s9371_s0 + $0x178] sm:$0xff]   ;;  %v8054_v6 = vld [vmem:[%s9371_s0 + $0x280] sm:$0xff]   ;;  %v8055_v7 = vld [vmem:[%s9371_s0 + $0x288] sm:$0xff]  }
  0x19   :  { %v8060_v42 = vld [vmem:[%s9371_s0 + $0x2b0] sm:$0xff]  }
  0x1e   :  { %7707 = vmatmul.mubr.msk.bf16.gmra.mxu0 %vm1474_vm0, %v7977_v8  ;;  %7835 = vmatmul.mubr.msk.bf16.gmra.mxu1 %vm1474_vm0, %v8041_v43  ;;  %v8023_v8 = vld [vmem:[%s9371_s0 + $0x188] sm:$0xff]   ;;  %v8061_v43 = vld [vmem:[%s9371_s0 + $0x2b8] sm:$0xff]  }
  0x1f   :  { %7710 = vmatprep.mubr.msk.bf16.mxu0 %vm1474_vm0, %v7978_v9  ;;  %7838 = vmatprep.mubr.msk.bf16.mxu1 %vm1474_vm0, %v8042_v46  ;;  %v8024_v9 = vld [vmem:[%s9371_s0 + $0x190] sm:$0xff]  }
  0x26   :  { %7711 = vmatmul.mubr.msk.bf16.gmra.mxu0 %vm1474_vm0, %v7979_v10  ;;  %7839 = vmatmul.mubr.msk.bf16.gmra.mxu1 %vm1474_vm0, %v8043_v47 }
  0x27   :  { %7714 = vmatprep.mubr.msk.bf16.mxu0 %vm1474_vm0, %v7980_v11  ;;  %7842 = vmatprep.mubr.msk.bf16.mxu1 %vm1474_vm0, %v8044_v50  ;;  %v8056_v11 = vld [vmem:[%s9371_s0 + $0x290] sm:$0xff]  }
  0x2e   :  { %7715 = vmatmul.mubr.msk.bf16.gmra.mxu0 %vm1474_vm0, %v7981_v12  ;;  %7843 = vmatmul.mubr.msk.bf16.gmra.mxu1 %vm1474_vm0, %v8045_v51  ;;  %v8057_v12 = vld [vmem:[%s9371_s0 + $0x298] sm:$0xff]  }
  0x2f   :  { %7718 = vmatprep.mubr.msk.bf16.mxu0 %vm1474_vm0, %v7982_v13  ;;  %7846 = vmatprep.mubr.msk.bf16.mxu1 %vm1474_vm0, %v8046_v54  ;;  %v8029_v54 = vld [vmem:[%s9371_s0 + $0x1b8] sm:$0xff]  }
  0x36   :  { %7719 = vmatmul.mubr.msk.bf16.gmra.mxu0 %vm1474_vm0, %v7983_v14  ;;  %7847 = vmatmul.mubr.msk.bf16.gmra.mxu1 %vm1474_vm0, %v8047_v55 }
  0x37   :  { %7722 = vmatprep.mubr.msk.bf16.mxu0 %vm1474_vm0, %v7984_v15  ;;  %7850 = vmatprep.mubr.msk.bf16.mxu1 %vm1474_vm0, %v8048_v58  ;;  %v8025_v15 = vld [vmem:[%s9371_s0 + $0x198] sm:$0xff]  }
  0x3e   :  { %7723 = vmatmul.mubr.msk.bf16.gmra.mxu0 %vm1474_vm0, %v7985_v16  ;;  %7851 = vmatmul.mubr.msk.bf16.gmra.mxu1 %vm1474_vm0, %v8049_v59 }
  0x3f   :  { %7726 = vmatprep.mubr.msk.bf16.mxu0 %vm1474_vm0, %v7986_v17  ;;  %7854 = vmatprep.mubr.msk.bf16.mxu1 %vm1474_vm0, %v8050_v62  ;;  %v8026_v17 = vld [vmem:[%s9371_s0 + $0x1a0] sm:$0xff]  }
  0x46   :  { %7727 = vmatmul.mubr.msk.bf16.gmra.mxu0 %vm1474_vm0, %v7987_v18  ;;  %7855 = vmatmul.mubr.msk.bf16.gmra.mxu1 %vm1474_vm0, %v8051_v63 }
  0x47   :  { %7730 = vmatprep.mubr.msk.bf16.mxu0 %vm1474_vm0, %v7988_v19  ;;  %7858 = vmatprep.mubr.msk.bf16.mxu1 %vm1474_vm0, %v8052_v2 }
  0x4e   :  { %7731 = vmatmul.mubr.msk.bf16.gmra.mxu0 %vm1474_vm0, %v7989_v20  ;;  %7859 = vmatmul.mubr.msk.bf16.gmra.mxu1 %vm1474_vm0, %v8053_v3  ;;  %v8062_v3 = vld [vmem:[%s9371_s0 + $0x2c0] sm:$0xff]  }
  0x4f   :  { %7734 = vmatprep.mubr.msk.bf16.mxu0 %vm1474_vm0, %v7990_v21  ;;  %7862 = vmatprep.mubr.msk.bf16.mxu1 %vm1474_vm0, %v8054_v6  ;;  %v8058_v21 = vld [vmem:[%s9371_s0 + $0x2a0] sm:$0xff]  }
  0x56   :  { %7735 = vmatmul.mubr.msk.bf16.gmra.mxu0 %vm1474_vm0, %v7991_v22  ;;  %7863 = vmatmul.mubr.msk.bf16.gmra.mxu1 %vm1474_vm0, %v8055_v7 }
  0x57   :  { %7738 = vmatprep.mubr.msk.bf16.mxu0 %vm1474_vm0, %v7992_v23  ;;  %7866 = vmatprep.mubr.msk.bf16.mxu1 %vm1474_vm0, %v8056_v11 }
  0x5e   :  { %7739 = vmatmul.mubr.msk.bf16.gmra.mxu0 %vm1474_vm0, %v7993_v24  ;;  %7867 = vmatmul.mubr.msk.bf16.gmra.mxu1 %vm1474_vm0, %v8057_v12  ;;  %v8059_v24 = vld [vmem:[%s9371_s0 + $0x2a8] sm:$0xff]  }
  0x5f   :  { %7742 = vmatprep.mubr.msk.bf16.mxu0 %vm1474_vm0, %v7994_v25  ;;  %7870 = vmatprep.mubr.msk.bf16.mxu1 %vm1474_vm0, %v8058_v21 }
  0x66   :  { %7743 = vmatmul.mubr.msk.bf16.gmra.mxu0 %vm1474_vm0, %v7995_v26  ;;  %7871 = vmatmul.mubr.msk.bf16.gmra.mxu1 %vm1474_vm0, %v8059_v24 }
  0x67   :  { %7746 = vmatprep.mubr.msk.bf16.mxu0 %vm1474_vm0, %v7996_v27  ;;  %7874 = vmatprep.mubr.msk.bf16.mxu1 %vm1474_vm0, %v8060_v42  ;;  %v8033_v42 = vld [vmem:[%s9371_s0 + $0x1d8] sm:$0xff]  }
  0x6e   :  { %7747 = vmatmul.mubr.msk.bf16.gmra.mxu0 %vm1474_vm0, %v7997_v28  ;;  %7875 = vmatmul.mubr.msk.bf16.gmra.mxu1 %vm1474_vm0, %v8061_v43 }
  0x6f   :  { %7750 = vmatprep.mubr.msk.bf16.mxu0 %vm1474_vm0, %v7998_v29  ;;  %7878 = vmatprep.mubr.msk.bf16.mxu1 %vm1474_vm0, %v8062_v3 }
  0x76   :  { %7751 = vmatmul.mubr.msk.bf16.gmra.mxu0 %vm1474_vm0, %v7999_v30 }
  0x77   :  { %7754 = vmatprep.mubr.msk.bf16.mxu0 %vm1474_vm0, %v8000_v31  ;;  %v8027_v31 = vld [vmem:[%s9371_s0 + $0x1a8] sm:$0xff]  }
  0x7e   :  { %7755 = vmatmul.mubr.msk.bf16.gmra.mxu0 %vm1474_vm0, %v8001_v32 }
  0x7f   :  { %7758 = vmatprep.mubr.msk.bf16.mxu0 %vm1474_vm0, %v8002_v33 }
  0x86   :  { %7759 = vmatmul.mubr.msk.bf16.gmra.mxu0 %vm1474_vm0, %v8003_v34  ;;  %v8028_v34 = vld [vmem:[%s9371_s0 + $0x1b0] sm:$0xff]  }
  0x87   :  { %7762 = vmatprep.mubr.msk.bf16.mxu0 %vm1474_vm0, %v8004_v35 }
  0x8e   :  { %7763 = vmatmul.mubr.msk.bf16.gmra.mxu0 %vm1474_vm0, %v8005_v36 }
  0x8f   :  { %7766 = vmatprep.mubr.msk.bf16.mxu0 %vm1474_vm0, %v8006_v37 }
  0x96   :  { %7767 = vmatmul.mubr.msk.bf16.gmra.mxu0 %vm1474_vm0, %v8007_v40 }
  0x97   :  { %7770 = vmatprep.mubr.msk.bf16.mxu0 %vm1474_vm0, %v8008_v41 }
  0x9e   :  { %7771 = vmatmul.mubr.msk.bf16.gmra.mxu0 %vm1474_vm0, %v8009_v44 }
  0x9f   :  { %7774 = vmatprep.mubr.msk.bf16.mxu0 %vm1474_vm0, %v8010_v45 }
  0xa6   :  { %7775 = vmatmul.mubr.msk.bf16.gmra.mxu0 %vm1474_vm0, %v8011_v48 }
  0xa7   :  { %7778 = vmatprep.mubr.msk.bf16.mxu0 %vm1474_vm0, %v8012_v49 }
  0xae   :  { %7779 = vmatmul.mubr.msk.bf16.gmra.mxu0 %vm1474_vm0, %v8013_v52 }
  0xaf   :  { %7782 = vmatprep.mubr.msk.bf16.mxu0 %vm1474_vm0, %v8014_v53 }
  0xb6   :  { %7783 = vmatmul.mubr.msk.bf16.gmra.mxu0 %vm1474_vm0, %v8015_v56  ;;  %v8030_v56 = vld [vmem:[%s9371_s0 + $0x1c0] sm:$0xff]  }
  0xb7   :  { %7786 = vmatprep.mubr.msk.bf16.mxu0 %vm1474_vm0, %v8016_v57 }
  0xbe   :  { %7787 = vmatmul.mubr.msk.bf16.gmra.mxu0 %vm1474_vm0, %v8017_v60 }
  0xbf   :  { %7790 = vmatprep.mubr.msk.bf16.mxu0 %vm1474_vm0, %v8018_v61 }
  0xc6   :  { %7791 = vmatmul.mubr.msk.bf16.gmra.mxu0 %vm1474_vm0, %v8019_v0 }
  0xc7   :  { %7794 = vmatprep.mubr.msk.bf16.mxu0 %vm1474_vm0, %v8020_v1 }
  0xce   :  { %7795 = vmatmul.mubr.msk.bf16.gmra.mxu0 %vm1474_vm0, %v8021_v4 }
  0xcf   :  { %7798 = vmatprep.mubr.msk.bf16.mxu0 %vm1474_vm0, %v8022_v5  ;;  %v8063_v5 = vld [vmem:[%s9371_s0 + $0x2c8] sm:$0xff]  }
  0xd0   :  { %7879 = vmatmul.mubr.msk.bf16.gmra.mxu1 %vm1474_vm0, %v8063_v5 }
  0xd6   :  { %v7704_v10 = vpop.f32.mrf.mxu0  ;;  %7799 = vmatmul.mubr.msk.bf16.gmra.mxu0 %vm1474_vm0, %v8023_v8 }
  0xd7   :  { %7802 = vmatprep.mubr.msk.bf16.mxu0 %vm1474_vm0, %v8024_v9 }
  0xd8   :  { %v1893_v13 = vpop.f32.mrf.mxu0 }
  0xda   :  { %v7705_v14 = vpop.f32.mrf.mxu0 }
  0xdb   :  { %v3688_v16 = vpack.c.bf16 %v7705_v14, %v7704_v10 }
  0xdc   :  { %v1896_v18 = vpop.f32.mrf.mxu0 }
  0xdd   :  { %7432 = vst [vmem:[%s9372_s2 + $0x8] sm:$0xff] %v3688_v16   ;;  %v3687_v19 = vpack.c.bf16 %v1896_v18, %v1893_v13  ;;  %v4969_v25 = vunpack.c.l.bf16 %v3688_v16  ;;  %v4970_v35 = vunpack.c.h.bf16 %v3688_v16  ;;  %v8031_v16 = vld [vmem:[%s9371_s0 + $0x1c8] sm:$0xff]   ;;  %v8032_v18 = vld [vmem:[%s9371_s0 + $0x1d0] sm:$0xff]  }
  0xde   :  { %v7708_v20 = vpop.f32.mrf.mxu0  ;;  %7803 = vmatmul.mubr.msk.bf16.gmra.mxu0 %vm1474_vm0, %v8025_v15 }
  0xdf   :  { %6796 = vst [vmem:[%s9372_s2] sm:$0xff] %v3687_v19   ;;  %v4967_v22 = vunpack.c.l.bf16 %v3687_v19  ;;  %v4968_v23 = vunpack.c.h.bf16 %v3687_v19  ;;  %7806 = vmatprep.mubr.msk.bf16.mxu0 %vm1474_vm0, %v8026_v17  ;;  %v5490_v36 = vmul.f32 %v4969_v25, %v4969_v25  ;;  %v5491_v44 = vmul.f32 %v4970_v35, %v4970_v35 }
  0xe0   :  { %v1909_v26 = vpop.f32.mrf.mxu0 }
  0xe1   :  { %v5224_v27 = vadd.f32 %v4968_v23, %v4967_v22  ;;  %v5488_v28 = vmul.f32 %v4967_v22, %v4967_v22  ;;  %v5489_v29 = vmul.f32 %v4968_v23, %v4968_v23 }
  0xe2   :  { %v7709_v30 = vpop.f32.mrf.mxu0 }
  0xe3   :  { %v5744_v32 = vadd.f32 %v5489_v29, %v5488_v28  ;;  %v3690_v33 = vpack.c.bf16 %v7709_v30, %v7708_v20  ;;  %v5225_v37 = vadd.f32 %v5224_v27, %v4969_v25  ;;  %v8064_v29 = vld [vmem:[%s9371_s0 + $0x2d0] sm:$0xff]  }
  0xe4   :  { %v1912_v38 = vpop.f32.mrf.mxu0  ;;  %7882 = vmatprep.mubr.msk.bf16.mxu1 %vm1474_vm0, %v8064_v29 }
  0xe5   :  { %7434 = vst [vmem:[%s9372_s2 + $0x18] sm:$0xff] %v3690_v33   ;;  %v5745_v39 = vadd.f32 %v5744_v32, %v5490_v36  ;;  %v3689_v40 = vpack.c.bf16 %v1912_v38, %v1909_v26  ;;  %v5226_v45 = vadd.f32 %v5225_v37, %v4970_v35  ;;  %v4973_v50 = vunpack.c.l.bf16 %v3690_v33 }
  0xe6   :  { %v7712_v41 = vpop.f32.mrf.mxu0  ;;  %7807 = vmatmul.mubr.msk.bf16.gmra.mxu0 %vm1474_vm0, %v8027_v31  ;;  %v4974_v57 = vunpack.c.h.bf16 %v3690_v33  ;;  %v8065_v31 = vld [vmem:[%s9371_s0 + $0x2d8] sm:$0xff]  }
  0xe7   :  { %7810 = vmatprep.mubr.msk.bf16.mxu0 %vm1474_vm0, %v8028_v34  ;;  %7433 = vst [vmem:[%s9372_s2 + $0x10] sm:$0xff] %v3689_v40   ;;  %v4971_v46 = vunpack.c.l.bf16 %v3689_v40  ;;  %v4972_v47 = vunpack.c.h.bf16 %v3689_v40  ;;  %v5746_v49 = vadd.f32 %v5745_v39, %v5491_v44  ;;  %v5494_v63 = vmul.f32 %v4973_v50, %v4973_v50  ;;  %7883 = vmatmul.mubr.msk.bf16.gmra.mxu1 %vm1474_vm0, %v8065_v31  ;;  %v8034_v44 = vld [vmem:[%s9371_s0 + $0x1e0] sm:$0xff]  }
  0xe8   :  { %v1925_v48 = vpop.f32.mrf.mxu0  ;;  %v5495_v6 = vmul.f32 %v4974_v57, %v4974_v57 }
  0xe9   :  { %v5227_v51 = vadd.f32 %v5226_v45, %v4971_v46  ;;  %v5492_v52 = vmul.f32 %v4971_v46, %v4971_v46  ;;  %v5493_v59 = vmul.f32 %v4972_v47, %v4972_v47 }
  0xea   :  { %v7713_v53 = vpop.f32.mrf.mxu0 }
  0xeb   :  { %v3692_v55 = vpack.c.bf16 %v7713_v53, %v7712_v41  ;;  %v5228_v58 = vadd.f32 %v5227_v51, %v4972_v47  ;;  %v5747_v60 = vadd.f32 %v5746_v49, %v5492_v52 }
  0xec   :  { %v1928_v61 = vpop.f32.mrf.mxu0 }
  0xed   :  { %7436 = vst [vmem:[%s9372_s2 + $0x28] sm:$0xff] %v3692_v55   ;;  %v3691_v62 = vpack.c.bf16 %v1928_v61, %v1925_v48  ;;  %v5229_v0 = vadd.f32 %v5228_v58, %v4973_v50  ;;  %v5748_v1 = vadd.f32 %v5747_v60, %v5493_v59  ;;  %v4977_v13 = vunpack.c.l.bf16 %v3692_v55 }
  0xee   :  { %v7716_v2 = vpop.f32.mrf.mxu0  ;;  %7811 = vmatmul.mubr.msk.bf16.gmra.mxu0 %vm1474_vm0, %v8029_v54  ;;  %v4978_v19 = vunpack.c.h.bf16 %v3692_v55  ;;  %v8066_v55 = vld [vmem:[%s9371_s0 + $0x2e0] sm:$0xff]  }
  0xef   :  { %7435 = vst [vmem:[%s9372_s2 + $0x20] sm:$0xff] %v3691_v62   ;;  %v4975_v4 = vunpack.c.l.bf16 %v3691_v62  ;;  %7814 = vmatprep.mubr.msk.bf16.mxu0 %vm1474_vm0, %v8030_v56  ;;  %v5230_v7 = vadd.f32 %v5229_v0, %v4974_v57  ;;  %v5749_v8 = vadd.f32 %v5748_v1, %v5494_v63  ;;  %v4976_v9 = vunpack.c.h.bf16 %v3691_v62  ;;  %v8067_v57 = vld [vmem:[%s9371_s0 + $0x2e8] sm:$0xff]   ;;  %7886 = vmatprep.mubr.msk.bf16.mxu1 %vm1474_vm0, %v8066_v55 }
  0xf0   :  { %v1941_v10 = vpop.f32.mrf.mxu0  ;;  %v5498_v25 = vmul.f32 %v4977_v13, %v4977_v13  ;;  %v5499_v32 = vmul.f32 %v4978_v19, %v4978_v19  ;;  %7887 = vmatmul.mubr.msk.bf16.gmra.mxu1 %vm1474_vm0, %v8067_v57 }
  0xf1   :  { %v5496_v11 = vmul.f32 %v4975_v4, %v4975_v4  ;;  %v5750_v12 = vadd.f32 %v5749_v8, %v5495_v6  ;;  %v5231_v14 = vadd.f32 %v5230_v7, %v4975_v4  ;;  %v5497_v21 = vmul.f32 %v4976_v9, %v4976_v9  ;;  %v8035_v4 = vld [vmem:[%s9371_s0 + $0x1e8] sm:$0xff]   ;;  %v8036_v6 = vld [vmem:[%s9371_s0 + $0x1f0] sm:$0xff]  }
  0xf2   :  { %v7717_v15 = vpop.f32.mrf.mxu0 }
  0xf3   :  { %v3694_v17 = vpack.c.bf16 %v7717_v15, %v7716_v2  ;;  %v5232_v20 = vadd.f32 %v5231_v14, %v4976_v9  ;;  %v5751_v22 = vadd.f32 %v5750_v12, %v5496_v11 }
  0xf4   :  { %v1944_v23 = vpop.f32.mrf.mxu0 }
  0xf5   :  { %7438 = vst [vmem:[%s9372_s2 + $0x38] sm:$0xff] %v3694_v17   ;;  %v3693_v24 = vpack.c.bf16 %v1944_v23, %v1941_v10  ;;  %v5233_v26 = vadd.f32 %v5232_v20, %v4977_v13  ;;  %v5752_v27 = vadd.f32 %v5751_v22, %v5497_v21  ;;  %v4981_v39 = vunpack.c.l.bf16 %v3694_v17 }
  0xf6   :  { %v7720_v28 = vpop.f32.mrf.mxu0  ;;  %7815 = vmatmul.mubr.msk.bf16.gmra.mxu0 %vm1474_vm0, %v8031_v16  ;;  %v4982_v45 = vunpack.c.h.bf16 %v3694_v17  ;;  %v8068_v17 = vld [vmem:[%s9371_s0 + $0x2f0] sm:$0xff]  }
  0xf7   :  { %7437 = vst [vmem:[%s9372_s2 + $0x30] sm:$0xff] %v3693_v24   ;;  %v4979_v30 = vunpack.c.l.bf16 %v3693_v24  ;;  %7818 = vmatprep.mubr.msk.bf16.mxu0 %vm1474_vm0, %v8032_v18  ;;  %v5234_v33 = vadd.f32 %v5233_v26, %v4978_v19  ;;  %v5753_v34 = vadd.f32 %v5752_v27, %v5498_v25  ;;  %v4980_v35 = vunpack.c.h.bf16 %v3693_v24  ;;  %v8069_v19 = vld [vmem:[%s9371_s0 + $0x2f8] sm:$0xff]   ;;  %7890 = vmatprep.mubr.msk.bf16.mxu1 %vm1474_vm0, %v8068_v17 }
  0xf8   :  { %v1957_v36 = vpop.f32.mrf.mxu0  ;;  %v5502_v51 = vmul.f32 %v4981_v39, %v4981_v39  ;;  %v5503_v58 = vmul.f32 %v4982_v45, %v4982_v45  ;;  %7891 = vmatmul.mubr.msk.bf16.gmra.mxu1 %vm1474_vm0, %v8069_v19 }
  0xf9   :  { %v5500_v37 = vmul.f32 %v4979_v30, %v4979_v30  ;;  %v5754_v38 = vadd.f32 %v5753_v34, %v5499_v32  ;;  %v5235_v40 = vadd.f32 %v5234_v33, %v4979_v30  ;;  %v5501_v47 = vmul.f32 %v4980_v35, %v4980_v35  ;;  %v8037_v30 = vld [vmem:[%s9371_s0 + $0x1f8] sm:$0xff]  }
  0xfa   :  { %v7721_v41 = vpop.f32.mrf.mxu0 }
  0xfb   :  { %v3696_v43 = vpack.c.bf16 %v7721_v41, %v7720_v28  ;;  %v5236_v46 = vadd.f32 %v5235_v40, %v4980_v35  ;;  %v5755_v48 = vadd.f32 %v5754_v38, %v5500_v37 }
  0xfc   :  { %v1960_v49 = vpop.f32.mrf.mxu0 }
  0xfd   :  { %7440 = vst [vmem:[%s9372_s2 + $0x48] sm:$0xff] %v3696_v43   ;;  %v3695_v50 = vpack.c.bf16 %v1960_v49, %v1957_v36  ;;  %v5237_v52 = vadd.f32 %v5236_v46, %v4981_v39  ;;  %v5756_v53 = vadd.f32 %v5755_v48, %v5501_v47  ;;  %v4985_v1 = vunpack.c.l.bf16 %v3696_v43 }
  0xfe   :  { %v7724_v54 = vpop.f32.mrf.mxu0  ;;  %7819 = vmatmul.mubr.msk.bf16.gmra.mxu0 %vm1474_vm0, %v8033_v42  ;;  %v4986_v7 = vunpack.c.h.bf16 %v3696_v43  ;;  %v8070_v42 = vld [vmem:[%s9371_s0 + $0x300] sm:$0xff]  }
  0xff   :  { %7439 = vst [vmem:[%s9372_s2 + $0x40] sm:$0xff] %v3695_v50   ;;  %v4983_v56 = vunpack.c.l.bf16 %v3695_v50  ;;  %7822 = vmatprep.mubr.msk.bf16.mxu0 %vm1474_vm0, %v8034_v44  ;;  %v5238_v59 = vadd.f32 %v5237_v52, %v4982_v45  ;;  %v5757_v60 = vadd.f32 %v5756_v53, %v5502_v51  ;;  %v4984_v61 = vunpack.c.h.bf16 %v3695_v50  ;;  %v8071_v44 = vld [vmem:[%s9371_s0 + $0x308] sm:$0xff]   ;;  %7894 = vmatprep.mubr.msk.bf16.mxu1 %vm1474_vm0, %v8070_v42 }
 0x100   :  { %v1973_v62 = vpop.f32.mrf.mxu0  ;;  %v5506_v13 = vmul.f32 %v4985_v1, %v4985_v1  ;;  %v5507_v20 = vmul.f32 %v4986_v7, %v4986_v7  ;;  %7895 = vmatmul.mubr.msk.bf16.gmra.mxu1 %vm1474_vm0, %v8071_v44 }
 0x101   :  { %v5504_v63 = vmul.f32 %v4983_v56, %v4983_v56  ;;  %v5758_v0 = vadd.f32 %v5757_v60, %v5503_v58  ;;  %v5239_v2 = vadd.f32 %v5238_v59, %v4983_v56  ;;  %v5505_v9 = vmul.f32 %v4984_v61, %v4984_v61 }
 0x102   :  { %v7725_v3 = vpop.f32.mrf.mxu0 }
 0x103   :  { %v3698_v5 = vpack.c.bf16 %v7725_v3, %v7724_v54  ;;  %v5240_v8 = vadd.f32 %v5239_v2, %v4984_v61  ;;  %v5759_v10 = vadd.f32 %v5758_v0, %v5504_v63  ;;  %v8072_v2 = vld [vmem:[%s9371_s0 + $0x310] sm:$0xff]  }
 0x104   :  { %v1976_v11 = vpop.f32.mrf.mxu0  ;;  %7898 = vmatprep.mubr.msk.bf16.mxu1 %vm1474_vm0, %v8072_v2 }
 0x105   :  { %7442 = vst [vmem:[%s9372_s2 + $0x58] sm:$0xff] %v3698_v5   ;;  %v3697_v12 = vpack.c.bf16 %v1976_v11, %v1973_v62  ;;  %v5241_v14 = vadd.f32 %v5240_v8, %v4985_v1  ;;  %v5760_v15 = vadd.f32 %v5759_v10, %v5505_v9  ;;  %v4989_v27 = vunpack.c.l.bf16 %v3698_v5 }
 0x106   :  { %v7728_v16 = vpop.f32.mrf.mxu0  ;;  %7823 = vmatmul.mubr.msk.bf16.gmra.mxu0 %vm1474_vm0, %v8035_v4  ;;  %v4990_v32 = vunpack.c.h.bf16 %v3698_v5  ;;  %v8073_v4 = vld [vmem:[%s9371_s0 + $0x318] sm:$0xff]  }
 0x107   :  { %7441 = vst [vmem:[%s9372_s2 + $0x50] sm:$0xff] %v3697_v12   ;;  %v4987_v18 = vunpack.c.l.bf16 %v3697_v12  ;;  %7826 = vmatprep.mubr.msk.bf16.mxu0 %vm1474_vm0, %v8036_v6  ;;  %v5242_v21 = vadd.f32 %v5241_v14, %v4986_v7  ;;  %v5761_v22 = vadd.f32 %v5760_v15, %v5506_v13  ;;  %v4988_v23 = vunpack.c.h.bf16 %v3697_v12 }
 0x108   :  { %v1989_v24 = vpop.f32.mrf.mxu0  ;;  %v5510_v38 = vmul.f32 %v4989_v27, %v4989_v27  ;;  %v5511_v45 = vmul.f32 %v4990_v32, %v4990_v32  ;;  %7899 = vmatmul.mubr.msk.bf16.gmra.mxu1 %vm1474_vm0, %v8073_v4 }
 0x109   :  { %v5508_v25 = vmul.f32 %v4987_v18, %v4987_v18  ;;  %v5762_v26 = vadd.f32 %v5761_v22, %v5507_v20  ;;  %v5243_v28 = vadd.f32 %v5242_v21, %v4987_v18  ;;  %v5509_v34 = vmul.f32 %v4988_v23, %v4988_v23 }
 0x10a   :  { %v7729_v29 = vpop.f32.mrf.mxu0 }
 0x10b   :  { %v3700_v31 = vpack.c.bf16 %v7729_v29, %v7728_v16  ;;  %v5244_v33 = vadd.f32 %v5243_v28, %v4988_v23  ;;  %v5763_v35 = vadd.f32 %v5762_v26, %v5508_v25  ;;  %v8074_v26 = vld [vmem:[%s9371_s0 + $0x320] sm:$0xff]   ;;  %v8075_v28 = vld [vmem:[%s9371_s0 + $0x328] sm:$0xff]  }
 0x10c   :  { %v1992_v36 = vpop.f32.mrf.mxu0  ;;  %7902 = vmatprep.mubr.msk.bf16.mxu1 %vm1474_vm0, %v8074_v26 }
 0x10d   :  { %7444 = vst [vmem:[%s9372_s2 + $0x68] sm:$0xff] %v3700_v31   ;;  %v3699_v37 = vpack.c.bf16 %v1992_v36, %v1989_v24  ;;  %v5245_v39 = vadd.f32 %v5244_v33, %v4989_v27  ;;  %v5764_v40 = vadd.f32 %v5763_v35, %v5509_v34  ;;  %v4993_v52 = vunpack.c.l.bf16 %v3700_v31 }
 0x10e   :  { %v7732_v41 = vpop.f32.mrf.mxu0  ;;  %7827 = vmatmul.mubr.msk.bf16.gmra.mxu0 %vm1474_vm0, %v8037_v30  ;;  %v4994_v56 = vunpack.c.h.bf16 %v3700_v31 }
 0x10f   :  { %7443 = vst [vmem:[%s9372_s2 + $0x60] sm:$0xff] %v3699_v37   ;;  %v4991_v43 = vunpack.c.l.bf16 %v3699_v37  ;;  %v5246_v46 = vadd.f32 %v5245_v39, %v4990_v32  ;;  %v5765_v47 = vadd.f32 %v5764_v40, %v5510_v38  ;;  %v4992_v48 = vunpack.c.h.bf16 %v3699_v37 }
 0x110   :  { %v2005_v49 = vpop.f32.mrf.mxu0  ;;  %v5514_v62 = vmul.f32 %v4993_v52, %v4993_v52  ;;  %v5515_v5 = vmul.f32 %v4994_v56, %v4994_v56  ;;  %7903 = vmatmul.mubr.msk.bf16.gmra.mxu1 %vm1474_vm0, %v8075_v28 }
 0x111   :  { %v5512_v50 = vmul.f32 %v4991_v43, %v4991_v43  ;;  %v5766_v51 = vadd.f32 %v5765_v47, %v5511_v45  ;;  %v5247_v53 = vadd.f32 %v5246_v46, %v4991_v43  ;;  %v5513_v58 = vmul.f32 %v4992_v48, %v4992_v48 }
 0x112   :  { %v7733_v54 = vpop.f32.mrf.mxu0 }
 0x113   :  { %v3702_v55 = vpack.c.bf16 %v7733_v54, %v7732_v41  ;;  %v5248_v57 = vadd.f32 %v5247_v53, %v4992_v48  ;;  %v5767_v59 = vadd.f32 %v5766_v51, %v5512_v50  ;;  %v8076_v50 = vld [vmem:[%s9371_s0 + $0x330] sm:$0xff]  }
 0x114   :  { %v2008_v60 = vpop.f32.mrf.mxu0  ;;  %7906 = vmatprep.mubr.msk.bf16.mxu1 %vm1474_vm0, %v8076_v50 }
 0x115   :  { %7446 = vst [vmem:[%s9372_s2 + $0x78] sm:$0xff] %v3702_v55   ;;  %v3701_v61 = vpack.c.bf16 %v2008_v60, %v2005_v49  ;;  %v5249_v63 = vadd.f32 %v5248_v57, %v4993_v52  ;;  %v5768_v0 = vadd.f32 %v5767_v59, %v5513_v58  ;;  %v4997_v12 = vunpack.c.l.bf16 %v3702_v55  ;;  %v8077_v52 = vld [vmem:[%s9371_s0 + $0x338] sm:$0xff]  }
 0x116   :  { %v7736_v1 = vpop.f32.mrf.mxu0  ;;  %v4998_v16 = vunpack.c.h.bf16 %v3702_v55 }
 0x117   :  { %7445 = vst [vmem:[%s9372_s2 + $0x70] sm:$0xff] %v3701_v61   ;;  %v4995_v3 = vunpack.c.l.bf16 %v3701_v61  ;;  %v5250_v6 = vadd.f32 %v5249_v63, %v4994_v56  ;;  %v5769_v7 = vadd.f32 %v5768_v0, %v5514_v62  ;;  %v4996_v8 = vunpack.c.h.bf16 %v3701_v61 }
 0x118   :  { %v2021_v9 = vpop.f32.mrf.mxu0  ;;  %v5518_v22 = vmul.f32 %v4997_v12, %v4997_v12  ;;  %v5519_v29 = vmul.f32 %v4998_v16, %v4998_v16  ;;  %7907 = vmatmul.mubr.msk.bf16.gmra.mxu1 %vm1474_vm0, %v8077_v52 }
 0x119   :  { %v5516_v10 = vmul.f32 %v4995_v3, %v4995_v3  ;;  %v5770_v11 = vadd.f32 %v5769_v7, %v5515_v5  ;;  %v5251_v13 = vadd.f32 %v5250_v6, %v4995_v3  ;;  %v5517_v18 = vmul.f32 %v4996_v8, %v4996_v8 }
 0x11a   :  { %v7737_v14 = vpop.f32.mrf.mxu0 }
 0x11b   :  { %v3704_v15 = vpack.c.bf16 %v7737_v14, %v7736_v1  ;;  %v5252_v17 = vadd.f32 %v5251_v13, %v4996_v8  ;;  %v5771_v19 = vadd.f32 %v5770_v11, %v5516_v10  ;;  %v8078_v10 = vld [vmem:[%s9371_s0 + $0x340] sm:$0xff]  }
 0x11c   :  { %v2024_v20 = vpop.f32.mrf.mxu0  ;;  %7910 = vmatprep.mubr.msk.bf16.mxu1 %vm1474_vm0, %v8078_v10 }
 0x11d   :  { %7448 = vst [vmem:[%s9372_s2 + $0x88] sm:$0xff] %v3704_v15   ;;  %v3703_v21 = vpack.c.bf16 %v2024_v20, %v2021_v9  ;;  %v5253_v23 = vadd.f32 %v5252_v17, %v4997_v12  ;;  %v5772_v24 = vadd.f32 %v5771_v19, %v5517_v18  ;;  %v5001_v36 = vunpack.c.l.bf16 %v3704_v15  ;;  %v8079_v12 = vld [vmem:[%s9371_s0 + $0x348] sm:$0xff]  }
 0x11e   :  { %v7740_v25 = vpop.f32.mrf.mxu0  ;;  %v5002_v40 = vunpack.c.h.bf16 %v3704_v15 }
 0x11f   :  { %7447 = vst [vmem:[%s9372_s2 + $0x80] sm:$0xff] %v3703_v21   ;;  %v4999_v27 = vunpack.c.l.bf16 %v3703_v21  ;;  %v5254_v30 = vadd.f32 %v5253_v23, %v4998_v16  ;;  %v5773_v31 = vadd.f32 %v5772_v24, %v5518_v22  ;;  %v5000_v32 = vunpack.c.h.bf16 %v3703_v21 }
 0x120   :  { %v2037_v33 = vpop.f32.mrf.mxu0  ;;  %v5522_v46 = vmul.f32 %v5001_v36, %v5001_v36  ;;  %v5523_v53 = vmul.f32 %v5002_v40, %v5002_v40  ;;  %7911 = vmatmul.mubr.msk.bf16.gmra.mxu1 %vm1474_vm0, %v8079_v12 }
 0x121   :  { %v5520_v34 = vmul.f32 %v4999_v27, %v4999_v27  ;;  %v5774_v35 = vadd.f32 %v5773_v31, %v5519_v29  ;;  %v5255_v37 = vadd.f32 %v5254_v30, %v4999_v27  ;;  %v5521_v42 = vmul.f32 %v5000_v32, %v5000_v32 }
 0x122   :  { %v7741_v38 = vpop.f32.mrf.mxu0 }
 0x123   :  { %v3706_v39 = vpack.c.bf16 %v7741_v38, %v7740_v25  ;;  %v5256_v41 = vadd.f32 %v5255_v37, %v5000_v32  ;;  %v5775_v43 = vadd.f32 %v5774_v35, %v5520_v34  ;;  %v8080_v34 = vld [vmem:[%s9371_s0 + $0x350] sm:$0xff]  }
 0x124   :  { %v2040_v44 = vpop.f32.mrf.mxu0  ;;  %7914 = vmatprep.mubr.msk.bf16.mxu1 %vm1474_vm0, %v8080_v34 }
 0x125   :  { %7450 = vst [vmem:[%s9372_s2 + $0x98] sm:$0xff] %v3706_v39   ;;  %v3705_v45 = vpack.c.bf16 %v2040_v44, %v2037_v33  ;;  %v5257_v47 = vadd.f32 %v5256_v41, %v5001_v36  ;;  %v5776_v48 = vadd.f32 %v5775_v43, %v5521_v42  ;;  %v5005_v60 = vunpack.c.l.bf16 %v3706_v39  ;;  %v8081_v36 = vld [vmem:[%s9371_s0 + $0x358] sm:$0xff]  }
 0x126   :  { %v7744_v49 = vpop.f32.mrf.mxu0  ;;  %v5006_v0 = vunpack.c.h.bf16 %v3706_v39 }
 0x127   :  { %7449 = vst [vmem:[%s9372_s2 + $0x90] sm:$0xff] %v3705_v45   ;;  %v5003_v51 = vunpack.c.l.bf16 %v3705_v45  ;;  %v5258_v54 = vadd.f32 %v5257_v47, %v5002_v40  ;;  %v5777_v55 = vadd.f32 %v5776_v48, %v5522_v46  ;;  %v5004_v56 = vunpack.c.h.bf16 %v3705_v45 }
 0x128   :  { %v2053_v57 = vpop.f32.mrf.mxu0  ;;  %v5526_v6 = vmul.f32 %v5005_v60, %v5005_v60  ;;  %v5527_v13 = vmul.f32 %v5006_v0, %v5006_v0  ;;  %7915 = vmatmul.mubr.msk.bf16.gmra.mxu1 %vm1474_vm0, %v8081_v36 }
 0x129   :  { %v5524_v58 = vmul.f32 %v5003_v51, %v5003_v51  ;;  %v5778_v59 = vadd.f32 %v5777_v55, %v5523_v53  ;;  %v5259_v61 = vadd.f32 %v5258_v54, %v5003_v51  ;;  %v5525_v2 = vmul.f32 %v5004_v56, %v5004_v56 }
 0x12a   :  { %v7745_v62 = vpop.f32.mrf.mxu0 }
 0x12b   :  { %v3708_v63 = vpack.c.bf16 %v7745_v62, %v7744_v49  ;;  %v5260_v1 = vadd.f32 %v5259_v61, %v5004_v56  ;;  %v5779_v3 = vadd.f32 %v5778_v59, %v5524_v58  ;;  %v8082_v58 = vld [vmem:[%s9371_s0 + $0x360] sm:$0xff]  }
 0x12c   :  { %v2056_v4 = vpop.f32.mrf.mxu0  ;;  %7918 = vmatprep.mubr.msk.bf16.mxu1 %vm1474_vm0, %v8082_v58 }
 0x12d   :  { %7452 = vst [vmem:[%s9372_s2 + $0xa8] sm:$0xff] %v3708_v63   ;;  %v3707_v5 = vpack.c.bf16 %v2056_v4, %v2053_v57  ;;  %v5261_v7 = vadd.f32 %v5260_v1, %v5005_v60  ;;  %v5780_v8 = vadd.f32 %v5779_v3, %v5525_v2  ;;  %v5009_v20 = vunpack.c.l.bf16 %v3708_v63  ;;  %v8083_v60 = vld [vmem:[%s9371_s0 + $0x368] sm:$0xff]  }
 0x12e   :  { %v7748_v9 = vpop.f32.mrf.mxu0  ;;  %v5010_v24 = vunpack.c.h.bf16 %v3708_v63 }
 0x12f   :  { %7451 = vst [vmem:[%s9372_s2 + $0xa0] sm:$0xff] %v3707_v5   ;;  %v5007_v11 = vunpack.c.l.bf16 %v3707_v5  ;;  %v5262_v14 = vadd.f32 %v5261_v7, %v5006_v0  ;;  %v5781_v15 = vadd.f32 %v5780_v8, %v5526_v6  ;;  %v5008_v16 = vunpack.c.h.bf16 %v3707_v5 }
 0x130   :  { %v2069_v17 = vpop.f32.mrf.mxu0  ;;  %v5530_v30 = vmul.f32 %v5009_v20, %v5009_v20  ;;  %v5531_v37 = vmul.f32 %v5010_v24, %v5010_v24  ;;  %7919 = vmatmul.mubr.msk.bf16.gmra.mxu1 %vm1474_vm0, %v8083_v60 }
 0x131   :  { %v5528_v18 = vmul.f32 %v5007_v11, %v5007_v11  ;;  %v5782_v19 = vadd.f32 %v5781_v15, %v5527_v13  ;;  %v5263_v21 = vadd.f32 %v5262_v14, %v5007_v11  ;;  %v5529_v26 = vmul.f32 %v5008_v16, %v5008_v16 }
 0x132   :  { %v7749_v22 = vpop.f32.mrf.mxu0 }
 0x133   :  { %v3710_v23 = vpack.c.bf16 %v7749_v22, %v7748_v9  ;;  %v5264_v25 = vadd.f32 %v5263_v21, %v5008_v16  ;;  %v5783_v27 = vadd.f32 %v5782_v19, %v5528_v18  ;;  %v8084_v18 = vld [vmem:[%s9371_s0 + $0x370] sm:$0xff]  }
 0x134   :  { %v2072_v28 = vpop.f32.mrf.mxu0  ;;  %7922 = vmatprep.mubr.msk.bf16.mxu1 %vm1474_vm0, %v8084_v18 }
 0x135   :  { %7454 = vst [vmem:[%s9372_s2 + $0xb8] sm:$0xff] %v3710_v23   ;;  %v3709_v29 = vpack.c.bf16 %v2072_v28, %v2069_v17  ;;  %v5265_v31 = vadd.f32 %v5264_v25, %v5009_v20  ;;  %v5784_v32 = vadd.f32 %v5783_v27, %v5529_v26  ;;  %v5013_v44 = vunpack.c.l.bf16 %v3710_v23  ;;  %v8085_v20 = vld [vmem:[%s9371_s0 + $0x378] sm:$0xff]  }
 0x136   :  { %v7752_v33 = vpop.f32.mrf.mxu0  ;;  %v5014_v48 = vunpack.c.h.bf16 %v3710_v23 }
 0x137   :  { %7453 = vst [vmem:[%s9372_s2 + $0xb0] sm:$0xff] %v3709_v29   ;;  %v5011_v35 = vunpack.c.l.bf16 %v3709_v29  ;;  %v5266_v38 = vadd.f32 %v5265_v31, %v5010_v24  ;;  %v5785_v39 = vadd.f32 %v5784_v32, %v5530_v30  ;;  %v5012_v40 = vunpack.c.h.bf16 %v3709_v29 }
 0x138   :  { %v2085_v41 = vpop.f32.mrf.mxu0  ;;  %v5534_v54 = vmul.f32 %v5013_v44, %v5013_v44  ;;  %v5535_v61 = vmul.f32 %v5014_v48, %v5014_v48  ;;  %7923 = vmatmul.mubr.msk.bf16.gmra.mxu1 %vm1474_vm0, %v8085_v20 }
 0x139   :  { %v5532_v42 = vmul.f32 %v5011_v35, %v5011_v35  ;;  %v5786_v43 = vadd.f32 %v5785_v39, %v5531_v37  ;;  %v5267_v45 = vadd.f32 %v5266_v38, %v5011_v35  ;;  %v5533_v50 = vmul.f32 %v5012_v40, %v5012_v40 }
 0x13a   :  { %v7753_v46 = vpop.f32.mrf.mxu0 }
 0x13b   :  { %v3712_v47 = vpack.c.bf16 %v7753_v46, %v7752_v33  ;;  %v5268_v49 = vadd.f32 %v5267_v45, %v5012_v40  ;;  %v5787_v51 = vadd.f32 %v5786_v43, %v5532_v42  ;;  %v8086_v42 = vld [vmem:[%s9371_s0 + $0x380] sm:$0xff]  }
 0x13c   :  { %v2088_v52 = vpop.f32.mrf.mxu0  ;;  %7926 = vmatprep.mubr.msk.bf16.mxu1 %vm1474_vm0, %v8086_v42 }
 0x13d   :  { %7456 = vst [vmem:[%s9372_s2 + $0xc8] sm:$0xff] %v3712_v47   ;;  %v3711_v53 = vpack.c.bf16 %v2088_v52, %v2085_v41  ;;  %v5269_v55 = vadd.f32 %v5268_v49, %v5013_v44  ;;  %v5788_v56 = vadd.f32 %v5787_v51, %v5533_v50  ;;  %v5017_v4 = vunpack.c.l.bf16 %v3712_v47  ;;  %v8087_v44 = vld [vmem:[%s9371_s0 + $0x388] sm:$0xff]   ;;  %v7832_v51 = vpop.f32.mrf.mxu1 }
 0x13e   :  { %v7756_v57 = vpop.f32.mrf.mxu0  ;;  %v5018_v8 = vunpack.c.h.bf16 %v3712_v47 }
 0x13f   :  { %7455 = vst [vmem:[%s9372_s2 + $0xc0] sm:$0xff] %v3711_v53   ;;  %v5015_v59 = vunpack.c.l.bf16 %v3711_v53  ;;  %v5270_v62 = vadd.f32 %v5269_v55, %v5014_v48  ;;  %v5789_v63 = vadd.f32 %v5788_v56, %v5534_v54  ;;  %v5016_v0 = vunpack.c.h.bf16 %v3711_v53  ;;  %v2405_v58 = vpop.f32.mrf.mxu1 }
 0x140   :  { %v2101_v1 = vpop.f32.mrf.mxu0  ;;  %v5538_v14 = vmul.f32 %v5017_v4, %v5017_v4  ;;  %v5539_v21 = vmul.f32 %v5018_v8, %v5018_v8  ;;  %7927 = vmatmul.mubr.msk.bf16.gmra.mxu1 %vm1474_vm0, %v8087_v44 }
 0x141   :  { %v5536_v2 = vmul.f32 %v5015_v59, %v5015_v59  ;;  %v5790_v3 = vadd.f32 %v5789_v63, %v5535_v61  ;;  %v5271_v5 = vadd.f32 %v5270_v62, %v5015_v59  ;;  %v5537_v10 = vmul.f32 %v5016_v0, %v5016_v0 }
 0x142   :  { %v7757_v6 = vpop.f32.mrf.mxu0 }
 0x143   :  { %v3714_v7 = vpack.c.bf16 %v7757_v6, %v7756_v57  ;;  %v5272_v9 = vadd.f32 %v5271_v5, %v5016_v0  ;;  %v5791_v11 = vadd.f32 %v5790_v3, %v5536_v2  ;;  %v7833_v0 = vpop.f32.mrf.mxu1  ;;  %v8088_v5 = vld [vmem:[%s9371_s0 + $0x390] sm:$0xff]  }
 0x144   :  { %v2104_v12 = vpop.f32.mrf.mxu0  ;;  %7930 = vmatprep.mubr.msk.bf16.mxu1 %vm1474_vm0, %v8088_v5 }
 0x145   :  { %7458 = vst [vmem:[%s9372_s2 + $0xd8] sm:$0xff] %v3714_v7   ;;  %v3713_v13 = vpack.c.bf16 %v2104_v12, %v2101_v1  ;;  %v5273_v15 = vadd.f32 %v5272_v9, %v5017_v4  ;;  %v5792_v16 = vadd.f32 %v5791_v11, %v5537_v10  ;;  %v5021_v28 = vunpack.c.l.bf16 %v3714_v7  ;;  %v2408_v9 = vpop.f32.mrf.mxu1  ;;  %v8089_v10 = vld [vmem:[%s9371_s0 + $0x398] sm:$0xff]  }
 0x146   :  { %v7760_v17 = vpop.f32.mrf.mxu0  ;;  %v5022_v32 = vunpack.c.h.bf16 %v3714_v7 }
 0x147   :  { %7457 = vst [vmem:[%s9372_s2 + $0xd0] sm:$0xff] %v3713_v13   ;;  %v5019_v19 = vunpack.c.l.bf16 %v3713_v13  ;;  %v5274_v22 = vadd.f32 %v5273_v15, %v5018_v8  ;;  %v5793_v23 = vadd.f32 %v5792_v16, %v5538_v14  ;;  %v5020_v24 = vunpack.c.h.bf16 %v3713_v13 }
 0x148   :  { %v2117_v25 = vpop.f32.mrf.mxu0  ;;  %v5542_v38 = vmul.f32 %v5021_v28, %v5021_v28  ;;  %v5543_v45 = vmul.f32 %v5022_v32, %v5022_v32  ;;  %v3752_v14 = vpack.c.bf16 %v7833_v0, %v7832_v51  ;;  %v3751_v15 = vpack.c.bf16 %v2408_v9, %v2405_v58  ;;  %7931 = vmatmul.mubr.msk.bf16.gmra.mxu1 %vm1474_vm0, %v8089_v10 }
 0x149   :  { %v5540_v26 = vmul.f32 %v5019_v19, %v5019_v19  ;;  %v5794_v27 = vadd.f32 %v5793_v23, %v5539_v21  ;;  %v5275_v29 = vadd.f32 %v5274_v22, %v5019_v19  ;;  %v5541_v34 = vmul.f32 %v5020_v24, %v5020_v24 }
 0x14a   :  { %v7761_v30 = vpop.f32.mrf.mxu0  ;;  %7496 = vst [vmem:[%s9372_s2 + $0x208] sm:$0xff] %v3752_v14   ;;  %7495 = vst [vmem:[%s9372_s2 + $0x200] sm:$0xff] %v3751_v15  }
 0x14b   :  { %v3716_v31 = vpack.c.bf16 %v7761_v30, %v7760_v17  ;;  %v5276_v33 = vadd.f32 %v5275_v29, %v5020_v24  ;;  %v5795_v35 = vadd.f32 %v5794_v27, %v5540_v26  ;;  %v7836_v17 = vpop.f32.mrf.mxu1 }
 0x14c   :  { %v2120_v36 = vpop.f32.mrf.mxu0 }
 0x14d   :  { %7460 = vst [vmem:[%s9372_s2 + $0xe8] sm:$0xff] %v3716_v31   ;;  %v3715_v37 = vpack.c.bf16 %v2120_v36, %v2117_v25  ;;  %v5277_v39 = vadd.f32 %v5276_v33, %v5021_v28  ;;  %v5796_v40 = vadd.f32 %v5795_v35, %v5541_v34  ;;  %v5025_v53 = vunpack.c.l.bf16 %v3716_v31  ;;  %v2421_v24 = vpop.f32.mrf.mxu1  ;;  %v8090_v35 = vld [vmem:[%s9371_s0 + $0x3a0] sm:$0xff]  }
 0x14e   :  { %v7764_v41 = vpop.f32.mrf.mxu0  ;;  %v5026_v56 = vunpack.c.h.bf16 %v3716_v31  ;;  %7934 = vmatprep.mubr.msk.bf16.mxu1 %vm1474_vm0, %v8090_v35 }
 0x14f   :  { %7459 = vst [vmem:[%s9372_s2 + $0xe0] sm:$0xff] %v3715_v37   ;;  %v5023_v43 = vunpack.c.l.bf16 %v3715_v37  ;;  %v5278_v46 = vadd.f32 %v5277_v39, %v5022_v32  ;;  %v5797_v47 = vadd.f32 %v5796_v40, %v5542_v38  ;;  %v5024_v48 = vunpack.c.h.bf16 %v3715_v37  ;;  %v7837_v30 = vpop.f32.mrf.mxu1  ;;  %v8091_v40 = vld [vmem:[%s9371_s0 + $0x3a8] sm:$0xff]  }
 0x150   :  { %v2133_v49 = vpop.f32.mrf.mxu0  ;;  %v5546_v1 = vmul.f32 %v5025_v53, %v5025_v53  ;;  %v5547_v6 = vmul.f32 %v5026_v56, %v5026_v56  ;;  %v3754_v44 = vpack.c.bf16 %v7837_v30, %v7836_v17  ;;  %7935 = vmatmul.mubr.msk.bf16.gmra.mxu1 %vm1474_vm0, %v8091_v40 }
 0x151   :  { %v5544_v50 = vmul.f32 %v5023_v43, %v5023_v43  ;;  %v5798_v52 = vadd.f32 %v5797_v47, %v5543_v45  ;;  %v5279_v54 = vadd.f32 %v5278_v46, %v5023_v43  ;;  %v5545_v60 = vmul.f32 %v5024_v48, %v5024_v48  ;;  %v2424_v39 = vpop.f32.mrf.mxu1 }
 0x152   :  { %v7765_v55 = vpop.f32.mrf.mxu0  ;;  %v3753_v45 = vpack.c.bf16 %v2424_v39, %v2421_v24  ;;  %7498 = vst [vmem:[%s9372_s2 + $0x218] sm:$0xff] %v3754_v44  }
 0x153   :  { %v3718_v57 = vpack.c.bf16 %v7765_v55, %v7764_v41  ;;  %v5280_v59 = vadd.f32 %v5279_v54, %v5024_v48  ;;  %v5799_v61 = vadd.f32 %v5798_v52, %v5544_v50  ;;  %v7840_v47 = vpop.f32.mrf.mxu1 }
 0x154   :  { %v2136_v62 = vpop.f32.mrf.mxu0  ;;  %7497 = vst [vmem:[%s9372_s2 + $0x210] sm:$0xff] %v3753_v45  }
 0x155   :  { %7462 = vst [vmem:[%s9372_s2 + $0xf8] sm:$0xff] %v3718_v57   ;;  %v3717_v63 = vpack.c.bf16 %v2136_v62, %v2133_v49  ;;  %v5281_v2 = vadd.f32 %v5280_v59, %v5025_v53  ;;  %v5800_v3 = vadd.f32 %v5799_v61, %v5545_v60  ;;  %v5029_v19 = vunpack.c.l.bf16 %v3718_v57  ;;  %v2437_v54 = vpop.f32.mrf.mxu1 }
 0x156   :  { %v7768_v4 = vpop.f32.mrf.mxu0  ;;  %v5030_v22 = vunpack.c.h.bf16 %v3718_v57 }
 0x157   :  { %7461 = vst [vmem:[%s9372_s2 + $0xf0] sm:$0xff] %v3717_v63   ;;  %v5027_v7 = vunpack.c.l.bf16 %v3717_v63  ;;  %v5028_v8 = vunpack.c.h.bf16 %v3717_v63  ;;  %v5282_v11 = vadd.f32 %v5281_v2, %v5026_v56  ;;  %v5801_v12 = vadd.f32 %v5800_v3, %v5546_v1  ;;  %v7841_v60 = vpop.f32.mrf.mxu1  ;;  %v8092_v1 = vld [vmem:[%s9371_s0 + $0x3b0] sm:$0xff]  }
 0x158   :  { %v2149_v13 = vpop.f32.mrf.mxu0  ;;  %v5550_v31 = vmul.f32 %v5029_v19, %v5029_v19  ;;  %v5551_v36 = vmul.f32 %v5030_v22, %v5030_v22  ;;  %v3756_v10 = vpack.c.bf16 %v7841_v60, %v7840_v47  ;;  %7938 = vmatprep.mubr.msk.bf16.mxu1 %vm1474_vm0, %v8092_v1 }
 0x159   :  { %v5548_v16 = vmul.f32 %v5027_v7, %v5027_v7  ;;  %v5802_v18 = vadd.f32 %v5801_v12, %v5547_v6  ;;  %v5283_v20 = vadd.f32 %v5282_v11, %v5027_v7  ;;  %v5549_v26 = vmul.f32 %v5028_v8, %v5028_v8  ;;  %v2440_v5 = vpop.f32.mrf.mxu1  ;;  %v8093_v6 = vld [vmem:[%s9371_s0 + $0x3b8] sm:$0xff]  }
 0x15a   :  { %v7769_v21 = vpop.f32.mrf.mxu0  ;;  %v3755_v11 = vpack.c.bf16 %v2440_v5, %v2437_v54  ;;  %7939 = vmatmul.mubr.msk.bf16.gmra.mxu1 %vm1474_vm0, %v8093_v6  ;;  %7500 = vst [vmem:[%s9372_s2 + $0x228] sm:$0xff] %v3756_v10  }
 0x15b   :  { %v3720_v23 = vpack.c.bf16 %v7769_v21, %v7768_v4  ;;  %v5284_v25 = vadd.f32 %v5283_v20, %v5028_v8  ;;  %v5803_v27 = vadd.f32 %v5802_v18, %v5548_v16 }
 0x15c   :  { %v2152_v28 = vpop.f32.mrf.mxu0  ;;  %7499 = vst [vmem:[%s9372_s2 + $0x220] sm:$0xff] %v3755_v11  }
 0x15d   :  { %7464 = vst [vmem:[%s9372_s2 + $0x108] sm:$0xff] %v3720_v23   ;;  %v3719_v29 = vpack.c.bf16 %v2152_v28, %v2149_v13  ;;  %v5285_v32 = vadd.f32 %v5284_v25, %v5029_v19  ;;  %v5804_v33 = vadd.f32 %v5803_v27, %v5549_v26  ;;  %v5033_v49 = vunpack.c.l.bf16 %v3720_v23  ;;  %v7844_v13 = vpop.f32.mrf.mxu1 }
 0x15e   :  { %v7772_v34 = vpop.f32.mrf.mxu0  ;;  %v5034_v52 = vunpack.c.h.bf16 %v3720_v23 }
 0x15f   :  { %7463 = vst [vmem:[%s9372_s2 + $0x100] sm:$0xff] %v3719_v29   ;;  %v5031_v37 = vunpack.c.l.bf16 %v3719_v29  ;;  %v5032_v38 = vunpack.c.h.bf16 %v3719_v29  ;;  %v5286_v41 = vadd.f32 %v5285_v32, %v5030_v22  ;;  %v5805_v42 = vadd.f32 %v5804_v33, %v5550_v31  ;;  %v2453_v20 = vpop.f32.mrf.mxu1  ;;  %v8094_v31 = vld [vmem:[%s9371_s0 + $0x3c0] sm:$0xff]  }
 0x160   :  { %v2165_v43 = vpop.f32.mrf.mxu0  ;;  %v5554_v61 = vmul.f32 %v5033_v49, %v5033_v49  ;;  %v5555_v2 = vmul.f32 %v5034_v52, %v5034_v52  ;;  %7942 = vmatprep.mubr.msk.bf16.mxu1 %vm1474_vm0, %v8094_v31 }
 0x161   :  { %v5552_v46 = vmul.f32 %v5031_v37, %v5031_v37  ;;  %v5806_v48 = vadd.f32 %v5805_v42, %v5551_v36  ;;  %v5287_v50 = vadd.f32 %v5286_v41, %v5031_v37  ;;  %v5553_v56 = vmul.f32 %v5032_v38, %v5032_v38  ;;  %v7845_v26 = vpop.f32.mrf.mxu1  ;;  %v8095_v36 = vld [vmem:[%s9371_s0 + $0x3c8] sm:$0xff]  }
 0x162   :  { %v7773_v51 = vpop.f32.mrf.mxu0  ;;  %v3758_v40 = vpack.c.bf16 %v7845_v26, %v7844_v13  ;;  %7943 = vmatmul.mubr.msk.bf16.gmra.mxu1 %vm1474_vm0, %v8095_v36 }
 0x163   :  { %v3722_v53 = vpack.c.bf16 %v7773_v51, %v7772_v34  ;;  %v5288_v55 = vadd.f32 %v5287_v50, %v5032_v38  ;;  %v5807_v57 = vadd.f32 %v5806_v48, %v5552_v46  ;;  %v2456_v35 = vpop.f32.mrf.mxu1 }
 0x164   :  { %v2168_v58 = vpop.f32.mrf.mxu0  ;;  %v8768_v41 = vpack.c.bf16 %v2456_v35, %v2453_v20  ;;  %7502 = vst [vmem:[%s9372_s2 + $0x238] sm:$0xff] %v3758_v40  }
 0x165   :  { %7466 = vst [vmem:[%s9372_s2 + $0x118] sm:$0xff] %v3722_v53   ;;  %v3721_v59 = vpack.c.bf16 %v2168_v58, %v2165_v43  ;;  %v5289_v62 = vadd.f32 %v5288_v55, %v5033_v49  ;;  %v5808_v63 = vadd.f32 %v5807_v57, %v5553_v56  ;;  %v5037_v15 = vunpack.c.l.bf16 %v3722_v53  ;;  %v7848_v43 = vpop.f32.mrf.mxu1 }
 0x166   :  { %v7776_v0 = vpop.f32.mrf.mxu0  ;;  %v5038_v18 = vunpack.c.h.bf16 %v3722_v53  ;;  %7501 = vst [vmem:[%s9372_s2 + $0x230] sm:$0xff] %v8768_v41  }
 0x167   :  { %7465 = vst [vmem:[%s9372_s2 + $0x110] sm:$0xff] %v3721_v59   ;;  %v5035_v3 = vunpack.c.l.bf16 %v3721_v59  ;;  %v5036_v4 = vunpack.c.h.bf16 %v3721_v59  ;;  %v5290_v7 = vadd.f32 %v5289_v62, %v5034_v52  ;;  %v5809_v8 = vadd.f32 %v5808_v63, %v5554_v61  ;;  %v2469_v50 = vpop.f32.mrf.mxu1  ;;  %v8096_v61 = vld [vmem:[%s9371_s0 + $0x3d0] sm:$0xff]  }
 0x168   :  { %v2181_v9 = vpop.f32.mrf.mxu0  ;;  %v5558_v27 = vmul.f32 %v5037_v15, %v5037_v15  ;;  %v5559_v32 = vmul.f32 %v5038_v18, %v5038_v18  ;;  %7946 = vmatprep.mubr.msk.bf16.mxu1 %vm1474_vm0, %v8096_v61 }
 0x169   :  { %v5556_v12 = vmul.f32 %v5035_v3, %v5035_v3  ;;  %v5810_v14 = vadd.f32 %v5809_v8, %v5555_v2  ;;  %v5291_v16 = vadd.f32 %v5290_v7, %v5035_v3  ;;  %v5557_v22 = vmul.f32 %v5036_v4, %v5036_v4  ;;  %v7849_v56 = vpop.f32.mrf.mxu1  ;;  %v8097_v2 = vld [vmem:[%s9371_s0 + $0x3d8] sm:$0xff]  }
 0x16a   :  { %v7777_v17 = vpop.f32.mrf.mxu0  ;;  %v8791_v6 = vpack.c.bf16 %v7849_v56, %v7848_v43  ;;  %7947 = vmatmul.mubr.msk.bf16.gmra.mxu1 %vm1474_vm0, %v8097_v2 }
 0x16b   :  { %v3724_v19 = vpack.c.bf16 %v7777_v17, %v7776_v0  ;;  %v5292_v21 = vadd.f32 %v5291_v16, %v5036_v4  ;;  %v5811_v23 = vadd.f32 %v5810_v14, %v5556_v12  ;;  %v2472_v1 = vpop.f32.mrf.mxu1 }
 0x16c   :  { %v2184_v24 = vpop.f32.mrf.mxu0  ;;  %v8793_v7 = vpack.c.bf16 %v2472_v1, %v2469_v50  ;;  %7504 = vst [vmem:[%s9372_s2 + $0x248] sm:$0xff] %v8791_v6  }
 0x16d   :  { %7468 = vst [vmem:[%s9372_s2 + $0x128] sm:$0xff] %v3724_v19   ;;  %v3723_v25 = vpack.c.bf16 %v2184_v24, %v2181_v9  ;;  %v5293_v28 = vadd.f32 %v5292_v21, %v5037_v15  ;;  %v5812_v29 = vadd.f32 %v5811_v23, %v5557_v22  ;;  %v5041_v45 = vunpack.c.l.bf16 %v3724_v19  ;;  %v7852_v9 = vpop.f32.mrf.mxu1 }
 0x16e   :  { %v7780_v30 = vpop.f32.mrf.mxu0  ;;  %v5042_v48 = vunpack.c.h.bf16 %v3724_v19  ;;  %7503 = vst [vmem:[%s9372_s2 + $0x240] sm:$0xff] %v8793_v7  }
 0x16f   :  { %7467 = vst [vmem:[%s9372_s2 + $0x120] sm:$0xff] %v3723_v25   ;;  %v5039_v33 = vunpack.c.l.bf16 %v3723_v25  ;;  %v5040_v34 = vunpack.c.h.bf16 %v3723_v25  ;;  %v5294_v37 = vadd.f32 %v5293_v28, %v5038_v18  ;;  %v5813_v38 = vadd.f32 %v5812_v29, %v5558_v27  ;;  %v2485_v16 = vpop.f32.mrf.mxu1  ;;  %v8098_v27 = vld [vmem:[%s9371_s0 + $0x3e0] sm:$0xff]  }
 0x170   :  { %v2197_v39 = vpop.f32.mrf.mxu0  ;;  %v5562_v57 = vmul.f32 %v5041_v45, %v5041_v45  ;;  %v5563_v62 = vmul.f32 %v5042_v48, %v5042_v48  ;;  %7950 = vmatprep.mubr.msk.bf16.mxu1 %vm1474_vm0, %v8098_v27 }
 0x171   :  { %v5560_v42 = vmul.f32 %v5039_v33, %v5039_v33  ;;  %v5814_v44 = vadd.f32 %v5813_v38, %v5559_v32  ;;  %v5295_v46 = vadd.f32 %v5294_v37, %v5039_v33  ;;  %v5561_v52 = vmul.f32 %v5040_v34, %v5040_v34  ;;  %v7853_v22 = vpop.f32.mrf.mxu1  ;;  %v8099_v32 = vld [vmem:[%s9371_s0 + $0x3e8] sm:$0xff]  }
 0x172   :  { %v7781_v47 = vpop.f32.mrf.mxu0  ;;  %v8817_v36 = vpack.c.bf16 %v7853_v22, %v7852_v9  ;;  %7951 = vmatmul.mubr.msk.bf16.gmra.mxu1 %vm1474_vm0, %v8099_v32 }
 0x173   :  { %v3726_v49 = vpack.c.bf16 %v7781_v47, %v7780_v30  ;;  %v5296_v51 = vadd.f32 %v5295_v46, %v5040_v34  ;;  %v5815_v53 = vadd.f32 %v5814_v44, %v5560_v42  ;;  %v2488_v31 = vpop.f32.mrf.mxu1 }
 0x174   :  { %v2200_v54 = vpop.f32.mrf.mxu0  ;;  %v8819_v37 = vpack.c.bf16 %v2488_v31, %v2485_v16  ;;  %7506 = vst [vmem:[%s9372_s2 + $0x258] sm:$0xff] %v8817_v36  }
 0x175   :  { %7470 = vst [vmem:[%s9372_s2 + $0x138] sm:$0xff] %v3726_v49   ;;  %v3725_v55 = vpack.c.bf16 %v2200_v54, %v2197_v39  ;;  %v5297_v58 = vadd.f32 %v5296_v51, %v5041_v45  ;;  %v5816_v59 = vadd.f32 %v5815_v53, %v5561_v52  ;;  %v5045_v11 = vunpack.c.l.bf16 %v3726_v49  ;;  %v7856_v39 = vpop.f32.mrf.mxu1 }
 0x176   :  { %v7784_v60 = vpop.f32.mrf.mxu0  ;;  %v5046_v14 = vunpack.c.h.bf16 %v3726_v49  ;;  %7505 = vst [vmem:[%s9372_s2 + $0x250] sm:$0xff] %v8819_v37  }
 0x177   :  { %7469 = vst [vmem:[%s9372_s2 + $0x130] sm:$0xff] %v3725_v55   ;;  %v5043_v63 = vunpack.c.l.bf16 %v3725_v55  ;;  %v5044_v0 = vunpack.c.h.bf16 %v3725_v55  ;;  %v5298_v3 = vadd.f32 %v5297_v58, %v5042_v48  ;;  %v5817_v4 = vadd.f32 %v5816_v59, %v5562_v57  ;;  %v2501_v47 = vpop.f32.mrf.mxu1  ;;  %v8100_v58 = vld [vmem:[%s9371_s0 + $0x3f0] sm:$0xff]  }
 0x178   :  { %v2213_v5 = vpop.f32.mrf.mxu0  ;;  %v5566_v23 = vmul.f32 %v5045_v11, %v5045_v11  ;;  %v5567_v28 = vmul.f32 %v5046_v14, %v5046_v14  ;;  %7954 = vmatprep.mubr.msk.bf16.mxu1 %vm1474_vm0, %v8100_v58 }
 0x179   :  { %v5564_v8 = vmul.f32 %v5043_v63, %v5043_v63  ;;  %v5818_v10 = vadd.f32 %v5817_v4, %v5563_v62  ;;  %v5299_v12 = vadd.f32 %v5298_v3, %v5043_v63  ;;  %v5565_v18 = vmul.f32 %v5044_v0, %v5044_v0  ;;  %v7857_v53 = vpop.f32.mrf.mxu1  ;;  %v8101_v63 = vld [vmem:[%s9371_s0 + $0x3f8] sm:$0xff]  }
 0x17a   :  { %v7785_v13 = vpop.f32.mrf.mxu0  ;;  %v8843_v3 = vpack.c.bf16 %v7857_v53, %v7856_v39  ;;  %7955 = vmatmul.mubr.msk.bf16.gmra.mxu1 %vm1474_vm0, %v8101_v63 }
 0x17b   :  { %v3728_v15 = vpack.c.bf16 %v7785_v13, %v7784_v60  ;;  %v5300_v17 = vadd.f32 %v5299_v12, %v5044_v0  ;;  %v5819_v19 = vadd.f32 %v5818_v10, %v5564_v8  ;;  %v2504_v62 = vpop.f32.mrf.mxu1 }
 0x17c   :  { %v2216_v20 = vpop.f32.mrf.mxu0  ;;  %v8845_v4 = vpack.c.bf16 %v2504_v62, %v2501_v47  ;;  %7508 = vst [vmem:[%s9372_s2 + $0x268] sm:$0xff] %v8843_v3  }
 0x17d   :  { %7472 = vst [vmem:[%s9372_s2 + $0x148] sm:$0xff] %v3728_v15   ;;  %v3727_v21 = vpack.c.bf16 %v2216_v20, %v2213_v5  ;;  %v5301_v24 = vadd.f32 %v5300_v17, %v5045_v11  ;;  %v5820_v25 = vadd.f32 %v5819_v19, %v5565_v18  ;;  %v5049_v42 = vunpack.c.l.bf16 %v3728_v15  ;;  %v7860_v8 = vpop.f32.mrf.mxu1 }
 0x17e   :  { %v7788_v26 = vpop.f32.mrf.mxu0  ;;  %v5050_v45 = vunpack.c.h.bf16 %v3728_v15  ;;  %7507 = vst [vmem:[%s9372_s2 + $0x260] sm:$0xff] %v8845_v4  }
 0x17f   :  { %7471 = vst [vmem:[%s9372_s2 + $0x140] sm:$0xff] %v3727_v21   ;;  %v5047_v29 = vunpack.c.l.bf16 %v3727_v21  ;;  %v5048_v30 = vunpack.c.h.bf16 %v3727_v21  ;;  %v5302_v33 = vadd.f32 %v5301_v24, %v5046_v14  ;;  %v5821_v34 = vadd.f32 %v5820_v25, %v5566_v23  ;;  %v2517_v15 = vpop.f32.mrf.mxu1 }
 0x180   :  { %v2229_v35 = vpop.f32.mrf.mxu0  ;;  %v5570_v54 = vmul.f32 %v5049_v42, %v5049_v42  ;;  %v5571_v59 = vmul.f32 %v5050_v45, %v5050_v45 }
 0x181   :  { %v5568_v38 = vmul.f32 %v5047_v29, %v5047_v29  ;;  %v5822_v40 = vadd.f32 %v5821_v34, %v5567_v28  ;;  %v5303_v43 = vadd.f32 %v5302_v33, %v5047_v29  ;;  %v5569_v49 = vmul.f32 %v5048_v30, %v5048_v30  ;;  %v7861_v21 = vpop.f32.mrf.mxu1 }
 0x182   :  { %v7789_v44 = vpop.f32.mrf.mxu0  ;;  %v8863_v33 = vpack.c.bf16 %v7861_v21, %v7860_v8 }
 0x183   :  { %v3730_v46 = vpack.c.bf16 %v7789_v44, %v7788_v26  ;;  %v5304_v48 = vadd.f32 %v5303_v43, %v5048_v30  ;;  %v5823_v50 = vadd.f32 %v5822_v40, %v5568_v38  ;;  %v2520_v29 = vpop.f32.mrf.mxu1 }
 0x184   :  { %v2232_v51 = vpop.f32.mrf.mxu0  ;;  %v8865_v34 = vpack.c.bf16 %v2520_v29, %v2517_v15  ;;  %7510 = vst [vmem:[%s9372_s2 + $0x278] sm:$0xff] %v8863_v33  }
 0x185   :  { %7474 = vst [vmem:[%s9372_s2 + $0x158] sm:$0xff] %v3730_v46   ;;  %v3729_v52 = vpack.c.bf16 %v2232_v51, %v2229_v35  ;;  %v5305_v55 = vadd.f32 %v5304_v48, %v5049_v42  ;;  %v5824_v56 = vadd.f32 %v5823_v50, %v5569_v49  ;;  %v5053_v10 = vunpack.c.l.bf16 %v3730_v46  ;;  %v7864_v38 = vpop.f32.mrf.mxu1 }
 0x186   :  { %v7792_v57 = vpop.f32.mrf.mxu0  ;;  %v5054_v13 = vunpack.c.h.bf16 %v3730_v46  ;;  %7509 = vst [vmem:[%s9372_s2 + $0x270] sm:$0xff] %v8865_v34  }
 0x187   :  { %7473 = vst [vmem:[%s9372_s2 + $0x150] sm:$0xff] %v3729_v52   ;;  %v5051_v60 = vunpack.c.l.bf16 %v3729_v52  ;;  %v5052_v61 = vunpack.c.h.bf16 %v3729_v52  ;;  %v5306_v0 = vadd.f32 %v5305_v55, %v5050_v45  ;;  %v5825_v1 = vadd.f32 %v5824_v56, %v5570_v54  ;;  %v2533_v46 = vpop.f32.mrf.mxu1 }
 0x188   :  { %v2245_v2 = vpop.f32.mrf.mxu0  ;;  %v5574_v22 = vmul.f32 %v5053_v10, %v5053_v10  ;;  %v5575_v26 = vmul.f32 %v5054_v13, %v5054_v13 }
 0x189   :  { %v5572_v5 = vmul.f32 %v5051_v60, %v5051_v60  ;;  %v5826_v9 = vadd.f32 %v5825_v1, %v5571_v59  ;;  %v5307_v11 = vadd.f32 %v5306_v0, %v5051_v60  ;;  %v5573_v17 = vmul.f32 %v5052_v61, %v5052_v61  ;;  %v7865_v52 = vpop.f32.mrf.mxu1 }
 0x18a   :  { %v7793_v12 = vpop.f32.mrf.mxu0  ;;  %v8881_v0 = vpack.c.bf16 %v7865_v52, %v7864_v38 }
 0x18b   :  { %v3732_v14 = vpack.c.bf16 %v7793_v12, %v7792_v57  ;;  %v5308_v16 = vadd.f32 %v5307_v11, %v5052_v61  ;;  %v5827_v18 = vadd.f32 %v5826_v9, %v5572_v5  ;;  %v2536_v60 = vpop.f32.mrf.mxu1 }
 0x18c   :  { %v2248_v19 = vpop.f32.mrf.mxu0  ;;  %v8883_v1 = vpack.c.bf16 %v2536_v60, %v2533_v46  ;;  %7512 = vst [vmem:[%s9372_s2 + $0x288] sm:$0xff] %v8881_v0  }
 0x18d   :  { %7476 = vst [vmem:[%s9372_s2 + $0x168] sm:$0xff] %v3732_v14   ;;  %v3731_v20 = vpack.c.bf16 %v2248_v19, %v2245_v2  ;;  %v5309_v23 = vadd.f32 %v5308_v16, %v5053_v10  ;;  %v5828_v24 = vadd.f32 %v5827_v18, %v5573_v17  ;;  %v5057_v40 = vunpack.c.l.bf16 %v3732_v14  ;;  %v7868_v5 = vpop.f32.mrf.mxu1 }
 0x18e   :  { %v7796_v25 = vpop.f32.mrf.mxu0  ;;  %v5058_v44 = vunpack.c.h.bf16 %v3732_v14  ;;  %7511 = vst [vmem:[%s9372_s2 + $0x280] sm:$0xff] %v8883_v1  }
 0x18f   :  { %7475 = vst [vmem:[%s9372_s2 + $0x160] sm:$0xff] %v3731_v20   ;;  %v5055_v27 = vunpack.c.l.bf16 %v3731_v20  ;;  %v5056_v28 = vunpack.c.h.bf16 %v3731_v20  ;;  %v5310_v30 = vadd.f32 %v5309_v23, %v5054_v13  ;;  %v5829_v31 = vadd.f32 %v5828_v24, %v5574_v22  ;;  %v2549_v14 = vpop.f32.mrf.mxu1 }
 0x190   :  { %v2261_v32 = vpop.f32.mrf.mxu0  ;;  %v5578_v53 = vmul.f32 %v5057_v40, %v5057_v40  ;;  %v5579_v57 = vmul.f32 %v5058_v44, %v5058_v44 }
 0x191   :  { %v5576_v35 = vmul.f32 %v5055_v27, %v5055_v27  ;;  %v5830_v39 = vadd.f32 %v5829_v31, %v5575_v26  ;;  %v5311_v42 = vadd.f32 %v5310_v30, %v5055_v27  ;;  %v5577_v48 = vmul.f32 %v5056_v28, %v5056_v28  ;;  %v7869_v20 = vpop.f32.mrf.mxu1 }
 0x192   :  { %v7797_v43 = vpop.f32.mrf.mxu0 }
 0x193   :  { %v3734_v45 = vpack.c.bf16 %v7797_v43, %v7796_v25  ;;  %v5312_v47 = vadd.f32 %v5311_v42, %v5056_v28  ;;  %v5831_v49 = vadd.f32 %v5830_v39, %v5576_v35  ;;  %v2552_v28 = vpop.f32.mrf.mxu1 }
 0x194   :  { %v2264_v50 = vpop.f32.mrf.mxu0  ;;  %v8901_v35 = vpack.c.bf16 %v2552_v28, %v2549_v14 }
 0x195   :  { %7478 = vst [vmem:[%s9372_s2 + $0x178] sm:$0xff] %v3734_v45   ;;  %v3733_v51 = vpack.c.bf16 %v2264_v50, %v2261_v32  ;;  %v5313_v54 = vadd.f32 %v5312_v47, %v5057_v40  ;;  %v5832_v55 = vadd.f32 %v5831_v49, %v5577_v48  ;;  %v5061_v9 = vunpack.c.l.bf16 %v3734_v45  ;;  %v7872_v39 = vpop.f32.mrf.mxu1 }
 0x196   :  { %v7800_v56 = vpop.f32.mrf.mxu0  ;;  %v5062_v12 = vunpack.c.h.bf16 %v3734_v45  ;;  %v8899_v32 = vpack.c.bf16 %v7869_v20, %v7868_v5  ;;  %7513 = vst [vmem:[%s9372_s2 + $0x290] sm:$0xff] %v8901_v35  }
 0x197   :  { %7477 = vst [vmem:[%s9372_s2 + $0x170] sm:$0xff] %v3733_v51   ;;  %v5059_v58 = vunpack.c.l.bf16 %v3733_v51  ;;  %v5060_v59 = vunpack.c.h.bf16 %v3733_v51  ;;  %v5314_v61 = vadd.f32 %v5313_v54, %v5058_v44  ;;  %v5833_v62 = vadd.f32 %v5832_v55, %v5578_v53  ;;  %v2565_v47 = vpop.f32.mrf.mxu1 }
 0x198   :  { %v2277_v63 = vpop.f32.mrf.mxu0  ;;  %v5582_v21 = vmul.f32 %v5061_v9, %v5061_v9  ;;  %v5583_v25 = vmul.f32 %v5062_v12, %v5062_v12  ;;  %7514 = vst [vmem:[%s9372_s2 + $0x298] sm:$0xff] %v8899_v32  }
 0x199   :  { %v5580_v2 = vmul.f32 %v5059_v58, %v5059_v58  ;;  %v5834_v8 = vadd.f32 %v5833_v62, %v5579_v57  ;;  %v5315_v10 = vadd.f32 %v5314_v61, %v5059_v58  ;;  %v5581_v16 = vmul.f32 %v5060_v59, %v5060_v59  ;;  %v7873_v53 = vpop.f32.mrf.mxu1 }
 0x19a   :  { %v7801_v11 = vpop.f32.mrf.mxu0  ;;  %v8917_v5 = vpack.c.bf16 %v7873_v53, %v7872_v39 }
 0x19b   :  { %v3736_v13 = vpack.c.bf16 %v7801_v11, %v7800_v56  ;;  %v5316_v15 = vadd.f32 %v5315_v10, %v5060_v59  ;;  %v5835_v17 = vadd.f32 %v5834_v8, %v5580_v2  ;;  %v2568_v61 = vpop.f32.mrf.mxu1 }
 0x19c   :  { %v2280_v18 = vpop.f32.mrf.mxu0  ;;  %v8919_v8 = vpack.c.bf16 %v2568_v61, %v2565_v47  ;;  %7516 = vst [vmem:[%s9372_s2 + $0x2a8] sm:$0xff] %v8917_v5  }
 0x19d   :  { %7480 = vst [vmem:[%s9372_s2 + $0x188] sm:$0xff] %v3736_v13   ;;  %v3735_v19 = vpack.c.bf16 %v2280_v18, %v2277_v63  ;;  %v5317_v22 = vadd.f32 %v5316_v15, %v5061_v9  ;;  %v5836_v23 = vadd.f32 %v5835_v17, %v5581_v16  ;;  %v5065_v42 = vunpack.c.l.bf16 %v3736_v13  ;;  %v7876_v10 = vpop.f32.mrf.mxu1 }
 0x19e   :  { %v7804_v24 = vpop.f32.mrf.mxu0  ;;  %v5066_v45 = vunpack.c.h.bf16 %v3736_v13  ;;  %7515 = vst [vmem:[%s9372_s2 + $0x2a0] sm:$0xff] %v8919_v8  }
 0x19f   :  { %7479 = vst [vmem:[%s9372_s2 + $0x180] sm:$0xff] %v3735_v19   ;;  %v5063_v26 = vunpack.c.l.bf16 %v3735_v19  ;;  %v5064_v27 = vunpack.c.h.bf16 %v3735_v19  ;;  %v5318_v29 = vadd.f32 %v5317_v22, %v5062_v12  ;;  %v5837_v30 = vadd.f32 %v5836_v23, %v5582_v21  ;;  %v2581_v17 = vpop.f32.mrf.mxu1 }
 0x1a0   :  { %v2293_v31 = vpop.f32.mrf.mxu0  ;;  %v5586_v54 = vmul.f32 %v5065_v42, %v5065_v42  ;;  %v5587_v58 = vmul.f32 %v5066_v45, %v5066_v45 }
 0x1a1   :  { %v5584_v38 = vmul.f32 %v5063_v26, %v5063_v26  ;;  %v5838_v40 = vadd.f32 %v5837_v30, %v5583_v25  ;;  %v5319_v43 = vadd.f32 %v5318_v29, %v5063_v26  ;;  %v5585_v49 = vmul.f32 %v5064_v27, %v5064_v27  ;;  %v7877_v23 = vpop.f32.mrf.mxu1 }
 0x1a2   :  { %v7805_v44 = vpop.f32.mrf.mxu0 }
 0x1a3   :  { %v3738_v46 = vpack.c.bf16 %v7805_v44, %v7804_v24  ;;  %v5320_v48 = vadd.f32 %v5319_v43, %v5064_v27  ;;  %v5839_v50 = vadd.f32 %v5838_v40, %v5584_v38 }
 0x1a4   :  { %v2296_v51 = vpop.f32.mrf.mxu0 }
 0x1a5   :  { %7482 = vst [vmem:[%s9372_s2 + $0x198] sm:$0xff] %v3738_v46   ;;  %v3737_v52 = vpack.c.bf16 %v2296_v51, %v2293_v31  ;;  %v5321_v55 = vadd.f32 %v5320_v48, %v5065_v42  ;;  %v5840_v56 = vadd.f32 %v5839_v50, %v5585_v49  ;;  %v5069_v12 = vunpack.c.l.bf16 %v3738_v46  ;;  %v2584_v31 = vpop.f32.mrf.mxu1 }
 0x1a6   :  { %v7808_v57 = vpop.f32.mrf.mxu0  ;;  %v5070_v15 = vunpack.c.h.bf16 %v3738_v46  ;;  %v8935_v42 = vpack.c.bf16 %v7877_v23, %v7876_v10  ;;  %v8937_v43 = vpack.c.bf16 %v2584_v31, %v2581_v17 }
 0x1a7   :  { %7481 = vst [vmem:[%s9372_s2 + $0x190] sm:$0xff] %v3737_v52   ;;  %v5067_v59 = vunpack.c.l.bf16 %v3737_v52  ;;  %v5068_v60 = vunpack.c.h.bf16 %v3737_v52  ;;  %v5322_v62 = vadd.f32 %v5321_v55, %v5066_v45  ;;  %v5841_v63 = vadd.f32 %v5840_v56, %v5586_v54  ;;  %v7880_v45 = vpop.f32.mrf.mxu1 }
 0x1a8   :  { %v2309_v2 = vpop.f32.mrf.mxu0  ;;  %v5590_v24 = vmul.f32 %v5069_v12, %v5069_v12  ;;  %v5591_v28 = vmul.f32 %v5070_v15, %v5070_v15  ;;  %7518 = vst [vmem:[%s9372_s2 + $0x2b8] sm:$0xff] %v8935_v42   ;;  %7517 = vst [vmem:[%s9372_s2 + $0x2b0] sm:$0xff] %v8937_v43  }
 0x1a9   :  { %v5588_v9 = vmul.f32 %v5067_v59, %v5067_v59  ;;  %v5842_v11 = vadd.f32 %v5841_v63, %v5587_v58  ;;  %v5323_v13 = vadd.f32 %v5322_v62, %v5067_v59  ;;  %v5589_v19 = vmul.f32 %v5068_v60, %v5068_v60  ;;  %v2597_v52 = vpop.f32.mrf.mxu1 }
 0x1aa   :  { %v7809_v14 = vpop.f32.mrf.mxu0 }
 0x1ab   :  { %v3740_v16 = vpack.c.bf16 %v7809_v14, %v7808_v57  ;;  %v5324_v18 = vadd.f32 %v5323_v13, %v5068_v60  ;;  %v5843_v20 = vadd.f32 %v5842_v11, %v5588_v9  ;;  %v7881_v58 = vpop.f32.mrf.mxu1 }
 0x1ac   :  { %v2312_v21 = vpop.f32.mrf.mxu0  ;;  %v8953_v14 = vpack.c.bf16 %v7881_v58, %v7880_v45 }
 0x1ad   :  { %7484 = vst [vmem:[%s9372_s2 + $0x1a8] sm:$0xff] %v3740_v16   ;;  %v3739_v22 = vpack.c.bf16 %v2312_v21, %v2309_v2  ;;  %v5325_v25 = vadd.f32 %v5324_v18, %v5069_v12  ;;  %v5844_v26 = vadd.f32 %v5843_v20, %v5589_v19  ;;  %v5073_v47 = vunpack.c.l.bf16 %v3740_v16  ;;  %v2600_v10 = vpop.f32.mrf.mxu1 }
 0x1ae   :  { %v7812_v27 = vpop.f32.mrf.mxu0  ;;  %v5074_v50 = vunpack.c.h.bf16 %v3740_v16  ;;  %7520 = vst [vmem:[%s9372_s2 + $0x2c8] sm:$0xff] %v8953_v14  }
 0x1af   :  { %7483 = vst [vmem:[%s9372_s2 + $0x1a0] sm:$0xff] %v3739_v22   ;;  %v5071_v29 = vunpack.c.l.bf16 %v3739_v22  ;;  %v5072_v30 = vunpack.c.h.bf16 %v3739_v22  ;;  %v5326_v38 = vadd.f32 %v5325_v25, %v5070_v15  ;;  %v5845_v39 = vadd.f32 %v5844_v26, %v5590_v24  ;;  %v7884_v17 = vpop.f32.mrf.mxu1 }
 0x1b0   :  { %v2325_v40 = vpop.f32.mrf.mxu0  ;;  %v5594_v59 = vmul.f32 %v5073_v47, %v5073_v47  ;;  %v5595_v63 = vmul.f32 %v5074_v50, %v5074_v50  ;;  %v8955_v15 = vpack.c.bf16 %v2600_v10, %v2597_v52 }
 0x1b1   :  { %v5592_v44 = vmul.f32 %v5071_v29, %v5071_v29  ;;  %v5846_v46 = vadd.f32 %v5845_v39, %v5591_v28  ;;  %v5327_v48 = vadd.f32 %v5326_v38, %v5071_v29  ;;  %v5593_v54 = vmul.f32 %v5072_v30, %v5072_v30  ;;  %v2613_v24 = vpop.f32.mrf.mxu1 }
 0x1b2   :  { %v7813_v49 = vpop.f32.mrf.mxu0  ;;  %7519 = vst [vmem:[%s9372_s2 + $0x2c0] sm:$0xff] %v8955_v15  }
 0x1b3   :  { %v3742_v51 = vpack.c.bf16 %v7813_v49, %v7812_v27  ;;  %v5328_v53 = vadd.f32 %v5327_v48, %v5072_v30  ;;  %v5847_v55 = vadd.f32 %v5846_v46, %v5592_v44  ;;  %v7885_v30 = vpop.f32.mrf.mxu1 }
 0x1b4   :  { %v2328_v56 = vpop.f32.mrf.mxu0 }
 0x1b5   :  { %7486 = vst [vmem:[%s9372_s2 + $0x1b8] sm:$0xff] %v3742_v51   ;;  %v3741_v57 = vpack.c.bf16 %v2328_v56, %v2325_v40  ;;  %v5329_v60 = vadd.f32 %v5328_v53, %v5073_v47  ;;  %v5848_v61 = vadd.f32 %v5847_v55, %v5593_v54  ;;  %v5077_v19 = vunpack.c.l.bf16 %v3742_v51  ;;  %v2616_v47 = vpop.f32.mrf.mxu1 }
 0x1b6   :  { %v7816_v62 = vpop.f32.mrf.mxu0  ;;  %v5078_v22 = vunpack.c.h.bf16 %v3742_v51  ;;  %v8971_v51 = vpack.c.bf16 %v7885_v30, %v7884_v17  ;;  %v8973_v52 = vpack.c.bf16 %v2616_v47, %v2613_v24 }
 0x1b7   :  { %7485 = vst [vmem:[%s9372_s2 + $0x1b0] sm:$0xff] %v3741_v57   ;;  %v5075_v2 = vunpack.c.l.bf16 %v3741_v57  ;;  %v5076_v9 = vunpack.c.h.bf16 %v3741_v57  ;;  %v5330_v11 = vadd.f32 %v5329_v60, %v5074_v50  ;;  %v5849_v12 = vadd.f32 %v5848_v61, %v5594_v59  ;;  %v7888_v54 = vpop.f32.mrf.mxu1 }
 0x1b8   :  { %v2341_v13 = vpop.f32.mrf.mxu0  ;;  %v5598_v31 = vmul.f32 %v5077_v19, %v5077_v19  ;;  %v5599_v44 = vmul.f32 %v5078_v22, %v5078_v22  ;;  %7522 = vst [vmem:[%s9372_s2 + $0x2d8] sm:$0xff] %v8971_v51   ;;  %7521 = vst [vmem:[%s9372_s2 + $0x2d0] sm:$0xff] %v8973_v52  }
 0x1b9   :  { %v5596_v16 = vmul.f32 %v5075_v2, %v5075_v2  ;;  %v5850_v18 = vadd.f32 %v5849_v12, %v5595_v63  ;;  %v5331_v20 = vadd.f32 %v5330_v11, %v5075_v2  ;;  %v5597_v26 = vmul.f32 %v5076_v9, %v5076_v9  ;;  %v2629_v61 = vpop.f32.mrf.mxu1 }
 0x1ba   :  { %v7817_v21 = vpop.f32.mrf.mxu0 }
 0x1bb   :  { %v3744_v23 = vpack.c.bf16 %v7817_v21, %v7816_v62  ;;  %v5332_v25 = vadd.f32 %v5331_v20, %v5076_v9  ;;  %v5851_v27 = vadd.f32 %v5850_v18, %v5596_v16  ;;  %v7889_v11 = vpop.f32.mrf.mxu1 }
 0x1bc   :  { %v2344_v28 = vpop.f32.mrf.mxu0 }
 0x1bd   :  { %7488 = vst [vmem:[%s9372_s2 + $0x1c8] sm:$0xff] %v3744_v23   ;;  %v3743_v29 = vpack.c.bf16 %v2344_v28, %v2341_v13  ;;  %v5333_v38 = vadd.f32 %v5332_v25, %v5077_v19  ;;  %v5852_v39 = vadd.f32 %v5851_v27, %v5597_v26  ;;  %v5081_v56 = vunpack.c.l.bf16 %v3744_v23  ;;  %v2632_v21 = vpop.f32.mrf.mxu1 }
 0x1be   :  { %v7820_v40 = vpop.f32.mrf.mxu0  ;;  %v5082_v59 = vunpack.c.h.bf16 %v3744_v23  ;;  %v8989_v25 = vpack.c.bf16 %v7889_v11, %v7888_v54  ;;  %v8991_v26 = vpack.c.bf16 %v2632_v21, %v2629_v61 }
 0x1bf   :  { %7487 = vst [vmem:[%s9372_s2 + $0x1c0] sm:$0xff] %v3743_v29   ;;  %v5079_v45 = vunpack.c.l.bf16 %v3743_v29  ;;  %v5080_v46 = vunpack.c.h.bf16 %v3743_v29  ;;  %v5334_v48 = vadd.f32 %v5333_v38, %v5078_v22  ;;  %v5853_v49 = vadd.f32 %v5852_v39, %v5598_v31  ;;  %v7892_v28 = vpop.f32.mrf.mxu1 }
 0x1c0   :  { %v2357_v50 = vpop.f32.mrf.mxu0  ;;  %v5602_v12 = vmul.f32 %v5081_v56, %v5081_v56  ;;  %v5603_v18 = vmul.f32 %v5082_v59, %v5082_v59  ;;  %7524 = vst [vmem:[%s9372_s2 + $0x2e8] sm:$0xff] %v8989_v25   ;;  %7523 = vst [vmem:[%s9372_s2 + $0x2e0] sm:$0xff] %v8991_v26  }
 0x1c1   :  { %v5600_v53 = vmul.f32 %v5079_v45, %v5079_v45  ;;  %v5854_v55 = vadd.f32 %v5853_v49, %v5599_v44  ;;  %v5335_v57 = vadd.f32 %v5334_v48, %v5079_v45  ;;  %v5601_v63 = vmul.f32 %v5080_v46, %v5080_v46  ;;  %v2645_v44 = vpop.f32.mrf.mxu1 }
 0x1c2   :  { %v7821_v58 = vpop.f32.mrf.mxu0 }
 0x1c3   :  { %v3746_v60 = vpack.c.bf16 %v7821_v58, %v7820_v40  ;;  %v5336_v62 = vadd.f32 %v5335_v57, %v5080_v46  ;;  %v5855_v2 = vadd.f32 %v5854_v55, %v5600_v53 }
 0x1c4   :  { %v2360_v9 = vpop.f32.mrf.mxu0 }
 0x1c5   :  { %7490 = vst [vmem:[%s9372_s2 + $0x1d8] sm:$0xff] %v3746_v60   ;;  %v3745_v10 = vpack.c.bf16 %v2360_v9, %v2357_v50  ;;  %v5337_v13 = vadd.f32 %v5336_v62, %v5081_v56  ;;  %v5856_v16 = vadd.f32 %v5855_v2, %v5601_v63  ;;  %v5085_v30 = vunpack.c.l.bf16 %v3746_v60  ;;  %v7893_v50 = vpop.f32.mrf.mxu1 }
 0x1c6   :  { %v7824_v17 = vpop.f32.mrf.mxu0  ;;  %v5086_v39 = vunpack.c.h.bf16 %v3746_v60  ;;  %v9007_v2 = vpack.c.bf16 %v7893_v50, %v7892_v28 }
 0x1c7   :  { %7489 = vst [vmem:[%s9372_s2 + $0x1d0] sm:$0xff] %v3745_v10   ;;  %v5083_v19 = vunpack.c.l.bf16 %v3745_v10  ;;  %v5084_v20 = vunpack.c.h.bf16 %v3745_v10  ;;  %v5338_v22 = vadd.f32 %v5337_v13, %v5082_v59  ;;  %v5857_v23 = vadd.f32 %v5856_v16, %v5602_v12  ;;  %v2648_v60 = vpop.f32.mrf.mxu1 }
 0x1c8   :  { %v2373_v24 = vpop.f32.mrf.mxu0  ;;  %v5606_v53 = vmul.f32 %v5085_v30, %v5085_v30  ;;  %v5607_v57 = vmul.f32 %v5086_v39, %v5086_v39  ;;  %v9009_v9 = vpack.c.bf16 %v2648_v60, %v2645_v44  ;;  %7526 = vst [vmem:[%s9372_s2 + $0x2f8] sm:$0xff] %v9007_v2  }
 0x1c9   :  { %v5604_v27 = vmul.f32 %v5083_v19, %v5083_v19  ;;  %v5858_v29 = vadd.f32 %v5857_v23, %v5603_v18  ;;  %v5339_v31 = vadd.f32 %v5338_v22, %v5083_v19  ;;  %v5605_v46 = vmul.f32 %v5084_v20, %v5084_v20  ;;  %v7896_v11 = vpop.f32.mrf.mxu1 }
 0x1ca   :  { %v7825_v38 = vpop.f32.mrf.mxu0  ;;  %7525 = vst [vmem:[%s9372_s2 + $0x2f0] sm:$0xff] %v9009_v9  }
 0x1cb   :  { %v3748_v40 = vpack.c.bf16 %v7825_v38, %v7824_v17  ;;  %v5340_v45 = vadd.f32 %v5339_v31, %v5084_v20  ;;  %v5859_v47 = vadd.f32 %v5858_v29, %v5604_v27  ;;  %v2661_v20 = vpop.f32.mrf.mxu1 }
 0x1cc   :  { %v2376_v48 = vpop.f32.mrf.mxu0 }
 0x1cd   :  { %7492 = vst [vmem:[%s9372_s2 + $0x1e8] sm:$0xff] %v3748_v40   ;;  %v3747_v49 = vpack.c.bf16 %v2376_v48, %v2373_v24  ;;  %v5341_v54 = vadd.f32 %v5340_v45, %v5085_v30  ;;  %v5860_v55 = vadd.f32 %v5859_v47, %v5605_v46  ;;  %v5089_v13 = vunpack.c.l.bf16 %v3748_v40  ;;  %v7897_v28 = vpop.f32.mrf.mxu1 }
 0x1ce   :  { %v7828_v56 = vpop.f32.mrf.mxu0  ;;  %v5090_v18 = vunpack.c.h.bf16 %v3748_v40  ;;  %v9025_v47 = vpack.c.bf16 %v7897_v28, %v7896_v11  ;;  %v8102_v11 = vld [vmem:[%s9372_s2 + $0x200] sm:$0xff] }
 0x1cf   :  { %7491 = vst [vmem:[%s9372_s2 + $0x1e0] sm:$0xff] %v3747_v49   ;;  %v5087_v58 = vunpack.c.l.bf16 %v3747_v49  ;;  %v5088_v59 = vunpack.c.h.bf16 %v3747_v49  ;;  %v5342_v61 = vadd.f32 %v5341_v54, %v5086_v39  ;;  %v5861_v62 = vadd.f32 %v5860_v55, %v5606_v53  ;;  %v2664_v44 = vpop.f32.mrf.mxu1 }
 0x1d0   :  { %v2389_v63 = vpop.f32.mrf.mxu0  ;;  %v5610_v29 = vmul.f32 %v5089_v13, %v5089_v13  ;;  %v5611_v38 = vmul.f32 %v5090_v18, %v5090_v18  ;;  %v9027_v48 = vpack.c.bf16 %v2664_v44, %v2661_v20  ;;  %7528 = vst [vmem:[%s9372_s2 + $0x308] sm:$0xff] %v9025_v47  }
 0x1d1   :  { %v5608_v10 = vmul.f32 %v5087_v58, %v5087_v58  ;;  %v5862_v12 = vadd.f32 %v5861_v62, %v5607_v57  ;;  %v5343_v16 = vadd.f32 %v5342_v61, %v5087_v58  ;;  %v5609_v22 = vmul.f32 %v5088_v59, %v5088_v59  ;;  %v7900_v50 = vpop.f32.mrf.mxu1 }
 0x1d2   :  { %v7829_v17 = vpop.f32.mrf.mxu0  ;;  %7527 = vst [vmem:[%s9372_s2 + $0x300] sm:$0xff] %v9027_v48  }
 0x1d3   :  { %v3750_v19 = vpack.c.bf16 %v7829_v17, %v7828_v56  ;;  %v5344_v21 = vadd.f32 %v5343_v16, %v5088_v59  ;;  %v5863_v23 = vadd.f32 %v5862_v12, %v5608_v10  ;;  %v2677_v57 = vpop.f32.mrf.mxu1  ;;  %v5095_v12 = vunpack.c.l.bf16 %v8102_v11 }
 0x1d4   :  { %v2392_v24 = vpop.f32.mrf.mxu0  ;;  %v5096_v16 = vunpack.c.h.bf16 %v8102_v11 }
 0x1d5   :  { %7494 = vst [vmem:[%s9372_s2 + $0x1f8] sm:$0xff] %v3750_v19   ;;  %v3749_v27 = vpack.c.bf16 %v2392_v24, %v2389_v63  ;;  %v5345_v30 = vadd.f32 %v5344_v21, %v5089_v13  ;;  %v5864_v31 = vadd.f32 %v5863_v23, %v5609_v22  ;;  %v5093_v54 = vunpack.c.l.bf16 %v3750_v19  ;;  %v7901_v61 = vpop.f32.mrf.mxu1  ;;  %v8103_v24 = vld [vmem:[%s9372_s2 + $0x208] sm:$0xff] }
 0x1d6   :  { %v5094_v56 = vunpack.c.h.bf16 %v3750_v19  ;;  %v9040_v21 = vpack.c.bf16 %v7901_v61, %v7900_v50  ;;  %v8104_v50 = vld [vmem:[%s9372_s2 + $0x210] sm:$0xff] }
 0x1d7   :  { %7493 = vst [vmem:[%s9372_s2 + $0x1f0] sm:$0xff] %v3749_v27   ;;  %v5091_v39 = vunpack.c.l.bf16 %v3749_v27  ;;  %v5092_v40 = vunpack.c.h.bf16 %v3749_v27  ;;  %v5346_v45 = vadd.f32 %v5345_v30, %v5090_v18  ;;  %v5865_v46 = vadd.f32 %v5864_v31, %v5610_v29  ;;  %v2680_v17 = vpop.f32.mrf.mxu1 }
 0x1d8   :  { %v5614_v62 = vmul.f32 %v5093_v54, %v5093_v54  ;;  %v5615_v13 = vmul.f32 %v5094_v56, %v5094_v56  ;;  %v9042_v19 = vpack.c.bf16 %v2680_v17, %v2677_v57  ;;  %v5097_v27 = vunpack.c.l.bf16 %v8103_v24  ;;  %7530 = vst [vmem:[%s9372_s2 + $0x318] sm:$0xff] %v9040_v21  }
 0x1d9   :  { %v5612_v49 = vmul.f32 %v5091_v39, %v5091_v39  ;;  %v5866_v53 = vadd.f32 %v5865_v46, %v5611_v38  ;;  %v5347_v55 = vadd.f32 %v5346_v45, %v5091_v39  ;;  %v5613_v59 = vmul.f32 %v5092_v40, %v5092_v40  ;;  %v7904_v22 = vpop.f32.mrf.mxu1 }
 0x1da   :  { %v5616_v29 = vmul.f32 %v5095_v12, %v5095_v12  ;;  %7529 = vst [vmem:[%s9372_s2 + $0x310] sm:$0xff] %v9042_v19   ;;  %v5098_v30 = vunpack.c.h.bf16 %v8103_v24  ;;  %v5617_v39 = vmul.f32 %v5096_v16, %v5096_v16  ;;  %v5618_v45 = vmul.f32 %v5097_v27, %v5097_v27 }
 0x1db   :  { %v5348_v58 = vadd.f32 %v5347_v55, %v5092_v40  ;;  %v5867_v60 = vadd.f32 %v5866_v53, %v5612_v49  ;;  %v2693_v31 = vpop.f32.mrf.mxu1  ;;  %v5099_v53 = vunpack.c.l.bf16 %v8104_v50  ;;  %v5100_v55 = vunpack.c.h.bf16 %v8104_v50  ;;  %v8107_v50 = vld [vmem:[%s9372_s2 + $0x228] sm:$0xff] }
 0x1dd   :  { %v5349_v63 = vadd.f32 %v5348_v58, %v5093_v54  ;;  %v5868_v10 = vadd.f32 %v5867_v60, %v5613_v59  ;;  %v7905_v44 = vpop.f32.mrf.mxu1  ;;  %v5619_v54 = vmul.f32 %v5098_v30, %v5098_v30 }
 0x1de   :  { %v9058_v59 = vpack.c.bf16 %v7905_v44, %v7904_v22 }
 0x1df   :  { %v5350_v18 = vadd.f32 %v5349_v63, %v5094_v56  ;;  %v5869_v20 = vadd.f32 %v5868_v10, %v5614_v62  ;;  %v2696_v56 = vpop.f32.mrf.mxu1  ;;  %v8105_v63 = vld [vmem:[%s9372_s2 + $0x218] sm:$0xff] }
 0x1e0   :  { %v9060_v60 = vpack.c.bf16 %v2696_v56, %v2693_v31  ;;  %v5101_v10 = vunpack.c.l.bf16 %v8105_v63  ;;  %7532 = vst [vmem:[%s9372_s2 + $0x328] sm:$0xff] %v9058_v59   ;;  %v5106_v56 = vunpack.c.h.bf16 %v8107_v50 }
 0x1e1   :  { %v5870_v23 = vadd.f32 %v5869_v20, %v5615_v13  ;;  %v5351_v28 = vadd.f32 %v5350_v18, %v5095_v12  ;;  %v7908_v61 = vpop.f32.mrf.mxu1  ;;  %v5620_v12 = vmul.f32 %v5099_v53, %v5099_v53  ;;  %v5102_v13 = vunpack.c.h.bf16 %v8105_v63 }
 0x1e2   :  { %7531 = vst [vmem:[%s9372_s2 + $0x320] sm:$0xff] %v9060_v60   ;;  %v5621_v18 = vmul.f32 %v5100_v55, %v5100_v55 }
 0x1e3   :  { %v5352_v38 = vadd.f32 %v5351_v28, %v5096_v16  ;;  %v5871_v40 = vadd.f32 %v5870_v23, %v5616_v29  ;;  %v2709_v16 = vpop.f32.mrf.mxu1  ;;  %v5622_v23 = vmul.f32 %v5101_v10, %v5101_v10  ;;  %v8106_v28 = vld [vmem:[%s9372_s2 + $0x220] sm:$0xff] }
 0x1e4   :  { %v5103_v29 = vunpack.c.l.bf16 %v8106_v28  ;;  %v5104_v31 = vunpack.c.h.bf16 %v8106_v28 }
 0x1e5   :  { %v5353_v46 = vadd.f32 %v5352_v38, %v5097_v27  ;;  %v5872_v49 = vadd.f32 %v5871_v40, %v5617_v39  ;;  %v7909_v22 = vpop.f32.mrf.mxu1 }
 0x1e6   :  { %v9076_v44 = vpack.c.bf16 %v7909_v22, %v7908_v61  ;;  %v5625_v61 = vmul.f32 %v5104_v31, %v5104_v31 }
 0x1e7   :  { %v5354_v57 = vadd.f32 %v5353_v46, %v5098_v30  ;;  %v5873_v58 = vadd.f32 %v5872_v49, %v5618_v45  ;;  %v5623_v30 = vmul.f32 %v5102_v13, %v5102_v13  ;;  %v2712_v38 = vpop.f32.mrf.mxu1 }
 0x1e8   :  { %v9078_v45 = vpack.c.bf16 %v2712_v38, %v2709_v16  ;;  %7534 = vst [vmem:[%s9372_s2 + $0x338] sm:$0xff] %v9076_v44   ;;  %v5627_v16 = vmul.f32 %v5106_v56, %v5106_v56 }
 0x1e9   :  { %v5874_v62 = vadd.f32 %v5873_v58, %v5619_v54  ;;  %v5355_v11 = vadd.f32 %v5354_v57, %v5099_v53  ;;  %v7912_v46 = vpop.f32.mrf.mxu1  ;;  %v5105_v53 = vunpack.c.l.bf16 %v8107_v50 }
 0x1ea   :  { %7533 = vst [vmem:[%s9372_s2 + $0x330] sm:$0xff] %v9078_v45  }
 0x1eb   :  { %v5356_v17 = vadd.f32 %v5355_v11, %v5100_v55  ;;  %v5875_v20 = vadd.f32 %v5874_v62, %v5620_v12  ;;  %v5624_v55 = vmul.f32 %v5103_v29, %v5103_v29  ;;  %v2725_v57 = vpop.f32.mrf.mxu1 }
 0x1ed   :  { %v5357_v24 = vadd.f32 %v5356_v17, %v5101_v10  ;;  %v5876_v27 = vadd.f32 %v5875_v20, %v5621_v18  ;;  %v7913_v63 = vpop.f32.mrf.mxu1  ;;  %v5626_v10 = vmul.f32 %v5105_v53, %v5105_v53  ;;  %v5108_v17 = vunpack.c.h.bf16 %v8768_v41 }
 0x1ef   :  { %v5358_v39 = vadd.f32 %v5357_v24, %v5102_v13  ;;  %v5877_v40 = vadd.f32 %v5876_v27, %v5622_v23  ;;  %v5107_v13 = vunpack.c.l.bf16 %v8768_v41  ;;  %v2728_v18 = vpop.f32.mrf.mxu1  ;;  %v9093_v23 = vpack.c.bf16 %v7913_v63, %v7912_v46 }
 0x1f0   :  { %v9095_v24 = vpack.c.bf16 %v2728_v18, %v2725_v57  ;;  %v5629_v46 = vmul.f32 %v5108_v17, %v5108_v17 }
 0x1f1   :  { %v5878_v49 = vadd.f32 %v5877_v40, %v5623_v30  ;;  %v5359_v54 = vadd.f32 %v5358_v39, %v5103_v29  ;;  %v7916_v27 = vpop.f32.mrf.mxu1  ;;  %v8108_v29 = vld [vmem:[%s9372_s2 + $0x238] sm:$0xff]  ;;  %v5628_v38 = vmul.f32 %v5107_v13, %v5107_v13  ;;  %7536 = vst [vmem:[%s9372_s2 + $0x348] sm:$0xff] %v9093_v23  }
 0x1f2   :  { %v5109_v30 = vunpack.c.l.bf16 %v8108_v29  ;;  %7535 = vst [vmem:[%s9372_s2 + $0x340] sm:$0xff] %v9095_v24   ;;  %v5110_v41 = vunpack.c.h.bf16 %v8108_v29 }
 0x1f3   :  { %v5360_v58 = vadd.f32 %v5359_v54, %v5104_v31  ;;  %v5879_v62 = vadd.f32 %v5878_v49, %v5624_v55  ;;  %v2741_v39 = vpop.f32.mrf.mxu1 }
 0x1f4   :  { %v5631_v57 = vmul.f32 %v5110_v41, %v5110_v41 }
 0x1f5   :  { %v5361_v11 = vadd.f32 %v5360_v58, %v5105_v53  ;;  %v5880_v12 = vadd.f32 %v5879_v62, %v5625_v61  ;;  %v7917_v50 = vpop.f32.mrf.mxu1  ;;  %v5630_v53 = vmul.f32 %v5109_v30, %v5109_v30  ;;  %v5112_v58 = vunpack.c.h.bf16 %v8793_v7 }
 0x1f7   :  { %v5362_v20 = vadd.f32 %v5361_v11, %v5106_v56  ;;  %v5881_v22 = vadd.f32 %v5880_v12, %v5626_v10  ;;  %v5111_v56 = vunpack.c.l.bf16 %v8793_v7  ;;  %v2744_v61 = vpop.f32.mrf.mxu1  ;;  %v9110_v10 = vpack.c.bf16 %v7917_v50, %v7916_v27 }
 0x1f8   :  { %v9112_v11 = vpack.c.bf16 %v2744_v61, %v2741_v39  ;;  %v5114_v7 = vunpack.c.h.bf16 %v8791_v6  ;;  %v5633_v27 = vmul.f32 %v5112_v58, %v5112_v58 }
 0x1f9   :  { %v5882_v28 = vadd.f32 %v5881_v22, %v5627_v16  ;;  %v5363_v31 = vadd.f32 %v5362_v20, %v5107_v13  ;;  %v7920_v12 = vpop.f32.mrf.mxu1  ;;  %v5113_v16 = vunpack.c.l.bf16 %v8791_v6  ;;  %v5632_v18 = vmul.f32 %v5111_v56, %v5111_v56  ;;  %7538 = vst [vmem:[%s9372_s2 + $0x358] sm:$0xff] %v9110_v10  }
 0x1fa   :  { %7537 = vst [vmem:[%s9372_s2 + $0x350] sm:$0xff] %v9112_v11   ;;  %v5635_v39 = vmul.f32 %v5114_v7, %v5114_v7 }
 0x1fb   :  { %v5364_v40 = vadd.f32 %v5363_v31, %v5108_v17  ;;  %v5883_v49 = vadd.f32 %v5882_v28, %v5628_v38  ;;  %v2757_v20 = vpop.f32.mrf.mxu1 }
 0x1fd   :  { %v5365_v54 = vadd.f32 %v5364_v40, %v5109_v30  ;;  %v5884_v55 = vadd.f32 %v5883_v49, %v5629_v46  ;;  %v7921_v29 = vpop.f32.mrf.mxu1  ;;  %v5634_v30 = vmul.f32 %v5113_v16, %v5113_v16  ;;  %v5116_v40 = vunpack.c.h.bf16 %v8819_v37 }
 0x1ff   :  { %v5366_v62 = vadd.f32 %v5365_v54, %v5110_v41  ;;  %v5885_v63 = vadd.f32 %v5884_v55, %v5630_v53  ;;  %v5115_v41 = vunpack.c.l.bf16 %v8819_v37  ;;  %v2760_v46 = vpop.f32.mrf.mxu1  ;;  %v9126_v53 = vpack.c.bf16 %v7921_v29, %v7920_v12 }
 0x200   :  { %v9128_v54 = vpack.c.bf16 %v2760_v46, %v2757_v20  ;;  %v5118_v37 = vunpack.c.h.bf16 %v8817_v36 }
 0x201   :  { %v5886_v13 = vadd.f32 %v5885_v63, %v5631_v57  ;;  %v5367_v17 = vadd.f32 %v5366_v62, %v5111_v56  ;;  %v7924_v6 = vpop.f32.mrf.mxu1  ;;  %v5117_v56 = vunpack.c.l.bf16 %v8817_v36  ;;  %7540 = vst [vmem:[%s9372_s2 + $0x368] sm:$0xff] %v9126_v53   ;;  %v5637_v63 = vmul.f32 %v5116_v40, %v5116_v40 }
 0x202   :  { %7539 = vst [vmem:[%s9372_s2 + $0x360] sm:$0xff] %v9128_v54   ;;  %v5639_v20 = vmul.f32 %v5118_v37, %v5118_v37 }
 0x203   :  { %v5368_v22 = vadd.f32 %v5367_v17, %v5112_v58  ;;  %v5887_v28 = vadd.f32 %v5886_v13, %v5632_v18  ;;  %v5636_v58 = vmul.f32 %v5115_v41, %v5115_v41  ;;  %v2773_v61 = vpop.f32.mrf.mxu1 }
 0x205   :  { %v5369_v31 = vadd.f32 %v5368_v22, %v5113_v16  ;;  %v5888_v38 = vadd.f32 %v5887_v28, %v5633_v27  ;;  %v7925_v13 = vpop.f32.mrf.mxu1  ;;  %v5638_v16 = vmul.f32 %v5117_v56, %v5117_v56  ;;  %v5120_v22 = vunpack.c.h.bf16 %v8845_v4 }
 0x207   :  { %v5370_v49 = vadd.f32 %v5369_v31, %v5114_v7  ;;  %v5889_v50 = vadd.f32 %v5888_v38, %v5634_v30  ;;  %v5119_v7 = vunpack.c.l.bf16 %v8845_v4  ;;  %v2776_v27 = vpop.f32.mrf.mxu1  ;;  %v9142_v30 = vpack.c.bf16 %v7925_v13, %v7924_v6 }
 0x208   :  { %v9144_v31 = vpack.c.bf16 %v2776_v27, %v2773_v61  ;;  %v5122_v4 = vunpack.c.h.bf16 %v8843_v3 }
 0x209   :  { %v5890_v55 = vadd.f32 %v5889_v50, %v5635_v39  ;;  %v5371_v57 = vadd.f32 %v5370_v49, %v5115_v41  ;;  %v7928_v36 = vpop.f32.mrf.mxu1  ;;  %v5121_v41 = vunpack.c.l.bf16 %v8843_v3  ;;  %7542 = vst [vmem:[%s9372_s2 + $0x378] sm:$0xff] %v9142_v30   ;;  %v5641_v50 = vmul.f32 %v5120_v22, %v5120_v22 }
 0x20a   :  { %7541 = vst [vmem:[%s9372_s2 + $0x370] sm:$0xff] %v9144_v31   ;;  %v5643_v61 = vmul.f32 %v5122_v4, %v5122_v4 }
 0x20b   :  { %v5372_v62 = vadd.f32 %v5371_v57, %v5116_v40  ;;  %v5891_v12 = vadd.f32 %v5890_v55, %v5636_v58  ;;  %v5640_v40 = vmul.f32 %v5119_v7, %v5119_v7  ;;  %v2789_v46 = vpop.f32.mrf.mxu1 }
 0x20d   :  { %v5373_v17 = vadd.f32 %v5372_v62, %v5117_v56  ;;  %v5892_v18 = vadd.f32 %v5891_v12, %v5637_v63  ;;  %v7929_v55 = vpop.f32.mrf.mxu1  ;;  %v5642_v56 = vmul.f32 %v5121_v41, %v5121_v41  ;;  %v5124_v62 = vunpack.c.h.bf16 %v8865_v34 }
 0x20f   :  { %v5374_v28 = vadd.f32 %v5373_v17, %v5118_v37  ;;  %v5893_v29 = vadd.f32 %v5892_v18, %v5638_v16  ;;  %v5123_v37 = vunpack.c.l.bf16 %v8865_v34  ;;  %v2792_v63 = vpop.f32.mrf.mxu1  ;;  %v9158_v16 = vpack.c.bf16 %v7929_v55, %v7928_v36 }
 0x210   :  { %v9160_v17 = vpack.c.bf16 %v2792_v63, %v2789_v46  ;;  %v5126_v34 = vunpack.c.h.bf16 %v8863_v33 }
 0x211   :  { %v5894_v38 = vadd.f32 %v5893_v29, %v5639_v20  ;;  %v5375_v39 = vadd.f32 %v5374_v28, %v5119_v7  ;;  %v7932_v3 = vpop.f32.mrf.mxu1  ;;  %v5125_v7 = vunpack.c.l.bf16 %v8863_v33  ;;  %7544 = vst [vmem:[%s9372_s2 + $0x388] sm:$0xff] %v9158_v16   ;;  %v5645_v29 = vmul.f32 %v5124_v62, %v5124_v62 }
 0x212   :  { %7543 = vst [vmem:[%s9372_s2 + $0x380] sm:$0xff] %v9160_v17   ;;  %v5647_v46 = vmul.f32 %v5126_v34, %v5126_v34 }
 0x213   :  { %v5376_v49 = vadd.f32 %v5375_v39, %v5120_v22  ;;  %v5895_v6 = vadd.f32 %v5894_v38, %v5640_v40  ;;  %v5644_v22 = vmul.f32 %v5123_v37, %v5123_v37  ;;  %v2805_v27 = vpop.f32.mrf.mxu1 }
 0x215   :  { %v5377_v57 = vadd.f32 %v5376_v49, %v5121_v41  ;;  %v5896_v58 = vadd.f32 %v5895_v6, %v5641_v50  ;;  %v7933_v38 = vpop.f32.mrf.mxu1  ;;  %v5646_v41 = vmul.f32 %v5125_v7, %v5125_v7  ;;  %v5128_v49 = vunpack.c.h.bf16 %v8883_v1 }
 0x217   :  { %v5378_v12 = vadd.f32 %v5377_v57, %v5122_v4  ;;  %v5897_v13 = vadd.f32 %v5896_v58, %v5642_v56  ;;  %v5127_v4 = vunpack.c.l.bf16 %v8883_v1  ;;  %v2808_v50 = vpop.f32.mrf.mxu1  ;;  %v9174_v56 = vpack.c.bf16 %v7933_v38, %v7932_v3 }
 0x218   :  { %v9176_v57 = vpack.c.bf16 %v2808_v50, %v2805_v27  ;;  %v5130_v1 = vunpack.c.h.bf16 %v8881_v0 }
 0x219   :  { %v5898_v18 = vadd.f32 %v5897_v13, %v5643_v61  ;;  %v5379_v20 = vadd.f32 %v5378_v12, %v5123_v37  ;;  %v7936_v33 = vpop.f32.mrf.mxu1  ;;  %v5129_v37 = vunpack.c.l.bf16 %v8881_v0  ;;  %7546 = vst [vmem:[%s9372_s2 + $0x398] sm:$0xff] %v9174_v56   ;;  %v5649_v13 = vmul.f32 %v5128_v49, %v5128_v49 }
 0x21a   :  { %7545 = vst [vmem:[%s9372_s2 + $0x390] sm:$0xff] %v9176_v57   ;;  %v5651_v27 = vmul.f32 %v5130_v1, %v5130_v1 }
 0x21b   :  { %v5380_v28 = vadd.f32 %v5379_v20, %v5124_v62  ;;  %v5899_v36 = vadd.f32 %v5898_v18, %v5644_v22  ;;  %v5648_v62 = vmul.f32 %v5127_v4, %v5127_v4  ;;  %v2821_v63 = vpop.f32.mrf.mxu1 }
 0x21d   :  { %v5381_v39 = vadd.f32 %v5380_v28, %v5125_v7  ;;  %v5900_v40 = vadd.f32 %v5899_v36, %v5645_v29  ;;  %v7937_v18 = vpop.f32.mrf.mxu1  ;;  %v5650_v7 = vmul.f32 %v5129_v37, %v5129_v37  ;;  %v5132_v28 = vunpack.c.h.bf16 %v8901_v35 }
 0x21f   :  { %v5382_v6 = vadd.f32 %v5381_v39, %v5126_v34  ;;  %v5901_v55 = vadd.f32 %v5900_v40, %v5646_v41  ;;  %v5131_v34 = vunpack.c.l.bf16 %v8901_v35  ;;  %v2824_v29 = vpop.f32.mrf.mxu1  ;;  %v9190_v41 = vpack.c.bf16 %v7937_v18, %v7936_v33 }
 0x220   :  { %v9192_v39 = vpack.c.bf16 %v2824_v29, %v2821_v63  ;;  %v5134_v35 = vunpack.c.h.bf16 %v8899_v32 }
 0x221   :  { %v5902_v58 = vadd.f32 %v5901_v55, %v5647_v46  ;;  %v5383_v61 = vadd.f32 %v5382_v6, %v5127_v4  ;;  %v7940_v0 = vpop.f32.mrf.mxu1  ;;  %v5133_v4 = vunpack.c.l.bf16 %v8899_v32  ;;  %7548 = vst [vmem:[%s9372_s2 + $0x3a8] sm:$0xff] %v9190_v41   ;;  %v5653_v55 = vmul.f32 %v5132_v28, %v5132_v28 }
 0x222   :  { %7547 = vst [vmem:[%s9372_s2 + $0x3a0] sm:$0xff] %v9192_v39   ;;  %v5655_v63 = vmul.f32 %v5134_v35, %v5134_v35 }
 0x223   :  { %v5384_v12 = vadd.f32 %v5383_v61, %v5128_v49  ;;  %v5903_v3 = vadd.f32 %v5902_v58, %v5648_v62  ;;  %v5652_v49 = vmul.f32 %v5131_v34, %v5131_v34  ;;  %v2837_v50 = vpop.f32.mrf.mxu1 }
 0x225   :  { %v5385_v20 = vadd.f32 %v5384_v12, %v5129_v37  ;;  %v5904_v22 = vadd.f32 %v5903_v3, %v5649_v13  ;;  %v7941_v58 = vpop.f32.mrf.mxu1  ;;  %v5654_v37 = vmul.f32 %v5133_v4, %v5133_v4  ;;  %v5136_v12 = vunpack.c.h.bf16 %v8919_v8 }
 0x227   :  { %v5386_v36 = vadd.f32 %v5385_v20, %v5130_v1  ;;  %v5905_v38 = vadd.f32 %v5904_v22, %v5650_v7  ;;  %v5135_v1 = vunpack.c.l.bf16 %v8919_v8  ;;  %v2840_v13 = vpop.f32.mrf.mxu1  ;;  %v9206_v7 = vpack.c.bf16 %v7941_v58, %v7940_v0 }
 0x228   :  { %v9208_v20 = vpack.c.bf16 %v2840_v13, %v2837_v50  ;;  %v5138_v8 = vunpack.c.h.bf16 %v8917_v5 }
 0x229   :  { %v5906_v40 = vadd.f32 %v5905_v38, %v5651_v27  ;;  %v5387_v46 = vadd.f32 %v5386_v36, %v5131_v34  ;;  %v7944_v32 = vpop.f32.mrf.mxu1  ;;  %v5137_v34 = vunpack.c.l.bf16 %v8917_v5  ;;  %7550 = vst [vmem:[%s9372_s2 + $0x3b8] sm:$0xff] %v9206_v7   ;;  %v5657_v38 = vmul.f32 %v5136_v12, %v5136_v12 }
 0x22a   :  { %7549 = vst [vmem:[%s9372_s2 + $0x3b0] sm:$0xff] %v9208_v20   ;;  %v5659_v50 = vmul.f32 %v5138_v8, %v5138_v8 }
 0x22b   :  { %v5388_v6 = vadd.f32 %v5387_v46, %v5132_v28  ;;  %v5907_v33 = vadd.f32 %v5906_v40, %v5652_v49  ;;  %v5656_v28 = vmul.f32 %v5135_v1, %v5135_v1  ;;  %v2853_v29 = vpop.f32.mrf.mxu1 }
 0x22d   :  { %v5389_v61 = vadd.f32 %v5388_v6, %v5133_v4  ;;  %v5908_v62 = vadd.f32 %v5907_v33, %v5653_v55  ;;  %v7945_v40 = vpop.f32.mrf.mxu1  ;;  %v5658_v4 = vmul.f32 %v5137_v34, %v5137_v34  ;;  %v5140_v6 = vunpack.c.h.bf16 %v8937_v43 }
 0x22f   :  { %v5390_v3 = vadd.f32 %v5389_v61, %v5134_v35  ;;  %v5909_v18 = vadd.f32 %v5908_v62, %v5654_v37  ;;  %v5139_v35 = vunpack.c.l.bf16 %v8937_v43  ;;  %v2856_v55 = vpop.f32.mrf.mxu1  ;;  %v9222_v37 = vpack.c.bf16 %v7945_v40, %v7944_v32 }
 0x230   :  { %v9224_v61 = vpack.c.bf16 %v2856_v55, %v2853_v29  ;;  %v5142_v43 = vunpack.c.h.bf16 %v8935_v42 }
 0x231   :  { %v5910_v22 = vadd.f32 %v5909_v18, %v5655_v63  ;;  %v5391_v27 = vadd.f32 %v5390_v3, %v5135_v1  ;;  %v7948_v5 = vpop.f32.mrf.mxu1  ;;  %v5141_v1 = vunpack.c.l.bf16 %v8935_v42  ;;  %7552 = vst [vmem:[%s9372_s2 + $0x3c8] sm:$0xff] %v9222_v37   ;;  %v5661_v18 = vmul.f32 %v5140_v6, %v5140_v6 }
 0x232   :  { %7551 = vst [vmem:[%s9372_s2 + $0x3c0] sm:$0xff] %v9224_v61   ;;  %v5663_v29 = vmul.f32 %v5142_v43, %v5142_v43 }
 0x233   :  { %v5392_v36 = vadd.f32 %v5391_v27, %v5136_v12  ;;  %v5911_v0 = vadd.f32 %v5910_v22, %v5656_v28  ;;  %v5660_v12 = vmul.f32 %v5139_v35, %v5139_v35  ;;  %v2869_v13 = vpop.f32.mrf.mxu1 }
 0x235   :  { %v5393_v46 = vadd.f32 %v5392_v36, %v5137_v34  ;;  %v5912_v49 = vadd.f32 %v5911_v0, %v5657_v38  ;;  %v7949_v22 = vpop.f32.mrf.mxu1  ;;  %v5662_v34 = vmul.f32 %v5141_v1, %v5141_v1  ;;  %v5144_v36 = vunpack.c.h.bf16 %v8955_v15 }
 0x237   :  { %v5394_v33 = vadd.f32 %v5393_v46, %v5138_v8  ;;  %v5913_v58 = vadd.f32 %v5912_v49, %v5658_v4  ;;  %v5143_v8 = vunpack.c.l.bf16 %v8955_v15  ;;  %v2872_v38 = vpop.f32.mrf.mxu1  ;;  %v9238_v4 = vpack.c.bf16 %v7949_v22, %v7948_v5 }
 0x238   :  { %v9240_v46 = vpack.c.bf16 %v2872_v38, %v2869_v13  ;;  %v5146_v15 = vunpack.c.h.bf16 %v8953_v14 }
 0x239   :  { %v5914_v62 = vadd.f32 %v5913_v58, %v5659_v50  ;;  %v5395_v63 = vadd.f32 %v5394_v33, %v5139_v35  ;;  %v7952_v42 = vpop.f32.mrf.mxu1  ;;  %v5145_v35 = vunpack.c.l.bf16 %v8953_v14  ;;  %7554 = vst [vmem:[%s9372_s2 + $0x3d8] sm:$0xff] %v9238_v4   ;;  %v5665_v58 = vmul.f32 %v5144_v36, %v5144_v36 }
 0x23a   :  { %7553 = vst [vmem:[%s9372_s2 + $0x3d0] sm:$0xff] %v9240_v46   ;;  %v5667_v13 = vmul.f32 %v5146_v15, %v5146_v15 }
 0x23b   :  { %v5396_v3 = vadd.f32 %v5395_v63, %v5140_v6  ;;  %v5915_v32 = vadd.f32 %v5914_v62, %v5660_v12  ;;  %v5664_v6 = vmul.f32 %v5143_v8, %v5143_v8  ;;  %v2885_v55 = vpop.f32.mrf.mxu1 }
 0x23d   :  { %v5397_v27 = vadd.f32 %v5396_v3, %v5141_v1  ;;  %v5916_v28 = vadd.f32 %v5915_v32, %v5661_v18  ;;  %v7953_v62 = vpop.f32.mrf.mxu1  ;;  %v5666_v1 = vmul.f32 %v5145_v35, %v5145_v35  ;;  %v5148_v3 = vunpack.c.h.bf16 %v8973_v52 }
 0x23f   :  { %v5398_v0 = vadd.f32 %v5397_v27, %v5142_v43  ;;  %v5917_v40 = vadd.f32 %v5916_v28, %v5662_v34  ;;  %v5147_v43 = vunpack.c.l.bf16 %v8973_v52  ;;  %v2888_v18 = vpop.f32.mrf.mxu1  ;;  %v9254_v34 = vpack.c.bf16 %v7953_v62, %v7952_v42 }
 0x240   :  { %v9256_v27 = vpack.c.bf16 %v2888_v18, %v2885_v55  ;;  %v5150_v52 = vunpack.c.h.bf16 %v8971_v51 }
 0x241   :  { %v5918_v49 = vadd.f32 %v5917_v40, %v5663_v29  ;;  %v5399_v50 = vadd.f32 %v5398_v0, %v5143_v8  ;;  %v7956_v14 = vpop.f32.mrf.mxu1  ;;  %v5149_v8 = vunpack.c.l.bf16 %v8971_v51  ;;  %7556 = vst [vmem:[%s9372_s2 + $0x3e8] sm:$0xff] %v9254_v34   ;;  %v5669_v40 = vmul.f32 %v5148_v3, %v5148_v3 }
 0x242   :  { %7555 = vst [vmem:[%s9372_s2 + $0x3e0] sm:$0xff] %v9256_v27   ;;  %v5671_v55 = vmul.f32 %v5150_v52, %v5150_v52 }
 0x243   :  { %v5400_v33 = vadd.f32 %v5399_v50, %v5144_v36  ;;  %v5919_v5 = vadd.f32 %v5918_v49, %v5664_v6  ;;  %v5668_v36 = vmul.f32 %v5147_v43, %v5147_v43  ;;  %v2901_v38 = vpop.f32.mrf.mxu1 }
 0x245   :  { %v5401_v63 = vadd.f32 %v5400_v33, %v5145_v35  ;;  %v5920_v12 = vadd.f32 %v5919_v5, %v5665_v58  ;;  %v7957_v49 = vpop.f32.mrf.mxu1  ;;  %v5670_v35 = vmul.f32 %v5149_v8, %v5149_v8  ;;  %v5152_v33 = vunpack.c.h.bf16 %v8991_v26 }
 0x247   :  { %v5402_v32 = vadd.f32 %v5401_v63, %v5146_v15  ;;  %v5921_v22 = vadd.f32 %v5920_v12, %v5666_v1  ;;  %v5151_v15 = vunpack.c.l.bf16 %v8991_v26  ;;  %v2904_v58 = vpop.f32.mrf.mxu1  ;;  %v9270_v1 = vpack.c.bf16 %v7957_v49, %v7956_v14 }
 0x248   :  { %v9272_v63 = vpack.c.bf16 %v2904_v58, %v2901_v38  ;;  %v5153_v12 = vunpack.c.l.bf16 %v8989_v25  ;;  %v5154_v26 = vunpack.c.h.bf16 %v8989_v25  ;;  %v5673_v18 = vmul.f32 %v5152_v33, %v5152_v33 }
 0x249   :  { %v5922_v28 = vadd.f32 %v5921_v22, %v5667_v13  ;;  %v5403_v29 = vadd.f32 %v5402_v32, %v5147_v43  ;;  %v5672_v13 = vmul.f32 %v5151_v15, %v5151_v15  ;;  %7558 = vst [vmem:[%s9372_s2 + $0x3f8] sm:$0xff] %v9270_v1   ;;  %v5156_v38 = vunpack.c.h.bf16 %v9009_v9 }
 0x24a   :  { %7557 = vst [vmem:[%s9372_s2 + $0x3f0] sm:$0xff] %v9272_v63   ;;  %v5674_v22 = vmul.f32 %v5153_v12, %v5153_v12  ;;  %v5159_v58 = vunpack.c.l.bf16 %v9027_v48 }
 0x24b   :  { %v5404_v0 = vadd.f32 %v5403_v29, %v5148_v3  ;;  %v5923_v42 = vadd.f32 %v5922_v28, %v5668_v36  ;;  %v5675_v29 = vmul.f32 %v5154_v26, %v5154_v26 }
 0x24d   :  { %v5405_v50 = vadd.f32 %v5404_v0, %v5149_v8  ;;  %v5924_v6 = vadd.f32 %v5923_v42, %v5669_v40  ;;  %v5155_v8 = vunpack.c.l.bf16 %v9009_v9  ;;  %v8109_v0 = vmov 0.0  }
 0x24e   :  { %280 = vst [vmem:[%s9373_s3] sm:$0x1] %v8109_v0  ;;  %281 = vst [vmem:[%s9374_s4] sm:$0x1] %v8109_v0  ;;  %v5157_v40 = vunpack.c.l.bf16 %v9007_v2  ;;  %v5165_v0 = vunpack.c.l.bf16 %v9040_v21 }
 0x24f   :  { %v5406_v5 = vadd.f32 %v5405_v50, %v5150_v52  ;;  %v5925_v62 = vadd.f32 %v5924_v6, %v5670_v35  ;;  %v5676_v49 = vmul.f32 %v5155_v8, %v5155_v8  ;;  %v5158_v35 = vunpack.c.h.bf16 %v9007_v2 }
 0x250   :  { %v5677_v6 = vmul.f32 %v5156_v38, %v5156_v38  ;;  %v5678_v9 = vmul.f32 %v5157_v40, %v5157_v40  ;;  %v5162_v2 = vunpack.c.h.bf16 %v9025_v47 }
 0x251   :  { %v5926_v51 = vadd.f32 %v5925_v62, %v5671_v55  ;;  %v5407_v43 = vadd.f32 %v5406_v5, %v5151_v15  ;;  %v5679_v5 = vmul.f32 %v5158_v35, %v5158_v35 }
 0x253   :  { %v5408_v3 = vadd.f32 %v5407_v43, %v5152_v33  ;;  %v5927_v32 = vadd.f32 %v5926_v51, %v5672_v13  ;;  %v5161_v13 = vunpack.c.l.bf16 %v9025_v47  ;;  %v5166_v47 = vunpack.c.h.bf16 %v9040_v21 }
 0x254   :  { %v5170_v21 = vunpack.c.h.bf16 %v9058_v59 }
 0x255   :  { %v5409_v14 = vadd.f32 %v5408_v3, %v5153_v12  ;;  %v5928_v28 = vadd.f32 %v5927_v32, %v5673_v18  ;;  %v5160_v12 = vunpack.c.h.bf16 %v9027_v48  ;;  %v5680_v3 = vmul.f32 %v5159_v58, %v5159_v58 }
 0x257   :  { %v5410_v36 = vadd.f32 %v5409_v14, %v5154_v26  ;;  %v5929_v52 = vadd.f32 %v5928_v28, %v5674_v22  ;;  %v5681_v32 = vmul.f32 %v5160_v12, %v5160_v12  ;;  %v5682_v14 = vmul.f32 %v5161_v13, %v5161_v13 }
 0x259   :  { %v5930_v25 = vadd.f32 %v5929_v52, %v5675_v29  ;;  %v5411_v42 = vadd.f32 %v5410_v36, %v5155_v8  ;;  %v5163_v29 = vunpack.c.l.bf16 %v9042_v19  ;;  %v5683_v36 = vmul.f32 %v5162_v2, %v5162_v2 }
 0x25b   :  { %v5412_v50 = vadd.f32 %v5411_v42, %v5156_v38  ;;  %v5931_v15 = vadd.f32 %v5930_v25, %v5676_v49  ;;  %v5164_v38 = vunpack.c.h.bf16 %v9042_v19  ;;  %v5168_v19 = vunpack.c.h.bf16 %v9060_v60 }
 0x25d   :  { %v5413_v55 = vadd.f32 %v5412_v50, %v5157_v40  ;;  %v5932_v33 = vadd.f32 %v5931_v15, %v5677_v6  ;;  %v5684_v40 = vmul.f32 %v5163_v29, %v5163_v29  ;;  %v5686_v6 = vmul.f32 %v5165_v0, %v5165_v0 }
 0x25f   :  { %v5414_v62 = vadd.f32 %v5413_v55, %v5158_v35  ;;  %v5933_v51 = vadd.f32 %v5932_v33, %v5678_v9  ;;  %v5685_v35 = vmul.f32 %v5164_v38, %v5164_v38  ;;  %v5167_v55 = vunpack.c.l.bf16 %v9060_v60 }
 0x260   :  { %v5687_v33 = vmul.f32 %v5166_v47, %v5166_v47  ;;  %v5172_v60 = vunpack.c.h.bf16 %v9078_v45 }
 0x261   :  { %v5934_v43 = vadd.f32 %v5933_v51, %v5679_v5  ;;  %v5415_v26 = vadd.f32 %v5414_v62, %v5159_v58  ;;  %v5169_v62 = vunpack.c.l.bf16 %v9058_v59  ;;  %v5174_v59 = vunpack.c.h.bf16 %v9076_v44 }
 0x263   :  { %v5416_v18 = vadd.f32 %v5415_v26, %v5160_v12  ;;  %v5935_v22 = vadd.f32 %v5934_v43, %v5680_v3  ;;  %v5688_v12 = vmul.f32 %v5167_v55, %v5167_v55  ;;  %v5689_v26 = vmul.f32 %v5168_v19, %v5168_v19 }
 0x265   :  { %v5417_v28 = vadd.f32 %v5416_v18, %v5161_v13  ;;  %v5936_v8 = vadd.f32 %v5935_v22, %v5681_v32  ;;  %v5171_v22 = vunpack.c.l.bf16 %v9078_v45  ;;  %v5176_v45 = vunpack.c.h.bf16 %v9095_v24 }
 0x267   :  { %v5937_v52 = vadd.f32 %v5936_v8, %v5682_v14  ;;  %v5418_v48 = vadd.f32 %v5417_v28, %v5162_v2  ;;  %v5690_v2 = vmul.f32 %v5169_v62, %v5169_v62  ;;  %v5691_v14 = vmul.f32 %v5170_v21, %v5170_v21 }
 0x269   :  { %v5419_v25 = vadd.f32 %v5418_v48, %v5163_v29  ;;  %v5938_v42 = vadd.f32 %v5937_v52, %v5683_v36  ;;  %v5173_v29 = vunpack.c.l.bf16 %v9076_v44  ;;  %v5692_v52 = vmul.f32 %v5171_v22, %v5171_v22 }
 0x26a   :  { %v5178_v44 = vunpack.c.h.bf16 %v9093_v23 }
 0x26b   :  { %v5420_v49 = vadd.f32 %v5419_v25, %v5164_v38  ;;  %v5939_v50 = vadd.f32 %v5938_v42, %v5684_v40  ;;  %v5694_v40 = vmul.f32 %v5173_v29, %v5173_v29 }
 0x26d   :  { %v5421_v15 = vadd.f32 %v5420_v49, %v5165_v0  ;;  %v5940_v9 = vadd.f32 %v5939_v50, %v5685_v35  ;;  %v5693_v0 = vmul.f32 %v5172_v60, %v5172_v60  ;;  %v5175_v49 = vunpack.c.l.bf16 %v9095_v24 }
 0x26e   :  { %v5695_v35 = vmul.f32 %v5174_v59, %v5174_v59  ;;  %v5180_v24 = vunpack.c.h.bf16 %v9112_v11 }
 0x26f   :  { %v5941_v58 = vadd.f32 %v5940_v9, %v5686_v6  ;;  %v5422_v5 = vadd.f32 %v5421_v15, %v5166_v47  ;;  %v5177_v15 = vunpack.c.l.bf16 %v9093_v23  ;;  %v5182_v23 = vunpack.c.h.bf16 %v9110_v10 }
 0x271   :  { %v5423_v51 = vadd.f32 %v5422_v5, %v5167_v55  ;;  %v5942_v43 = vadd.f32 %v5941_v58, %v5687_v33  ;;  %v5696_v55 = vmul.f32 %v5175_v49, %v5175_v49 }
 0x273   :  { %v5424_v13 = vadd.f32 %v5423_v51, %v5168_v19  ;;  %v5943_v3 = vadd.f32 %v5942_v43, %v5688_v12  ;;  %v5697_v19 = vmul.f32 %v5176_v45, %v5176_v45  ;;  %v5179_v43 = vunpack.c.l.bf16 %v9112_v11 }
 0x274   :  { %v5184_v11 = vunpack.c.h.bf16 %v9128_v54 }
 0x275   :  { %v5425_v18 = vadd.f32 %v5424_v13, %v5169_v62  ;;  %v5944_v32 = vadd.f32 %v5943_v3, %v5689_v26  ;;  %v5698_v62 = vmul.f32 %v5177_v15, %v5177_v15  ;;  %v5181_v3 = vunpack.c.l.bf16 %v9110_v10 }
 0x276   :  { %v5186_v10 = vunpack.c.h.bf16 %v9126_v53 }
 0x277   :  { %v5945_v28 = vadd.f32 %v5944_v32, %v5690_v2  ;;  %v5426_v8 = vadd.f32 %v5425_v18, %v5170_v21  ;;  %v5699_v21 = vmul.f32 %v5178_v44, %v5178_v44  ;;  %v5700_v18 = vmul.f32 %v5179_v43, %v5179_v43 }
 0x279   :  { %v5427_v36 = vadd.f32 %v5426_v8, %v5171_v22  ;;  %v5946_v38 = vadd.f32 %v5945_v28, %v5691_v14  ;;  %v5701_v14 = vmul.f32 %v5180_v24, %v5180_v24 }
 0x27b   :  { %v5428_v48 = vadd.f32 %v5427_v36, %v5172_v60  ;;  %v5947_v25 = vadd.f32 %v5946_v38, %v5692_v52  ;;  %v5702_v60 = vmul.f32 %v5181_v3, %v5181_v3  ;;  %v5183_v36 = vunpack.c.l.bf16 %v9128_v54 }
 0x27c   :  { %v5703_v52 = vmul.f32 %v5182_v23, %v5182_v23  ;;  %v5188_v54 = vunpack.c.h.bf16 %v9144_v31 }
 0x27d   :  { %v5429_v42 = vadd.f32 %v5428_v48, %v5173_v29  ;;  %v5948_v47 = vadd.f32 %v5947_v25, %v5693_v0  ;;  %v5185_v48 = vunpack.c.l.bf16 %v9126_v53  ;;  %v5704_v25 = vmul.f32 %v5183_v36, %v5183_v36 }
 0x27e   :  { %v5190_v53 = vunpack.c.h.bf16 %v9142_v30 }
 0x27f   :  { %v5949_v50 = vadd.f32 %v5948_v47, %v5694_v40  ;;  %v5430_v6 = vadd.f32 %v5429_v42, %v5174_v59  ;;  %v5705_v47 = vmul.f32 %v5184_v11, %v5184_v11 }
 0x281   :  { %v5431_v9 = vadd.f32 %v5430_v6, %v5175_v49  ;;  %v5950_v33 = vadd.f32 %v5949_v50, %v5695_v35  ;;  %v5706_v35 = vmul.f32 %v5185_v48, %v5185_v48  ;;  %v5187_v6 = vunpack.c.l.bf16 %v9144_v31 }
 0x282   :  { %v5192_v31 = vunpack.c.h.bf16 %v9160_v17 }
 0x283   :  { %v5432_v58 = vadd.f32 %v5431_v9, %v5176_v45  ;;  %v5951_v5 = vadd.f32 %v5950_v33, %v5696_v55  ;;  %v5189_v33 = vunpack.c.l.bf16 %v9142_v30  ;;  %v5194_v30 = vunpack.c.h.bf16 %v9158_v16 }
 0x285   :  { %v5433_v51 = vadd.f32 %v5432_v58, %v5177_v15  ;;  %v5952_v12 = vadd.f32 %v5951_v5, %v5697_v19  ;;  %v5707_v15 = vmul.f32 %v5186_v10, %v5186_v10  ;;  %v5708_v58 = vmul.f32 %v5187_v6, %v5187_v6 }
 0x287   :  { %v5953_v13 = vadd.f32 %v5952_v12, %v5698_v62  ;;  %v5434_v26 = vadd.f32 %v5433_v51, %v5178_v44  ;;  %v5709_v62 = vmul.f32 %v5188_v54, %v5188_v54  ;;  %v5710_v12 = vmul.f32 %v5189_v33, %v5189_v33 }
 0x289   :  { %v5435_v2 = vadd.f32 %v5434_v26, %v5179_v43  ;;  %v5954_v32 = vadd.f32 %v5953_v13, %v5699_v21  ;;  %v5191_v13 = vunpack.c.l.bf16 %v9160_v17  ;;  %v5196_v17 = vunpack.c.h.bf16 %v9176_v57 }
 0x28b   :  { %v5436_v22 = vadd.f32 %v5435_v2, %v5180_v24  ;;  %v5955_v28 = vadd.f32 %v5954_v32, %v5700_v18  ;;  %v5711_v24 = vmul.f32 %v5190_v53, %v5190_v53  ;;  %v5193_v2 = vunpack.c.l.bf16 %v9158_v16 }
 0x28c   :  { %v5712_v32 = vmul.f32 %v5191_v13, %v5191_v13  ;;  %v5198_v16 = vunpack.c.h.bf16 %v9174_v56 }
 0x28d   :  { %v5437_v8 = vadd.f32 %v5436_v22, %v5181_v3  ;;  %v5956_v29 = vadd.f32 %v5955_v28, %v5701_v14  ;;  %v5713_v14 = vmul.f32 %v5192_v31, %v5192_v31 }
 0x28f   :  { %v5957_v38 = vadd.f32 %v5956_v29, %v5702_v60  ;;  %v5438_v59 = vadd.f32 %v5437_v8, %v5182_v23  ;;  %v5714_v60 = vmul.f32 %v5193_v2, %v5193_v2 }
 0x291   :  { %v5439_v0 = vadd.f32 %v5438_v59, %v5183_v36  ;;  %v5958_v40 = vadd.f32 %v5957_v38, %v5703_v52  ;;  %v5195_v36 = vunpack.c.l.bf16 %v9176_v57  ;;  %v5715_v52 = vmul.f32 %v5194_v30, %v5194_v30 }
 0x292   :  { %v5197_v59 = vunpack.c.l.bf16 %v9174_v56  ;;  %v5200_v57 = vunpack.c.h.bf16 %v9192_v39  ;;  %v5202_v56 = vunpack.c.h.bf16 %v9190_v41 }
 0x293   :  { %v5440_v42 = vadd.f32 %v5439_v0, %v5184_v11  ;;  %v5959_v49 = vadd.f32 %v5958_v40, %v5704_v25  ;;  %v5716_v0 = vmul.f32 %v5195_v36, %v5195_v36 }
 0x295   :  { %v5441_v50 = vadd.f32 %v5440_v42, %v5185_v48  ;;  %v5960_v45 = vadd.f32 %v5959_v49, %v5705_v47  ;;  %v5718_v47 = vmul.f32 %v5197_v59, %v5197_v59 }
 0x297   :  { %v5961_v9 = vadd.f32 %v5960_v45, %v5706_v35  ;;  %v5442_v55 = vadd.f32 %v5441_v50, %v5186_v10  ;;  %v5717_v10 = vmul.f32 %v5196_v17, %v5196_v17  ;;  %v5199_v50 = vunpack.c.l.bf16 %v9192_v39 }
 0x298   :  { %v5719_v45 = vmul.f32 %v5198_v16, %v5198_v16  ;;  %v5204_v39 = vunpack.c.h.bf16 %v9208_v20 }
 0x299   :  { %v5443_v44 = vadd.f32 %v5442_v55, %v5187_v6  ;;  %v5962_v19 = vadd.f32 %v5961_v9, %v5707_v15  ;;  %v5201_v9 = vunpack.c.l.bf16 %v9190_v41  ;;  %v5720_v55 = vmul.f32 %v5199_v50, %v5199_v50 }
 0x29a   :  { %v5206_v41 = vunpack.c.h.bf16 %v9206_v7 }
 0x29b   :  { %v5444_v5 = vadd.f32 %v5443_v44, %v5188_v54  ;;  %v5963_v51 = vadd.f32 %v5962_v19, %v5708_v58  ;;  %v5721_v58 = vmul.f32 %v5200_v57, %v5200_v57 }
 0x29d   :  { %v5445_v43 = vadd.f32 %v5444_v5, %v5189_v33  ;;  %v5964_v21 = vadd.f32 %v5963_v51, %v5709_v62  ;;  %v5203_v51 = vunpack.c.l.bf16 %v9208_v20  ;;  %v5208_v20 = vunpack.c.h.bf16 %v9224_v61 }
 0x29f   :  { %v5965_v26 = vadd.f32 %v5964_v21, %v5710_v12  ;;  %v5446_v3 = vadd.f32 %v5445_v43, %v5190_v53  ;;  %v5722_v53 = vmul.f32 %v5201_v9, %v5201_v9  ;;  %v5723_v12 = vmul.f32 %v5202_v56, %v5202_v56 }
 0x2a1   :  { %v5447_v18 = vadd.f32 %v5446_v3, %v5191_v13  ;;  %v5966_v23 = vadd.f32 %v5965_v26, %v5711_v24  ;;  %v5205_v13 = vunpack.c.l.bf16 %v9206_v7  ;;  %v5724_v26 = vmul.f32 %v5203_v51, %v5203_v51 }
 0x2a2   :  { %v5210_v7 = vunpack.c.h.bf16 %v9222_v37 }
 0x2a3   :  { %v5448_v22 = vadd.f32 %v5447_v18, %v5192_v31  ;;  %v5967_v28 = vadd.f32 %v5966_v23, %v5712_v32  ;;  %v5726_v32 = vmul.f32 %v5205_v13, %v5205_v13 }
 0x2a5   :  { %v5449_v8 = vadd.f32 %v5448_v22, %v5193_v2  ;;  %v5968_v29 = vadd.f32 %v5967_v28, %v5713_v14  ;;  %v5725_v2 = vmul.f32 %v5204_v39, %v5204_v39  ;;  %v5207_v22 = vunpack.c.l.bf16 %v9224_v61 }
 0x2a6   :  { %v5727_v14 = vmul.f32 %v5206_v41, %v5206_v41  ;;  %v5212_v61 = vunpack.c.h.bf16 %v9240_v46 }
 0x2a7   :  { %v5969_v38 = vadd.f32 %v5968_v29, %v5714_v60  ;;  %v5450_v11 = vadd.f32 %v5449_v8, %v5194_v30  ;;  %v5209_v8 = vunpack.c.l.bf16 %v9222_v37  ;;  %v5214_v37 = vunpack.c.h.bf16 %v9238_v4 }
 0x2a9   :  { %v5451_v48 = vadd.f32 %v5450_v11, %v5195_v36  ;;  %v5970_v25 = vadd.f32 %v5969_v38, %v5715_v52  ;;  %v5728_v36 = vmul.f32 %v5207_v22, %v5207_v22 }
 0x2ab   :  { %v5452_v40 = vadd.f32 %v5451_v48, %v5196_v17  ;;  %v5971_v42 = vadd.f32 %v5970_v25, %v5716_v0  ;;  %v5729_v17 = vmul.f32 %v5208_v20, %v5208_v20  ;;  %v5211_v25 = vunpack.c.l.bf16 %v9240_v46 }
 0x2ac   :  { %v5216_v46 = vunpack.c.h.bf16 %v9256_v27 }
 0x2ad   :  { %v5453_v49 = vadd.f32 %v5452_v40, %v5197_v59  ;;  %v5972_v35 = vadd.f32 %v5971_v42, %v5717_v10  ;;  %v5730_v59 = vmul.f32 %v5209_v8, %v5209_v8  ;;  %v5213_v42 = vunpack.c.l.bf16 %v9238_v4 }
 0x2ae   :  { %v5218_v4 = vunpack.c.h.bf16 %v9254_v34 }
 0x2af   :  { %v5973_v6 = vadd.f32 %v5972_v35, %v5718_v47  ;;  %v5454_v15 = vadd.f32 %v5453_v49, %v5198_v16  ;;  %v5731_v16 = vmul.f32 %v5210_v7, %v5210_v7  ;;  %v5732_v49 = vmul.f32 %v5211_v25, %v5211_v25 }
 0x2b1   :  { %v5455_v54 = vadd.f32 %v5454_v15, %v5199_v50  ;;  %v5974_v33 = vadd.f32 %v5973_v6, %v5719_v45  ;;  %v5733_v45 = vmul.f32 %v5212_v61, %v5212_v61 }
 0x2b3   :  { %v5456_v44 = vadd.f32 %v5455_v54, %v5200_v57  ;;  %v5975_v19 = vadd.f32 %v5974_v33, %v5720_v55  ;;  %v5734_v57 = vmul.f32 %v5213_v42, %v5213_v42  ;;  %v5215_v54 = vunpack.c.l.bf16 %v9256_v27 }
 0x2b4   :  { %v5735_v55 = vmul.f32 %v5214_v37, %v5214_v37  ;;  %v5220_v27 = vunpack.c.h.bf16 %v9272_v63 }
 0x2b5   :  { %v5457_v5 = vadd.f32 %v5456_v44, %v5201_v9  ;;  %v5976_v62 = vadd.f32 %v5975_v19, %v5721_v58  ;;  %v5217_v44 = vunpack.c.l.bf16 %v9254_v34  ;;  %v5736_v19 = vmul.f32 %v5215_v54, %v5215_v54 }
 0x2b6   :  { %v5222_v34 = vunpack.c.h.bf16 %v9270_v1 }
 0x2b7   :  { %v5977_v43 = vadd.f32 %v5976_v62, %v5722_v53  ;;  %v5458_v21 = vadd.f32 %v5457_v5, %v5202_v56  ;;  %v5737_v62 = vmul.f32 %v5216_v46, %v5216_v46 }
 0x2b9   :  { %v5459_v24 = vadd.f32 %v5458_v21, %v5203_v51  ;;  %v5978_v31 = vadd.f32 %v5977_v43, %v5723_v12  ;;  %v5738_v12 = vmul.f32 %v5217_v44, %v5217_v44  ;;  %v5219_v21 = vunpack.c.l.bf16 %v9272_v63 }
 0x2bb   :  { %v5460_v3 = vadd.f32 %v5459_v24, %v5204_v39  ;;  %v5979_v18 = vadd.f32 %v5978_v31, %v5724_v26  ;;  %v5221_v31 = vunpack.c.l.bf16 %v9270_v1  ;;  %v5223_v1 = vld [vmem:[%s9373_s3] sm:$0x1] }
 0x2bd   :  { %v5461_v23 = vadd.f32 %v5460_v3, %v5205_v13  ;;  %v5980_v30 = vadd.f32 %v5979_v18, %v5725_v2  ;;  %v5739_v13 = vmul.f32 %v5218_v4, %v5218_v4  ;;  %v5740_v3 = vmul.f32 %v5219_v21, %v5219_v21 }
 0x2bf   :  { %v5981_v28 = vadd.f32 %v5980_v30, %v5726_v32  ;;  %v5462_v60 = vadd.f32 %v5461_v23, %v5206_v41  ;;  %v5741_v32 = vmul.f32 %v5220_v27, %v5220_v27  ;;  %v5742_v30 = vmul.f32 %v5221_v31, %v5221_v31 }
 0x2c1   :  { %v5463_v29 = vadd.f32 %v5462_v60, %v5207_v22  ;;  %v5982_v52 = vadd.f32 %v5981_v28, %v5727_v14  ;;  %v5743_v28 = vmul.f32 %v5222_v34, %v5222_v34 }
 0x2c3   :  { %v5464_v38 = vadd.f32 %v5463_v29, %v5208_v20  ;;  %v5983_v11 = vadd.f32 %v5982_v52, %v5728_v36 }
 0x2c5   :  { %v5465_v48 = vadd.f32 %v5464_v38, %v5209_v8  ;;  %v5984_v0 = vadd.f32 %v5983_v11, %v5729_v17 }
 0x2c7   :  { %v5985_v40 = vadd.f32 %v5984_v0, %v5730_v59  ;;  %v5466_v10 = vadd.f32 %v5465_v48, %v5210_v7 }
 0x2c9   :  { %v5467_v47 = vadd.f32 %v5466_v10, %v5211_v25  ;;  %v5986_v35 = vadd.f32 %v5985_v40, %v5731_v16  ;;  %v5487_v25 = vld [vmem:[%s9374_s4] sm:$0x1] }
 0x2cb   :  { %v5468_v50 = vadd.f32 %v5467_v47, %v5212_v61  ;;  %v5987_v6 = vadd.f32 %v5986_v35, %v5732_v49 }
 0x2cd   :  { %v5469_v15 = vadd.f32 %v5468_v50, %v5213_v42  ;;  %v5988_v9 = vadd.f32 %v5987_v6, %v5733_v45 }
 0x2cf   :  { %v5989_v33 = vadd.f32 %v5988_v9, %v5734_v57  ;;  %v5470_v56 = vadd.f32 %v5469_v15, %v5214_v37 }
 0x2d1   :  { %v5471_v58 = vadd.f32 %v5470_v56, %v5215_v54  ;;  %v5990_v53 = vadd.f32 %v5989_v33, %v5735_v55 }
 0x2d3   :  { %v5472_v5 = vadd.f32 %v5471_v58, %v5216_v46  ;;  %v5991_v51 = vadd.f32 %v5990_v53, %v5736_v19 }
 0x2d5   :  { %v5473_v43 = vadd.f32 %v5472_v5, %v5217_v44  ;;  %v5992_v39 = vadd.f32 %v5991_v51, %v5737_v62 }
 0x2d7   :  { %v5993_v24 = vadd.f32 %v5992_v39, %v5738_v12  ;;  %v5474_v26 = vadd.f32 %v5473_v43, %v5218_v4 }
 0x2d9   :  { %v5475_v41 = vadd.f32 %v5474_v26, %v5219_v21  ;;  %v5994_v2 = vadd.f32 %v5993_v24, %v5739_v13 }
 0x2db   :  { %v5476_v18 = vadd.f32 %v5475_v41, %v5220_v27  ;;  %v5995_v23 = vadd.f32 %v5994_v2, %v5740_v3 }
 0x2dd   :  { %v5477_v22 = vadd.f32 %v5476_v18, %v5221_v31  ;;  %v5996_v14 = vadd.f32 %v5995_v23, %v5741_v32 }
 0x2df   :  { %v5478_v20 = vadd.f32 %v5477_v22, %v5222_v34  ;;  %v5997_v60 = vadd.f32 %v5996_v14, %v5742_v30 }
 0x2e1   :  { %v5479_v8 = vrot.slane %v5478_v20, 4  ;;  %v5998_v29 = vadd.f32 %v5997_v60, %v5743_v28 }
 0x2e3   :  { %v5480_v63 = vadd.f32 %v5479_v8, %v5478_v20  ;;  %v5999_v36 = vrot.slane %v5998_v29, 4 }
 0x2e5   :  { %v5481_v52 = vrot.slane %v5480_v63, 2  ;;  %v6000_v7 = vadd.f32 %v5999_v36, %v5998_v29 }
 0x2e7   :  { %v5482_v38 = vadd.f32 %v5481_v52, %v5480_v63  ;;  %v6001_v17 = vrot.slane %v6000_v7, 2 }
 0x2e9   :  { %v5483_v11 = vrot.slane %v5482_v38, 1  ;;  %v6002_v59 = vadd.f32 %v6001_v17, %v6000_v7 }
 0x2eb   :  { %v5484_v48 = vadd.f32 %v5483_v11, %v5482_v38  ;;  %v6003_v0 = vrot.slane %v6002_v59, 1 }
 0x2ed   :  { %v5485_v16 = vadd.f32 %v5484_v48, %v5223_v1  ;;  %v6004_v40 = vadd.f32 %v6003_v0, %v6002_v59 }
 0x2ef   :  { %5486 = vst [vmem:[%s9373_s3] sm:$0x1] %v5485_v16  ;;  %v6005_v61 = vadd.f32 %v6004_v40, %v5487_v25 }
 0x2f1   :  { %6006 = vst [vmem:[%s9374_s4] sm:$0x1] %v6005_v61 }

// kernel: generator_forward.11
= control target key start
LH: loop header
LB: loop body
LE: loop exit
PB: predicated region body
PF: predicated region fallthrough
CT: control target
= control target key end

     0   :  { %s8158_s9 = smov 0   ;;  %s8160_s10 = smov 0   ;;  %s8595_s0 = inlined_call_operand.vmem [shape: bf16[8192,48], index: 0, kind: input, shape index: {}]   ;;  %s8596_s1 = inlined_call_operand.vmem [shape: bf16[48,128], index: 1, kind: input, shape index: {}]   ;;  %s8597_s2 = inlined_call_operand.vmem [shape: bf16[8192,128], index: 2, kind: output, shape index: {}]  }
   0x1   :  { %s8162_s11 = smov 0  }
   0x2 LB: > { %s27_s12 = sadd.s32 1, %s8137_s10  ;;  %p5508_p0 = scmp.ge.s32.totalorder %s8141_s11, 1  ;;  %s8141_s11 = sphi %s8162_s11, %s12_s11   ;;  %s8137_s10 = sphi %s8160_s10, %s8599_s10   ;;  %s8133_s9 = sphi %s8158_s9, %s8598_s9  }
   0x3   : > { %p29_p1 = scmp.ge.s32.totalorder %s27_s12, 4  ;;  %p155_p2 = scmp.lt.s32.totalorder %s8141_s11, 5 }
   0x5   : > { %s8601_s12 = smov (%p29_p1, %s27_s12), 0  ;;  %p156_p3 = pnand %p5508_p0, %p155_p2 }
   0x6   : > { %s5509_s15 = sshll.u32 (!%p156_p3), %s8133_s9, 8 }
   0x7   : > { %159 = sbr.rel (%p156_p3) target bundleno = 490 (0x1ea), region = 28  ;;  %p192_p4 = scmp.lt.s32.totalorder (!%p156_p3), %s5509_s15, 1023 }
   0xc   : > { %v7476_v0 = vld [vmem:[%s8596_s1 + $0x10] sm:$0xff]   ;;  %v7477_v1 = vld [vmem:[%s8596_s1 + $0x8] sm:$0xff]   ;;  %s8603_s15 = smov (!%p192_p4, %s5509_s15), 1023  ;;  %v7478_v2 = vld [vmem:[%s8596_s1] sm:$0xff]   ;;  %vm1655_vm0 = vcmask 392192  }
   0xd   : > { %7184 = vmatprep.subr.bf16.mxu0 %v7476_v0  ;;  %7446 = vmatprep.subr.bf16.mxu1 %v7476_v0  ;;  %s5510_s20 = sshll.u32 %s8603_s15, 2 }
   0xe   : > { %7185 = vmatpush3.bf16.msra.mxu0 %v7476_v0  ;;  %7449 = vmatpush3.bf16.msra.mxu1 %v7476_v0  ;;  %s8193_s23 = scalar_lea.vmem %s8595_s0, %s5510_s20  ;;  %s8420_s26 = scalar_lea.vmem %s8597_s2, %s5510_s20 }
   0xf   : > { %7186 = vmatprep.subr.bf16.mxu0 %v7477_v1  ;;  %7447 = vmatprep.subr.bf16.mxu1 %v7477_v1  ;;  %v7479_v3 = vld [vmem:[%s8193_s23] sm:$0xff]   ;;  %v7481_v5 = vld [vmem:[%s8193_s23 + $0x8] sm:$0xff]   ;;  %v7483_v7 = vld [vmem:[%s8193_s23 + $0x10] sm:$0xff]  }
  0x10   : > { %v7480_v4 = vld [vmem:[%s8193_s23 + $0x200] sm:$0xff]   ;;  %7190 = vmatprep.mubr.msk.bf16.mxu0 %vm1655_vm0, %v7479_v3  ;;  %v7482_v6 = vld [vmem:[%s8193_s23 + $0x208] sm:$0xff]   ;;  %v7484_v8 = vld [vmem:[%s8193_s23 + $0x210] sm:$0xff]  }
  0x11   : > { %7318 = vmatprep.mubr.msk.bf16.mxu1 %vm1655_vm0, %v7480_v4  ;;  %v7485_v9 = vld [vmem:[%s8193_s23 + $0x18] sm:$0xff]   ;;  %v7487_v11 = vld [vmem:[%s8193_s23 + $0x20] sm:$0xff]   ;;  %v7489_v13 = vld [vmem:[%s8193_s23 + $0x28] sm:$0xff]  }
  0x12   : > { %7187 = vmatpush3.bf16.msra.mxu0 %v7477_v1  ;;  %7450 = vmatpush3.bf16.msra.mxu1 %v7477_v1  ;;  %v7486_v10 = vld [vmem:[%s8193_s23 + $0x218] sm:$0xff]   ;;  %v7488_v12 = vld [vmem:[%s8193_s23 + $0x220] sm:$0xff]   ;;  %v7490_v14 = vld [vmem:[%s8193_s23 + $0x228] sm:$0xff]  }
  0x13   : > { %7188 = vmatprep.subr.bf16.mxu0 %v7478_v2  ;;  %7448 = vmatprep.subr.bf16.mxu1 %v7478_v2  ;;  %v7491_v15 = vld [vmem:[%s8193_s23 + $0x30] sm:$0xff]   ;;  %v7493_v17 = vld [vmem:[%s8193_s23 + $0x38] sm:$0xff]   ;;  %v7495_v19 = vld [vmem:[%s8193_s23 + $0x40] sm:$0xff]  }
  0x14   : > { %v7492_v16 = vld [vmem:[%s8193_s23 + $0x230] sm:$0xff]   ;;  %v7494_v18 = vld [vmem:[%s8193_s23 + $0x238] sm:$0xff]   ;;  %v7496_v20 = vld [vmem:[%s8193_s23 + $0x240] sm:$0xff]  }
  0x15   : > { %v7497_v21 = vld [vmem:[%s8193_s23 + $0x48] sm:$0xff]   ;;  %v7499_v23 = vld [vmem:[%s8193_s23 + $0x50] sm:$0xff]   ;;  %v7501_v25 = vld [vmem:[%s8193_s23 + $0x58] sm:$0xff]  }
  0x16   : > { %7189 = vmatpush3.bf16.msra.mxu0 %v7478_v2  ;;  %7451 = vmatpush3.bf16.msra.mxu1 %v7478_v2  ;;  %v7498_v22 = vld [vmem:[%s8193_s23 + $0x248] sm:$0xff]   ;;  %v7500_v24 = vld [vmem:[%s8193_s23 + $0x250] sm:$0xff]   ;;  %v7502_v26 = vld [vmem:[%s8193_s23 + $0x258] sm:$0xff]  }
  0x17   : > { %v7503_v27 = vld [vmem:[%s8193_s23 + $0x60] sm:$0xff]   ;;  %v7505_v29 = vld [vmem:[%s8193_s23 + $0x68] sm:$0xff]   ;;  %v7507_v31 = vld [vmem:[%s8193_s23 + $0x70] sm:$0xff]  }
  0x18   : > { %v7504_v28 = vld [vmem:[%s8193_s23 + $0x260] sm:$0xff]   ;;  %v7506_v30 = vld [vmem:[%s8193_s23 + $0x268] sm:$0xff]   ;;  %v7508_v32 = vld [vmem:[%s8193_s23 + $0x270] sm:$0xff]  }
  0x19   : > { %7191 = vmatmul.mubr.msk.bf16.vlgmr.msra.gmra.mxu0 %vm1655_vm0, %v7481_v5  ;;  %7319 = vmatmul.mubr.msk.bf16.vlgmr.msra.gmra.mxu1 %vm1655_vm0, %v7482_v6  ;;  %v7509_v33 = vld [vmem:[%s8193_s23 + $0x78] sm:$0xff]   ;;  %v7511_v35 = vld [vmem:[%s8193_s23 + $0x80] sm:$0xff]   ;;  %v7513_v37 = vld [vmem:[%s8193_s23 + $0x88] sm:$0xff]  }
  0x1a   : > { %7194 = vmatprep.mubr.msk.bf16.mxu0 %vm1655_vm0, %v7483_v7  ;;  %7322 = vmatprep.mubr.msk.bf16.mxu1 %vm1655_vm0, %v7484_v8  ;;  %v7510_v34 = vld [vmem:[%s8193_s23 + $0x278] sm:$0xff]   ;;  %v7512_v36 = vld [vmem:[%s8193_s23 + $0x280] sm:$0xff]   ;;  %v7514_v38 = vld [vmem:[%s8193_s23 + $0x288] sm:$0xff]  }
  0x1b   : > { %v7515_v39 = vld [vmem:[%s8193_s23 + $0x90] sm:$0xff]   ;;  %v7517_v41 = vld [vmem:[%s8193_s23 + $0x98] sm:$0xff]   ;;  %v7519_v43 = vld [vmem:[%s8193_s23 + $0xa0] sm:$0xff]  }
  0x1c   : > { %v7516_v40 = vld [vmem:[%s8193_s23 + $0x290] sm:$0xff]   ;;  %v7518_v42 = vld [vmem:[%s8193_s23 + $0x298] sm:$0xff]   ;;  %v7520_v44 = vld [vmem:[%s8193_s23 + $0x2a0] sm:$0xff]  }
  0x1d   : > { %v7521_v45 = vld [vmem:[%s8193_s23 + $0xa8] sm:$0xff]   ;;  %v7523_v47 = vld [vmem:[%s8193_s23 + $0xb0] sm:$0xff]   ;;  %v7525_v49 = vld [vmem:[%s8193_s23 + $0xb8] sm:$0xff]  }
  0x1e   : > { %v7522_v46 = vld [vmem:[%s8193_s23 + $0x2a8] sm:$0xff]   ;;  %v7524_v48 = vld [vmem:[%s8193_s23 + $0x2b0] sm:$0xff]   ;;  %v7526_v50 = vld [vmem:[%s8193_s23 + $0x2b8] sm:$0xff]  }
  0x1f   : > { %v7527_v51 = vld [vmem:[%s8193_s23 + $0xc0] sm:$0xff]   ;;  %v7529_v53 = vld [vmem:[%s8193_s23 + $0xc8] sm:$0xff]   ;;  %v7531_v55 = vld [vmem:[%s8193_s23 + $0xd0] sm:$0xff]  }
  0x20   : > { %v7528_v52 = vld [vmem:[%s8193_s23 + $0x2c0] sm:$0xff]   ;;  %v7530_v54 = vld [vmem:[%s8193_s23 + $0x2c8] sm:$0xff]   ;;  %v7532_v56 = vld [vmem:[%s8193_s23 + $0x2d0] sm:$0xff]  }
  0x21   : > { %7195 = vmatmul.mubr.msk.bf16.gmra.mxu0 %vm1655_vm0, %v7485_v9  ;;  %7323 = vmatmul.mubr.msk.bf16.gmra.mxu1 %vm1655_vm0, %v7486_v10  ;;  %v7533_v57 = vld [vmem:[%s8193_s23 + $0xd8] sm:$0xff]   ;;  %v7535_v59 = vld [vmem:[%s8193_s23 + $0xe0] sm:$0xff]   ;;  %v7537_v61 = vld [vmem:[%s8193_s23 + $0xe8] sm:$0xff]  }
  0x22   : > { %7198 = vmatprep.mubr.msk.bf16.mxu0 %vm1655_vm0, %v7487_v11  ;;  %7326 = vmatprep.mubr.msk.bf16.mxu1 %vm1655_vm0, %v7488_v12  ;;  %v7534_v58 = vld [vmem:[%s8193_s23 + $0x2d8] sm:$0xff]   ;;  %v7536_v60 = vld [vmem:[%s8193_s23 + $0x2e0] sm:$0xff]   ;;  %v7538_v62 = vld [vmem:[%s8193_s23 + $0x2e8] sm:$0xff]  }
  0x23   : > { %v7539_v63 = vld [vmem:[%s8193_s23 + $0xf0] sm:$0xff]   ;;  %v7541_v1 = vld [vmem:[%s8193_s23 + $0xf8] sm:$0xff]   ;;  %v7543_v3 = vld [vmem:[%s8193_s23 + $0x100] sm:$0xff]  }
  0x24   : > { %v7540_v0 = vld [vmem:[%s8193_s23 + $0x2f0] sm:$0xff]   ;;  %v7542_v2 = vld [vmem:[%s8193_s23 + $0x2f8] sm:$0xff]   ;;  %v7544_v4 = vld [vmem:[%s8193_s23 + $0x300] sm:$0xff]  }
  0x25   : > { %v7545_v5 = vld [vmem:[%s8193_s23 + $0x108] sm:$0xff]   ;;  %v7547_v7 = vld [vmem:[%s8193_s23 + $0x110] sm:$0xff]   ;;  %v7549_v9 = vld [vmem:[%s8193_s23 + $0x118] sm:$0xff]  }
  0x26   : > { %v7546_v6 = vld [vmem:[%s8193_s23 + $0x308] sm:$0xff]   ;;  %v7548_v8 = vld [vmem:[%s8193_s23 + $0x310] sm:$0xff]   ;;  %v7550_v10 = vld [vmem:[%s8193_s23 + $0x318] sm:$0xff]  }
  0x27   : > { %v7551_v11 = vld [vmem:[%s8193_s23 + $0x120] sm:$0xff]  }
  0x28   : > { %v7552_v12 = vld [vmem:[%s8193_s23 + $0x320] sm:$0xff]  }
  0x29   : > { %7199 = vmatmul.mubr.msk.bf16.gmra.mxu0 %vm1655_vm0, %v7489_v13  ;;  %7327 = vmatmul.mubr.msk.bf16.gmra.mxu1 %vm1655_vm0, %v7490_v14  ;;  %v7553_v13 = vld [vmem:[%s8193_s23 + $0x128] sm:$0xff]  }
  0x2a   : > { %7202 = vmatprep.mubr.msk.bf16.mxu0 %vm1655_vm0, %v7491_v15  ;;  %7330 = vmatprep.mubr.msk.bf16.mxu1 %vm1655_vm0, %v7492_v16  ;;  %v7554_v14 = vld [vmem:[%s8193_s23 + $0x328] sm:$0xff]   ;;  %v7555_v15 = vld [vmem:[%s8193_s23 + $0x130] sm:$0xff]  }
  0x2b   : > { %v7556_v16 = vld [vmem:[%s8193_s23 + $0x330] sm:$0xff]  }
  0x31   : > { %7203 = vmatmul.mubr.msk.bf16.gmra.mxu0 %vm1655_vm0, %v7493_v17  ;;  %7331 = vmatmul.mubr.msk.bf16.gmra.mxu1 %vm1655_vm0, %v7494_v18  ;;  %v7557_v17 = vld [vmem:[%s8193_s23 + $0x138] sm:$0xff]  }
  0x32   : > { %7206 = vmatprep.mubr.msk.bf16.mxu0 %vm1655_vm0, %v7495_v19  ;;  %7334 = vmatprep.mubr.msk.bf16.mxu1 %vm1655_vm0, %v7496_v20  ;;  %v7558_v18 = vld [vmem:[%s8193_s23 + $0x338] sm:$0xff]   ;;  %v7559_v19 = vld [vmem:[%s8193_s23 + $0x140] sm:$0xff]  }
  0x33   : > { %v7560_v20 = vld [vmem:[%s8193_s23 + $0x340] sm:$0xff]  }
  0x39   : > { %7207 = vmatmul.mubr.msk.bf16.gmra.mxu0 %vm1655_vm0, %v7497_v21  ;;  %7335 = vmatmul.mubr.msk.bf16.gmra.mxu1 %vm1655_vm0, %v7498_v22  ;;  %v7561_v21 = vld [vmem:[%s8193_s23 + $0x148] sm:$0xff]  }
  0x3a   : > { %7210 = vmatprep.mubr.msk.bf16.mxu0 %vm1655_vm0, %v7499_v23  ;;  %7338 = vmatprep.mubr.msk.bf16.mxu1 %vm1655_vm0, %v7500_v24  ;;  %v7562_v22 = vld [vmem:[%s8193_s23 + $0x348] sm:$0xff]   ;;  %v7563_v23 = vld [vmem:[%s8193_s23 + $0x150] sm:$0xff]  }
  0x3b   : > { %v7564_v24 = vld [vmem:[%s8193_s23 + $0x350] sm:$0xff]  }
  0x41   : > { %7211 = vmatmul.mubr.msk.bf16.gmra.mxu0 %vm1655_vm0, %v7501_v25  ;;  %7339 = vmatmul.mubr.msk.bf16.gmra.mxu1 %vm1655_vm0, %v7502_v26  ;;  %v7565_v25 = vld [vmem:[%s8193_s23 + $0x158] sm:$0xff]  }
  0x42   : > { %7214 = vmatprep.mubr.msk.bf16.mxu0 %vm1655_vm0, %v7503_v27  ;;  %7342 = vmatprep.mubr.msk.bf16.mxu1 %vm1655_vm0, %v7504_v28  ;;  %v7566_v26 = vld [vmem:[%s8193_s23 + $0x358] sm:$0xff]   ;;  %v7567_v27 = vld [vmem:[%s8193_s23 + $0x160] sm:$0xff]  }
  0x43   : > { %v7568_v28 = vld [vmem:[%s8193_s23 + $0x360] sm:$0xff]  }
  0x49   : > { %7215 = vmatmul.mubr.msk.bf16.gmra.mxu0 %vm1655_vm0, %v7505_v29  ;;  %7343 = vmatmul.mubr.msk.bf16.gmra.mxu1 %vm1655_vm0, %v7506_v30  ;;  %v7569_v29 = vld [vmem:[%s8193_s23 + $0x168] sm:$0xff]  }
  0x4a   : > { %7218 = vmatprep.mubr.msk.bf16.mxu0 %vm1655_vm0, %v7507_v31  ;;  %7346 = vmatprep.mubr.msk.bf16.mxu1 %vm1655_vm0, %v7508_v32  ;;  %v7570_v30 = vld [vmem:[%s8193_s23 + $0x368] sm:$0xff]   ;;  %v7571_v31 = vld [vmem:[%s8193_s23 + $0x170] sm:$0xff]  }
  0x4b   : > { %v7572_v32 = vld [vmem:[%s8193_s23 + $0x370] sm:$0xff]  }
  0x51   : > { %7219 = vmatmul.mubr.msk.bf16.gmra.mxu0 %vm1655_vm0, %v7509_v33  ;;  %7347 = vmatmul.mubr.msk.bf16.gmra.mxu1 %vm1655_vm0, %v7510_v34  ;;  %v7573_v33 = vld [vmem:[%s8193_s23 + $0x178] sm:$0xff]  }
  0x52   : > { %7222 = vmatprep.mubr.msk.bf16.mxu0 %vm1655_vm0, %v7511_v35  ;;  %7350 = vmatprep.mubr.msk.bf16.mxu1 %vm1655_vm0, %v7512_v36  ;;  %v7574_v34 = vld [vmem:[%s8193_s23 + $0x378] sm:$0xff]   ;;  %v7575_v35 = vld [vmem:[%s8193_s23 + $0x180] sm:$0xff]  }
  0x53   : > { %v7576_v36 = vld [vmem:[%s8193_s23 + $0x380] sm:$0xff]  }
  0x59   : > { %7223 = vmatmul.mubr.msk.bf16.gmra.mxu0 %vm1655_vm0, %v7513_v37  ;;  %7351 = vmatmul.mubr.msk.bf16.gmra.mxu1 %vm1655_vm0, %v7514_v38  ;;  %v7577_v37 = vld [vmem:[%s8193_s23 + $0x188] sm:$0xff]  }
  0x5a   : > { %7226 = vmatprep.mubr.msk.bf16.mxu0 %vm1655_vm0, %v7515_v39  ;;  %7354 = vmatprep.mubr.msk.bf16.mxu1 %vm1655_vm0, %v7516_v40  ;;  %v7578_v38 = vld [vmem:[%s8193_s23 + $0x388] sm:$0xff]   ;;  %v7579_v39 = vld [vmem:[%s8193_s23 + $0x190] sm:$0xff]  }
  0x5b   : > { %v7580_v40 = vld [vmem:[%s8193_s23 + $0x390] sm:$0xff]  }
  0x61   : > { %7227 = vmatmul.mubr.msk.bf16.gmra.mxu0 %vm1655_vm0, %v7517_v41  ;;  %7355 = vmatmul.mubr.msk.bf16.gmra.mxu1 %vm1655_vm0, %v7518_v42 }
  0x62   : > { %7230 = vmatprep.mubr.msk.bf16.mxu0 %vm1655_vm0, %v7519_v43  ;;  %7358 = vmatprep.mubr.msk.bf16.mxu1 %vm1655_vm0, %v7520_v44 }
  0x69   : > { %7231 = vmatmul.mubr.msk.bf16.gmra.mxu0 %vm1655_vm0, %v7521_v45  ;;  %7359 = vmatmul.mubr.msk.bf16.gmra.mxu1 %vm1655_vm0, %v7522_v46 }
  0x6a   : > { %7234 = vmatprep.mubr.msk.bf16.mxu0 %vm1655_vm0, %v7523_v47  ;;  %7362 = vmatprep.mubr.msk.bf16.mxu1 %vm1655_vm0, %v7524_v48  ;;  %v7581_v47 = vld [vmem:[%s8193_s23 + $0x198] sm:$0xff]  }
  0x6b   : > { %v7582_v48 = vld [vmem:[%s8193_s23 + $0x398] sm:$0xff]  }
  0x71   : > { %7235 = vmatmul.mubr.msk.bf16.gmra.mxu0 %vm1655_vm0, %v7525_v49  ;;  %7363 = vmatmul.mubr.msk.bf16.gmra.mxu1 %vm1655_vm0, %v7526_v50  ;;  %v7583_v49 = vld [vmem:[%s8193_s23 + $0x1a0] sm:$0xff]  }
  0x72   : > { %7238 = vmatprep.mubr.msk.bf16.mxu0 %vm1655_vm0, %v7527_v51  ;;  %7366 = vmatprep.mubr.msk.bf16.mxu1 %vm1655_vm0, %v7528_v52  ;;  %v7584_v50 = vld [vmem:[%s8193_s23 + $0x3a0] sm:$0xff]  }
  0x79   : > { %7239 = vmatmul.mubr.msk.bf16.gmra.mxu0 %vm1655_vm0, %v7529_v53  ;;  %7367 = vmatmul.mubr.msk.bf16.gmra.mxu1 %vm1655_vm0, %v7530_v54 }
  0x7a   : > { %7242 = vmatprep.mubr.msk.bf16.mxu0 %vm1655_vm0, %v7531_v55  ;;  %7370 = vmatprep.mubr.msk.bf16.mxu1 %vm1655_vm0, %v7532_v56 }
  0x81   : > { %7243 = vmatmul.mubr.msk.bf16.gmra.mxu0 %vm1655_vm0, %v7533_v57  ;;  %7371 = vmatmul.mubr.msk.bf16.gmra.mxu1 %vm1655_vm0, %v7534_v58 }
  0x82   : > { %7246 = vmatprep.mubr.msk.bf16.mxu0 %vm1655_vm0, %v7535_v59  ;;  %7374 = vmatprep.mubr.msk.bf16.mxu1 %vm1655_vm0, %v7536_v60  ;;  %v7585_v59 = vld [vmem:[%s8193_s23 + $0x1a8] sm:$0xff]  }
  0x83   : > { %v7586_v60 = vld [vmem:[%s8193_s23 + $0x3a8] sm:$0xff]  }
  0x89   : > { %7247 = vmatmul.mubr.msk.bf16.gmra.mxu0 %vm1655_vm0, %v7537_v61  ;;  %7375 = vmatmul.mubr.msk.bf16.gmra.mxu1 %vm1655_vm0, %v7538_v62  ;;  %v7587_v61 = vld [vmem:[%s8193_s23 + $0x1b0] sm:$0xff]  }
  0x8a   : > { %7250 = vmatprep.mubr.msk.bf16.mxu0 %vm1655_vm0, %v7539_v63  ;;  %7378 = vmatprep.mubr.msk.bf16.mxu1 %vm1655_vm0, %v7540_v0  ;;  %v7588_v62 = vld [vmem:[%s8193_s23 + $0x3b0] sm:$0xff]  }
  0x91   : > { %7251 = vmatmul.mubr.msk.bf16.gmra.mxu0 %vm1655_vm0, %v7541_v1  ;;  %7379 = vmatmul.mubr.msk.bf16.gmra.mxu1 %vm1655_vm0, %v7542_v2 }
  0x92   : > { %7254 = vmatprep.mubr.msk.bf16.mxu0 %vm1655_vm0, %v7543_v3  ;;  %7382 = vmatprep.mubr.msk.bf16.mxu1 %vm1655_vm0, %v7544_v4 }
  0x99   : > { %7255 = vmatmul.mubr.msk.bf16.gmra.mxu0 %vm1655_vm0, %v7545_v5  ;;  %7383 = vmatmul.mubr.msk.bf16.gmra.mxu1 %vm1655_vm0, %v7546_v6 }
  0x9a   : > { %7258 = vmatprep.mubr.msk.bf16.mxu0 %vm1655_vm0, %v7547_v7  ;;  %7386 = vmatprep.mubr.msk.bf16.mxu1 %vm1655_vm0, %v7548_v8 }
  0xa1   : > { %7259 = vmatmul.mubr.msk.bf16.gmra.mxu0 %vm1655_vm0, %v7549_v9  ;;  %7387 = vmatmul.mubr.msk.bf16.gmra.mxu1 %vm1655_vm0, %v7550_v10 }
  0xa2   : > { %7262 = vmatprep.mubr.msk.bf16.mxu0 %vm1655_vm0, %v7551_v11  ;;  %7390 = vmatprep.mubr.msk.bf16.mxu1 %vm1655_vm0, %v7552_v12 }
  0xa9   : > { %7263 = vmatmul.mubr.msk.bf16.gmra.mxu0 %vm1655_vm0, %v7553_v13  ;;  %7391 = vmatmul.mubr.msk.bf16.gmra.mxu1 %vm1655_vm0, %v7554_v14 }
  0xaa   : > { %7266 = vmatprep.mubr.msk.bf16.mxu0 %vm1655_vm0, %v7555_v15  ;;  %7394 = vmatprep.mubr.msk.bf16.mxu1 %vm1655_vm0, %v7556_v16  ;;  %v7589_v16 = vld [vmem:[%s8193_s23 + $0x1b8] sm:$0xff]  }
  0xb1   : > { %7267 = vmatmul.mubr.msk.bf16.gmra.mxu0 %vm1655_vm0, %v7557_v17  ;;  %7395 = vmatmul.mubr.msk.bf16.gmra.mxu1 %vm1655_vm0, %v7558_v18  ;;  %v7590_v17 = vld [vmem:[%s8193_s23 + $0x3b8] sm:$0xff]  }
  0xb2   : > { %7270 = vmatprep.mubr.msk.bf16.mxu0 %vm1655_vm0, %v7559_v19  ;;  %7398 = vmatprep.mubr.msk.bf16.mxu1 %vm1655_vm0, %v7560_v20  ;;  %v7591_v20 = vld [vmem:[%s8193_s23 + $0x1c0] sm:$0xff]  }
  0xb9   : > { %7271 = vmatmul.mubr.msk.bf16.gmra.mxu0 %vm1655_vm0, %v7561_v21  ;;  %7399 = vmatmul.mubr.msk.bf16.gmra.mxu1 %vm1655_vm0, %v7562_v22  ;;  %v7592_v21 = vld [vmem:[%s8193_s23 + $0x3c0] sm:$0xff]  }
  0xba   : > { %7274 = vmatprep.mubr.msk.bf16.mxu0 %vm1655_vm0, %v7563_v23  ;;  %7402 = vmatprep.mubr.msk.bf16.mxu1 %vm1655_vm0, %v7564_v24 }
  0xc1   : > { %7275 = vmatmul.mubr.msk.bf16.gmra.mxu0 %vm1655_vm0, %v7565_v25  ;;  %7403 = vmatmul.mubr.msk.bf16.gmra.mxu1 %vm1655_vm0, %v7566_v26 }
  0xc2   : > { %7278 = vmatprep.mubr.msk.bf16.mxu0 %vm1655_vm0, %v7567_v27  ;;  %7406 = vmatprep.mubr.msk.bf16.mxu1 %vm1655_vm0, %v7568_v28 }
  0xc9   : > { %7279 = vmatmul.mubr.msk.bf16.gmra.mxu0 %vm1655_vm0, %v7569_v29  ;;  %7407 = vmatmul.mubr.msk.bf16.gmra.mxu1 %vm1655_vm0, %v7570_v30 }
  0xca   : > { %7282 = vmatprep.mubr.msk.bf16.mxu0 %vm1655_vm0, %v7571_v31  ;;  %7410 = vmatprep.mubr.msk.bf16.mxu1 %vm1655_vm0, %v7572_v32 }
  0xd1   : > { %7283 = vmatmul.mubr.msk.bf16.gmra.mxu0 %vm1655_vm0, %v7573_v33  ;;  %7411 = vmatmul.mubr.msk.bf16.gmra.mxu1 %vm1655_vm0, %v7574_v34 }
  0xd2   : > { %7286 = vmatprep.mubr.msk.bf16.mxu0 %vm1655_vm0, %v7575_v35  ;;  %7414 = vmatprep.mubr.msk.bf16.mxu1 %vm1655_vm0, %v7576_v36 }
  0xd9   : > { %v7192_v41 = vpop.f32.mrf.mxu0  ;;  %7287 = vmatmul.mubr.msk.bf16.gmra.mxu0 %vm1655_vm0, %v7577_v37  ;;  %v7320_v42 = vpop.f32.mrf.mxu1  ;;  %7415 = vmatmul.mubr.msk.bf16.gmra.mxu1 %vm1655_vm0, %v7578_v38 }
  0xda   : > { %7607 = vtanh.f32 %v7192_v41  ;;  %7290 = vmatprep.mubr.msk.bf16.mxu0 %vm1655_vm0, %v7579_v39  ;;  %7418 = vmatprep.mubr.msk.bf16.mxu1 %vm1655_vm0, %v7580_v40  ;;  %v7593_v40 = vld [vmem:[%s8193_s23 + $0x1c8] sm:$0xff]  }
  0xdb   : > { %7609 = vtanh.f32 %v7320_v42  ;;  %v2074_v43 = vpop.f32.mrf.mxu0  ;;  %v2586_v44 = vpop.f32.mrf.mxu1  ;;  %v7594_v41 = vld [vmem:[%s8193_s23 + $0x3c8] sm:$0xff]  }
  0xdc   : > { %7611 = vtanh.f32 %v2074_v43 }
  0xdd   : > { %7613 = vtanh.f32 %v2586_v44  ;;  %v7193_v45 = vpop.f32.mrf.mxu0  ;;  %v7321_v46 = vpop.f32.mrf.mxu1  ;;  %v7595_v44 = vld [vmem:[%s8193_s23 + $0x1d0] sm:$0xff]  }
  0xde   : > { %7615 = vtanh.f32 %v7193_v45  ;;  %v7596_v45 = vld [vmem:[%s8193_s23 + $0x3d0] sm:$0xff]  }
  0xdf   : > { %7617 = vtanh.f32 %v7321_v46  ;;  %v2077_v51 = vpop.f32.mrf.mxu0  ;;  %v2589_v52 = vpop.f32.mrf.mxu1 }
  0xe0   : > { %7619 = vtanh.f32 %v2077_v51 }
  0xe1   : > { %7621 = vtanh.f32 %v2589_v52  ;;  %v7196_v53 = vpop.f32.mrf.mxu0  ;;  %7291 = vmatmul.mubr.msk.bf16.gmra.mxu0 %vm1655_vm0, %v7581_v47  ;;  %v7324_v54 = vpop.f32.mrf.mxu1  ;;  %7419 = vmatmul.mubr.msk.bf16.gmra.mxu1 %vm1655_vm0, %v7582_v48 }
  0xe2   : > { %7623 = vtanh.f32 %v7196_v53  ;;  %7294 = vmatprep.mubr.msk.bf16.mxu0 %vm1655_vm0, %v7583_v49  ;;  %7422 = vmatprep.mubr.msk.bf16.mxu1 %vm1655_vm0, %v7584_v50 }
  0xe3   : > { %7625 = vtanh.f32 %v7324_v54  ;;  %v2090_v55 = vpop.f32.mrf.mxu0  ;;  %v2602_v56 = vpop.f32.mrf.mxu1 }
  0xe4   : > { %7627 = vtanh.f32 %v2090_v55 }
  0xe5   : > { %7629 = vtanh.f32 %v2602_v56  ;;  %v7197_v57 = vpop.f32.mrf.mxu0  ;;  %v7325_v58 = vpop.f32.mrf.mxu1 }
  0xe6   : > { %7631 = vtanh.f32 %v7197_v57 }
  0xe7   : > { %v7608_v63 = vpop.eup %7607  ;;  %7633 = vtanh.f32 %v7325_v58  ;;  %v2093_v0 = vpop.f32.mrf.mxu0 }
  0xe8   : > { %v2605_v1 = vpop.f32.mrf.mxu1  ;;  %v7610_v2 = vpop.eup %7609  ;;  %7635 = vtanh.f32 %v2093_v0  ;;  %v7597_v0 = vld [vmem:[%s8193_s23 + $0x1d8] sm:$0xff]  }
  0xe9   : > { %v7612_v3 = vpop.eup %7611  ;;  %7637 = vtanh.f32 %v2605_v1  ;;  %v7200_v4 = vpop.f32.mrf.mxu0  ;;  %7295 = vmatmul.mubr.msk.bf16.gmra.mxu0 %vm1655_vm0, %v7585_v59  ;;  %7423 = vmatmul.mubr.msk.bf16.gmra.mxu1 %vm1655_vm0, %v7586_v60  ;;  %v7598_v1 = vld [vmem:[%s8193_s23 + $0x3d8] sm:$0xff]  }
  0xea   : > { %v7328_v5 = vpop.f32.mrf.mxu1  ;;  %v7614_v6 = vpop.eup %7613  ;;  %7639 = vtanh.f32 %v7200_v4  ;;  %7298 = vmatprep.mubr.msk.bf16.mxu0 %vm1655_vm0, %v7587_v61  ;;  %7426 = vmatprep.mubr.msk.bf16.mxu1 %vm1655_vm0, %v7588_v62  ;;  %v7599_v4 = vld [vmem:[%s8193_s23 + $0x1e0] sm:$0xff]  }
  0xeb   : > { %v7616_v7 = vpop.eup %7615  ;;  %7641 = vtanh.f32 %v7328_v5  ;;  %v2106_v8 = vpop.f32.mrf.mxu0  ;;  %v7600_v5 = vld [vmem:[%s8193_s23 + $0x3e0] sm:$0xff]  }
  0xec   : > { %v2618_v9 = vpop.f32.mrf.mxu1  ;;  %v7618_v10 = vpop.eup %7617  ;;  %v6294_v11 = vpack.c.bf16 %v7616_v7, %v7608_v63  ;;  %7643 = vtanh.f32 %v2106_v8 }
  0xed   : > { %v7620_v12 = vpop.eup %7619  ;;  %v6614_v13 = vpack.c.bf16 %v7618_v10, %v7610_v2  ;;  %7645 = vtanh.f32 %v2618_v9  ;;  %v7201_v14 = vpop.f32.mrf.mxu0 }
  0xee   : > { %v7329_v15 = vpop.f32.mrf.mxu1  ;;  %v7622_v18 = vpop.eup %7621  ;;  %6926 = vst [vmem:[%s8420_s26 + $0x8] sm:$0xff] %v6294_v11   ;;  %v6289_v19 = vpack.c.bf16 %v7620_v12, %v7612_v3  ;;  %7647 = vtanh.f32 %v7201_v14 }
  0xef   : > { %v7624_v22 = vpop.eup %7623  ;;  %6990 = vst [vmem:[%s8420_s26 + $0x208] sm:$0xff] %v6614_v13   ;;  %v6609_v23 = vpack.c.bf16 %v7622_v18, %v7614_v6  ;;  %7649 = vtanh.f32 %v7329_v15  ;;  %v2109_v24 = vpop.f32.mrf.mxu0 }
  0xf0   : > { %v2621_v25 = vpop.f32.mrf.mxu1  ;;  %v7626_v26 = vpop.eup %7625  ;;  %6290 = vst [vmem:[%s8420_s26] sm:$0xff] %v6289_v19   ;;  %7651 = vtanh.f32 %v2109_v24  ;;  %v7601_v24 = vld [vmem:[%s8193_s23 + $0x1e8] sm:$0xff]  }
  0xf1   : > { %v7628_v27 = vpop.eup %7627  ;;  %6989 = vst [vmem:[%s8420_s26 + $0x200] sm:$0xff] %v6609_v23   ;;  %7653 = vtanh.f32 %v2621_v25  ;;  %v7204_v28 = vpop.f32.mrf.mxu0  ;;  %7299 = vmatmul.mubr.msk.bf16.gmra.mxu0 %vm1655_vm0, %v7589_v16  ;;  %7427 = vmatmul.mubr.msk.bf16.gmra.mxu1 %vm1655_vm0, %v7590_v17  ;;  %v7602_v25 = vld [vmem:[%s8193_s23 + $0x3e8] sm:$0xff]  }
  0xf2   : > { %v7332_v29 = vpop.f32.mrf.mxu1  ;;  %v7630_v30 = vpop.eup %7629  ;;  %7655 = vtanh.f32 %v7204_v28  ;;  %7302 = vmatprep.mubr.msk.bf16.mxu0 %vm1655_vm0, %v7591_v20  ;;  %7430 = vmatprep.mubr.msk.bf16.mxu1 %vm1655_vm0, %v7592_v21  ;;  %v7603_v28 = vld [vmem:[%s8193_s23 + $0x1f0] sm:$0xff]  }
  0xf3   : > { %v7632_v31 = vpop.eup %7631  ;;  %7657 = vtanh.f32 %v7332_v29  ;;  %v2122_v32 = vpop.f32.mrf.mxu0  ;;  %v7604_v29 = vld [vmem:[%s8193_s23 + $0x3f0] sm:$0xff]  }
  0xf4   : > { %v2634_v33 = vpop.f32.mrf.mxu1  ;;  %v7634_v34 = vpop.eup %7633  ;;  %v6304_v35 = vpack.c.bf16 %v7632_v31, %v7624_v22  ;;  %7659 = vtanh.f32 %v2122_v32 }
  0xf5   : > { %v7636_v36 = vpop.eup %7635  ;;  %v6624_v37 = vpack.c.bf16 %v7634_v34, %v7626_v26  ;;  %7661 = vtanh.f32 %v2634_v33  ;;  %v7205_v38 = vpop.f32.mrf.mxu0 }
  0xf6   : > { %v7333_v39 = vpop.f32.mrf.mxu1  ;;  %v7638_v42 = vpop.eup %7637  ;;  %6928 = vst [vmem:[%s8420_s26 + $0x18] sm:$0xff] %v6304_v35   ;;  %v6299_v43 = vpack.c.bf16 %v7636_v36, %v7628_v27  ;;  %7663 = vtanh.f32 %v7205_v38 }
  0xf7   : > { %v7640_v46 = vpop.eup %7639  ;;  %6992 = vst [vmem:[%s8420_s26 + $0x218] sm:$0xff] %v6624_v37   ;;  %v6619_v47 = vpack.c.bf16 %v7638_v42, %v7630_v30  ;;  %7665 = vtanh.f32 %v7333_v39  ;;  %v2125_v48 = vpop.f32.mrf.mxu0 }
  0xf8   : > { %v2637_v49 = vpop.f32.mrf.mxu1  ;;  %v7642_v50 = vpop.eup %7641  ;;  %6927 = vst [vmem:[%s8420_s26 + $0x10] sm:$0xff] %v6299_v43   ;;  %7667 = vtanh.f32 %v2125_v48  ;;  %v7605_v48 = vld [vmem:[%s8193_s23 + $0x1f8] sm:$0xff]  }
  0xf9   : > { %v7644_v51 = vpop.eup %7643  ;;  %6991 = vst [vmem:[%s8420_s26 + $0x210] sm:$0xff] %v6619_v47   ;;  %7669 = vtanh.f32 %v2637_v49  ;;  %v7208_v52 = vpop.f32.mrf.mxu0  ;;  %7303 = vmatmul.mubr.msk.bf16.gmra.mxu0 %vm1655_vm0, %v7593_v40  ;;  %7431 = vmatmul.mubr.msk.bf16.gmra.mxu1 %vm1655_vm0, %v7594_v41  ;;  %v7606_v49 = vld [vmem:[%s8193_s23 + $0x3f8] sm:$0xff]  }
  0xfa   : > { %v7336_v53 = vpop.f32.mrf.mxu1  ;;  %v7646_v54 = vpop.eup %7645  ;;  %7671 = vtanh.f32 %v7208_v52  ;;  %7306 = vmatprep.mubr.msk.bf16.mxu0 %vm1655_vm0, %v7595_v44  ;;  %7434 = vmatprep.mubr.msk.bf16.mxu1 %vm1655_vm0, %v7596_v45 }
  0xfb   : > { %v7648_v55 = vpop.eup %7647  ;;  %7673 = vtanh.f32 %v7336_v53  ;;  %v2138_v56 = vpop.f32.mrf.mxu0 }
  0xfc   : > { %v2650_v57 = vpop.f32.mrf.mxu1  ;;  %v7650_v58 = vpop.eup %7649  ;;  %v6314_v59 = vpack.c.bf16 %v7648_v55, %v7640_v46  ;;  %7675 = vtanh.f32 %v2138_v56 }
  0xfd   : > { %v7652_v60 = vpop.eup %7651  ;;  %v6634_v61 = vpack.c.bf16 %v7650_v58, %v7642_v50  ;;  %7677 = vtanh.f32 %v2650_v57  ;;  %v7209_v62 = vpop.f32.mrf.mxu0 }
  0xfe   : > { %v7337_v63 = vpop.f32.mrf.mxu1  ;;  %v7654_v2 = vpop.eup %7653  ;;  %6930 = vst [vmem:[%s8420_s26 + $0x28] sm:$0xff] %v6314_v59   ;;  %v6309_v3 = vpack.c.bf16 %v7652_v60, %v7644_v51  ;;  %7679 = vtanh.f32 %v7209_v62 }
  0xff   : > { %v7656_v6 = vpop.eup %7655  ;;  %6994 = vst [vmem:[%s8420_s26 + $0x228] sm:$0xff] %v6634_v61   ;;  %v6629_v7 = vpack.c.bf16 %v7654_v2, %v7646_v54  ;;  %7681 = vtanh.f32 %v7337_v63  ;;  %v2141_v8 = vpop.f32.mrf.mxu0 }
 0x100   : > { %v2653_v9 = vpop.f32.mrf.mxu1  ;;  %v7658_v10 = vpop.eup %7657  ;;  %6929 = vst [vmem:[%s8420_s26 + $0x20] sm:$0xff] %v6309_v3   ;;  %7683 = vtanh.f32 %v2141_v8 }
 0x101   : > { %v7660_v11 = vpop.eup %7659  ;;  %6993 = vst [vmem:[%s8420_s26 + $0x220] sm:$0xff] %v6629_v7   ;;  %7685 = vtanh.f32 %v2653_v9  ;;  %v7212_v12 = vpop.f32.mrf.mxu0  ;;  %7307 = vmatmul.mubr.msk.bf16.gmra.mxu0 %vm1655_vm0, %v7597_v0  ;;  %7435 = vmatmul.mubr.msk.bf16.gmra.mxu1 %vm1655_vm0, %v7598_v1 }
 0x102   : > { %v7340_v13 = vpop.f32.mrf.mxu1  ;;  %v7662_v14 = vpop.eup %7661  ;;  %7687 = vtanh.f32 %v7212_v12  ;;  %7310 = vmatprep.mubr.msk.bf16.mxu0 %vm1655_vm0, %v7599_v4  ;;  %7438 = vmatprep.mubr.msk.bf16.mxu1 %vm1655_vm0, %v7600_v5 }
 0x103   : > { %v7664_v15 = vpop.eup %7663  ;;  %7689 = vtanh.f32 %v7340_v13  ;;  %v2154_v16 = vpop.f32.mrf.mxu0 }
 0x104   : > { %v2666_v17 = vpop.f32.mrf.mxu1  ;;  %v7666_v18 = vpop.eup %7665  ;;  %v6324_v19 = vpack.c.bf16 %v7664_v15, %v7656_v6  ;;  %7691 = vtanh.f32 %v2154_v16 }
 0x105   : > { %v7668_v20 = vpop.eup %7667  ;;  %v6644_v21 = vpack.c.bf16 %v7666_v18, %v7658_v10  ;;  %7693 = vtanh.f32 %v2666_v17  ;;  %v7213_v22 = vpop.f32.mrf.mxu0 }
 0x106   : > { %v7341_v23 = vpop.f32.mrf.mxu1  ;;  %v7670_v26 = vpop.eup %7669  ;;  %6932 = vst [vmem:[%s8420_s26 + $0x38] sm:$0xff] %v6324_v19   ;;  %v6319_v27 = vpack.c.bf16 %v7668_v20, %v7660_v11  ;;  %7695 = vtanh.f32 %v7213_v22 }
 0x107   : > { %v7672_v30 = vpop.eup %7671  ;;  %6996 = vst [vmem:[%s8420_s26 + $0x238] sm:$0xff] %v6644_v21   ;;  %v6639_v31 = vpack.c.bf16 %v7670_v26, %v7662_v14  ;;  %7697 = vtanh.f32 %v7341_v23  ;;  %v2157_v32 = vpop.f32.mrf.mxu0 }
 0x108   : > { %v2669_v33 = vpop.f32.mrf.mxu1  ;;  %v7674_v34 = vpop.eup %7673  ;;  %6931 = vst [vmem:[%s8420_s26 + $0x30] sm:$0xff] %v6319_v27   ;;  %7699 = vtanh.f32 %v2157_v32 }
 0x109   : > { %v7676_v35 = vpop.eup %7675  ;;  %6995 = vst [vmem:[%s8420_s26 + $0x230] sm:$0xff] %v6639_v31   ;;  %7701 = vtanh.f32 %v2669_v33  ;;  %v7216_v36 = vpop.f32.mrf.mxu0  ;;  %7311 = vmatmul.mubr.msk.bf16.gmra.mxu0 %vm1655_vm0, %v7601_v24  ;;  %7439 = vmatmul.mubr.msk.bf16.gmra.mxu1 %vm1655_vm0, %v7602_v25 }
 0x10a   : > { %v7344_v37 = vpop.f32.mrf.mxu1  ;;  %v7678_v38 = vpop.eup %7677  ;;  %7703 = vtanh.f32 %v7216_v36  ;;  %7314 = vmatprep.mubr.msk.bf16.mxu0 %vm1655_vm0, %v7603_v28  ;;  %7442 = vmatprep.mubr.msk.bf16.mxu1 %vm1655_vm0, %v7604_v29 }
 0x10b   : > { %v7680_v39 = vpop.eup %7679  ;;  %7705 = vtanh.f32 %v7344_v37  ;;  %v2170_v40 = vpop.f32.mrf.mxu0 }
 0x10c   : > { %v2682_v41 = vpop.f32.mrf.mxu1  ;;  %v7682_v42 = vpop.eup %7681  ;;  %v6334_v43 = vpack.c.bf16 %v7680_v39, %v7672_v30  ;;  %7707 = vtanh.f32 %v2170_v40 }
 0x10d   : > { %v7684_v44 = vpop.eup %7683  ;;  %v6654_v45 = vpack.c.bf16 %v7682_v42, %v7674_v34  ;;  %7709 = vtanh.f32 %v2682_v41  ;;  %v7217_v46 = vpop.f32.mrf.mxu0 }
 0x10e   : > { %v7345_v47 = vpop.f32.mrf.mxu1  ;;  %v7686_v50 = vpop.eup %7685  ;;  %6934 = vst [vmem:[%s8420_s26 + $0x48] sm:$0xff] %v6334_v43   ;;  %v6329_v51 = vpack.c.bf16 %v7684_v44, %v7676_v35  ;;  %7711 = vtanh.f32 %v7217_v46 }
 0x10f   : > { %v7688_v52 = vpop.eup %7687  ;;  %6998 = vst [vmem:[%s8420_s26 + $0x248] sm:$0xff] %v6654_v45   ;;  %v6649_v53 = vpack.c.bf16 %v7686_v50, %v7678_v38  ;;  %7713 = vtanh.f32 %v7345_v47  ;;  %v2173_v54 = vpop.f32.mrf.mxu0 }
 0x110   : > { %v2685_v55 = vpop.f32.mrf.mxu1  ;;  %v7690_v56 = vpop.eup %7689  ;;  %6933 = vst [vmem:[%s8420_s26 + $0x40] sm:$0xff] %v6329_v51   ;;  %7715 = vtanh.f32 %v2173_v54 }
 0x111   : > { %v7692_v57 = vpop.eup %7691  ;;  %6997 = vst [vmem:[%s8420_s26 + $0x240] sm:$0xff] %v6649_v53   ;;  %7717 = vtanh.f32 %v2685_v55  ;;  %v7220_v58 = vpop.f32.mrf.mxu0  ;;  %7315 = vmatmul.mubr.msk.bf16.gmra.mxu0 %vm1655_vm0, %v7605_v48  ;;  %7443 = vmatmul.mubr.msk.bf16.gmra.mxu1 %vm1655_vm0, %v7606_v49 }
 0x112   : > { %v7348_v59 = vpop.f32.mrf.mxu1  ;;  %v7694_v60 = vpop.eup %7693  ;;  %7719 = vtanh.f32 %v7220_v58 }
 0x113   : > { %v7696_v61 = vpop.eup %7695  ;;  %7721 = vtanh.f32 %v7348_v59  ;;  %v2186_v62 = vpop.f32.mrf.mxu0 }
 0x114   : > { %v2698_v63 = vpop.f32.mrf.mxu1  ;;  %v7698_v0 = vpop.eup %7697  ;;  %v6344_v1 = vpack.c.bf16 %v7696_v61, %v7688_v52  ;;  %7723 = vtanh.f32 %v2186_v62 }
 0x115   : > { %v7700_v2 = vpop.eup %7699  ;;  %v6664_v3 = vpack.c.bf16 %v7698_v0, %v7690_v56  ;;  %7725 = vtanh.f32 %v2698_v63  ;;  %v7221_v4 = vpop.f32.mrf.mxu0 }
 0x116   : > { %v7349_v5 = vpop.f32.mrf.mxu1  ;;  %v7702_v6 = vpop.eup %7701  ;;  %6936 = vst [vmem:[%s8420_s26 + $0x58] sm:$0xff] %v6344_v1   ;;  %v6339_v7 = vpack.c.bf16 %v7700_v2, %v7692_v57  ;;  %7727 = vtanh.f32 %v7221_v4 }
 0x117   : > { %v7704_v8 = vpop.eup %7703  ;;  %7000 = vst [vmem:[%s8420_s26 + $0x258] sm:$0xff] %v6664_v3   ;;  %v6659_v9 = vpack.c.bf16 %v7702_v6, %v7694_v60  ;;  %7729 = vtanh.f32 %v7349_v5  ;;  %v2189_v10 = vpop.f32.mrf.mxu0 }
 0x118   : > { %v2701_v11 = vpop.f32.mrf.mxu1  ;;  %v7706_v12 = vpop.eup %7705  ;;  %6935 = vst [vmem:[%s8420_s26 + $0x50] sm:$0xff] %v6339_v7   ;;  %7731 = vtanh.f32 %v2189_v10 }
 0x119   : > { %v7708_v13 = vpop.eup %7707  ;;  %6999 = vst [vmem:[%s8420_s26 + $0x250] sm:$0xff] %v6659_v9   ;;  %7733 = vtanh.f32 %v2701_v11  ;;  %v7224_v14 = vpop.f32.mrf.mxu0 }
 0x11a   : > { %v7352_v15 = vpop.f32.mrf.mxu1  ;;  %v7710_v16 = vpop.eup %7709  ;;  %7735 = vtanh.f32 %v7224_v14 }
 0x11b   : > { %v7712_v17 = vpop.eup %7711  ;;  %7737 = vtanh.f32 %v7352_v15  ;;  %v2202_v18 = vpop.f32.mrf.mxu0 }
 0x11c   : > { %v2714_v19 = vpop.f32.mrf.mxu1  ;;  %v7714_v20 = vpop.eup %7713  ;;  %v6354_v21 = vpack.c.bf16 %v7712_v17, %v7704_v8  ;;  %7739 = vtanh.f32 %v2202_v18 }
 0x11d   : > { %v7716_v22 = vpop.eup %7715  ;;  %v6674_v23 = vpack.c.bf16 %v7714_v20, %v7706_v12  ;;  %7741 = vtanh.f32 %v2714_v19  ;;  %v7225_v24 = vpop.f32.mrf.mxu0 }
 0x11e   : > { %v7353_v25 = vpop.f32.mrf.mxu1  ;;  %v7718_v26 = vpop.eup %7717  ;;  %6938 = vst [vmem:[%s8420_s26 + $0x68] sm:$0xff] %v6354_v21   ;;  %v6349_v27 = vpack.c.bf16 %v7716_v22, %v7708_v13  ;;  %7743 = vtanh.f32 %v7225_v24 }
 0x11f   : > { %v7720_v28 = vpop.eup %7719  ;;  %7002 = vst [vmem:[%s8420_s26 + $0x268] sm:$0xff] %v6674_v23   ;;  %v6669_v29 = vpack.c.bf16 %v7718_v26, %v7710_v16  ;;  %7745 = vtanh.f32 %v7353_v25  ;;  %v2205_v30 = vpop.f32.mrf.mxu0 }
 0x120   : > { %v2717_v31 = vpop.f32.mrf.mxu1  ;;  %v7722_v32 = vpop.eup %7721  ;;  %6937 = vst [vmem:[%s8420_s26 + $0x60] sm:$0xff] %v6349_v27   ;;  %7747 = vtanh.f32 %v2205_v30 }
 0x121   : > { %v7724_v33 = vpop.eup %7723  ;;  %7001 = vst [vmem:[%s8420_s26 + $0x260] sm:$0xff] %v6669_v29   ;;  %7749 = vtanh.f32 %v2717_v31  ;;  %v7228_v34 = vpop.f32.mrf.mxu0 }
 0x122   : > { %v7356_v35 = vpop.f32.mrf.mxu1  ;;  %v7726_v36 = vpop.eup %7725  ;;  %7751 = vtanh.f32 %v7228_v34 }
 0x123   : > { %v7728_v37 = vpop.eup %7727  ;;  %7753 = vtanh.f32 %v7356_v35  ;;  %v2218_v38 = vpop.f32.mrf.mxu0 }
 0x124   : > { %v2730_v39 = vpop.f32.mrf.mxu1  ;;  %v7730_v40 = vpop.eup %7729  ;;  %v6364_v41 = vpack.c.bf16 %v7728_v37, %v7720_v28  ;;  %7755 = vtanh.f32 %v2218_v38 }
 0x125   : > { %v7732_v42 = vpop.eup %7731  ;;  %v6684_v43 = vpack.c.bf16 %v7730_v40, %v7722_v32  ;;  %7757 = vtanh.f32 %v2730_v39  ;;  %v7229_v44 = vpop.f32.mrf.mxu0 }
 0x126   : > { %v7357_v45 = vpop.f32.mrf.mxu1  ;;  %v7734_v46 = vpop.eup %7733  ;;  %6940 = vst [vmem:[%s8420_s26 + $0x78] sm:$0xff] %v6364_v41   ;;  %v6359_v47 = vpack.c.bf16 %v7732_v42, %v7724_v33  ;;  %7759 = vtanh.f32 %v7229_v44 }
 0x127   : > { %v7736_v48 = vpop.eup %7735  ;;  %7004 = vst [vmem:[%s8420_s26 + $0x278] sm:$0xff] %v6684_v43   ;;  %v6679_v49 = vpack.c.bf16 %v7734_v46, %v7726_v36  ;;  %7761 = vtanh.f32 %v7357_v45  ;;  %v2221_v50 = vpop.f32.mrf.mxu0 }
 0x128   : > { %v2733_v51 = vpop.f32.mrf.mxu1  ;;  %v7738_v52 = vpop.eup %7737  ;;  %6939 = vst [vmem:[%s8420_s26 + $0x70] sm:$0xff] %v6359_v47   ;;  %7763 = vtanh.f32 %v2221_v50 }
 0x129   : > { %v7740_v53 = vpop.eup %7739  ;;  %7003 = vst [vmem:[%s8420_s26 + $0x270] sm:$0xff] %v6679_v49   ;;  %7765 = vtanh.f32 %v2733_v51  ;;  %v7232_v54 = vpop.f32.mrf.mxu0 }
 0x12a   : > { %v7360_v55 = vpop.f32.mrf.mxu1  ;;  %v7742_v56 = vpop.eup %7741  ;;  %7767 = vtanh.f32 %v7232_v54 }
 0x12b   : > { %v7744_v57 = vpop.eup %7743  ;;  %7769 = vtanh.f32 %v7360_v55  ;;  %v2234_v58 = vpop.f32.mrf.mxu0 }
 0x12c   : > { %v2746_v59 = vpop.f32.mrf.mxu1  ;;  %v7746_v60 = vpop.eup %7745  ;;  %v6374_v61 = vpack.c.bf16 %v7744_v57, %v7736_v48  ;;  %7771 = vtanh.f32 %v2234_v58 }
 0x12d   : > { %v7748_v62 = vpop.eup %7747  ;;  %v6694_v63 = vpack.c.bf16 %v7746_v60, %v7738_v52  ;;  %7773 = vtanh.f32 %v2746_v59  ;;  %v7233_v0 = vpop.f32.mrf.mxu0 }
 0x12e   : > { %v7361_v1 = vpop.f32.mrf.mxu1  ;;  %v7750_v2 = vpop.eup %7749  ;;  %6942 = vst [vmem:[%s8420_s26 + $0x88] sm:$0xff] %v6374_v61   ;;  %v6369_v3 = vpack.c.bf16 %v7748_v62, %v7740_v53  ;;  %7775 = vtanh.f32 %v7233_v0 }
 0x12f   : > { %v7752_v4 = vpop.eup %7751  ;;  %7006 = vst [vmem:[%s8420_s26 + $0x288] sm:$0xff] %v6694_v63   ;;  %v6689_v5 = vpack.c.bf16 %v7750_v2, %v7742_v56  ;;  %7777 = vtanh.f32 %v7361_v1  ;;  %v2237_v6 = vpop.f32.mrf.mxu0 }
 0x130   : > { %v2749_v7 = vpop.f32.mrf.mxu1  ;;  %v7754_v8 = vpop.eup %7753  ;;  %6941 = vst [vmem:[%s8420_s26 + $0x80] sm:$0xff] %v6369_v3   ;;  %7779 = vtanh.f32 %v2237_v6 }
 0x131   : > { %v7756_v9 = vpop.eup %7755  ;;  %7005 = vst [vmem:[%s8420_s26 + $0x280] sm:$0xff] %v6689_v5   ;;  %7781 = vtanh.f32 %v2749_v7  ;;  %v7236_v10 = vpop.f32.mrf.mxu0 }
 0x132   : > { %v7364_v11 = vpop.f32.mrf.mxu1  ;;  %v7758_v12 = vpop.eup %7757  ;;  %7783 = vtanh.f32 %v7236_v10 }
 0x133   : > { %v7760_v13 = vpop.eup %7759  ;;  %7785 = vtanh.f32 %v7364_v11  ;;  %v2250_v14 = vpop.f32.mrf.mxu0 }
 0x134   : > { %v2762_v15 = vpop.f32.mrf.mxu1  ;;  %v7762_v16 = vpop.eup %7761  ;;  %v6384_v17 = vpack.c.bf16 %v7760_v13, %v7752_v4  ;;  %7787 = vtanh.f32 %v2250_v14 }
 0x135   : > { %v7764_v18 = vpop.eup %7763  ;;  %v6704_v19 = vpack.c.bf16 %v7762_v16, %v7754_v8  ;;  %7789 = vtanh.f32 %v2762_v15  ;;  %v7237_v20 = vpop.f32.mrf.mxu0 }
 0x136   : > { %v7365_v21 = vpop.f32.mrf.mxu1  ;;  %v7766_v22 = vpop.eup %7765  ;;  %6944 = vst [vmem:[%s8420_s26 + $0x98] sm:$0xff] %v6384_v17   ;;  %v6379_v23 = vpack.c.bf16 %v7764_v18, %v7756_v9  ;;  %7791 = vtanh.f32 %v7237_v20 }
 0x137   : > { %v7768_v24 = vpop.eup %7767  ;;  %7008 = vst [vmem:[%s8420_s26 + $0x298] sm:$0xff] %v6704_v19   ;;  %v6699_v25 = vpack.c.bf16 %v7766_v22, %v7758_v12  ;;  %7793 = vtanh.f32 %v7365_v21  ;;  %v2253_v26 = vpop.f32.mrf.mxu0 }
 0x138   : > { %v2765_v27 = vpop.f32.mrf.mxu1  ;;  %v7770_v28 = vpop.eup %7769  ;;  %6943 = vst [vmem:[%s8420_s26 + $0x90] sm:$0xff] %v6379_v23   ;;  %7795 = vtanh.f32 %v2253_v26 }
 0x139   : > { %v7772_v29 = vpop.eup %7771  ;;  %7007 = vst [vmem:[%s8420_s26 + $0x290] sm:$0xff] %v6699_v25   ;;  %7797 = vtanh.f32 %v2765_v27  ;;  %v7240_v30 = vpop.f32.mrf.mxu0 }
 0x13a   : > { %v7368_v31 = vpop.f32.mrf.mxu1  ;;  %v7774_v32 = vpop.eup %7773  ;;  %7799 = vtanh.f32 %v7240_v30 }
 0x13b   : > { %v7776_v33 = vpop.eup %7775  ;;  %7801 = vtanh.f32 %v7368_v31  ;;  %v2266_v34 = vpop.f32.mrf.mxu0 }
 0x13c   : > { %v2778_v35 = vpop.f32.mrf.mxu1  ;;  %v7778_v36 = vpop.eup %7777  ;;  %v6394_v37 = vpack.c.bf16 %v7776_v33, %v7768_v24  ;;  %7803 = vtanh.f32 %v2266_v34 }
 0x13d   : > { %v7780_v38 = vpop.eup %7779  ;;  %v6714_v39 = vpack.c.bf16 %v7778_v36, %v7770_v28  ;;  %7805 = vtanh.f32 %v2778_v35  ;;  %v7241_v40 = vpop.f32.mrf.mxu0 }
 0x13e   : > { %v7369_v41 = vpop.f32.mrf.mxu1  ;;  %v7782_v42 = vpop.eup %7781  ;;  %6946 = vst [vmem:[%s8420_s26 + $0xa8] sm:$0xff] %v6394_v37   ;;  %v6389_v43 = vpack.c.bf16 %v7780_v38, %v7772_v29  ;;  %7807 = vtanh.f32 %v7241_v40 }
 0x13f   : > { %v7784_v44 = vpop.eup %7783  ;;  %7010 = vst [vmem:[%s8420_s26 + $0x2a8] sm:$0xff] %v6714_v39   ;;  %v6709_v45 = vpack.c.bf16 %v7782_v42, %v7774_v32  ;;  %7809 = vtanh.f32 %v7369_v41  ;;  %v2269_v46 = vpop.f32.mrf.mxu0 }
 0x140   : > { %v2781_v47 = vpop.f32.mrf.mxu1  ;;  %v7786_v48 = vpop.eup %7785  ;;  %6945 = vst [vmem:[%s8420_s26 + $0xa0] sm:$0xff] %v6389_v43   ;;  %7811 = vtanh.f32 %v2269_v46 }
 0x141   : > { %v7788_v49 = vpop.eup %7787  ;;  %7009 = vst [vmem:[%s8420_s26 + $0x2a0] sm:$0xff] %v6709_v45   ;;  %7813 = vtanh.f32 %v2781_v47  ;;  %v7244_v50 = vpop.f32.mrf.mxu0 }
 0x142   : > { %v7372_v51 = vpop.f32.mrf.mxu1  ;;  %v7790_v52 = vpop.eup %7789  ;;  %7815 = vtanh.f32 %v7244_v50 }
 0x143   : > { %v7792_v53 = vpop.eup %7791  ;;  %7817 = vtanh.f32 %v7372_v51  ;;  %v2282_v54 = vpop.f32.mrf.mxu0 }
 0x144   : > { %v2794_v55 = vpop.f32.mrf.mxu1  ;;  %v7794_v56 = vpop.eup %7793  ;;  %v6404_v57 = vpack.c.bf16 %v7792_v53, %v7784_v44  ;;  %7819 = vtanh.f32 %v2282_v54 }
 0x145   : > { %v7796_v58 = vpop.eup %7795  ;;  %v6724_v59 = vpack.c.bf16 %v7794_v56, %v7786_v48  ;;  %7821 = vtanh.f32 %v2794_v55  ;;  %v7245_v60 = vpop.f32.mrf.mxu0 }
 0x146   : > { %v7373_v61 = vpop.f32.mrf.mxu1  ;;  %v7798_v62 = vpop.eup %7797  ;;  %6948 = vst [vmem:[%s8420_s26 + $0xb8] sm:$0xff] %v6404_v57   ;;  %v6399_v63 = vpack.c.bf16 %v7796_v58, %v7788_v49  ;;  %7823 = vtanh.f32 %v7245_v60 }
 0x147   : > { %v7800_v0 = vpop.eup %7799  ;;  %7012 = vst [vmem:[%s8420_s26 + $0x2b8] sm:$0xff] %v6724_v59   ;;  %v6719_v1 = vpack.c.bf16 %v7798_v62, %v7790_v52  ;;  %7825 = vtanh.f32 %v7373_v61  ;;  %v2285_v2 = vpop.f32.mrf.mxu0 }
 0x148   : > { %v2797_v3 = vpop.f32.mrf.mxu1  ;;  %v7802_v4 = vpop.eup %7801  ;;  %6947 = vst [vmem:[%s8420_s26 + $0xb0] sm:$0xff] %v6399_v63   ;;  %7827 = vtanh.f32 %v2285_v2 }
 0x149   : > { %v7804_v5 = vpop.eup %7803  ;;  %7011 = vst [vmem:[%s8420_s26 + $0x2b0] sm:$0xff] %v6719_v1   ;;  %7829 = vtanh.f32 %v2797_v3  ;;  %v7248_v6 = vpop.f32.mrf.mxu0 }
 0x14a   : > { %v7376_v7 = vpop.f32.mrf.mxu1  ;;  %v7806_v8 = vpop.eup %7805  ;;  %7831 = vtanh.f32 %v7248_v6 }
 0x14b   : > { %v7808_v9 = vpop.eup %7807  ;;  %7833 = vtanh.f32 %v7376_v7  ;;  %v2298_v10 = vpop.f32.mrf.mxu0 }
 0x14c   : > { %v2810_v11 = vpop.f32.mrf.mxu1  ;;  %v7810_v12 = vpop.eup %7809  ;;  %v6414_v13 = vpack.c.bf16 %v7808_v9, %v7800_v0  ;;  %7835 = vtanh.f32 %v2298_v10 }
 0x14d   : > { %v7812_v14 = vpop.eup %7811  ;;  %v6734_v15 = vpack.c.bf16 %v7810_v12, %v7802_v4  ;;  %7837 = vtanh.f32 %v2810_v11  ;;  %v7249_v16 = vpop.f32.mrf.mxu0 }
 0x14e   : > { %v7377_v17 = vpop.f32.mrf.mxu1  ;;  %v7814_v18 = vpop.eup %7813  ;;  %6950 = vst [vmem:[%s8420_s26 + $0xc8] sm:$0xff] %v6414_v13   ;;  %v6409_v19 = vpack.c.bf16 %v7812_v14, %v7804_v5  ;;  %7839 = vtanh.f32 %v7249_v16 }
 0x14f   : > { %v7816_v20 = vpop.eup %7815  ;;  %7014 = vst [vmem:[%s8420_s26 + $0x2c8] sm:$0xff] %v6734_v15   ;;  %v6729_v21 = vpack.c.bf16 %v7814_v18, %v7806_v8  ;;  %7841 = vtanh.f32 %v7377_v17  ;;  %v2301_v22 = vpop.f32.mrf.mxu0 }
 0x150   : > { %v2813_v23 = vpop.f32.mrf.mxu1  ;;  %v7818_v24 = vpop.eup %7817  ;;  %6949 = vst [vmem:[%s8420_s26 + $0xc0] sm:$0xff] %v6409_v19   ;;  %7843 = vtanh.f32 %v2301_v22 }
 0x151   : > { %v7820_v25 = vpop.eup %7819  ;;  %7013 = vst [vmem:[%s8420_s26 + $0x2c0] sm:$0xff] %v6729_v21   ;;  %7845 = vtanh.f32 %v2813_v23  ;;  %v7252_v26 = vpop.f32.mrf.mxu0 }
 0x152   : > { %v7380_v27 = vpop.f32.mrf.mxu1  ;;  %v7822_v28 = vpop.eup %7821  ;;  %7847 = vtanh.f32 %v7252_v26 }
 0x153   : > { %v7824_v29 = vpop.eup %7823  ;;  %7849 = vtanh.f32 %v7380_v27  ;;  %v2314_v30 = vpop.f32.mrf.mxu0 }
 0x154   : > { %v2826_v31 = vpop.f32.mrf.mxu1  ;;  %v7826_v32 = vpop.eup %7825  ;;  %v6424_v33 = vpack.c.bf16 %v7824_v29, %v7816_v20  ;;  %7851 = vtanh.f32 %v2314_v30 }
 0x155   : > { %v7828_v34 = vpop.eup %7827  ;;  %v6744_v35 = vpack.c.bf16 %v7826_v32, %v7818_v24  ;;  %7853 = vtanh.f32 %v2826_v31  ;;  %v7253_v36 = vpop.f32.mrf.mxu0 }
 0x156   : > { %v7381_v37 = vpop.f32.mrf.mxu1  ;;  %v7830_v38 = vpop.eup %7829  ;;  %6952 = vst [vmem:[%s8420_s26 + $0xd8] sm:$0xff] %v6424_v33   ;;  %v6419_v39 = vpack.c.bf16 %v7828_v34, %v7820_v25  ;;  %7855 = vtanh.f32 %v7253_v36 }
 0x157   : > { %v7832_v40 = vpop.eup %7831  ;;  %7016 = vst [vmem:[%s8420_s26 + $0x2d8] sm:$0xff] %v6744_v35   ;;  %v6739_v41 = vpack.c.bf16 %v7830_v38, %v7822_v28  ;;  %7857 = vtanh.f32 %v7381_v37  ;;  %v2317_v42 = vpop.f32.mrf.mxu0 }
 0x158   : > { %v2829_v43 = vpop.f32.mrf.mxu1  ;;  %v7834_v44 = vpop.eup %7833  ;;  %6951 = vst [vmem:[%s8420_s26 + $0xd0] sm:$0xff] %v6419_v39   ;;  %7859 = vtanh.f32 %v2317_v42 }
 0x159   : > { %v7836_v45 = vpop.eup %7835  ;;  %7015 = vst [vmem:[%s8420_s26 + $0x2d0] sm:$0xff] %v6739_v41   ;;  %7861 = vtanh.f32 %v2829_v43  ;;  %v7256_v46 = vpop.f32.mrf.mxu0 }
 0x15a   : > { %v7384_v47 = vpop.f32.mrf.mxu1  ;;  %v7838_v48 = vpop.eup %7837  ;;  %7863 = vtanh.f32 %v7256_v46 }
 0x15b   : > { %v7840_v49 = vpop.eup %7839  ;;  %7865 = vtanh.f32 %v7384_v47  ;;  %v2330_v50 = vpop.f32.mrf.mxu0 }
 0x15c   : > { %v2842_v51 = vpop.f32.mrf.mxu1  ;;  %v7842_v52 = vpop.eup %7841  ;;  %v6434_v53 = vpack.c.bf16 %v7840_v49, %v7832_v40  ;;  %7867 = vtanh.f32 %v2330_v50 }
 0x15d   : > { %v7844_v54 = vpop.eup %7843  ;;  %v6754_v55 = vpack.c.bf16 %v7842_v52, %v7834_v44  ;;  %7869 = vtanh.f32 %v2842_v51  ;;  %v7257_v56 = vpop.f32.mrf.mxu0 }
 0x15e   : > { %v7385_v57 = vpop.f32.mrf.mxu1  ;;  %v7846_v58 = vpop.eup %7845  ;;  %6954 = vst [vmem:[%s8420_s26 + $0xe8] sm:$0xff] %v6434_v53   ;;  %v6429_v59 = vpack.c.bf16 %v7844_v54, %v7836_v45  ;;  %7871 = vtanh.f32 %v7257_v56 }
 0x15f   : > { %v7848_v60 = vpop.eup %7847  ;;  %7018 = vst [vmem:[%s8420_s26 + $0x2e8] sm:$0xff] %v6754_v55   ;;  %v6749_v61 = vpack.c.bf16 %v7846_v58, %v7838_v48  ;;  %7873 = vtanh.f32 %v7385_v57  ;;  %v2333_v62 = vpop.f32.mrf.mxu0 }
 0x160   : > { %v2845_v63 = vpop.f32.mrf.mxu1  ;;  %v7850_v0 = vpop.eup %7849  ;;  %6953 = vst [vmem:[%s8420_s26 + $0xe0] sm:$0xff] %v6429_v59   ;;  %7875 = vtanh.f32 %v2333_v62 }
 0x161   : > { %v7852_v1 = vpop.eup %7851  ;;  %7017 = vst [vmem:[%s8420_s26 + $0x2e0] sm:$0xff] %v6749_v61   ;;  %7877 = vtanh.f32 %v2845_v63  ;;  %v7260_v2 = vpop.f32.mrf.mxu0 }
 0x162   : > { %v7388_v3 = vpop.f32.mrf.mxu1  ;;  %v7854_v4 = vpop.eup %7853  ;;  %7879 = vtanh.f32 %v7260_v2 }
 0x163   : > { %v7856_v5 = vpop.eup %7855  ;;  %7881 = vtanh.f32 %v7388_v3  ;;  %v2346_v6 = vpop.f32.mrf.mxu0 }
 0x164   : > { %v2858_v7 = vpop.f32.mrf.mxu1  ;;  %v7858_v8 = vpop.eup %7857  ;;  %v6444_v9 = vpack.c.bf16 %v7856_v5, %v7848_v60  ;;  %7883 = vtanh.f32 %v2346_v6 }
 0x165   : > { %v7860_v10 = vpop.eup %7859  ;;  %v6764_v11 = vpack.c.bf16 %v7858_v8, %v7850_v0  ;;  %7885 = vtanh.f32 %v2858_v7  ;;  %v7261_v12 = vpop.f32.mrf.mxu0 }
 0x166   : > { %v7389_v13 = vpop.f32.mrf.mxu1  ;;  %v7862_v14 = vpop.eup %7861  ;;  %6956 = vst [vmem:[%s8420_s26 + $0xf8] sm:$0xff] %v6444_v9   ;;  %v6439_v15 = vpack.c.bf16 %v7860_v10, %v7852_v1  ;;  %7887 = vtanh.f32 %v7261_v12 }
 0x167   : > { %v7864_v16 = vpop.eup %7863  ;;  %7020 = vst [vmem:[%s8420_s26 + $0x2f8] sm:$0xff] %v6764_v11   ;;  %v6759_v17 = vpack.c.bf16 %v7862_v14, %v7854_v4  ;;  %7889 = vtanh.f32 %v7389_v13  ;;  %v2349_v18 = vpop.f32.mrf.mxu0 }
 0x168   : > { %v2861_v19 = vpop.f32.mrf.mxu1  ;;  %v7866_v20 = vpop.eup %7865  ;;  %6955 = vst [vmem:[%s8420_s26 + $0xf0] sm:$0xff] %v6439_v15   ;;  %7891 = vtanh.f32 %v2349_v18 }
 0x169   : > { %v7868_v21 = vpop.eup %7867  ;;  %7019 = vst [vmem:[%s8420_s26 + $0x2f0] sm:$0xff] %v6759_v17   ;;  %7893 = vtanh.f32 %v2861_v19  ;;  %v7264_v22 = vpop.f32.mrf.mxu0 }
 0x16a   : > { %v7392_v23 = vpop.f32.mrf.mxu1  ;;  %v7870_v24 = vpop.eup %7869  ;;  %7895 = vtanh.f32 %v7264_v22 }
 0x16b   : > { %v7872_v25 = vpop.eup %7871  ;;  %7897 = vtanh.f32 %v7392_v23  ;;  %v2362_v26 = vpop.f32.mrf.mxu0 }
 0x16c   : > { %v2874_v27 = vpop.f32.mrf.mxu1  ;;  %v7874_v28 = vpop.eup %7873  ;;  %v6454_v29 = vpack.c.bf16 %v7872_v25, %v7864_v16  ;;  %7899 = vtanh.f32 %v2362_v26 }
 0x16d   : > { %v7876_v30 = vpop.eup %7875  ;;  %v6774_v31 = vpack.c.bf16 %v7874_v28, %v7866_v20  ;;  %7901 = vtanh.f32 %v2874_v27  ;;  %v7265_v32 = vpop.f32.mrf.mxu0 }
 0x16e   : > { %v7393_v33 = vpop.f32.mrf.mxu1  ;;  %v7878_v34 = vpop.eup %7877  ;;  %6958 = vst [vmem:[%s8420_s26 + $0x108] sm:$0xff] %v6454_v29   ;;  %v6449_v35 = vpack.c.bf16 %v7876_v30, %v7868_v21  ;;  %7903 = vtanh.f32 %v7265_v32 }
 0x16f   : > { %v7880_v36 = vpop.eup %7879  ;;  %7022 = vst [vmem:[%s8420_s26 + $0x308] sm:$0xff] %v6774_v31   ;;  %v6769_v37 = vpack.c.bf16 %v7878_v34, %v7870_v24  ;;  %7905 = vtanh.f32 %v7393_v33  ;;  %v2365_v38 = vpop.f32.mrf.mxu0 }
 0x170   : > { %v2877_v39 = vpop.f32.mrf.mxu1  ;;  %v7882_v40 = vpop.eup %7881  ;;  %6957 = vst [vmem:[%s8420_s26 + $0x100] sm:$0xff] %v6449_v35   ;;  %7907 = vtanh.f32 %v2365_v38 }
 0x171   : > { %v7884_v41 = vpop.eup %7883  ;;  %7021 = vst [vmem:[%s8420_s26 + $0x300] sm:$0xff] %v6769_v37   ;;  %7909 = vtanh.f32 %v2877_v39  ;;  %v7268_v42 = vpop.f32.mrf.mxu0 }
 0x172   : > { %v7396_v43 = vpop.f32.mrf.mxu1  ;;  %v7886_v44 = vpop.eup %7885  ;;  %7911 = vtanh.f32 %v7268_v42 }
 0x173   : > { %v7888_v45 = vpop.eup %7887  ;;  %7913 = vtanh.f32 %v7396_v43  ;;  %v2378_v46 = vpop.f32.mrf.mxu0 }
 0x174   : > { %v2890_v47 = vpop.f32.mrf.mxu1  ;;  %v7890_v48 = vpop.eup %7889  ;;  %v6464_v49 = vpack.c.bf16 %v7888_v45, %v7880_v36  ;;  %7915 = vtanh.f32 %v2378_v46 }
 0x175   : > { %v7892_v50 = vpop.eup %7891  ;;  %v6784_v51 = vpack.c.bf16 %v7890_v48, %v7882_v40  ;;  %7917 = vtanh.f32 %v2890_v47  ;;  %v7269_v52 = vpop.f32.mrf.mxu0 }
 0x176   : > { %v7397_v53 = vpop.f32.mrf.mxu1  ;;  %v7894_v54 = vpop.eup %7893  ;;  %6960 = vst [vmem:[%s8420_s26 + $0x118] sm:$0xff] %v6464_v49   ;;  %v6459_v55 = vpack.c.bf16 %v7892_v50, %v7884_v41  ;;  %7919 = vtanh.f32 %v7269_v52 }
 0x177   : > { %v7896_v56 = vpop.eup %7895  ;;  %7024 = vst [vmem:[%s8420_s26 + $0x318] sm:$0xff] %v6784_v51   ;;  %v6779_v57 = vpack.c.bf16 %v7894_v54, %v7886_v44  ;;  %7921 = vtanh.f32 %v7397_v53  ;;  %v2381_v58 = vpop.f32.mrf.mxu0 }
 0x178   : > { %v2893_v59 = vpop.f32.mrf.mxu1  ;;  %v7898_v60 = vpop.eup %7897  ;;  %6959 = vst [vmem:[%s8420_s26 + $0x110] sm:$0xff] %v6459_v55   ;;  %7923 = vtanh.f32 %v2381_v58 }
 0x179   : > { %v7900_v61 = vpop.eup %7899  ;;  %7023 = vst [vmem:[%s8420_s26 + $0x310] sm:$0xff] %v6779_v57   ;;  %7925 = vtanh.f32 %v2893_v59  ;;  %v7272_v62 = vpop.f32.mrf.mxu0 }
 0x17a   : > { %v7400_v63 = vpop.f32.mrf.mxu1  ;;  %v7902_v0 = vpop.eup %7901  ;;  %7927 = vtanh.f32 %v7272_v62 }
 0x17b   : > { %v7904_v1 = vpop.eup %7903  ;;  %7929 = vtanh.f32 %v7400_v63  ;;  %v2394_v2 = vpop.f32.mrf.mxu0 }
 0x17c   : > { %v2906_v3 = vpop.f32.mrf.mxu1  ;;  %v7906_v4 = vpop.eup %7905  ;;  %v6474_v5 = vpack.c.bf16 %v7904_v1, %v7896_v56  ;;  %7931 = vtanh.f32 %v2394_v2 }
 0x17d   : > { %v7908_v6 = vpop.eup %7907  ;;  %v6794_v7 = vpack.c.bf16 %v7906_v4, %v7898_v60  ;;  %7933 = vtanh.f32 %v2906_v3  ;;  %v7273_v8 = vpop.f32.mrf.mxu0 }
 0x17e   : > { %v7401_v9 = vpop.f32.mrf.mxu1  ;;  %v7910_v10 = vpop.eup %7909  ;;  %6962 = vst [vmem:[%s8420_s26 + $0x128] sm:$0xff] %v6474_v5   ;;  %v6469_v11 = vpack.c.bf16 %v7908_v6, %v7900_v61  ;;  %7935 = vtanh.f32 %v7273_v8 }
 0x17f   : > { %v7912_v12 = vpop.eup %7911  ;;  %7026 = vst [vmem:[%s8420_s26 + $0x328] sm:$0xff] %v6794_v7   ;;  %v6789_v13 = vpack.c.bf16 %v7910_v10, %v7902_v0  ;;  %7937 = vtanh.f32 %v7401_v9  ;;  %v2397_v14 = vpop.f32.mrf.mxu0 }
 0x180   : > { %v2909_v15 = vpop.f32.mrf.mxu1  ;;  %v7914_v16 = vpop.eup %7913  ;;  %6961 = vst [vmem:[%s8420_s26 + $0x120] sm:$0xff] %v6469_v11   ;;  %7939 = vtanh.f32 %v2397_v14 }
 0x181   : > { %v7916_v17 = vpop.eup %7915  ;;  %7025 = vst [vmem:[%s8420_s26 + $0x320] sm:$0xff] %v6789_v13   ;;  %7941 = vtanh.f32 %v2909_v15  ;;  %v7276_v18 = vpop.f32.mrf.mxu0 }
 0x182   : > { %v7404_v19 = vpop.f32.mrf.mxu1  ;;  %v7918_v20 = vpop.eup %7917  ;;  %7943 = vtanh.f32 %v7276_v18 }
 0x183   : > { %v7920_v21 = vpop.eup %7919  ;;  %7945 = vtanh.f32 %v7404_v19  ;;  %v2410_v22 = vpop.f32.mrf.mxu0 }
 0x184   : > { %v2922_v23 = vpop.f32.mrf.mxu1  ;;  %v7922_v24 = vpop.eup %7921  ;;  %v6484_v25 = vpack.c.bf16 %v7920_v21, %v7912_v12  ;;  %7947 = vtanh.f32 %v2410_v22 }
 0x185   : > { %v7924_v26 = vpop.eup %7923  ;;  %v6804_v27 = vpack.c.bf16 %v7922_v24, %v7914_v16  ;;  %7949 = vtanh.f32 %v2922_v23  ;;  %v7277_v28 = vpop.f32.mrf.mxu0 }
 0x186   : > { %v7405_v29 = vpop.f32.mrf.mxu1  ;;  %v7926_v30 = vpop.eup %7925  ;;  %6964 = vst [vmem:[%s8420_s26 + $0x138] sm:$0xff] %v6484_v25   ;;  %v6479_v31 = vpack.c.bf16 %v7924_v26, %v7916_v17  ;;  %7951 = vtanh.f32 %v7277_v28 }
 0x187   : > { %v7928_v32 = vpop.eup %7927  ;;  %7028 = vst [vmem:[%s8420_s26 + $0x338] sm:$0xff] %v6804_v27   ;;  %v6799_v33 = vpack.c.bf16 %v7926_v30, %v7918_v20  ;;  %7953 = vtanh.f32 %v7405_v29  ;;  %v2413_v34 = vpop.f32.mrf.mxu0 }
 0x188   : > { %v2925_v35 = vpop.f32.mrf.mxu1  ;;  %v7930_v36 = vpop.eup %7929  ;;  %6963 = vst [vmem:[%s8420_s26 + $0x130] sm:$0xff] %v6479_v31   ;;  %7955 = vtanh.f32 %v2413_v34 }
 0x189   : > { %v7932_v37 = vpop.eup %7931  ;;  %7027 = vst [vmem:[%s8420_s26 + $0x330] sm:$0xff] %v6799_v33   ;;  %7957 = vtanh.f32 %v2925_v35  ;;  %v7280_v38 = vpop.f32.mrf.mxu0 }
 0x18a   : > { %v7408_v39 = vpop.f32.mrf.mxu1  ;;  %v7934_v40 = vpop.eup %7933  ;;  %7959 = vtanh.f32 %v7280_v38 }
 0x18b   : > { %v7936_v41 = vpop.eup %7935  ;;  %7961 = vtanh.f32 %v7408_v39  ;;  %v2426_v42 = vpop.f32.mrf.mxu0 }
 0x18c   : > { %v2938_v43 = vpop.f32.mrf.mxu1  ;;  %v7938_v44 = vpop.eup %7937  ;;  %v6494_v45 = vpack.c.bf16 %v7936_v41, %v7928_v32  ;;  %7963 = vtanh.f32 %v2426_v42 }
 0x18d   : > { %v7940_v46 = vpop.eup %7939  ;;  %v6814_v47 = vpack.c.bf16 %v7938_v44, %v7930_v36  ;;  %7965 = vtanh.f32 %v2938_v43  ;;  %v7281_v48 = vpop.f32.mrf.mxu0 }
 0x18e   : > { %v7409_v49 = vpop.f32.mrf.mxu1  ;;  %v7942_v50 = vpop.eup %7941  ;;  %6966 = vst [vmem:[%s8420_s26 + $0x148] sm:$0xff] %v6494_v45   ;;  %v6489_v51 = vpack.c.bf16 %v7940_v46, %v7932_v37  ;;  %7967 = vtanh.f32 %v7281_v48 }
 0x18f   : > { %v7944_v52 = vpop.eup %7943  ;;  %7030 = vst [vmem:[%s8420_s26 + $0x348] sm:$0xff] %v6814_v47   ;;  %v6809_v53 = vpack.c.bf16 %v7942_v50, %v7934_v40  ;;  %7969 = vtanh.f32 %v7409_v49  ;;  %v2429_v54 = vpop.f32.mrf.mxu0 }
 0x190   : > { %v2941_v55 = vpop.f32.mrf.mxu1  ;;  %v7946_v56 = vpop.eup %7945  ;;  %6965 = vst [vmem:[%s8420_s26 + $0x140] sm:$0xff] %v6489_v51   ;;  %7971 = vtanh.f32 %v2429_v54 }
 0x191   : > { %v7948_v57 = vpop.eup %7947  ;;  %7029 = vst [vmem:[%s8420_s26 + $0x340] sm:$0xff] %v6809_v53   ;;  %7973 = vtanh.f32 %v2941_v55  ;;  %v7284_v58 = vpop.f32.mrf.mxu0 }
 0x192   : > { %v7412_v59 = vpop.f32.mrf.mxu1  ;;  %v7950_v60 = vpop.eup %7949  ;;  %7975 = vtanh.f32 %v7284_v58 }
 0x193   : > { %v7952_v61 = vpop.eup %7951  ;;  %7977 = vtanh.f32 %v7412_v59  ;;  %v2442_v62 = vpop.f32.mrf.mxu0 }
 0x194   : > { %v2954_v63 = vpop.f32.mrf.mxu1  ;;  %v7954_v0 = vpop.eup %7953  ;;  %v6504_v1 = vpack.c.bf16 %v7952_v61, %v7944_v52  ;;  %7979 = vtanh.f32 %v2442_v62 }
 0x195   : > { %v7956_v2 = vpop.eup %7955  ;;  %v6824_v3 = vpack.c.bf16 %v7954_v0, %v7946_v56  ;;  %7981 = vtanh.f32 %v2954_v63  ;;  %v7285_v4 = vpop.f32.mrf.mxu0 }
 0x196   : > { %v7413_v5 = vpop.f32.mrf.mxu1  ;;  %v7958_v6 = vpop.eup %7957  ;;  %6968 = vst [vmem:[%s8420_s26 + $0x158] sm:$0xff] %v6504_v1   ;;  %v6499_v7 = vpack.c.bf16 %v7956_v2, %v7948_v57  ;;  %7983 = vtanh.f32 %v7285_v4 }
 0x197   : > { %v7960_v8 = vpop.eup %7959  ;;  %7032 = vst [vmem:[%s8420_s26 + $0x358] sm:$0xff] %v6824_v3   ;;  %v6819_v9 = vpack.c.bf16 %v7958_v6, %v7950_v60  ;;  %7985 = vtanh.f32 %v7413_v5  ;;  %v2445_v10 = vpop.f32.mrf.mxu0 }
 0x198   : > { %v2957_v11 = vpop.f32.mrf.mxu1  ;;  %v7962_v12 = vpop.eup %7961  ;;  %6967 = vst [vmem:[%s8420_s26 + $0x150] sm:$0xff] %v6499_v7   ;;  %7987 = vtanh.f32 %v2445_v10 }
 0x199   : > { %v7964_v13 = vpop.eup %7963  ;;  %7031 = vst [vmem:[%s8420_s26 + $0x350] sm:$0xff] %v6819_v9   ;;  %7989 = vtanh.f32 %v2957_v11  ;;  %v7288_v14 = vpop.f32.mrf.mxu0 }
 0x19a   : > { %v7416_v15 = vpop.f32.mrf.mxu1  ;;  %v7966_v16 = vpop.eup %7965  ;;  %7991 = vtanh.f32 %v7288_v14 }
 0x19b   : > { %v7968_v17 = vpop.eup %7967  ;;  %7993 = vtanh.f32 %v7416_v15  ;;  %v2458_v18 = vpop.f32.mrf.mxu0 }
 0x19c   : > { %v2970_v19 = vpop.f32.mrf.mxu1  ;;  %v7970_v20 = vpop.eup %7969  ;;  %v6514_v21 = vpack.c.bf16 %v7968_v17, %v7960_v8  ;;  %7995 = vtanh.f32 %v2458_v18 }
 0x19d   : > { %v7972_v22 = vpop.eup %7971  ;;  %v6834_v23 = vpack.c.bf16 %v7970_v20, %v7962_v12  ;;  %7997 = vtanh.f32 %v2970_v19  ;;  %v7289_v24 = vpop.f32.mrf.mxu0 }
 0x19e   : > { %v7417_v25 = vpop.f32.mrf.mxu1  ;;  %v7974_v26 = vpop.eup %7973  ;;  %6970 = vst [vmem:[%s8420_s26 + $0x168] sm:$0xff] %v6514_v21   ;;  %v6509_v27 = vpack.c.bf16 %v7972_v22, %v7964_v13  ;;  %7999 = vtanh.f32 %v7289_v24 }
 0x19f   : > { %v7976_v28 = vpop.eup %7975  ;;  %7034 = vst [vmem:[%s8420_s26 + $0x368] sm:$0xff] %v6834_v23   ;;  %v6829_v29 = vpack.c.bf16 %v7974_v26, %v7966_v16  ;;  %8001 = vtanh.f32 %v7417_v25  ;;  %v2461_v30 = vpop.f32.mrf.mxu0 }
 0x1a0   : > { %v2973_v31 = vpop.f32.mrf.mxu1  ;;  %v7978_v32 = vpop.eup %7977  ;;  %6969 = vst [vmem:[%s8420_s26 + $0x160] sm:$0xff] %v6509_v27   ;;  %8003 = vtanh.f32 %v2461_v30 }
 0x1a1   : > { %v7980_v33 = vpop.eup %7979  ;;  %7033 = vst [vmem:[%s8420_s26 + $0x360] sm:$0xff] %v6829_v29   ;;  %8005 = vtanh.f32 %v2973_v31  ;;  %v7292_v34 = vpop.f32.mrf.mxu0 }
 0x1a2   : > { %v7420_v35 = vpop.f32.mrf.mxu1  ;;  %v7982_v36 = vpop.eup %7981  ;;  %8007 = vtanh.f32 %v7292_v34 }
 0x1a3   : > { %v7984_v37 = vpop.eup %7983  ;;  %8009 = vtanh.f32 %v7420_v35  ;;  %v2474_v38 = vpop.f32.mrf.mxu0 }
 0x1a4   : > { %v2986_v39 = vpop.f32.mrf.mxu1  ;;  %v7986_v40 = vpop.eup %7985  ;;  %v6524_v41 = vpack.c.bf16 %v7984_v37, %v7976_v28  ;;  %8011 = vtanh.f32 %v2474_v38 }
 0x1a5   : > { %v7988_v42 = vpop.eup %7987  ;;  %v6844_v43 = vpack.c.bf16 %v7986_v40, %v7978_v32  ;;  %8013 = vtanh.f32 %v2986_v39  ;;  %v7293_v44 = vpop.f32.mrf.mxu0 }
 0x1a6   : > { %v7421_v45 = vpop.f32.mrf.mxu1  ;;  %v7990_v46 = vpop.eup %7989  ;;  %6972 = vst [vmem:[%s8420_s26 + $0x178] sm:$0xff] %v6524_v41   ;;  %v6519_v47 = vpack.c.bf16 %v7988_v42, %v7980_v33  ;;  %8015 = vtanh.f32 %v7293_v44 }
 0x1a7   : > { %v7992_v48 = vpop.eup %7991  ;;  %7036 = vst [vmem:[%s8420_s26 + $0x378] sm:$0xff] %v6844_v43   ;;  %v6839_v49 = vpack.c.bf16 %v7990_v46, %v7982_v36  ;;  %8017 = vtanh.f32 %v7421_v45  ;;  %v2477_v50 = vpop.f32.mrf.mxu0 }
 0x1a8   : > { %v2989_v51 = vpop.f32.mrf.mxu1  ;;  %v7994_v52 = vpop.eup %7993  ;;  %6971 = vst [vmem:[%s8420_s26 + $0x170] sm:$0xff] %v6519_v47   ;;  %8019 = vtanh.f32 %v2477_v50 }
 0x1a9   : > { %v7996_v53 = vpop.eup %7995  ;;  %7035 = vst [vmem:[%s8420_s26 + $0x370] sm:$0xff] %v6839_v49   ;;  %8021 = vtanh.f32 %v2989_v51  ;;  %v7296_v54 = vpop.f32.mrf.mxu0 }
 0x1aa   : > { %v7424_v55 = vpop.f32.mrf.mxu1  ;;  %v7998_v56 = vpop.eup %7997  ;;  %8023 = vtanh.f32 %v7296_v54 }
 0x1ab   : > { %v8000_v57 = vpop.eup %7999  ;;  %8025 = vtanh.f32 %v7424_v55  ;;  %v2490_v58 = vpop.f32.mrf.mxu0 }
 0x1ac   : > { %v3002_v59 = vpop.f32.mrf.mxu1  ;;  %v8002_v60 = vpop.eup %8001  ;;  %v6534_v61 = vpack.c.bf16 %v8000_v57, %v7992_v48  ;;  %8027 = vtanh.f32 %v2490_v58 }
 0x1ad   : > { %v8004_v62 = vpop.eup %8003  ;;  %v6854_v63 = vpack.c.bf16 %v8002_v60, %v7994_v52  ;;  %8029 = vtanh.f32 %v3002_v59  ;;  %v7297_v0 = vpop.f32.mrf.mxu0 }
 0x1ae   : > { %v7425_v1 = vpop.f32.mrf.mxu1  ;;  %v8006_v2 = vpop.eup %8005  ;;  %6974 = vst [vmem:[%s8420_s26 + $0x188] sm:$0xff] %v6534_v61   ;;  %v6529_v3 = vpack.c.bf16 %v8004_v62, %v7996_v53  ;;  %8031 = vtanh.f32 %v7297_v0 }
 0x1af   : > { %v8008_v4 = vpop.eup %8007  ;;  %7038 = vst [vmem:[%s8420_s26 + $0x388] sm:$0xff] %v6854_v63   ;;  %v6849_v5 = vpack.c.bf16 %v8006_v2, %v7998_v56  ;;  %8033 = vtanh.f32 %v7425_v1  ;;  %v2493_v6 = vpop.f32.mrf.mxu0 }
 0x1b0   : > { %v3005_v7 = vpop.f32.mrf.mxu1  ;;  %v8010_v8 = vpop.eup %8009  ;;  %6973 = vst [vmem:[%s8420_s26 + $0x180] sm:$0xff] %v6529_v3   ;;  %8035 = vtanh.f32 %v2493_v6 }
 0x1b1   : > { %v8012_v9 = vpop.eup %8011  ;;  %7037 = vst [vmem:[%s8420_s26 + $0x380] sm:$0xff] %v6849_v5   ;;  %8037 = vtanh.f32 %v3005_v7  ;;  %v7300_v10 = vpop.f32.mrf.mxu0 }
 0x1b2   : > { %v7428_v11 = vpop.f32.mrf.mxu1  ;;  %v8014_v12 = vpop.eup %8013  ;;  %8039 = vtanh.f32 %v7300_v10 }
 0x1b3   : > { %v8016_v13 = vpop.eup %8015  ;;  %8041 = vtanh.f32 %v7428_v11  ;;  %v2506_v14 = vpop.f32.mrf.mxu0 }
 0x1b4   : > { %v3018_v15 = vpop.f32.mrf.mxu1  ;;  %v8018_v16 = vpop.eup %8017  ;;  %v6544_v17 = vpack.c.bf16 %v8016_v13, %v8008_v4  ;;  %8043 = vtanh.f32 %v2506_v14 }
 0x1b5   : > { %v8020_v18 = vpop.eup %8019  ;;  %v6864_v19 = vpack.c.bf16 %v8018_v16, %v8010_v8  ;;  %8045 = vtanh.f32 %v3018_v15  ;;  %v7301_v20 = vpop.f32.mrf.mxu0 }
 0x1b6   : > { %v7429_v21 = vpop.f32.mrf.mxu1  ;;  %v8022_v22 = vpop.eup %8021  ;;  %6976 = vst [vmem:[%s8420_s26 + $0x198] sm:$0xff] %v6544_v17   ;;  %v6539_v23 = vpack.c.bf16 %v8020_v18, %v8012_v9  ;;  %8047 = vtanh.f32 %v7301_v20 }
 0x1b7   : > { %v8024_v24 = vpop.eup %8023  ;;  %7040 = vst [vmem:[%s8420_s26 + $0x398] sm:$0xff] %v6864_v19   ;;  %v6859_v25 = vpack.c.bf16 %v8022_v22, %v8014_v12  ;;  %8049 = vtanh.f32 %v7429_v21  ;;  %v2509_v26 = vpop.f32.mrf.mxu0 }
 0x1b8   : > { %v3021_v27 = vpop.f32.mrf.mxu1  ;;  %v8026_v28 = vpop.eup %8025  ;;  %6975 = vst [vmem:[%s8420_s26 + $0x190] sm:$0xff] %v6539_v23   ;;  %8051 = vtanh.f32 %v2509_v26 }
 0x1b9   : > { %v8028_v29 = vpop.eup %8027  ;;  %7039 = vst [vmem:[%s8420_s26 + $0x390] sm:$0xff] %v6859_v25   ;;  %8053 = vtanh.f32 %v3021_v27  ;;  %v7304_v30 = vpop.f32.mrf.mxu0 }
 0x1ba   : > { %v7432_v31 = vpop.f32.mrf.mxu1  ;;  %v8030_v32 = vpop.eup %8029  ;;  %8055 = vtanh.f32 %v7304_v30 }
 0x1bb   : > { %v8032_v33 = vpop.eup %8031  ;;  %8057 = vtanh.f32 %v7432_v31  ;;  %v2522_v34 = vpop.f32.mrf.mxu0 }
 0x1bc   : > { %v3034_v35 = vpop.f32.mrf.mxu1  ;;  %v8034_v36 = vpop.eup %8033  ;;  %v6554_v37 = vpack.c.bf16 %v8032_v33, %v8024_v24  ;;  %8059 = vtanh.f32 %v2522_v34 }
 0x1bd   : > { %v8036_v38 = vpop.eup %8035  ;;  %v6874_v39 = vpack.c.bf16 %v8034_v36, %v8026_v28  ;;  %8061 = vtanh.f32 %v3034_v35  ;;  %v7305_v40 = vpop.f32.mrf.mxu0 }
 0x1be   : > { %v7433_v41 = vpop.f32.mrf.mxu1  ;;  %v8038_v42 = vpop.eup %8037  ;;  %6978 = vst [vmem:[%s8420_s26 + $0x1a8] sm:$0xff] %v6554_v37   ;;  %v6549_v43 = vpack.c.bf16 %v8036_v38, %v8028_v29  ;;  %8063 = vtanh.f32 %v7305_v40 }
 0x1bf   : > { %v8040_v44 = vpop.eup %8039  ;;  %7042 = vst [vmem:[%s8420_s26 + $0x3a8] sm:$0xff] %v6874_v39   ;;  %v6869_v45 = vpack.c.bf16 %v8038_v42, %v8030_v32  ;;  %8065 = vtanh.f32 %v7433_v41  ;;  %v2525_v46 = vpop.f32.mrf.mxu0 }
 0x1c0   : > { %v3037_v47 = vpop.f32.mrf.mxu1  ;;  %v8042_v48 = vpop.eup %8041  ;;  %6977 = vst [vmem:[%s8420_s26 + $0x1a0] sm:$0xff] %v6549_v43   ;;  %8067 = vtanh.f32 %v2525_v46 }
 0x1c1   : > { %v8044_v49 = vpop.eup %8043  ;;  %7041 = vst [vmem:[%s8420_s26 + $0x3a0] sm:$0xff] %v6869_v45   ;;  %8069 = vtanh.f32 %v3037_v47  ;;  %v7308_v50 = vpop.f32.mrf.mxu0 }
 0x1c2   : > { %v7436_v51 = vpop.f32.mrf.mxu1  ;;  %v8046_v52 = vpop.eup %8045  ;;  %8071 = vtanh.f32 %v7308_v50 }
 0x1c3   : > { %v8048_v53 = vpop.eup %8047  ;;  %8073 = vtanh.f32 %v7436_v51  ;;  %v2538_v54 = vpop.f32.mrf.mxu0 }
 0x1c4   : > { %v3050_v55 = vpop.f32.mrf.mxu1  ;;  %v8050_v56 = vpop.eup %8049  ;;  %v6564_v57 = vpack.c.bf16 %v8048_v53, %v8040_v44  ;;  %8075 = vtanh.f32 %v2538_v54 }
 0x1c5   : > { %v8052_v58 = vpop.eup %8051  ;;  %v6884_v59 = vpack.c.bf16 %v8050_v56, %v8042_v48  ;;  %8077 = vtanh.f32 %v3050_v55  ;;  %v7309_v60 = vpop.f32.mrf.mxu0 }
 0x1c6   : > { %v7437_v61 = vpop.f32.mrf.mxu1  ;;  %v8054_v62 = vpop.eup %8053  ;;  %6980 = vst [vmem:[%s8420_s26 + $0x1b8] sm:$0xff] %v6564_v57   ;;  %v6559_v63 = vpack.c.bf16 %v8052_v58, %v8044_v49  ;;  %8079 = vtanh.f32 %v7309_v60 }
 0x1c7   : > { %v8056_v0 = vpop.eup %8055  ;;  %7044 = vst [vmem:[%s8420_s26 + $0x3b8] sm:$0xff] %v6884_v59   ;;  %v6879_v1 = vpack.c.bf16 %v8054_v62, %v8046_v52  ;;  %8081 = vtanh.f32 %v7437_v61  ;;  %v2541_v2 = vpop.f32.mrf.mxu0 }
 0x1c8   : > { %v3053_v3 = vpop.f32.mrf.mxu1  ;;  %v8058_v4 = vpop.eup %8057  ;;  %6979 = vst [vmem:[%s8420_s26 + $0x1b0] sm:$0xff] %v6559_v63   ;;  %8083 = vtanh.f32 %v2541_v2 }
 0x1c9   : > { %v8060_v5 = vpop.eup %8059  ;;  %7043 = vst [vmem:[%s8420_s26 + $0x3b0] sm:$0xff] %v6879_v1   ;;  %8085 = vtanh.f32 %v3053_v3  ;;  %v7312_v6 = vpop.f32.mrf.mxu0 }
 0x1ca   : > { %v7440_v7 = vpop.f32.mrf.mxu1  ;;  %v8062_v8 = vpop.eup %8061  ;;  %8087 = vtanh.f32 %v7312_v6 }
 0x1cb   : > { %v8064_v9 = vpop.eup %8063  ;;  %8089 = vtanh.f32 %v7440_v7  ;;  %v2554_v10 = vpop.f32.mrf.mxu0 }
 0x1cc   : > { %v3066_v11 = vpop.f32.mrf.mxu1  ;;  %v8066_v12 = vpop.eup %8065  ;;  %v6574_v13 = vpack.c.bf16 %v8064_v9, %v8056_v0  ;;  %8091 = vtanh.f32 %v2554_v10 }
 0x1cd   : > { %v8068_v14 = vpop.eup %8067  ;;  %v6894_v15 = vpack.c.bf16 %v8066_v12, %v8058_v4  ;;  %8093 = vtanh.f32 %v3066_v11  ;;  %v7313_v16 = vpop.f32.mrf.mxu0 }
 0x1ce   : > { %v7441_v17 = vpop.f32.mrf.mxu1  ;;  %v8070_v18 = vpop.eup %8069  ;;  %6982 = vst [vmem:[%s8420_s26 + $0x1c8] sm:$0xff] %v6574_v13   ;;  %v6569_v19 = vpack.c.bf16 %v8068_v14, %v8060_v5  ;;  %8095 = vtanh.f32 %v7313_v16 }
 0x1cf   : > { %v8072_v20 = vpop.eup %8071  ;;  %7046 = vst [vmem:[%s8420_s26 + $0x3c8] sm:$0xff] %v6894_v15   ;;  %v6889_v21 = vpack.c.bf16 %v8070_v18, %v8062_v8  ;;  %8097 = vtanh.f32 %v7441_v17  ;;  %v2557_v22 = vpop.f32.mrf.mxu0 }
 0x1d0   : > { %v3069_v23 = vpop.f32.mrf.mxu1  ;;  %v8074_v24 = vpop.eup %8073  ;;  %6981 = vst [vmem:[%s8420_s26 + $0x1c0] sm:$0xff] %v6569_v19   ;;  %8099 = vtanh.f32 %v2557_v22 }
 0x1d1   : > { %v8076_v25 = vpop.eup %8075  ;;  %7045 = vst [vmem:[%s8420_s26 + $0x3c0] sm:$0xff] %v6889_v21   ;;  %8101 = vtanh.f32 %v3069_v23  ;;  %v7316_v26 = vpop.f32.mrf.mxu0 }
 0x1d2   : > { %v7444_v27 = vpop.f32.mrf.mxu1  ;;  %v8078_v28 = vpop.eup %8077  ;;  %8103 = vtanh.f32 %v7316_v26 }
 0x1d3   : > { %v8080_v29 = vpop.eup %8079  ;;  %8105 = vtanh.f32 %v7444_v27  ;;  %v2570_v30 = vpop.f32.mrf.mxu0 }
 0x1d4   : > { %v3082_v31 = vpop.f32.mrf.mxu1  ;;  %v8082_v32 = vpop.eup %8081  ;;  %v6584_v33 = vpack.c.bf16 %v8080_v29, %v8072_v20  ;;  %8107 = vtanh.f32 %v2570_v30 }
 0x1d5   : > { %v8084_v34 = vpop.eup %8083  ;;  %v6904_v35 = vpack.c.bf16 %v8082_v32, %v8074_v24  ;;  %8109 = vtanh.f32 %v3082_v31  ;;  %v7317_v36 = vpop.f32.mrf.mxu0 }
 0x1d6   : > { %v7445_v37 = vpop.f32.mrf.mxu1  ;;  %v8086_v38 = vpop.eup %8085  ;;  %6984 = vst [vmem:[%s8420_s26 + $0x1d8] sm:$0xff] %v6584_v33   ;;  %v6579_v39 = vpack.c.bf16 %v8084_v34, %v8076_v25  ;;  %8111 = vtanh.f32 %v7317_v36 }
 0x1d7   : > { %v8088_v40 = vpop.eup %8087  ;;  %7048 = vst [vmem:[%s8420_s26 + $0x3d8] sm:$0xff] %v6904_v35   ;;  %v6899_v41 = vpack.c.bf16 %v8086_v38, %v8078_v28  ;;  %8113 = vtanh.f32 %v7445_v37  ;;  %v2573_v42 = vpop.f32.mrf.mxu0 }
 0x1d8   : > { %v3085_v43 = vpop.f32.mrf.mxu1  ;;  %v8090_v44 = vpop.eup %8089  ;;  %6983 = vst [vmem:[%s8420_s26 + $0x1d0] sm:$0xff] %v6579_v39   ;;  %8115 = vtanh.f32 %v2573_v42 }
 0x1d9   : > { %v8092_v45 = vpop.eup %8091  ;;  %7047 = vst [vmem:[%s8420_s26 + $0x3d0] sm:$0xff] %v6899_v41   ;;  %8117 = vtanh.f32 %v3085_v43 }
 0x1da   : > { %v8094_v46 = vpop.eup %8093 }
 0x1db   : > { %v8096_v47 = vpop.eup %8095 }
 0x1dc   : > { %v8098_v48 = vpop.eup %8097  ;;  %v6594_v49 = vpack.c.bf16 %v8096_v47, %v8088_v40 }
 0x1dd   : > { %v8100_v50 = vpop.eup %8099  ;;  %v6914_v51 = vpack.c.bf16 %v8098_v48, %v8090_v44 }
 0x1de   : > { %v8102_v52 = vpop.eup %8101  ;;  %6986 = vst [vmem:[%s8420_s26 + $0x1e8] sm:$0xff] %v6594_v49   ;;  %v6589_v53 = vpack.c.bf16 %v8100_v50, %v8092_v45 }
 0x1df   : > { %v8104_v54 = vpop.eup %8103  ;;  %7050 = vst [vmem:[%s8420_s26 + $0x3e8] sm:$0xff] %v6914_v51   ;;  %v6909_v55 = vpack.c.bf16 %v8102_v52, %v8094_v46 }
 0x1e0   : > { %v8106_v56 = vpop.eup %8105  ;;  %6985 = vst [vmem:[%s8420_s26 + $0x1e0] sm:$0xff] %v6589_v53  }
 0x1e1   : > { %v8108_v57 = vpop.eup %8107  ;;  %7049 = vst [vmem:[%s8420_s26 + $0x3e0] sm:$0xff] %v6909_v55  }
 0x1e2   : > { %v8110_v58 = vpop.eup %8109 }
 0x1e3   : > { %v8112_v59 = vpop.eup %8111 }
 0x1e4   : > { %v8114_v60 = vpop.eup %8113  ;;  %v6604_v61 = vpack.c.bf16 %v8112_v59, %v8104_v54 }
 0x1e5   : > { %v8116_v62 = vpop.eup %8115  ;;  %v6924_v63 = vpack.c.bf16 %v8114_v60, %v8106_v56 }
 0x1e6   : > { %v8118_v0 = vpop.eup %8117  ;;  %6988 = vst [vmem:[%s8420_s26 + $0x1f8] sm:$0xff] %v6604_v61   ;;  %v6599_v1 = vpack.c.bf16 %v8116_v62, %v8108_v57 }
 0x1e7   : > { %7052 = vst [vmem:[%s8420_s26 + $0x3f8] sm:$0xff] %v6924_v63   ;;  %v6919_v2 = vpack.c.bf16 %v8118_v0, %v8110_v58 }
 0x1e8   : > { %6987 = vst [vmem:[%s8420_s26 + $0x1f0] sm:$0xff] %v6599_v1  }
 0x1e9   : > { %7051 = vst [vmem:[%s8420_s26 + $0x3f0] sm:$0xff] %v6919_v2  }
 0x1ea PF: > { %s12_s11 = sadd.s32 1, %s8141_s11   ;;  %s8598_s9 = smov %s8137_s10 }
 0x1eb   : > { %p9_p5 = scmp.ge.s32.totalorder %s12_s11, 6   ;;  %s8599_s10 = smov %s8601_s12 }
 0x1ed   :  { %11 = sbr.rel (!%p9_p5) target bundleno = 2 (0x2), region = 69 }

</bundles_post_ra>
